<compile_context>
chip_gen: v5e
topology: v5e:2x2
jax: 0.10.0
libtpu: 0.0.40
codegen_flags: <defaults>
</compile_context>

<pallas_src>
import functools

import jax
import jax.numpy as jnp
from jax.experimental import pallas as pl
from jax.experimental.pallas import tpu as pltpu

BN_EPS = 1e-5
DISCR_FILTERS = 64


def _round_up(x, m):
    return ((x + m - 1) // m) * m


# ---------------------------------------------------------------------------
# Per-generation configuration (scoped VMEM limit)
# ---------------------------------------------------------------------------
@functools.lru_cache(maxsize=None)
def _vmem_limit():
    try:
        info = pltpu.get_tpu_info()
        vmem = int(getattr(info, "vmem_capacity_bytes", 64 * 1024 * 1024))
    except Exception:
        vmem = 64 * 1024 * 1024                     # conservative (v7x-sized)
    return int(min(64 * 1024 * 1024, (vmem * 5) // 8))


def _choose_tm(Mp, cap, min_tile=16):
    """Largest row tile (multiple of min_tile) dividing Mp, <= cap, preferring
    >=4 grid steps (v7x dual-core + pipelining), then >=2, then whatever fits."""
    cap = min(cap, Mp)
    hi = max(min_tile, (cap // min_tile) * min_tile)
    for steps_target in (4, 2, 1):
        tm = hi
        while tm >= min_tile:
            if Mp % tm == 0 and Mp // tm >= steps_target:
                return tm
            tm -= min_tile
    return Mp


# ---------------------------------------------------------------------------
# Probe: single-buffering (pl.Buffered(1)) for loop-invariant operands
# ---------------------------------------------------------------------------
_SINGLE_BUFFER_MODE = None
_SINGLE_BUFFER_PROBED = False


def _single_buffer_mode():
    """Returns a pl.Buffered(1) pipeline mode if supported, else None."""
    global _SINGLE_BUFFER_MODE, _SINGLE_BUFFER_PROBED
    if _SINGLE_BUFFER_PROBED:
        return _SINGLE_BUFFER_MODE
    _SINGLE_BUFFER_PROBED = True
    try:
        mode = pl.Buffered(buffer_count=1)

        def k(a_ref, b_ref, o_ref):
            o_ref[...] = a_ref[...] + b_ref[...]

        out = pl.pallas_call(
            k,
            out_shape=jax.ShapeDtypeStruct((16, 128), jnp.float32),
            grid=(2,),
            in_specs=[
                pl.BlockSpec((8, 128), lambda i: (i, 0)),
                pl.BlockSpec((8, 128), lambda i: (0, 0), pipeline_mode=mode),
            ],
            out_specs=pl.BlockSpec((8, 128), lambda i: (i, 0)),
        )(jnp.zeros((16, 128), jnp.float32), jnp.ones((8, 128), jnp.float32))
        jax.block_until_ready(out)
        _SINGLE_BUFFER_MODE = mode
    except Exception:
        _SINGLE_BUFFER_MODE = None
    return _SINGLE_BUFFER_MODE


# ---------------------------------------------------------------------------
# Pallas kernels
# ---------------------------------------------------------------------------
def _make_conv_kernel(act, with_stats):
    """Fused im2col matmul (bf16 x bf16 -> f32 acc, K-tiled) + bias
    (+ per-tile BN statistic partial sums) + activation."""

    def kernel(p_ref, w_ref, b_ref, o_ref, *rest):
        if with_stats:
            s_ref, q_ref, acc_ref = rest
        else:
            (acc_ref,) = rest
        k = pl.program_id(1)

        @pl.when(k == 0)
        def _():
            acc_ref[...] = jnp.zeros_like(acc_ref)

        acc_ref[...] += jnp.dot(p_ref[...], w_ref[...],
                                preferred_element_type=jnp.float32)

        @pl.when(k == pl.num_programs(1) - 1)
        def _():
            a = acc_ref[...]                      # pre-bias activations, f32
            if with_stats:
                # Partial sums of (y - bias): bias removed before squaring
                # (variance hardening) and zero-padded rows contribute nothing.
                s = jnp.sum(a, axis=0, keepdims=True)
                q = jnp.sum(a * a, axis=0, keepdims=True)
                s_ref[...] = jnp.broadcast_to(s, s_ref.shape)
                q_ref[...] = jnp.broadcast_to(q, q_ref.shape)
            y = a + b_ref[...]
            if act == "relu":
                y = jnp.maximum(y, 0.0)
            o_ref[...] = y.astype(o_ref.dtype)

    return kernel


def bn_relu_kernel(x_ref, scale_ref, shift_ref, o_ref):
    """Elementwise folded-BatchNorm affine + ReLU (f32 math, bf16 store)."""
    y = x_ref[...] * scale_ref[...] + shift_ref[...]
    o_ref[...] = jnp.maximum(y, 0.0).astype(o_ref.dtype)


def head_kernel(p_ref, w_ref, b_ref, o_ref):
    """Final Conv(Cout=1, k4, valid) + Sigmoid as an MXU dot (col 0 is real)."""
    y = jnp.dot(p_ref[...], w_ref[...], preferred_element_type=jnp.float32)
    o_ref[...] = jax.nn.sigmoid(y + b_ref[...])


# ---------------------------------------------------------------------------
# JAX glue: NHWC im2col (layout plumbing only, no transposes, dtype-preserving)
# ---------------------------------------------------------------------------
def im2col_nhwc(x, k, stride, pad):
    """x: (N, H, W, C) -> patches (N*Ho*Wo, k*k*C), feature order (kh, kw, c)."""
    N, H, W, C = x.shape
    if pad:
        x = jnp.pad(x, ((0, 0), (pad, pad), (pad, pad), (0, 0)))
    Ho = (H + 2 * pad - k) // stride + 1
    Wo = (W + 2 * pad - k) // stride + 1
    cols = []
    for i in range(k):
        for j in range(k):
            cols.append(x[:, i:i + stride * Ho:stride, j:j + stride * Wo:stride, :])
    p = jnp.stack(cols, axis=3)                      # (N, Ho, Wo, k*k, C)
    return p.reshape(N * Ho * Wo, k * k * C), Ho, Wo


# ---------------------------------------------------------------------------
# Weight pre-packing (done ONCE, outside the jitted forward)
# ---------------------------------------------------------------------------
def pack_conv_params(w, b):
    Cout, Cin, kh, kw = w.shape
    K = kh * kw * Cin
    Cp = _round_up(Cout, 128)
    wmat = jnp.transpose(w, (2, 3, 1, 0)).reshape(K, Cout).astype(jnp.bfloat16)
    if Cp != Cout:
        wmat = jnp.pad(wmat, ((0, 0), (0, Cp - Cout)))
    bvec = jnp.zeros((1, Cp), jnp.float32).at[0, :Cout].set(b.astype(jnp.float32))
    return wmat, bvec


def pack_head_params(w, b):
    Cout, Cin, kh, kw = w.shape            # (1, 512, 4, 4)
    K = kh * kw * Cin
    wk = jnp.transpose(w, (2, 3, 1, 0)).reshape(K, Cout).astype(jnp.bfloat16)
    wmat = jnp.zeros((K, 128), jnp.bfloat16).at[:, :Cout].set(wk)
    bvec = jnp.zeros((1, 128), jnp.float32).at[0, :Cout].set(b.astype(jnp.float32))
    return wmat, bvec


def pack_params(params):
    packed = {}
    couts = []
    for i in (1, 2, 3, 4):
        wm, bv = pack_conv_params(params[f"w{i}"], params[f"b{i}"])
        packed[f"wm{i}"], packed[f"bv{i}"] = wm, bv
        couts.append(int(params[f"w{i}"].shape[0]))
    packed["wm5"], packed["bv5"] = pack_head_params(params["w5"], params["b5"])
    for i in (2, 3, 4):
        packed[f"g{i}"] = params[f"g{i}"].astype(jnp.float32)
        packed[f"beta{i}"] = params[f"beta{i}"].astype(jnp.float32)
    return packed, tuple(couts)


# ---------------------------------------------------------------------------
# Pallas wrappers
# ---------------------------------------------------------------------------
def conv2d_pallas(x_nhwc, wmat, bvec, cout, ksize, stride, pad, act,
                  with_stats, out_dtype):
    """Conv2d over bf16 NHWC input as a fused, K-tiled im2col matmul.

    Returns (out (Mp, Cp) out_dtype, mean (cout,)|None, var (cout,)|None,
             M, Ho, Wo).  Output rows >= M and channels >= cout are padding.
    """
    N, H, W, C = x_nhwc.shape
    K, Cp = wmat.shape
    assert K == ksize * ksize * C and Cp % 128 == 0

    p, Ho, Wo = im2col_nhwc(x_nhwc, ksize, stride, pad)     # (M, K), bf16
    M = p.shape[0]
    vmem_limit = _vmem_limit()

    # K tiling: pipeline weight/patch DMAs behind MXU work for big contractions.
    tk = 1024 if (K > 1024 and K % 1024 == 0) else K
    nk = K // tk

    # Row tiling: fit VMEM, keep >=4 grid steps when M allows (v7x dual-core).
    budget = vmem_limit // 2
    w_bytes = tk * Cp * 2 * (1 if nk == 1 else 2)
    per_row = 2 * tk * 2 + 2 * Cp * 4 + Cp * 4
    cap = max(16, min(2048, max(0, budget - w_bytes) // per_row // 16 * 16))
    Mp = _round_up(M, 16)
    tm = _choose_tm(Mp, cap, 16)
    if Mp != M:
        p = jnp.pad(p, ((0, Mp - M), (0, 0)))
    nm = Mp // tm

    wb_mode = _single_buffer_mode()

    def _const_spec(shape):
        if wb_mode is not None:
            return pl.BlockSpec(shape, lambda i, kk: (0, 0), pipeline_mode=wb_mode)
        return pl.BlockSpec(shape, lambda i, kk: (0, 0))

    in_specs = [
        pl.BlockSpec((tm, tk), lambda i, kk: (i, kk)),
        (_const_spec((tk, Cp)) if nk == 1
         else pl.BlockSpec((tk, Cp), lambda i, kk: (kk, 0))),
        _const_spec((1, Cp)),
    ]

    out_shape = [jax.ShapeDtypeStruct((Mp, Cp), out_dtype)]
    out_specs = [pl.BlockSpec((tm, Cp), lambda i, kk: (i, 0))]
    if with_stats:
        out_shape += [jax.ShapeDtypeStruct((nm * 8, Cp), jnp.float32)] * 2
        out_specs += [pl.BlockSpec((8, Cp), lambda i, kk: (i, 0))] * 2

    res = pl.pallas_call(
        _make_conv_kernel(act, with_stats),
        out_shape=tuple(out_shape),
        grid=(nm, nk),
        in_specs=in_specs,
        out_specs=tuple(out_specs),
        scratch_shapes=[pltpu.VMEM((tm, Cp), jnp.float32)],
        compiler_params=pltpu.CompilerParams(
            dimension_semantics=("parallel", "arbitrary"),
            vmem_limit_bytes=vmem_limit,
        ),
    )(p, wmat, bvec)

    if not with_stats:
        return res[0], None, None, M, Ho, Wo

    y, s_p, q_p = res
    s = jnp.sum(s_p.reshape(nm, 8, Cp)[:, 0, :], axis=0)[:cout]
    q = jnp.sum(q_p.reshape(nm, 8, Cp)[:, 0, :], axis=0)[:cout]
    bias = bvec[0, :cout]
    mean_a = s / M                                   # mean of (y - bias)
    mean = mean_a + bias
    var = jnp.maximum(q / M - mean_a * mean_a, 0.0)  # biased var (BN training)
    return y, mean, var, M, Ho, Wo


def bn_relu_pallas(y, scale, shift):
    """y: (Mp, Cp) f32; scale/shift: (Cp,) — per-channel affine + ReLU -> bf16."""
    Mp, Cp = y.shape
    vmem_limit = _vmem_limit()
    per_row = 2 * Cp * 4 + 2 * Cp * 2
    cap = max(16, min(4096, (vmem_limit // 2) // per_row // 16 * 16))
    tm = _choose_tm(Mp, cap, 16)
    return pl.pallas_call(
        bn_relu_kernel,
        out_shape=jax.ShapeDtypeStruct((Mp, Cp), jnp.bfloat16),
        grid=(Mp // tm,),
        in_specs=[
            pl.BlockSpec((tm, Cp), lambda i: (i, 0)),
            pl.BlockSpec((1, Cp), lambda i: (0, 0)),
            pl.BlockSpec((1, Cp), lambda i: (0, 0)),
        ],
        out_specs=pl.BlockSpec((tm, Cp), lambda i: (i, 0)),
        compiler_params=pltpu.CompilerParams(
            dimension_semantics=("parallel",),
            vmem_limit_bytes=vmem_limit,
        ),
    )(y, scale.reshape(1, Cp).astype(jnp.float32),
      shift.reshape(1, Cp).astype(jnp.float32))


def head_pallas(h_nhwc, wmat, bvec):
    """Final Conv(512->1, k4, s1, valid) + Sigmoid via MXU dot. Returns (N,)."""
    p, _, _ = im2col_nhwc(h_nhwc, 4, 1, 0)           # (N, 4*4*512), bf16
    M, K = p.shape
    Mp = _round_up(M, 8)
    if Mp != M:
        p = jnp.pad(p, ((0, Mp - M), (0, 0)))
    out = pl.pallas_call(
        head_kernel,
        out_shape=jax.ShapeDtypeStruct((Mp, 128), jnp.float32),
    )(p, wmat, bvec)
    return out[:M, 0]                                # == view(-1,1).squeeze(1)


# ---------------------------------------------------------------------------
# Discriminator forward (Pallas)
# ---------------------------------------------------------------------------
def discriminator_forward(x, packed, *, couts):
    N = x.shape[0]
    # Single NCHW -> NHWC permute; bf16 activation chain from here on.
    h = jnp.transpose(x, (0, 2, 3, 1)).astype(jnp.bfloat16)

    # layer 1: Conv + ReLU (no BN stats), bf16 output
    c1 = couts[0]
    y, _, _, M, Ho, Wo = conv2d_pallas(
        h, packed["wm1"], packed["bv1"], c1, 4, 2, 1,
        act="relu", with_stats=False, out_dtype=jnp.bfloat16)
    h = y[:M, :c1].reshape(N, Ho, Wo, c1)

    # layers 2-4: Conv (+ batch stats, f32 out) then folded-BN affine + ReLU
    for idx in (2, 3, 4):
        c = couts[idx - 1]
        y, mean, var, M, Ho, Wo = conv2d_pallas(
            h, packed[f"wm{idx}"], packed[f"bv{idx}"], c, 4, 2, 1,
            act="none", with_stats=True, out_dtype=jnp.float32)
        scale = packed[f"g{idx}"] / jnp.sqrt(var + BN_EPS)
        shift = packed[f"beta{idx}"] - mean * scale
        Cp = y.shape[1]
        if Cp != c:
            scale = jnp.pad(scale, (0, Cp - c))
            shift = jnp.pad(shift, (0, Cp - c))
        yb = bn_relu_pallas(y, scale, shift)          # (Mp, Cp) bf16
        h = yb[:M, :c].reshape(N, Ho, Wo, c)

    # layer 5: Conv(k=4, s=1, p=0, Cout=1) + Sigmoid
    return head_pallas(h, packed["wm5"], packed["bv5"])


# ---------------------------------------------------------------------------
# Pure-JAX references (for correctness checks)
# ---------------------------------------------------------------------------
def ref_forward(x, params, mm_dtype=jnp.float32):
    """mm_dtype=bf16 mimics the kernel's bf16 MXU operands / bf16 activation
    storage (f32 accumulation and f32 BN math), matching the Pallas path."""

    def conv(x, w, b, stride, pad, dt):
        y = jax.lax.conv_general_dilated(
            x.astype(dt), w.astype(dt), (stride, stride),
            [(pad, pad), (pad, pad)],
            dimension_numbers=("NCHW", "OIHW", "NCHW"),
            preferred_element_type=jnp.float32)
        return y + b[None, :, None, None].astype(jnp.float32)

    y = jax.nn.relu(conv(x, params["w1"], params["b1"], 2, 1, mm_dtype))
    for idx in (2, 3, 4):
        y = conv(y, params[f"w{idx}"], params[f"b{idx}"], 2, 1, mm_dtype)
        mean = y.mean(axis=(0, 2, 3))
        var = y.var(axis=(0, 2, 3))
        y = (y - mean[None, :, None, None]) / jnp.sqrt(var[None, :, None, None] + BN_EPS)
        y = y * params[f"g{idx}"][None, :, None, None] + params[f"beta{idx}"][None, :, None, None]
        y = jax.nn.relu(y)
    y = jax.nn.sigmoid(conv(y, params["w5"], params["b5"], 1, 0, mm_dtype))
    return y.reshape(-1, 1).squeeze(1)


# ---------------------------------------------------------------------------
def make_params(key):
    DF = DISCR_FILTERS
    chans = [(3, DF), (DF, DF * 2), (DF * 2, DF * 4), (DF * 4, DF * 8), (DF * 8, 1)]
    params = {}
    keys = jax.random.split(key, 2 * len(chans))
    for i, (cin, cout) in enumerate(chans, start=1):
        params[f"w{i}"] = 0.05 * jax.random.normal(keys[2 * (i - 1)], (cout, cin, 4, 4),
                                                   dtype=jnp.float32)
        params[f"b{i}"] = 0.05 * jax.random.normal(keys[2 * (i - 1) + 1], (cout,),
                                                   dtype=jnp.float32)
    # BatchNorm params (PyTorch default init: gamma=1, beta=0) for layers 2-4.
    for i, c in zip((2, 3, 4), (DF * 2, DF * 4, DF * 8)):
        params[f"g{i}"] = jnp.ones((c,), jnp.float32)
        params[f"beta{i}"] = jnp.zeros((c,), jnp.float32)
    return params


if __name__ == "__main__":
    key = jax.random.PRNGKey(0)
    k_params, k_x = jax.random.split(key)
    params = make_params(k_params)
    # IMAGE_SIZE=64 is required by the conv arithmetic (last conv is 4x4 valid).
    x = jax.random.normal(k_x, (2, 3, 64, 64), dtype=jnp.float32)

    _single_buffer_mode()                 # probe Buffered(1) outside of tracing
    packed, couts = pack_params(params)   # pre-pack weights ONCE, outside jit
    fwd = jax.jit(functools.partial(discriminator_forward, couts=couts))
    out = jax.block_until_ready(fwd(x, packed))
    assert out.shape == (2,), out.shape

    # Tight check vs a reference that uses identical bf16 MXU operands /
    # activation rounding, plus a looser sanity check vs the pure-f32
    # PyTorch-equivalent reference.
    ref_match = jax.block_until_ready(ref_forward(x, params, jnp.bfloat16))
    ref_f32 = jax.block_until_ready(ref_forward(x, params, jnp.float32))
    err_match = float(jnp.max(jnp.abs(out - ref_match)))
    err_f32 = float(jnp.max(jnp.abs(out - ref_f32)))
    assert err_match < 5e-3, f"mismatch vs bf16-matched reference: {err_match}"
    assert err_f32 < 5e-2, f"mismatch vs f32 reference: {err_f32}"
    print("KERNEL_OK")
</pallas_src>

<mosaic_0001>
module attributes {stable_mosaic.version = 11 : i64} {
  func.func @k(%arg0: i32, %arg1: memref<8x128xf32, #tpu.memory_space<vmem>>, %arg2: memref<8x128xf32, #tpu.memory_space<vmem>>, %arg3: memref<8x128xf32, #tpu.memory_space<vmem>>) attributes {dimension_semantics = [#tpu.dimension_semantics<arbitrary>], iteration_bounds = array<i64: 2>, scalar_prefetch = 0 : i64, scratch_operands = 0 : i64, tpu.core_type = #tpu.core_type<tc>, window_params = [{transform_indices = @transform_0, window_bounds = array<i64: 8, 128>}, {pipeline_mode = #tpu.pipeline_mode<synchronous>, transform_indices = @transform_1, window_bounds = array<i64: 8, 128>}, {transform_indices = @transform_2, window_bounds = array<i64: 8, 128>}]} {
    %c0 = arith.constant 0 : index
    %c0_0 = arith.constant 0 : index
    %0 = vector.load %arg1[%c0, %c0_0] : memref<8x128xf32, #tpu.memory_space<vmem>>, vector<8x128xf32>
    %c0_1 = arith.constant 0 : index
    %c0_2 = arith.constant 0 : index
    %1 = vector.load %arg2[%c0_1, %c0_2] : memref<8x128xf32, #tpu.memory_space<vmem>>, vector<8x128xf32>
    %2 = arith.addf %0, %1 : vector<8x128xf32>
    %c0_3 = arith.constant 0 : index
    %c0_4 = arith.constant 0 : index
    %3 = vector.load %arg3[%c0_3, %c0_4] : memref<8x128xf32, #tpu.memory_space<vmem>>, vector<8x128xf32>
    tpu.vector_store %arg3[%c0_3, %c0_4], %2 {strides = array<i32>} : memref<8x128xf32, #tpu.memory_space<vmem>>, vector<8x128xf32>,
    return
  }
  func.func @transform_0(%arg0: i32) -> (i32, i32) {
    %c0_i32 = arith.constant 0 : i32
    %c0_i32_0 = arith.constant 0 : i32
    return %arg0, %c0_i32 : i32, i32
  }
  func.func @transform_1(%arg0: i32) -> (i32, i32) {
    %c0_i32 = arith.constant 0 : i32
    %c0_i32_0 = arith.constant 0 : i32
    %c0_i32_1 = arith.constant 0 : i32
    return %c0_i32, %c0_i32_0 : i32, i32
  }
  func.func @transform_2(%arg0: i32) -> (i32, i32) {
    %c0_i32 = arith.constant 0 : i32
    %c0_i32_0 = arith.constant 0 : i32
    return %arg0, %c0_i32 : i32, i32
  }
}

module attributes {stable_mosaic.version = 11 : i64} {
  func.func @kernel(%arg0: i32, %arg1: i32, %arg2: memref<512x48xbf16, #tpu.memory_space<vmem>>, %arg3: memref<48x128xbf16, #tpu.memory_space<vmem>>, %arg4: memref<1x128xf32, #tpu.memory_space<vmem>>, %arg5: memref<512x128xbf16, #tpu.memory_space<vmem>>, %arg6: memref<512x128xf32, #tpu.memory_space<vmem>>) attributes {dimension_semantics = [#tpu.dimension_semantics<parallel>, #tpu.dimension_semantics<arbitrary>], iteration_bounds = array<i64: 4, 1>, scalar_prefetch = 0 : i64, scratch_operands = 1 : i64, tpu.core_type = #tpu.core_type<tc>, window_params = [{transform_indices = @transform_0, window_bounds = array<i64: 512, 48>}, {pipeline_mode = #tpu.pipeline_mode<synchronous>, transform_indices = @transform_1, window_bounds = array<i64: 48, 128>}, {pipeline_mode = #tpu.pipeline_mode<synchronous>, transform_indices = @transform_2, window_bounds = array<i64: 1, 128>}, {transform_indices = @transform_3, window_bounds = array<i64: 512, 128>}]} {
    %c0_i32 = arith.constant 0 : i32
    %0 = arith.cmpi eq, %arg1, %c0_i32 : i32
    %1 = arith.extui %0 : i1 to i32
    %c0_i32_0 = arith.constant 0 : i32
    %2 = arith.cmpi ne, %1, %c0_i32_0 : i32
    scf.if %2 {
      %cst_10 = arith.constant 0.000000e+00 : f32
      %12 = vector.broadcast %cst_10 : f32 to vector<512x128xf32>
      %c0_11 = arith.constant 0 : index
      %c0_12 = arith.constant 0 : index
      %13 = vector.load %arg6[%c0_11, %c0_12] : memref<512x128xf32, #tpu.memory_space<vmem>>, vector<512x128xf32>
      tpu.vector_store %arg6[%c0_11, %c0_12], %12 {strides = array<i32>} : memref<512x128xf32, #tpu.memory_space<vmem>>, vector<512x128xf32>,
    } else {
    }
    %c0 = arith.constant 0 : index
    %c0_1 = arith.constant 0 : index
    %3 = vector.load %arg6[%c0, %c0_1] : memref<512x128xf32, #tpu.memory_space<vmem>>, vector<512x128xf32>
    %c0_2 = arith.constant 0 : index
    %c0_3 = arith.constant 0 : index
    %4 = vector.load %arg2[%c0_2, %c0_3] : memref<512x48xbf16, #tpu.memory_space<vmem>>, vector<512x48xbf16>
    %c0_4 = arith.constant 0 : index
    %c0_5 = arith.constant 0 : index
    %5 = vector.load %arg3[%c0_4, %c0_5] : memref<48x128xbf16, #tpu.memory_space<vmem>>, vector<48x128xbf16>
    %cst = arith.constant dense<0.000000e+00> : vector<512x128xf32>
    %6 = tpu.matmul %4, %5, %cst {dimension_numbers = #tpu.dot_dimension_numbers<[1], [0], [0], [1], [0, 0, 1, 1], [], []>} : vector<512x48xbf16>, vector<48x128xbf16>, vector<512x128xf32> -> vector<512x128xf32>
    %7 = arith.addf %3, %6 : vector<512x128xf32>
    %c0_6 = arith.constant 0 : index
    %c0_7 = arith.constant 0 : index
    %8 = vector.load %arg6[%c0_6, %c0_7] : memref<512x128xf32, #tpu.memory_space<vmem>>, vector<512x128xf32>
    tpu.vector_store %arg6[%c0_6, %c0_7], %7 {strides = array<i32>} : memref<512x128xf32, #tpu.memory_space<vmem>>, vector<512x128xf32>,
    %c0_i32_8 = arith.constant 0 : i32
    %9 = arith.cmpi eq, %arg1, %c0_i32_8 : i32
    %10 = arith.extui %9 : i1 to i32
    %c0_i32_9 = arith.constant 0 : i32
    %11 = arith.cmpi ne, %10, %c0_i32_9 : i32
    scf.if %11 {
      %c0_10 = arith.constant 0 : index
      %c0_11 = arith.constant 0 : index
      %12 = vector.load %arg6[%c0_10, %c0_11] : memref<512x128xf32, #tpu.memory_space<vmem>>, vector<512x128xf32>
      %c0_12 = arith.constant 0 : index
      %c0_13 = arith.constant 0 : index
      %13 = vector.load %arg4[%c0_12, %c0_13] : memref<1x128xf32, #tpu.memory_space<vmem>>, vector<1x128xf32>
      %14 = vector.broadcast %13 : vector<1x128xf32> to vector<512x128xf32>
      %15 = arith.addf %12, %14 : vector<512x128xf32>
      %cst_14 = arith.constant 0.000000e+00 : f32
      %16 = vector.broadcast %cst_14 : f32 to vector<512x128xf32>
      %17 = arith.maximumf %15, %16 : vector<512x128xf32>
      %18 = arith.truncf %17 : vector<512x128xf32> to vector<512x128xbf16>
      %c0_15 = arith.constant 0 : index
      %c0_16 = arith.constant 0 : index
      %19 = vector.load %arg5[%c0_15, %c0_16] : memref<512x128xbf16, #tpu.memory_space<vmem>>, vector<512x128xbf16>
      tpu.vector_store %arg5[%c0_15, %c0_16], %18 {strides = array<i32>} : memref<512x128xbf16, #tpu.memory_space<vmem>>, vector<512x128xbf16>,
    } else {
    }
    return
  }
  func.func @transform_0(%arg0: i32, %arg1: i32) -> (i32, i32) {
    %c0_i32 = arith.constant 0 : i32
    return %arg0, %arg1 : i32, i32
  }
  func.func @transform_1(%arg0: i32, %arg1: i32) -> (i32, i32) {
    %c0_i32 = arith.constant 0 : i32
    %c0_i32_0 = arith.constant 0 : i32
    %c0_i32_1 = arith.constant 0 : i32
    return %c0_i32, %c0_i32_0 : i32, i32
  }
  func.func @transform_2(%arg0: i32, %arg1: i32) -> (i32, i32) {
    %c0_i32 = arith.constant 0 : i32
    %c0_i32_0 = arith.constant 0 : i32
    %c0_i32_1 = arith.constant 0 : i32
    return %c0_i32, %c0_i32_0 : i32, i32
  }
  func.func @transform_3(%arg0: i32, %arg1: i32) -> (i32, i32) {
    %c0_i32 = arith.constant 0 : i32
    %c0_i32_0 = arith.constant 0 : i32
    return %arg0, %c0_i32 : i32, i32
  }
}

module attributes {stable_mosaic.version = 11 : i64} {
  func.func @kernel(%arg0: i32, %arg1: i32, %arg2: memref<128x1024xbf16, #tpu.memory_space<vmem>>, %arg3: memref<1024x128xbf16, #tpu.memory_space<vmem>>, %arg4: memref<1x128xf32, #tpu.memory_space<vmem>>, %arg5: memref<128x128xf32, #tpu.memory_space<vmem>>, %arg6: memref<8x128xf32, #tpu.memory_space<vmem>>, %arg7: memref<8x128xf32, #tpu.memory_space<vmem>>, %arg8: memref<128x128xf32, #tpu.memory_space<vmem>>) attributes {dimension_semantics = [#tpu.dimension_semantics<parallel>, #tpu.dimension_semantics<arbitrary>], iteration_bounds = array<i64: 4, 1>, scalar_prefetch = 0 : i64, scratch_operands = 1 : i64, tpu.core_type = #tpu.core_type<tc>, window_params = [{transform_indices = @transform_0, window_bounds = array<i64: 128, 1024>}, {pipeline_mode = #tpu.pipeline_mode<synchronous>, transform_indices = @transform_1, window_bounds = array<i64: 1024, 128>}, {pipeline_mode = #tpu.pipeline_mode<synchronous>, transform_indices = @transform_2, window_bounds = array<i64: 1, 128>}, {transform_indices = @transform_3, window_bounds = array<i64: 128, 128>}, {transform_indices = @transform_4, window_bounds = array<i64: 8, 128>}, {transform_indices = @transform_5, window_bounds = array<i64: 8, 128>}]} {
    %c0_i32 = arith.constant 0 : i32
    %0 = arith.cmpi eq, %arg1, %c0_i32 : i32
    %1 = arith.extui %0 : i1 to i32
    %c0_i32_0 = arith.constant 0 : i32
    %2 = arith.cmpi ne, %1, %c0_i32_0 : i32
    scf.if %2 {
      %cst_10 = arith.constant 0.000000e+00 : f32
      %12 = vector.broadcast %cst_10 : f32 to vector<128x128xf32>
      %c0_11 = arith.constant 0 : index
      %c0_12 = arith.constant 0 : index
      %13 = vector.load %arg8[%c0_11, %c0_12] : memref<128x128xf32, #tpu.memory_space<vmem>>, vector<128x128xf32>
      tpu.vector_store %arg8[%c0_11, %c0_12], %12 {strides = array<i32>} : memref<128x128xf32, #tpu.memory_space<vmem>>, vector<128x128xf32>,
    } else {
    }
    %c0 = arith.constant 0 : index
    %c0_1 = arith.constant 0 : index
    %3 = vector.load %arg8[%c0, %c0_1] : memref<128x128xf32, #tpu.memory_space<vmem>>, vector<128x128xf32>
    %c0_2 = arith.constant 0 : index
    %c0_3 = arith.constant 0 : index
    %4 = vector.load %arg2[%c0_2, %c0_3] : memref<128x1024xbf16, #tpu.memory_space<vmem>>, vector<128x1024xbf16>
    %c0_4 = arith.constant 0 : index
    %c0_5 = arith.constant 0 : index
    %5 = vector.load %arg3[%c0_4, %c0_5] : memref<1024x128xbf16, #tpu.memory_space<vmem>>, vector<1024x128xbf16>
    %cst = arith.constant dense<0.000000e+00> : vector<128x128xf32>
    %6 = tpu.matmul %4, %5, %cst {dimension_numbers = #tpu.dot_dimension_numbers<[1], [0], [0], [1], [0, 0, 1, 1], [], []>} : vector<128x1024xbf16>, vector<1024x128xbf16>, vector<128x128xf32> -> vector<128x128xf32>
    %7 = arith.addf %3, %6 : vector<128x128xf32>
    %c0_6 = arith.constant 0 : index
    %c0_7 = arith.constant 0 : index
    %8 = vector.load %arg8[%c0_6, %c0_7] : memref<128x128xf32, #tpu.memory_space<vmem>>, vector<128x128xf32>
    tpu.vector_store %arg8[%c0_6, %c0_7], %7 {strides = array<i32>} : memref<128x128xf32, #tpu.memory_space<vmem>>, vector<128x128xf32>,
    %c0_i32_8 = arith.constant 0 : i32
    %9 = arith.cmpi eq, %arg1, %c0_i32_8 : i32
    %10 = arith.extui %9 : i1 to i32
    %c0_i32_9 = arith.constant 0 : i32
    %11 = arith.cmpi ne, %10, %c0_i32_9 : i32
    scf.if %11 {
      %c0_10 = arith.constant 0 : index
      %c0_11 = arith.constant 0 : index
      %12 = vector.load %arg8[%c0_10, %c0_11] : memref<128x128xf32, #tpu.memory_space<vmem>>, vector<128x128xf32>
      %cst_12 = arith.constant dense<0.000000e+00> : vector<128xf32>
      %13 = vector.multi_reduction <add>, %12, %cst_12 [0] : vector<128x128xf32> to vector<128xf32>
      %14 = vector.shape_cast %13 : vector<128xf32> to vector<1x128xf32>
      %15 = arith.mulf %12, %12 : vector<128x128xf32>
      %cst_13 = arith.constant dense<0.000000e+00> : vector<128xf32>
      %16 = vector.multi_reduction <add>, %15, %cst_13 [0] : vector<128x128xf32> to vector<128xf32>
      %17 = vector.shape_cast %16 : vector<128xf32> to vector<1x128xf32>
      %18 = vector.shape_cast %14 : vector<1x128xf32> to vector<1x128xf32>
      %19 = vector.broadcast %18 : vector<1x128xf32> to vector<8x128xf32>
      %c0_14 = arith.constant 0 : index
      %c0_15 = arith.constant 0 : index
      %20 = vector.load %arg6[%c0_14, %c0_15] : memref<8x128xf32, #tpu.memory_space<vmem>>, vector<8x128xf32>
      tpu.vector_store %arg6[%c0_14, %c0_15], %19 {strides = array<i32>} : memref<8x128xf32, #tpu.memory_space<vmem>>, vector<8x128xf32>,
      %21 = vector.shape_cast %17 : vector<1x128xf32> to vector<1x128xf32>
      %22 = vector.broadcast %21 : vector<1x128xf32> to vector<8x128xf32>
      %c0_16 = arith.constant 0 : index
      %c0_17 = arith.constant 0 : index
      %23 = vector.load %arg7[%c0_16, %c0_17] : memref<8x128xf32, #tpu.memory_space<vmem>>, vector<8x128xf32>
      tpu.vector_store %arg7[%c0_16, %c0_17], %22 {strides = array<i32>} : memref<8x128xf32, #tpu.memory_space<vmem>>, vector<8x128xf32>,
      %c0_18 = arith.constant 0 : index
      %c0_19 = arith.constant 0 : index
      %24 = vector.load %arg4[%c0_18, %c0_19] : memref<1x128xf32, #tpu.memory_space<vmem>>, vector<1x128xf32>
      %25 = vector.broadcast %24 : vector<1x128xf32> to vector<128x128xf32>
      %26 = arith.addf %12, %25 : vector<128x128xf32>
      %c0_20 = arith.constant 0 : index
      %c0_21 = arith.constant 0 : index
      %27 = vector.load %arg5[%c0_20, %c0_21] : memref<128x128xf32, #tpu.memory_space<vmem>>, vector<128x128xf32>
      tpu.vector_store %arg5[%c0_20, %c0_21], %26 {strides = array<i32>} : memref<128x128xf32, #tpu.memory_space<vmem>>, vector<128x128xf32>,
    } else {
    }
    return
  }
  func.func @transform_0(%arg0: i32, %arg1: i32) -> (i32, i32) {
    %c0_i32 = arith.constant 0 : i32
    return %arg0, %arg1 : i32, i32
  }
  func.func @transform_1(%arg0: i32, %arg1: i32) -> (i32, i32) {
    %c0_i32 = arith.constant 0 : i32
    %c0_i32_0 = arith.constant 0 : i32
    %c0_i32_1 = arith.constant 0 : i32
    return %c0_i32, %c0_i32_0 : i32, i32
  }
  func.func @transform_2(%arg0: i32, %arg1: i32) -> (i32, i32) {
    %c0_i32 = arith.constant 0 : i32
    %c0_i32_0 = arith.constant 0 : i32
    %c0_i32_1 = arith.constant 0 : i32
    return %c0_i32, %c0_i32_0 : i32, i32
  }
  func.func @transform_3(%arg0: i32, %arg1: i32) -> (i32, i32) {
    %c0_i32 = arith.constant 0 : i32
    %c0_i32_0 = arith.constant 0 : i32
    return %arg0, %c0_i32 : i32, i32
  }
  func.func @transform_4(%arg0: i32, %arg1: i32) -> (i32, i32) {
    %c0_i32 = arith.constant 0 : i32
    %c0_i32_0 = arith.constant 0 : i32
    return %arg0, %c0_i32 : i32, i32
  }
  func.func @transform_5(%arg0: i32, %arg1: i32) -> (i32, i32) {
    %c0_i32 = arith.constant 0 : i32
    %c0_i32_0 = arith.constant 0 : i32
    return %arg0, %c0_i32 : i32, i32
  }
}

module attributes {stable_mosaic.version = 11 : i64} {
  func.func @bn_relu_kernel(%arg0: i32, %arg1: memref<128x128xf32, #tpu.memory_space<vmem>>, %arg2: memref<1x128xf32, #tpu.memory_space<vmem>>, %arg3: memref<1x128xf32, #tpu.memory_space<vmem>>, %arg4: memref<128x128xbf16, #tpu.memory_space<vmem>>) attributes {dimension_semantics = [#tpu.dimension_semantics<parallel>], iteration_bounds = array<i64: 4>, scalar_prefetch = 0 : i64, scratch_operands = 0 : i64, tpu.core_type = #tpu.core_type<tc>, window_params = [{transform_indices = @transform_0, window_bounds = array<i64: 128, 128>}, {pipeline_mode = #tpu.pipeline_mode<synchronous>, transform_indices = @transform_1, window_bounds = array<i64: 1, 128>}, {pipeline_mode = #tpu.pipeline_mode<synchronous>, transform_indices = @transform_2, window_bounds = array<i64: 1, 128>}, {transform_indices = @transform_3, window_bounds = array<i64: 128, 128>}]} {
    %c0 = arith.constant 0 : index
    %c0_0 = arith.constant 0 : index
    %0 = vector.load %arg1[%c0, %c0_0] : memref<128x128xf32, #tpu.memory_space<vmem>>, vector<128x128xf32>
    %c0_1 = arith.constant 0 : index
    %c0_2 = arith.constant 0 : index
    %1 = vector.load %arg2[%c0_1, %c0_2] : memref<1x128xf32, #tpu.memory_space<vmem>>, vector<1x128xf32>
    %2 = vector.broadcast %1 : vector<1x128xf32> to vector<128x128xf32>
    %3 = arith.mulf %0, %2 : vector<128x128xf32>
    %c0_3 = arith.constant 0 : index
    %c0_4 = arith.constant 0 : index
    %4 = vector.load %arg3[%c0_3, %c0_4] : memref<1x128xf32, #tpu.memory_space<vmem>>, vector<1x128xf32>
    %5 = vector.broadcast %4 : vector<1x128xf32> to vector<128x128xf32>
    %6 = arith.addf %3, %5 : vector<128x128xf32>
    %cst = arith.constant 0.000000e+00 : f32
    %7 = vector.broadcast %cst : f32 to vector<128x128xf32>
    %8 = arith.maximumf %6, %7 : vector<128x128xf32>
    %9 = arith.truncf %8 : vector<128x128xf32> to vector<128x128xbf16>
    %c0_5 = arith.constant 0 : index
    %c0_6 = arith.constant 0 : index
    %10 = vector.load %arg4[%c0_5, %c0_6] : memref<128x128xbf16, #tpu.memory_space<vmem>>, vector<128x128xbf16>
    tpu.vector_store %arg4[%c0_5, %c0_6], %9 {strides = array<i32>} : memref<128x128xbf16, #tpu.memory_space<vmem>>, vector<128x128xbf16>,
    return
  }
  func.func @transform_0(%arg0: i32) -> (i32, i32) {
    %c0_i32 = arith.constant 0 : i32
    %c0_i32_0 = arith.constant 0 : i32
    return %arg0, %c0_i32 : i32, i32
  }
  func.func @transform_1(%arg0: i32) -> (i32, i32) {
    %c0_i32 = arith.constant 0 : i32
    %c0_i32_0 = arith.constant 0 : i32
    %c0_i32_1 = arith.constant 0 : i32
    return %c0_i32, %c0_i32_0 : i32, i32
  }
  func.func @transform_2(%arg0: i32) -> (i32, i32) {
    %c0_i32 = arith.constant 0 : i32
    %c0_i32_0 = arith.constant 0 : i32
    %c0_i32_1 = arith.constant 0 : i32
    return %c0_i32, %c0_i32_0 : i32, i32
  }
  func.func @transform_3(%arg0: i32) -> (i32, i32) {
    %c0_i32 = arith.constant 0 : i32
    %c0_i32_0 = arith.constant 0 : i32
    return %arg0, %c0_i32 : i32, i32
  }
}

module attributes {stable_mosaic.version = 11 : i64} {
  func.func @kernel(%arg0: i32, %arg1: i32, %arg2: memref<32x1024xbf16, #tpu.memory_space<vmem>>, %arg3: memref<1024x256xbf16, #tpu.memory_space<vmem>>, %arg4: memref<1x256xf32, #tpu.memory_space<vmem>>, %arg5: memref<32x256xf32, #tpu.memory_space<vmem>>, %arg6: memref<8x256xf32, #tpu.memory_space<vmem>>, %arg7: memref<8x256xf32, #tpu.memory_space<vmem>>, %arg8: memref<32x256xf32, #tpu.memory_space<vmem>>) attributes {dimension_semantics = [#tpu.dimension_semantics<parallel>, #tpu.dimension_semantics<arbitrary>], iteration_bounds = array<i64: 4, 2>, scalar_prefetch = 0 : i64, scratch_operands = 1 : i64, tpu.core_type = #tpu.core_type<tc>, window_params = [{transform_indices = @transform_0, window_bounds = array<i64: 32, 1024>}, {transform_indices = @transform_1, window_bounds = array<i64: 1024, 256>}, {pipeline_mode = #tpu.pipeline_mode<synchronous>, transform_indices = @transform_2, window_bounds = array<i64: 1, 256>}, {transform_indices = @transform_3, window_bounds = array<i64: 32, 256>}, {transform_indices = @transform_4, window_bounds = array<i64: 8, 256>}, {transform_indices = @transform_5, window_bounds = array<i64: 8, 256>}]} {
    %c0_i32 = arith.constant 0 : i32
    %0 = arith.cmpi eq, %arg1, %c0_i32 : i32
    %1 = arith.extui %0 : i1 to i32
    %c0_i32_0 = arith.constant 0 : i32
    %2 = arith.cmpi ne, %1, %c0_i32_0 : i32
    scf.if %2 {
      %cst_9 = arith.constant 0.000000e+00 : f32
      %12 = vector.broadcast %cst_9 : f32 to vector<32x256xf32>
      %c0_10 = arith.constant 0 : index
      %c0_11 = arith.constant 0 : index
      %13 = vector.load %arg8[%c0_10, %c0_11] : memref<32x256xf32, #tpu.memory_space<vmem>>, vector<32x256xf32>
      tpu.vector_store %arg8[%c0_10, %c0_11], %12 {strides = array<i32>} : memref<32x256xf32, #tpu.memory_space<vmem>>, vector<32x256xf32>,
    } else {
    }
    %c0 = arith.constant 0 : index
    %c0_1 = arith.constant 0 : index
    %3 = vector.load %arg8[%c0, %c0_1] : memref<32x256xf32, #tpu.memory_space<vmem>>, vector<32x256xf32>
    %c0_2 = arith.constant 0 : index
    %c0_3 = arith.constant 0 : index
    %4 = vector.load %arg2[%c0_2, %c0_3] : memref<32x1024xbf16, #tpu.memory_space<vmem>>, vector<32x1024xbf16>
    %c0_4 = arith.constant 0 : index
    %c0_5 = arith.constant 0 : index
    %5 = vector.load %arg3[%c0_4, %c0_5] : memref<1024x256xbf16, #tpu.memory_space<vmem>>, vector<1024x256xbf16>
    %cst = arith.constant dense<0.000000e+00> : vector<32x256xf32>
    %6 = tpu.matmul %4, %5, %cst {dimension_numbers = #tpu.dot_dimension_numbers<[1], [0], [0], [1], [0, 0, 1, 1], [], []>} : vector<32x1024xbf16>, vector<1024x256xbf16>, vector<32x256xf32> -> vector<32x256xf32>
    %7 = arith.addf %3, %6 : vector<32x256xf32>
    %c0_6 = arith.constant 0 : index
    %c0_7 = arith.constant 0 : index
    %8 = vector.load %arg8[%c0_6, %c0_7] : memref<32x256xf32, #tpu.memory_space<vmem>>, vector<32x256xf32>
    tpu.vector_store %arg8[%c0_6, %c0_7], %7 {strides = array<i32>} : memref<32x256xf32, #tpu.memory_space<vmem>>, vector<32x256xf32>,
    %c1_i32 = arith.constant 1 : i32
    %9 = arith.cmpi eq, %arg1, %c1_i32 : i32
    %10 = arith.extui %9 : i1 to i32
    %c0_i32_8 = arith.constant 0 : i32
    %11 = arith.cmpi ne, %10, %c0_i32_8 : i32
    scf.if %11 {
      %c0_9 = arith.constant 0 : index
      %c0_10 = arith.constant 0 : index
      %12 = vector.load %arg8[%c0_9, %c0_10] : memref<32x256xf32, #tpu.memory_space<vmem>>, vector<32x256xf32>
      %cst_11 = arith.constant dense<0.000000e+00> : vector<256xf32>
      %13 = vector.multi_reduction <add>, %12, %cst_11 [0] : vector<32x256xf32> to vector<256xf32>
      %14 = vector.shape_cast %13 : vector<256xf32> to vector<1x256xf32>
      %15 = arith.mulf %12, %12 : vector<32x256xf32>
      %cst_12 = arith.constant dense<0.000000e+00> : vector<256xf32>
      %16 = vector.multi_reduction <add>, %15, %cst_12 [0] : vector<32x256xf32> to vector<256xf32>
      %17 = vector.shape_cast %16 : vector<256xf32> to vector<1x256xf32>
      %18 = vector.shape_cast %14 : vector<1x256xf32> to vector<1x256xf32>
      %19 = vector.broadcast %18 : vector<1x256xf32> to vector<8x256xf32>
      %c0_13 = arith.constant 0 : index
      %c0_14 = arith.constant 0 : index
      %20 = vector.load %arg6[%c0_13, %c0_14] : memref<8x256xf32, #tpu.memory_space<vmem>>, vector<8x256xf32>
      tpu.vector_store %arg6[%c0_13, %c0_14], %19 {strides = array<i32>} : memref<8x256xf32, #tpu.memory_space<vmem>>, vector<8x256xf32>,
      %21 = vector.shape_cast %17 : vector<1x256xf32> to vector<1x256xf32>
      %22 = vector.broadcast %21 : vector<1x256xf32> to vector<8x256xf32>
      %c0_15 = arith.constant 0 : index
      %c0_16 = arith.constant 0 : index
      %23 = vector.load %arg7[%c0_15, %c0_16] : memref<8x256xf32, #tpu.memory_space<vmem>>, vector<8x256xf32>
      tpu.vector_store %arg7[%c0_15, %c0_16], %22 {strides = array<i32>} : memref<8x256xf32, #tpu.memory_space<vmem>>, vector<8x256xf32>,
      %c0_17 = arith.constant 0 : index
      %c0_18 = arith.constant 0 : index
      %24 = vector.load %arg4[%c0_17, %c0_18] : memref<1x256xf32, #tpu.memory_space<vmem>>, vector<1x256xf32>
      %25 = vector.broadcast %24 : vector<1x256xf32> to vector<32x256xf32>
      %26 = arith.addf %12, %25 : vector<32x256xf32>
      %c0_19 = arith.constant 0 : index
      %c0_20 = arith.constant 0 : index
      %27 = vector.load %arg5[%c0_19, %c0_20] : memref<32x256xf32, #tpu.memory_space<vmem>>, vector<32x256xf32>
      tpu.vector_store %arg5[%c0_19, %c0_20], %26 {strides = array<i32>} : memref<32x256xf32, #tpu.memory_space<vmem>>, vector<32x256xf32>,
    } else {
    }
    return
  }
  func.func @transform_0(%arg0: i32, %arg1: i32) -> (i32, i32) {
    %c0_i32 = arith.constant 0 : i32
    return %arg0, %arg1 : i32, i32
  }
  func.func @transform_1(%arg0: i32, %arg1: i32) -> (i32, i32) {
    %c0_i32 = arith.constant 0 : i32
    %c0_i32_0 = arith.constant 0 : i32
    return %arg1, %c0_i32 : i32, i32
  }
  func.func @transform_2(%arg0: i32, %arg1: i32) -> (i32, i32) {
    %c0_i32 = arith.constant 0 : i32
    %c0_i32_0 = arith.constant 0 : i32
    %c0_i32_1 = arith.constant 0 : i32
    return %c0_i32, %c0_i32_0 : i32, i32
  }
  func.func @transform_3(%arg0: i32, %arg1: i32) -> (i32, i32) {
    %c0_i32 = arith.constant 0 : i32
    %c0_i32_0 = arith.constant 0 : i32
    return %arg0, %c0_i32 : i32, i32
  }
  func.func @transform_4(%arg0: i32, %arg1: i32) -> (i32, i32) {
    %c0_i32 = arith.constant 0 : i32
    %c0_i32_0 = arith.constant 0 : i32
    return %arg0, %c0_i32 : i32, i32
  }
  func.func @transform_5(%arg0: i32, %arg1: i32) -> (i32, i32) {
    %c0_i32 = arith.constant 0 : i32
    %c0_i32_0 = arith.constant 0 : i32
    return %arg0, %c0_i32 : i32, i32
  }
}

module attributes {stable_mosaic.version = 11 : i64} {
  func.func @bn_relu_kernel(%arg0: i32, %arg1: memref<32x256xf32, #tpu.memory_space<vmem>>, %arg2: memref<1x256xf32, #tpu.memory_space<vmem>>, %arg3: memref<1x256xf32, #tpu.memory_space<vmem>>, %arg4: memref<32x256xbf16, #tpu.memory_space<vmem>>) attributes {dimension_semantics = [#tpu.dimension_semantics<parallel>], iteration_bounds = array<i64: 4>, scalar_prefetch = 0 : i64, scratch_operands = 0 : i64, tpu.core_type = #tpu.core_type<tc>, window_params = [{transform_indices = @transform_0, window_bounds = array<i64: 32, 256>}, {pipeline_mode = #tpu.pipeline_mode<synchronous>, transform_indices = @transform_1, window_bounds = array<i64: 1, 256>}, {pipeline_mode = #tpu.pipeline_mode<synchronous>, transform_indices = @transform_2, window_bounds = array<i64: 1, 256>}, {transform_indices = @transform_3, window_bounds = array<i64: 32, 256>}]} {
    %c0 = arith.constant 0 : index
    %c0_0 = arith.constant 0 : index
    %0 = vector.load %arg1[%c0, %c0_0] : memref<32x256xf32, #tpu.memory_space<vmem>>, vector<32x256xf32>
    %c0_1 = arith.constant 0 : index
    %c0_2 = arith.constant 0 : index
    %1 = vector.load %arg2[%c0_1, %c0_2] : memref<1x256xf32, #tpu.memory_space<vmem>>, vector<1x256xf32>
    %2 = vector.broadcast %1 : vector<1x256xf32> to vector<32x256xf32>
    %3 = arith.mulf %0, %2 : vector<32x256xf32>
    %c0_3 = arith.constant 0 : index
    %c0_4 = arith.constant 0 : index
    %4 = vector.load %arg3[%c0_3, %c0_4] : memref<1x256xf32, #tpu.memory_space<vmem>>, vector<1x256xf32>
    %5 = vector.broadcast %4 : vector<1x256xf32> to vector<32x256xf32>
    %6 = arith.addf %3, %5 : vector<32x256xf32>
    %cst = arith.constant 0.000000e+00 : f32
    %7 = vector.broadcast %cst : f32 to vector<32x256xf32>
    %8 = arith.maximumf %6, %7 : vector<32x256xf32>
    %9 = arith.truncf %8 : vector<32x256xf32> to vector<32x256xbf16>
    %c0_5 = arith.constant 0 : index
    %c0_6 = arith.constant 0 : index
    %10 = vector.load %arg4[%c0_5, %c0_6] : memref<32x256xbf16, #tpu.memory_space<vmem>>, vector<32x256xbf16>
    tpu.vector_store %arg4[%c0_5, %c0_6], %9 {strides = array<i32>} : memref<32x256xbf16, #tpu.memory_space<vmem>>, vector<32x256xbf16>,
    return
  }
  func.func @transform_0(%arg0: i32) -> (i32, i32) {
    %c0_i32 = arith.constant 0 : i32
    %c0_i32_0 = arith.constant 0 : i32
    return %arg0, %c0_i32 : i32, i32
  }
  func.func @transform_1(%arg0: i32) -> (i32, i32) {
    %c0_i32 = arith.constant 0 : i32
    %c0_i32_0 = arith.constant 0 : i32
    %c0_i32_1 = arith.constant 0 : i32
    return %c0_i32, %c0_i32_0 : i32, i32
  }
  func.func @transform_2(%arg0: i32) -> (i32, i32) {
    %c0_i32 = arith.constant 0 : i32
    %c0_i32_0 = arith.constant 0 : i32
    %c0_i32_1 = arith.constant 0 : i32
    return %c0_i32, %c0_i32_0 : i32, i32
  }
  func.func @transform_3(%arg0: i32) -> (i32, i32) {
    %c0_i32 = arith.constant 0 : i32
    %c0_i32_0 = arith.constant 0 : i32
    return %arg0, %c0_i32 : i32, i32
  }
}

module attributes {stable_mosaic.version = 11 : i64} {
  func.func @kernel(%arg0: i32, %arg1: i32, %arg2: memref<16x1024xbf16, #tpu.memory_space<vmem>>, %arg3: memref<1024x512xbf16, #tpu.memory_space<vmem>>, %arg4: memref<1x512xf32, #tpu.memory_space<vmem>>, %arg5: memref<16x512xf32, #tpu.memory_space<vmem>>, %arg6: memref<8x512xf32, #tpu.memory_space<vmem>>, %arg7: memref<8x512xf32, #tpu.memory_space<vmem>>, %arg8: memref<16x512xf32, #tpu.memory_space<vmem>>) attributes {dimension_semantics = [#tpu.dimension_semantics<parallel>, #tpu.dimension_semantics<arbitrary>], iteration_bounds = array<i64: 2, 4>, scalar_prefetch = 0 : i64, scratch_operands = 1 : i64, tpu.core_type = #tpu.core_type<tc>, window_params = [{transform_indices = @transform_0, window_bounds = array<i64: 16, 1024>}, {transform_indices = @transform_1, window_bounds = array<i64: 1024, 512>}, {pipeline_mode = #tpu.pipeline_mode<synchronous>, transform_indices = @transform_2, window_bounds = array<i64: 1, 512>}, {transform_indices = @transform_3, window_bounds = array<i64: 16, 512>}, {transform_indices = @transform_4, window_bounds = array<i64: 8, 512>}, {transform_indices = @transform_5, window_bounds = array<i64: 8, 512>}]} {
    %c0_i32 = arith.constant 0 : i32
    %0 = arith.cmpi eq, %arg1, %c0_i32 : i32
    %1 = arith.extui %0 : i1 to i32
    %c0_i32_0 = arith.constant 0 : i32
    %2 = arith.cmpi ne, %1, %c0_i32_0 : i32
    scf.if %2 {
      %cst_9 = arith.constant 0.000000e+00 : f32
      %12 = vector.broadcast %cst_9 : f32 to vector<16x512xf32>
      %c0_10 = arith.constant 0 : index
      %c0_11 = arith.constant 0 : index
      %13 = vector.load %arg8[%c0_10, %c0_11] : memref<16x512xf32, #tpu.memory_space<vmem>>, vector<16x512xf32>
      tpu.vector_store %arg8[%c0_10, %c0_11], %12 {strides = array<i32>} : memref<16x512xf32, #tpu.memory_space<vmem>>, vector<16x512xf32>,
    } else {
    }
    %c0 = arith.constant 0 : index
    %c0_1 = arith.constant 0 : index
    %3 = vector.load %arg8[%c0, %c0_1] : memref<16x512xf32, #tpu.memory_space<vmem>>, vector<16x512xf32>
    %c0_2 = arith.constant 0 : index
    %c0_3 = arith.constant 0 : index
    %4 = vector.load %arg2[%c0_2, %c0_3] : memref<16x1024xbf16, #tpu.memory_space<vmem>>, vector<16x1024xbf16>
    %c0_4 = arith.constant 0 : index
    %c0_5 = arith.constant 0 : index
    %5 = vector.load %arg3[%c0_4, %c0_5] : memref<1024x512xbf16, #tpu.memory_space<vmem>>, vector<1024x512xbf16>
    %cst = arith.constant dense<0.000000e+00> : vector<16x512xf32>
    %6 = tpu.matmul %4, %5, %cst {dimension_numbers = #tpu.dot_dimension_numbers<[1], [0], [0], [1], [0, 0, 1, 1], [], []>} : vector<16x1024xbf16>, vector<1024x512xbf16>, vector<16x512xf32> -> vector<16x512xf32>
    %7 = arith.addf %3, %6 : vector<16x512xf32>
    %c0_6 = arith.constant 0 : index
    %c0_7 = arith.constant 0 : index
    %8 = vector.load %arg8[%c0_6, %c0_7] : memref<16x512xf32, #tpu.memory_space<vmem>>, vector<16x512xf32>
    tpu.vector_store %arg8[%c0_6, %c0_7], %7 {strides = array<i32>} : memref<16x512xf32, #tpu.memory_space<vmem>>, vector<16x512xf32>,
    %c3_i32 = arith.constant 3 : i32
    %9 = arith.cmpi eq, %arg1, %c3_i32 : i32
    %10 = arith.extui %9 : i1 to i32
    %c0_i32_8 = arith.constant 0 : i32
    %11 = arith.cmpi ne, %10, %c0_i32_8 : i32
    scf.if %11 {
      %c0_9 = arith.constant 0 : index
      %c0_10 = arith.constant 0 : index
      %12 = vector.load %arg8[%c0_9, %c0_10] : memref<16x512xf32, #tpu.memory_space<vmem>>, vector<16x512xf32>
      %cst_11 = arith.constant dense<0.000000e+00> : vector<512xf32>
      %13 = vector.multi_reduction <add>, %12, %cst_11 [0] : vector<16x512xf32> to vector<512xf32>
      %14 = vector.shape_cast %13 : vector<512xf32> to vector<1x512xf32>
      %15 = arith.mulf %12, %12 : vector<16x512xf32>
      %cst_12 = arith.constant dense<0.000000e+00> : vector<512xf32>
      %16 = vector.multi_reduction <add>, %15, %cst_12 [0] : vector<16x512xf32> to vector<512xf32>
      %17 = vector.shape_cast %16 : vector<512xf32> to vector<1x512xf32>
      %18 = vector.shape_cast %14 : vector<1x512xf32> to vector<1x512xf32>
      %19 = vector.broadcast %18 : vector<1x512xf32> to vector<8x512xf32>
      %c0_13 = arith.constant 0 : index
      %c0_14 = arith.constant 0 : index
      %20 = vector.load %arg6[%c0_13, %c0_14] : memref<8x512xf32, #tpu.memory_space<vmem>>, vector<8x512xf32>
      tpu.vector_store %arg6[%c0_13, %c0_14], %19 {strides = array<i32>} : memref<8x512xf32, #tpu.memory_space<vmem>>, vector<8x512xf32>,
      %21 = vector.shape_cast %17 : vector<1x512xf32> to vector<1x512xf32>
      %22 = vector.broadcast %21 : vector<1x512xf32> to vector<8x512xf32>
      %c0_15 = arith.constant 0 : index
      %c0_16 = arith.constant 0 : index
      %23 = vector.load %arg7[%c0_15, %c0_16] : memref<8x512xf32, #tpu.memory_space<vmem>>, vector<8x512xf32>
      tpu.vector_store %arg7[%c0_15, %c0_16], %22 {strides = array<i32>} : memref<8x512xf32, #tpu.memory_space<vmem>>, vector<8x512xf32>,
      %c0_17 = arith.constant 0 : index
      %c0_18 = arith.constant 0 : index
      %24 = vector.load %arg4[%c0_17, %c0_18] : memref<1x512xf32, #tpu.memory_space<vmem>>, vector<1x512xf32>
      %25 = vector.broadcast %24 : vector<1x512xf32> to vector<16x512xf32>
      %26 = arith.addf %12, %25 : vector<16x512xf32>
      %c0_19 = arith.constant 0 : index
      %c0_20 = arith.constant 0 : index
      %27 = vector.load %arg5[%c0_19, %c0_20] : memref<16x512xf32, #tpu.memory_space<vmem>>, vector<16x512xf32>
      tpu.vector_store %arg5[%c0_19, %c0_20], %26 {strides = array<i32>} : memref<16x512xf32, #tpu.memory_space<vmem>>, vector<16x512xf32>,
    } else {
    }
    return
  }
  func.func @transform_0(%arg0: i32, %arg1: i32) -> (i32, i32) {
    %c0_i32 = arith.constant 0 : i32
    return %arg0, %arg1 : i32, i32
  }
  func.func @transform_1(%arg0: i32, %arg1: i32) -> (i32, i32) {
    %c0_i32 = arith.constant 0 : i32
    %c0_i32_0 = arith.constant 0 : i32
    return %arg1, %c0_i32 : i32, i32
  }
  func.func @transform_2(%arg0: i32, %arg1: i32) -> (i32, i32) {
    %c0_i32 = arith.constant 0 : i32
    %c0_i32_0 = arith.constant 0 : i32
    %c0_i32_1 = arith.constant 0 : i32
    return %c0_i32, %c0_i32_0 : i32, i32
  }
  func.func @transform_3(%arg0: i32, %arg1: i32) -> (i32, i32) {
    %c0_i32 = arith.constant 0 : i32
    %c0_i32_0 = arith.constant 0 : i32
    return %arg0, %c0_i32 : i32, i32
  }
  func.func @transform_4(%arg0: i32, %arg1: i32) -> (i32, i32) {
    %c0_i32 = arith.constant 0 : i32
    %c0_i32_0 = arith.constant 0 : i32
    return %arg0, %c0_i32 : i32, i32
  }
  func.func @transform_5(%arg0: i32, %arg1: i32) -> (i32, i32) {
    %c0_i32 = arith.constant 0 : i32
    %c0_i32_0 = arith.constant 0 : i32
    return %arg0, %c0_i32 : i32, i32
  }
}

module attributes {stable_mosaic.version = 11 : i64} {
  func.func @bn_relu_kernel(%arg0: i32, %arg1: memref<16x512xf32, #tpu.memory_space<vmem>>, %arg2: memref<1x512xf32, #tpu.memory_space<vmem>>, %arg3: memref<1x512xf32, #tpu.memory_space<vmem>>, %arg4: memref<16x512xbf16, #tpu.memory_space<vmem>>) attributes {dimension_semantics = [#tpu.dimension_semantics<parallel>], iteration_bounds = array<i64: 2>, scalar_prefetch = 0 : i64, scratch_operands = 0 : i64, tpu.core_type = #tpu.core_type<tc>, window_params = [{transform_indices = @transform_0, window_bounds = array<i64: 16, 512>}, {pipeline_mode = #tpu.pipeline_mode<synchronous>, transform_indices = @transform_1, window_bounds = array<i64: 1, 512>}, {pipeline_mode = #tpu.pipeline_mode<synchronous>, transform_indices = @transform_2, window_bounds = array<i64: 1, 512>}, {transform_indices = @transform_3, window_bounds = array<i64: 16, 512>}]} {
    %c0 = arith.constant 0 : index
    %c0_0 = arith.constant 0 : index
    %0 = vector.load %arg1[%c0, %c0_0] : memref<16x512xf32, #tpu.memory_space<vmem>>, vector<16x512xf32>
    %c0_1 = arith.constant 0 : index
    %c0_2 = arith.constant 0 : index
    %1 = vector.load %arg2[%c0_1, %c0_2] : memref<1x512xf32, #tpu.memory_space<vmem>>, vector<1x512xf32>
    %2 = vector.broadcast %1 : vector<1x512xf32> to vector<16x512xf32>
    %3 = arith.mulf %0, %2 : vector<16x512xf32>
    %c0_3 = arith.constant 0 : index
    %c0_4 = arith.constant 0 : index
    %4 = vector.load %arg3[%c0_3, %c0_4] : memref<1x512xf32, #tpu.memory_space<vmem>>, vector<1x512xf32>
    %5 = vector.broadcast %4 : vector<1x512xf32> to vector<16x512xf32>
    %6 = arith.addf %3, %5 : vector<16x512xf32>
    %cst = arith.constant 0.000000e+00 : f32
    %7 = vector.broadcast %cst : f32 to vector<16x512xf32>
    %8 = arith.maximumf %6, %7 : vector<16x512xf32>
    %9 = arith.truncf %8 : vector<16x512xf32> to vector<16x512xbf16>
    %c0_5 = arith.constant 0 : index
    %c0_6 = arith.constant 0 : index
    %10 = vector.load %arg4[%c0_5, %c0_6] : memref<16x512xbf16, #tpu.memory_space<vmem>>, vector<16x512xbf16>
    tpu.vector_store %arg4[%c0_5, %c0_6], %9 {strides = array<i32>} : memref<16x512xbf16, #tpu.memory_space<vmem>>, vector<16x512xbf16>,
    return
  }
  func.func @transform_0(%arg0: i32) -> (i32, i32) {
    %c0_i32 = arith.constant 0 : i32
    %c0_i32_0 = arith.constant 0 : i32
    return %arg0, %c0_i32 : i32, i32
  }
  func.func @transform_1(%arg0: i32) -> (i32, i32) {
    %c0_i32 = arith.constant 0 : i32
    %c0_i32_0 = arith.constant 0 : i32
    %c0_i32_1 = arith.constant 0 : i32
    return %c0_i32, %c0_i32_0 : i32, i32
  }
  func.func @transform_2(%arg0: i32) -> (i32, i32) {
    %c0_i32 = arith.constant 0 : i32
    %c0_i32_0 = arith.constant 0 : i32
    %c0_i32_1 = arith.constant 0 : i32
    return %c0_i32, %c0_i32_0 : i32, i32
  }
  func.func @transform_3(%arg0: i32) -> (i32, i32) {
    %c0_i32 = arith.constant 0 : i32
    %c0_i32_0 = arith.constant 0 : i32
    return %arg0, %c0_i32 : i32, i32
  }
}

module attributes {stable_mosaic.version = 11 : i64} {
  func.func @head_kernel(%arg0: memref<8x8192xbf16, #tpu.memory_space<vmem>>, %arg1: memref<8192x128xbf16, #tpu.memory_space<vmem>>, %arg2: memref<1x128xf32, #tpu.memory_space<vmem>>, %arg3: memref<8x128xf32, #tpu.memory_space<vmem>>) attributes {dimension_semantics = [], scalar_prefetch = 0 : i64, scratch_operands = 0 : i64, tpu.core_type = #tpu.core_type<tc>} {
    %c0 = arith.constant 0 : index
    %c0_0 = arith.constant 0 : index
    %0 = vector.load %arg0[%c0, %c0_0] : memref<8x8192xbf16, #tpu.memory_space<vmem>>, vector<8x8192xbf16>
    %c0_1 = arith.constant 0 : index
    %c0_2 = arith.constant 0 : index
    %1 = vector.load %arg1[%c0_1, %c0_2] : memref<8192x128xbf16, #tpu.memory_space<vmem>>, vector<8192x128xbf16>
    %cst = arith.constant dense<0.000000e+00> : vector<8x128xf32>
    %2 = tpu.matmul %0, %1, %cst {dimension_numbers = #tpu.dot_dimension_numbers<[1], [0], [0], [1], [0, 0, 1, 1], [], []>} : vector<8x8192xbf16>, vector<8192x128xbf16>, vector<8x128xf32> -> vector<8x128xf32>
    %c0_3 = arith.constant 0 : index
    %c0_4 = arith.constant 0 : index
    %3 = vector.load %arg2[%c0_3, %c0_4] : memref<1x128xf32, #tpu.memory_space<vmem>>, vector<1x128xf32>
    %4 = vector.broadcast %3 : vector<1x128xf32> to vector<8x128xf32>
    %5 = arith.addf %2, %4 : vector<8x128xf32>
    %6 = arith.negf %5 : vector<8x128xf32>
    %7 = math.exp %6 : vector<8x128xf32>
    %cst_5 = arith.constant 1.000000e+00 : f32
    %8 = vector.broadcast %cst_5 : f32 to vector<8x128xf32>
    %9 = arith.addf %8, %7 : vector<8x128xf32>
    %10 = arith.divf %8, %9 : vector<8x128xf32>
    %c0_6 = arith.constant 0 : index
    %c0_7 = arith.constant 0 : index
    %11 = vector.load %arg3[%c0_6, %c0_7] : memref<8x128xf32, #tpu.memory_space<vmem>>, vector<8x128xf32>
    tpu.vector_store %arg3[%c0_6, %c0_7], %10 {strides = array<i32>} : memref<8x128xf32, #tpu.memory_space<vmem>>, vector<8x128xf32>,
    return
  }
}

</mosaic_0001>

<bundles_post_ra>
// kernel: tpu_custom_call.1
= control target key start
LH: loop header
LB: loop body
LE: loop exit
PB: predicated region body
PF: predicated region fallthrough
CT: control target
= control target key end

     0   :  { %7 = vsyncpa [#allocation3], 0  ;;  %s633_s0 = inlined_call_operand.hbm [shape: f32[16,128], index: 0, kind: input, shape index: {}]   ;;  %s634_s1 = inlined_call_operand.hbm [shape: f32[8,128], index: 1, kind: input, shape index: {}]   ;;  %s635_s2 = inlined_call_operand.hbm [shape: f32[16,128], index: 2, kind: output, shape index: {}]  }
   0x1   :  { %9 = vsyncpa [#allocation3 + $0x1], 0 }
   0x2   :  { %10 = vsyncpa [#allocation6], 0 }
   0x3   :  { %11 = vsyncpa [#allocation4], 0 }
   0x4   :  { %13 = vsyncpa [#allocation4 + $0x1], 0  ;;  %s495_s9 = smov 0   ;;  %s497_s10 = smov 0  }
   0x5   :  { %s499_s11 = smov 0   ;;  %s501_s12 = smov 0  }
   0x6 LB: > { %s516_s13 = sadd.s32 4294967295, %s477_s12   ;;  %s276_s14 = sadd.s32 4294967294, %s477_s12   ;;  %s477_s12 = sphi %s501_s12, %s645_s12   ;;  %s473_s11 = sphi %s499_s11, %s644_s11   ;;  %s469_s10 = sphi %s497_s10, %s643_s10   ;;  %s465_s9 = sphi %s495_s9, %s642_s9  }
   0x7   : > { %p39_p0 = scmp.ne.s32.totalorder %s469_s10, %s465_s9  ;;  %p40_p1 = scmp.eq.s32.totalorder %s516_s13, 0 }
   0x8   : > { %p84_p2 = scmp.eq.s32.totalorder %s516_s13, 1  ;;  %p90_p3 = scmp.eq.s32.totalorder %s276_s14, 1 }
   0x9   : > { %p525_p4 = por %p40_p1, %p39_p0  ;;  %p277_p5 = scmp.ge.s32.totalorder %s477_s12, 1 }
   0xa   : > { %p530_p6 = por %p90_p3, %p39_p0  ;;  %p97_p7 = scmp.lt.s32.totalorder %s477_s12, 3 }
   0xb   : > { %s109_s19 = sshll.u32 %s634_s1, 4  ;;  %s479_s21 = smov [#allocation5]   ;;  %s110_s19 = int_to_ptr.hbm [resolvable:$true] %s109_s19 }
   0xc   : > { %p538_p8 = pnand %p277_p5, %p97_p7  ;;  %s111_s22 = sshll.u32 %s479_s21, 4  ;;  %s112_s22 = int_to_ptr.vmem [resolvable:$true] %s111_s22 }
   0xd   : > { %s548_s23 = sadd.s32 1, %s477_s12   ;;  %s26_s24 = sadd.s32 1, %s473_s11 }
   0xe   : > { %p298_p10 = pneg %p538_p8  ;;  %s23_s25 = ssub.s32 %s477_s12, %s548_s23 }
   0xf   : > { %p24_p12 = scmp.eq.s32.totalorder %s23_s25, 0  ;;  %p33_p13 = scmp.ne.s32.totalorder %s473_s11, %s469_s10 }
  0x10   : > { %p299_p11 = pnand %p298_p10, %p40_p1  ;;  %p34_p0 = scmp.eq.s32.totalorder %s477_s12, 0 }
  0x11   : > { %s557_s26 = scalar_select %p24_p12, %s473_s11, %s26_s24  }
  0x12   : > { %301 = dma.hbm_to_vmem [thread:$0]  (!%p299_p11), %s110_s19, 128, %s112_s22, [#allocation6]  }
  0x13   : > { %p561_p3 = por %p84_p2, %p33_p13  ;;  %p311_p5 = scmp.lt.s32.totalorder %s477_s12, 2 }
  0x14   : > { %s122_s28 = sand.u32 1, %s473_s11   ;;  %s281_s29 = sshll.u32 %s477_s12, 3 }
  0x15   : > { %p35_p7 = por %p34_p0, %p33_p13  ;;  %s280_s30 = sshll.u32 %s122_s28, 3 }
  0x16   : > { %s130_s5 = scalar_lea.hbm %s633_s0, %s281_s29  ;;  %s126_s7 = scalar_lea.vmem [#allocation2], %s280_s30 }
  0x17   : > { %s132_s6 = sshll.u32 %s130_s5, 4  ;;  %s134_s8 = sshll.u32 %s126_s7, 4  ;;  %s133_s6 = int_to_ptr.hbm [resolvable:$true] %s132_s6  ;;  %s135_s8 = int_to_ptr.vmem [resolvable:$true] %s134_s8 }
  0x18   : > { %p571_p10 = pnand %p311_p5, %p35_p7  ;;  %s123_s17 = scalar_lea.sflag [#allocation3], %s122_s28 }
  0x19   : > { %s377_s18 = sshra.s32 %s133_s6, 4  ;;  %s384_s24 = scalar_lea.hbm %s633_s0, 16  ;;  %s378_s18 = int_to_ptr.hbm [resolvable:$true] %s377_s18 }
  0x1a   : > { %s379_s19 = scalar_lea.hbm %s378_s18, 8  ;;  %p381_p11 = pneg %p571_p10 }
  0x1b   : > { %p380_p2 = scmp.ne.s32.totalorder %s378_s18, %s379_s19  ;;  %p385_p0 = scmp.lt.s32.totalorder %s378_s18, %s633_s0 }
  0x1c   : > { %p386_p5 = scmp.lt.s32.totalorder %s384_s24, %s379_s19 }
  0x1d   : > { %p382_p12 = pnand %p381_p11, %p380_p2 }
  0x1e   : > { %p387_p7 = por %p386_p5, %p385_p0 }
  0x1f   : > { %p383_p13 = pneg %p382_p12 }
  0x21   : > { %p388_p9 = pnand %p387_p7, %p383_p13 }
  0x23   : > { %391 = shalt.err (!%p388_p9)
}
  0x24   : > { %305 = dma.hbm_to_vmem [thread:$0]  (!%p571_p10), %s133_s6, 128, %s135_s8, %s123_s17  }
  0x25   : > { %143 = sbr.rel (%p538_p8) target bundleno = 60 (0x3c), region = 28  ;;  %s588_s28 = sand.u32 (!%p538_p8), 1, %s469_s10  }
  0x26   : > { %s283_s30 = sshll.u32 (!%p538_p8), %s588_s28, 3  ;;  %s146_s3 = scalar_lea.sflag (!%p538_p8), [#allocation3], %s588_s28 }
  0x27   : > { %s149_s4 = scalar_lea.vmem (!%p538_p8), [#allocation2], %s283_s30 }
  0x2a   : > { %452 = dma.done.wait (%p525_p4), %s146_s3, 128  }
  0x2b   : > { %454 = vsyncadd (%p525_p4), %s146_s3, 4294967168 }
  0x2c   : > { %456 = dma.done.wait (%p40_p1), [#allocation6], 128  }
  0x2d   : > { %458 = vsyncadd (%p40_p1), [#allocation6], 4294967168  ;;  %s287_s20 = sshll.u32 %s516_s13, 3  ;;  %s175_s8 = scalar_lea.vmem [#allocation7], %s283_s30  ;;  %v176_v0 = vld [vmem:[%s149_s4] sm:$0xff]  ;;  %v177_v1 = vld [vmem:[#allocation5] sm:$0xff] }
  0x2e   : > { %s191_s7 = scalar_lea.hbm %s635_s2, %s287_s20  ;;  %s193_s14 = sshll.u32 %s175_s8, 4  ;;  %v178_v2 = vadd.f32 %v177_v1, %v176_v0  ;;  %s194_s14 = int_to_ptr.vmem [resolvable:$true] %s193_s14 }
  0x2f   : > { %s195_s17 = sshll.u32 %s191_s7, 4  ;;  %s181_s15 = scalar_lea.sflag [#allocation4], %s588_s28  ;;  %s196_s17 = int_to_ptr.hbm [resolvable:$true] %s195_s17 }
  0x30   : > { %179 = vst [vmem:[%s175_s8] sm:$0xff] %v178_v2  ;;  %s421_s18 = sshra.s32 %s196_s17, 4  ;;  %s427_s22 = scalar_lea.hbm %s635_s2, 16  ;;  %s422_s18 = int_to_ptr.hbm [resolvable:$true] %s421_s18 }
  0x31   : > { %s423_s19 = scalar_lea.hbm %s422_s18, 8  ;;  %p428_p9 = scmp.lt.s32.totalorder %s422_s18, %s635_s2 }
  0x32   : > { %p424_p1 = scmp.ne.s32.totalorder %s422_s18, %s423_s19  ;;  %p429_p10 = scmp.lt.s32.totalorder %s427_s22, %s423_s19 }
  0x34   : > { %p425_p4 = pnand %p424_p1, %p561_p3  ;;  %p430_p2 = por %p429_p10, %p428_p9 }
  0x36   : > { %p426_p8 = pneg %p425_p4 }
  0x38   : > { %p431_p11 = pnand %p430_p2, %p426_p8 }
  0x3a   : > { %434 = shalt.err (!%p431_p11)
}
  0x3b   : > { %296 = dma.vmem_to_hbm [thread:$0]  (%p561_p3), %s194_s14, 128, %s196_s17, %s181_s15  }
  0x3c PF: > { %s207_s29 = sand.u32 1, %s465_s9   ;;  %p641_p12 = scmp.ge.s32.totalorder %s477_s12, 2 }
  0x3d   : > { %s208_s28 = scalar_lea.sflag [#allocation4], %s207_s29 }
  0x3e   : > { %p307_p13 = pnand %p641_p12, %p530_p6 }
  0x40   : > { %p308_p0 = pneg %p307_p13 }
  0x42   : > { %460 = dma.done.wait (%p308_p0), %s208_s28, 128  }
  0x43   : > { %462 = vsyncadd (%p308_p0), %s208_s28, 4294967168  ;;  %p16_p5 = scmp.ge.s32.totalorder %s548_s23, 4   ;;  %s642_s9 = smov %s469_s10 }
  0x44   : > { %s643_s10 = smov %s473_s11  ;;  %s644_s11 = smov %s557_s26 }
  0x45   : > { %s645_s12 = smov %s548_s23  ;;  %18 = sbr.rel (!%p16_p5) target bundleno = 6 (0x6), region = 77 }
  0x4a   :  { %214 = vsyncpa [#allocation3], 1 }
  0x4b   :  { %216 = vsyncpa [#allocation3 + $0x1], 1 }
  0x4c   :  { %217 = vsyncpa [#allocation6], 1 }
  0x4d   :  { %218 = vsyncpa [#allocation4], 1 }
  0x4e   :  { %220 = vsyncpa [#allocation4 + $0x1], 1 }

// kernel: discriminator_forward.8
= control target key start
LH: loop header
LB: loop body
LE: loop exit
PB: predicated region body
PF: predicated region fallthrough
CT: control target
= control target key end

     0   :  { %s1854_s12 = smov 0   ;;  %s1856_s13 = smov 0   ;;  %s2072_s0 = inlined_call_operand.vmem [shape: bf16[2048,48], index: 0, kind: input, shape index: {}]   ;;  %s2073_s1 = inlined_call_operand.vmem [shape: bf16[48,128], index: 1, kind: input, shape index: {}]   ;;  %s2074_s2 = inlined_call_operand.vmem [shape: f32[1,128], index: 2, kind: input, shape index: {}]   ;;  %s2075_s3 = inlined_call_operand.vmem [shape: bf16[2048,128], index: 3, kind: output, shape index: {}]  }
   0x1   :  { %s1858_s14 = smov 0  }
   0x2 LB: > { %s25_s15 = sadd.s32 1, %s1828_s13  ;;  %p1371_p0 = scmp.ge.s32.totalorder %s1832_s14, 1  ;;  %s1832_s14 = sphi %s1858_s14, %s13_s14   ;;  %s1828_s13 = sphi %s1856_s13, %s2077_s13   ;;  %s1824_s12 = sphi %s1854_s12, %s2076_s12  }
   0x3   : > { %p27_p1 = scmp.ge.s32.totalorder %s25_s15, 4  ;;  %p155_p2 = scmp.lt.s32.totalorder %s1832_s14, 5 }
   0x5   : > { %s2079_s15 = smov (%p27_p1, %s25_s15), 0  ;;  %p156_p3 = pnand %p1371_p0, %p155_p2 }
   0x6   : > { %s1372_s18 = sshll.u32 (!%p156_p3), %s1824_s12, 6 }
   0x7   : > { %159 = sbr.rel (%p156_p3) target bundleno = 285 (0x11d), region = 32  ;;  %p183_p4 = scmp.lt.s32.totalorder (!%p156_p3), %s1372_s18, 255 }
   0xc   : > { %v1584_v0 = vld [vmem:[%s2073_s1 + $0x10] sm:$0xff]  ;;  %v1583_v1 = vld [vmem:[%s2073_s1 + $0x8] sm:$0xff]  ;;  %s2081_s18 = smov (!%p183_p4, %s1372_s18), 255  ;;  %v1582_v2 = vld [vmem:[%s2073_s1] sm:$0xff]  ;;  %vm578_vm0 = vcmask 392192  }
   0xd   : > { %680 = vmatpush.bf16.msra.mxu0 %v1584_v0  ;;  %1776 = vmatpush.bf16.msra.mxu1 %v1584_v0  ;;  %s1373_s21 = sshll.u32 %s2081_s18, 2  ;;  %v1958_v37 = vld [vmem:[%s2074_s2] ss:$0 sm:$0xff] }
   0xe   : > { %1777 = vmatpush.bf16.msra.mxu2 %v1584_v0  ;;  %1778 = vmatpush.bf16.msra.mxu3 %v1584_v0  ;;  %s1889_s26 = scalar_lea.vmem %s2072_s0, %s1373_s21  ;;  %s1969_s4 = scalar_lea.vmem %s2075_s3, %s1373_s21 }
   0xf   : > { %v1550_v3 = vld [vmem:[%s1889_s26] sm:$0xff]  ;;  %v1551_v7 = vld [vmem:[%s1889_s26 + $0x8] sm:$0xff]  ;;  %v1552_v11 = vld [vmem:[%s1889_s26 + $0x10] sm:$0xff] }
  0x10   : > { %v1558_v4 = vld [vmem:[%s1889_s26 + $0x40] sm:$0xff]  ;;  %v1559_v8 = vld [vmem:[%s1889_s26 + $0x48] sm:$0xff]  ;;  %v1560_v12 = vld [vmem:[%s1889_s26 + $0x50] sm:$0xff] }
  0x11   : > { %681 = vmatpush.bf16.msra.mxu0 %v1583_v1  ;;  %1779 = vmatpush.bf16.msra.mxu1 %v1583_v1  ;;  %v1566_v5 = vld [vmem:[%s1889_s26 + $0x80] sm:$0xff]  ;;  %v1567_v9 = vld [vmem:[%s1889_s26 + $0x88] sm:$0xff]  ;;  %v1568_v13 = vld [vmem:[%s1889_s26 + $0x90] sm:$0xff] }
  0x12   : > { %1780 = vmatpush.bf16.msra.mxu2 %v1583_v1  ;;  %1781 = vmatpush.bf16.msra.mxu3 %v1583_v1  ;;  %v1574_v6 = vld [vmem:[%s1889_s26 + $0xc0] sm:$0xff]  ;;  %v1575_v10 = vld [vmem:[%s1889_s26 + $0xc8] sm:$0xff]  ;;  %v1576_v14 = vld [vmem:[%s1889_s26 + $0xd0] sm:$0xff] }
  0x13   : > { %v1553_v15 = vld [vmem:[%s1889_s26 + $0x18] sm:$0xff]  ;;  %v1554_v19 = vld [vmem:[%s1889_s26 + $0x20] sm:$0xff]  ;;  %v1555_v23 = vld [vmem:[%s1889_s26 + $0x28] sm:$0xff] }
  0x14   : > { %v1561_v16 = vld [vmem:[%s1889_s26 + $0x58] sm:$0xff]  ;;  %v1562_v20 = vld [vmem:[%s1889_s26 + $0x60] sm:$0xff]  ;;  %v1563_v24 = vld [vmem:[%s1889_s26 + $0x68] sm:$0xff] }
  0x15   : > { %682 = vmatpush.bf16.msra.mxu0 %v1582_v2  ;;  %1782 = vmatpush.bf16.msra.mxu1 %v1582_v2  ;;  %v1569_v17 = vld [vmem:[%s1889_s26 + $0x98] sm:$0xff]  ;;  %v1570_v21 = vld [vmem:[%s1889_s26 + $0xa0] sm:$0xff]  ;;  %v1571_v25 = vld [vmem:[%s1889_s26 + $0xa8] sm:$0xff] }
  0x16   : > { %1783 = vmatpush.bf16.msra.mxu2 %v1582_v2  ;;  %1784 = vmatpush.bf16.msra.mxu3 %v1582_v2  ;;  %v1577_v18 = vld [vmem:[%s1889_s26 + $0xd8] sm:$0xff]  ;;  %v1578_v22 = vld [vmem:[%s1889_s26 + $0xe0] sm:$0xff]  ;;  %v1579_v26 = vld [vmem:[%s1889_s26 + $0xe8] sm:$0xff] }
  0x17   : > { %v1556_v27 = vld [vmem:[%s1889_s26 + $0x30] sm:$0xff]  ;;  %v1557_v31 = vld [vmem:[%s1889_s26 + $0x38] sm:$0xff] }
  0x18   : > { %1516 = vmatmul.msk.bf16.vlgmr.msra.gmra.mxu0 %vm578_vm0, %v1550_v3  ;;  %1524 = vmatmul.msk.bf16.vlgmr.msra.gmra.mxu1 %vm578_vm0, %v1558_v4  ;;  %v1564_v28 = vld [vmem:[%s1889_s26 + $0x70] sm:$0xff]  ;;  %v1565_v32 = vld [vmem:[%s1889_s26 + $0x78] sm:$0xff] }
  0x19   : > { %1532 = vmatmul.msk.bf16.vlgmr.msra.gmra.mxu2 %vm578_vm0, %v1566_v5  ;;  %1540 = vmatmul.msk.bf16.vlgmr.msra.gmra.mxu3 %vm578_vm0, %v1574_v6  ;;  %v1572_v29 = vld [vmem:[%s1889_s26 + $0xb0] sm:$0xff]  ;;  %v1573_v33 = vld [vmem:[%s1889_s26 + $0xb8] sm:$0xff] }
  0x1a   : > { %v1580_v30 = vld [vmem:[%s1889_s26 + $0xf0] sm:$0xff]  ;;  %v1581_v34 = vld [vmem:[%s1889_s26 + $0xf8] sm:$0xff] }
  0x28   : > { %1517 = vmatmul.msk.bf16.gmra.mxu0 %vm578_vm0, %v1551_v7  ;;  %1525 = vmatmul.msk.bf16.gmra.mxu1 %vm578_vm0, %v1559_v8 }
  0x29   : > { %1533 = vmatmul.msk.bf16.gmra.mxu2 %vm578_vm0, %v1567_v9  ;;  %1541 = vmatmul.msk.bf16.gmra.mxu3 %vm578_vm0, %v1575_v10 }
  0x38   : > { %1518 = vmatmul.msk.bf16.gmra.mxu0 %vm578_vm0, %v1552_v11  ;;  %1526 = vmatmul.msk.bf16.gmra.mxu1 %vm578_vm0, %v1560_v12 }
  0x39   : > { %1534 = vmatmul.msk.bf16.gmra.mxu2 %vm578_vm0, %v1568_v13  ;;  %1542 = vmatmul.msk.bf16.gmra.mxu3 %vm578_vm0, %v1576_v14 }
  0x48   : > { %1519 = vmatmul.msk.bf16.gmra.mxu0 %vm578_vm0, %v1553_v15  ;;  %1527 = vmatmul.msk.bf16.gmra.mxu1 %vm578_vm0, %v1561_v16 }
  0x49   : > { %1535 = vmatmul.msk.bf16.gmra.mxu2 %vm578_vm0, %v1569_v17  ;;  %1543 = vmatmul.msk.bf16.gmra.mxu3 %vm578_vm0, %v1577_v18 }
  0x58   : > { %1520 = vmatmul.msk.bf16.gmra.mxu0 %vm578_vm0, %v1554_v19  ;;  %1528 = vmatmul.msk.bf16.gmra.mxu1 %vm578_vm0, %v1562_v20 }
  0x59   : > { %1536 = vmatmul.msk.bf16.gmra.mxu2 %vm578_vm0, %v1570_v21  ;;  %1544 = vmatmul.msk.bf16.gmra.mxu3 %vm578_vm0, %v1578_v22 }
  0x68   : > { %1521 = vmatmul.msk.bf16.gmra.mxu0 %vm578_vm0, %v1555_v23  ;;  %1529 = vmatmul.msk.bf16.gmra.mxu1 %vm578_vm0, %v1563_v24 }
  0x69   : > { %1537 = vmatmul.msk.bf16.gmra.mxu2 %vm578_vm0, %v1571_v25  ;;  %1545 = vmatmul.msk.bf16.gmra.mxu3 %vm578_vm0, %v1579_v26 }
  0x78   : > { %1522 = vmatmul.msk.bf16.gmra.mxu0 %vm578_vm0, %v1556_v27  ;;  %1530 = vmatmul.msk.bf16.gmra.mxu1 %vm578_vm0, %v1564_v28 }
  0x79   : > { %1538 = vmatmul.msk.bf16.gmra.mxu2 %vm578_vm0, %v1572_v29  ;;  %1546 = vmatmul.msk.bf16.gmra.mxu3 %vm578_vm0, %v1580_v30 }
  0x88   : > { %1523 = vmatmul.msk.bf16.gmra.mxu0 %vm578_vm0, %v1557_v31  ;;  %1531 = vmatmul.msk.bf16.gmra.mxu1 %vm578_vm0, %v1565_v32 }
  0x89   : > { %1539 = vmatmul.msk.bf16.gmra.mxu2 %vm578_vm0, %v1573_v33  ;;  %1547 = vmatmul.msk.bf16.gmra.mxu3 %vm578_vm0, %v1581_v34 }
  0x95   : > { %v684_v35 = vpop.f32.mrf.mxu0  ;;  %v724_v36 = vpop.f32.mrf.mxu1 }
  0x96   : > { %v1043_v38 = vadd.f32 %v1958_v37, %v684_v35  ;;  %v1059_v39 = vadd.f32 %v1958_v37, %v724_v36 }
  0x98   : > { %v1107_v46 = vmax.f32 %v1043_v38, 0.0  ;;  %v1123_v47 = vmax.f32 %v1059_v39, 0.0 }
  0x9c   : > { %v764_v40 = vpop.f32.mrf.mxu2  ;;  %v804_v41 = vpop.f32.mrf.mxu3 }
  0x9d   : > { %v686_v42 = vpop.f32.mrf.mxu0  ;;  %v726_v43 = vpop.f32.mrf.mxu1  ;;  %v1075_v52 = vadd.f32 %v1958_v37, %v764_v40  ;;  %v1091_v53 = vadd.f32 %v1958_v37, %v804_v41 }
  0x9e   : > { %v1044_v44 = vadd.f32 %v1958_v37, %v686_v42  ;;  %v1060_v45 = vadd.f32 %v1958_v37, %v726_v43 }
  0x9f   : > { %v1139_v60 = vmax.f32 %v1075_v52, 0.0  ;;  %v1155_v61 = vmax.f32 %v1091_v53, 0.0 }
  0xa0   : > { %v1108_v48 = vmax.f32 %v1044_v44, 0.0  ;;  %v1124_v49 = vmax.f32 %v1060_v45, 0.0 }
  0xa2   : > { %v1588_v50 = vpack.c.bf16 %v1108_v48, %v1107_v46  ;;  %v1628_v51 = vpack.c.bf16 %v1124_v49, %v1123_v47 }
  0xa4   : > { %1589 = vst [vmem:[%s1969_s4] sm:$0xff] %v1588_v50   ;;  %v766_v54 = vpop.f32.mrf.mxu2  ;;  %v806_v55 = vpop.f32.mrf.mxu3 }
  0xa5   : > { %1752 = vst [vmem:[%s1969_s4 + $0x40] sm:$0xff] %v1628_v51   ;;  %v1076_v56 = vadd.f32 %v1958_v37, %v766_v54  ;;  %v1092_v57 = vadd.f32 %v1958_v37, %v806_v55  ;;  %v689_v58 = vpop.f32.mrf.mxu0  ;;  %v729_v59 = vpop.f32.mrf.mxu1 }
  0xa6   : > { %v1045_v2 = vadd.f32 %v1958_v37, %v689_v58  ;;  %v1061_v3 = vadd.f32 %v1958_v37, %v729_v59 }
  0xa7   : > { %v1140_v62 = vmax.f32 %v1076_v56, 0.0  ;;  %v1156_v63 = vmax.f32 %v1092_v57, 0.0 }
  0xa8   : > { %v1109_v10 = vmax.f32 %v1045_v2, 0.0  ;;  %v1125_v11 = vmax.f32 %v1061_v3, 0.0 }
  0xa9   : > { %v1668_v0 = vpack.c.bf16 %v1140_v62, %v1139_v60  ;;  %v1708_v1 = vpack.c.bf16 %v1156_v63, %v1155_v61 }
  0xab   : > { %1760 = vst [vmem:[%s1969_s4 + $0x80] sm:$0xff] %v1668_v0  }
  0xac   : > { %1768 = vst [vmem:[%s1969_s4 + $0xc0] sm:$0xff] %v1708_v1   ;;  %v769_v4 = vpop.f32.mrf.mxu2  ;;  %v809_v5 = vpop.f32.mrf.mxu3 }
  0xad   : > { %v691_v6 = vpop.f32.mrf.mxu0  ;;  %v731_v7 = vpop.f32.mrf.mxu1  ;;  %v1077_v16 = vadd.f32 %v1958_v37, %v769_v4  ;;  %v1093_v17 = vadd.f32 %v1958_v37, %v809_v5 }
  0xae   : > { %v1046_v8 = vadd.f32 %v1958_v37, %v691_v6  ;;  %v1062_v9 = vadd.f32 %v1958_v37, %v731_v7 }
  0xaf   : > { %v1141_v24 = vmax.f32 %v1077_v16, 0.0  ;;  %v1157_v25 = vmax.f32 %v1093_v17, 0.0 }
  0xb0   : > { %v1110_v12 = vmax.f32 %v1046_v8, 0.0  ;;  %v1126_v13 = vmax.f32 %v1062_v9, 0.0 }
  0xb2   : > { %v1593_v14 = vpack.c.bf16 %v1110_v12, %v1109_v10  ;;  %v1633_v15 = vpack.c.bf16 %v1126_v13, %v1125_v11 }
  0xb4   : > { %1745 = vst [vmem:[%s1969_s4 + $0x8] sm:$0xff] %v1593_v14   ;;  %v771_v18 = vpop.f32.mrf.mxu2  ;;  %v811_v19 = vpop.f32.mrf.mxu3 }
  0xb5   : > { %1753 = vst [vmem:[%s1969_s4 + $0x48] sm:$0xff] %v1633_v15   ;;  %v1078_v20 = vadd.f32 %v1958_v37, %v771_v18  ;;  %v1094_v21 = vadd.f32 %v1958_v37, %v811_v19  ;;  %v694_v22 = vpop.f32.mrf.mxu0  ;;  %v734_v23 = vpop.f32.mrf.mxu1 }
  0xb6   : > { %v1047_v30 = vadd.f32 %v1958_v37, %v694_v22  ;;  %v1063_v31 = vadd.f32 %v1958_v37, %v734_v23 }
  0xb7   : > { %v1142_v26 = vmax.f32 %v1078_v20, 0.0  ;;  %v1158_v27 = vmax.f32 %v1094_v21, 0.0 }
  0xb8   : > { %v1111_v39 = vmax.f32 %v1047_v30, 0.0  ;;  %v1127_v40 = vmax.f32 %v1063_v31, 0.0 }
  0xb9   : > { %v1673_v28 = vpack.c.bf16 %v1142_v26, %v1141_v24  ;;  %v1713_v29 = vpack.c.bf16 %v1158_v27, %v1157_v25 }
  0xbb   : > { %1761 = vst [vmem:[%s1969_s4 + $0x88] sm:$0xff] %v1673_v28  }
  0xbc   : > { %1769 = vst [vmem:[%s1969_s4 + $0xc8] sm:$0xff] %v1713_v29   ;;  %v774_v32 = vpop.f32.mrf.mxu2  ;;  %v814_v33 = vpop.f32.mrf.mxu3 }
  0xbd   : > { %v696_v34 = vpop.f32.mrf.mxu0  ;;  %v736_v35 = vpop.f32.mrf.mxu1  ;;  %v1079_v45 = vadd.f32 %v1958_v37, %v774_v32  ;;  %v1095_v46 = vadd.f32 %v1958_v37, %v814_v33 }
  0xbe   : > { %v1048_v36 = vadd.f32 %v1958_v37, %v696_v34  ;;  %v1064_v38 = vadd.f32 %v1958_v37, %v736_v35 }
  0xbf   : > { %v1143_v53 = vmax.f32 %v1079_v45, 0.0  ;;  %v1159_v54 = vmax.f32 %v1095_v46, 0.0 }
  0xc0   : > { %v1112_v41 = vmax.f32 %v1048_v36, 0.0  ;;  %v1128_v42 = vmax.f32 %v1064_v38, 0.0 }
  0xc2   : > { %v1598_v43 = vpack.c.bf16 %v1112_v41, %v1111_v39  ;;  %v1638_v44 = vpack.c.bf16 %v1128_v42, %v1127_v40 }
  0xc4   : > { %1746 = vst [vmem:[%s1969_s4 + $0x10] sm:$0xff] %v1598_v43   ;;  %v776_v47 = vpop.f32.mrf.mxu2  ;;  %v816_v48 = vpop.f32.mrf.mxu3 }
  0xc5   : > { %1754 = vst [vmem:[%s1969_s4 + $0x50] sm:$0xff] %v1638_v44   ;;  %v1080_v49 = vadd.f32 %v1958_v37, %v776_v47  ;;  %v1096_v50 = vadd.f32 %v1958_v37, %v816_v48  ;;  %v699_v51 = vpop.f32.mrf.mxu0  ;;  %v739_v52 = vpop.f32.mrf.mxu1 }
  0xc6   : > { %v1049_v59 = vadd.f32 %v1958_v37, %v699_v51  ;;  %v1065_v60 = vadd.f32 %v1958_v37, %v739_v52 }
  0xc7   : > { %v1144_v55 = vmax.f32 %v1080_v49, 0.0  ;;  %v1160_v56 = vmax.f32 %v1096_v50, 0.0 }
  0xc8   : > { %v1113_v3 = vmax.f32 %v1049_v59, 0.0  ;;  %v1129_v4 = vmax.f32 %v1065_v60, 0.0 }
  0xc9   : > { %v1678_v57 = vpack.c.bf16 %v1144_v55, %v1143_v53  ;;  %v1718_v58 = vpack.c.bf16 %v1160_v56, %v1159_v54 }
  0xcb   : > { %1762 = vst [vmem:[%s1969_s4 + $0x90] sm:$0xff] %v1678_v57  }
  0xcc   : > { %1770 = vst [vmem:[%s1969_s4 + $0xd0] sm:$0xff] %v1718_v58   ;;  %v779_v61 = vpop.f32.mrf.mxu2  ;;  %v819_v62 = vpop.f32.mrf.mxu3 }
  0xcd   : > { %v701_v63 = vpop.f32.mrf.mxu0  ;;  %v741_v0 = vpop.f32.mrf.mxu1  ;;  %v1081_v9 = vadd.f32 %v1958_v37, %v779_v61  ;;  %v1097_v10 = vadd.f32 %v1958_v37, %v819_v62 }
  0xce   : > { %v1050_v1 = vadd.f32 %v1958_v37, %v701_v63  ;;  %v1066_v2 = vadd.f32 %v1958_v37, %v741_v0 }
  0xcf   : > { %v1145_v17 = vmax.f32 %v1081_v9, 0.0  ;;  %v1161_v18 = vmax.f32 %v1097_v10, 0.0 }
  0xd0   : > { %v1114_v5 = vmax.f32 %v1050_v1, 0.0  ;;  %v1130_v6 = vmax.f32 %v1066_v2, 0.0 }
  0xd2   : > { %v1603_v7 = vpack.c.bf16 %v1114_v5, %v1113_v3  ;;  %v1643_v8 = vpack.c.bf16 %v1130_v6, %v1129_v4 }
  0xd4   : > { %1747 = vst [vmem:[%s1969_s4 + $0x18] sm:$0xff] %v1603_v7   ;;  %v781_v11 = vpop.f32.mrf.mxu2  ;;  %v821_v12 = vpop.f32.mrf.mxu3 }
  0xd5   : > { %1755 = vst [vmem:[%s1969_s4 + $0x58] sm:$0xff] %v1643_v8   ;;  %v1082_v13 = vadd.f32 %v1958_v37, %v781_v11  ;;  %v1098_v14 = vadd.f32 %v1958_v37, %v821_v12  ;;  %v704_v15 = vpop.f32.mrf.mxu0  ;;  %v744_v16 = vpop.f32.mrf.mxu1 }
  0xd6   : > { %v1051_v23 = vadd.f32 %v1958_v37, %v704_v15  ;;  %v1067_v24 = vadd.f32 %v1958_v37, %v744_v16 }
  0xd7   : > { %v1146_v19 = vmax.f32 %v1082_v13, 0.0  ;;  %v1162_v20 = vmax.f32 %v1098_v14, 0.0 }
  0xd8   : > { %v1115_v31 = vmax.f32 %v1051_v23, 0.0  ;;  %v1131_v32 = vmax.f32 %v1067_v24, 0.0 }
  0xd9   : > { %v1683_v21 = vpack.c.bf16 %v1146_v19, %v1145_v17  ;;  %v1723_v22 = vpack.c.bf16 %v1162_v20, %v1161_v18 }
  0xdb   : > { %1763 = vst [vmem:[%s1969_s4 + $0x98] sm:$0xff] %v1683_v21  }
  0xdc   : > { %1771 = vst [vmem:[%s1969_s4 + $0xd8] sm:$0xff] %v1723_v22   ;;  %v784_v25 = vpop.f32.mrf.mxu2  ;;  %v824_v26 = vpop.f32.mrf.mxu3 }
  0xdd   : > { %v706_v27 = vpop.f32.mrf.mxu0  ;;  %v746_v28 = vpop.f32.mrf.mxu1  ;;  %v1083_v38 = vadd.f32 %v1958_v37, %v784_v25  ;;  %v1099_v39 = vadd.f32 %v1958_v37, %v824_v26 }
  0xde   : > { %v1052_v29 = vadd.f32 %v1958_v37, %v706_v27  ;;  %v1068_v30 = vadd.f32 %v1958_v37, %v746_v28 }
  0xdf   : > { %v1147_v46 = vmax.f32 %v1083_v38, 0.0  ;;  %v1163_v47 = vmax.f32 %v1099_v39, 0.0 }
  0xe0   : > { %v1116_v33 = vmax.f32 %v1052_v29, 0.0  ;;  %v1132_v34 = vmax.f32 %v1068_v30, 0.0 }
  0xe2   : > { %v1608_v35 = vpack.c.bf16 %v1116_v33, %v1115_v31  ;;  %v1648_v36 = vpack.c.bf16 %v1132_v34, %v1131_v32 }
  0xe4   : > { %1748 = vst [vmem:[%s1969_s4 + $0x20] sm:$0xff] %v1608_v35   ;;  %v786_v40 = vpop.f32.mrf.mxu2  ;;  %v826_v41 = vpop.f32.mrf.mxu3 }
  0xe5   : > { %1756 = vst [vmem:[%s1969_s4 + $0x60] sm:$0xff] %v1648_v36   ;;  %v1084_v42 = vadd.f32 %v1958_v37, %v786_v40  ;;  %v1100_v43 = vadd.f32 %v1958_v37, %v826_v41  ;;  %v709_v44 = vpop.f32.mrf.mxu0  ;;  %v749_v45 = vpop.f32.mrf.mxu1 }
  0xe6   : > { %v1053_v52 = vadd.f32 %v1958_v37, %v709_v44  ;;  %v1069_v53 = vadd.f32 %v1958_v37, %v749_v45 }
  0xe7   : > { %v1148_v48 = vmax.f32 %v1084_v42, 0.0  ;;  %v1164_v49 = vmax.f32 %v1100_v43, 0.0 }
  0xe8   : > { %v1117_v60 = vmax.f32 %v1053_v52, 0.0  ;;  %v1133_v61 = vmax.f32 %v1069_v53, 0.0 }
  0xe9   : > { %v1688_v50 = vpack.c.bf16 %v1148_v48, %v1147_v46  ;;  %v1728_v51 = vpack.c.bf16 %v1164_v49, %v1163_v47 }
  0xeb   : > { %1764 = vst [vmem:[%s1969_s4 + $0xa0] sm:$0xff] %v1688_v50  }
  0xec   : > { %1772 = vst [vmem:[%s1969_s4 + $0xe0] sm:$0xff] %v1728_v51   ;;  %v789_v54 = vpop.f32.mrf.mxu2  ;;  %v829_v55 = vpop.f32.mrf.mxu3 }
  0xed   : > { %v711_v56 = vpop.f32.mrf.mxu0  ;;  %v751_v57 = vpop.f32.mrf.mxu1  ;;  %v1085_v2 = vadd.f32 %v1958_v37, %v789_v54  ;;  %v1101_v3 = vadd.f32 %v1958_v37, %v829_v55 }
  0xee   : > { %v1054_v58 = vadd.f32 %v1958_v37, %v711_v56  ;;  %v1070_v59 = vadd.f32 %v1958_v37, %v751_v57 }
  0xef   : > { %v1149_v10 = vmax.f32 %v1085_v2, 0.0  ;;  %v1165_v11 = vmax.f32 %v1101_v3, 0.0 }
  0xf0   : > { %v1118_v62 = vmax.f32 %v1054_v58, 0.0  ;;  %v1134_v63 = vmax.f32 %v1070_v59, 0.0 }
  0xf2   : > { %v1613_v0 = vpack.c.bf16 %v1118_v62, %v1117_v60  ;;  %v1653_v1 = vpack.c.bf16 %v1134_v63, %v1133_v61 }
  0xf4   : > { %1749 = vst [vmem:[%s1969_s4 + $0x28] sm:$0xff] %v1613_v0   ;;  %v791_v4 = vpop.f32.mrf.mxu2  ;;  %v831_v5 = vpop.f32.mrf.mxu3 }
  0xf5   : > { %1757 = vst [vmem:[%s1969_s4 + $0x68] sm:$0xff] %v1653_v1   ;;  %v1086_v6 = vadd.f32 %v1958_v37, %v791_v4  ;;  %v1102_v7 = vadd.f32 %v1958_v37, %v831_v5  ;;  %v714_v8 = vpop.f32.mrf.mxu0  ;;  %v754_v9 = vpop.f32.mrf.mxu1 }
  0xf6   : > { %v1055_v16 = vadd.f32 %v1958_v37, %v714_v8  ;;  %v1071_v17 = vadd.f32 %v1958_v37, %v754_v9 }
  0xf7   : > { %v1150_v12 = vmax.f32 %v1086_v6, 0.0  ;;  %v1166_v13 = vmax.f32 %v1102_v7, 0.0 }
  0xf8   : > { %v1119_v24 = vmax.f32 %v1055_v16, 0.0  ;;  %v1135_v25 = vmax.f32 %v1071_v17, 0.0 }
  0xf9   : > { %v1693_v14 = vpack.c.bf16 %v1150_v12, %v1149_v10  ;;  %v1733_v15 = vpack.c.bf16 %v1166_v13, %v1165_v11 }
  0xfb   : > { %1765 = vst [vmem:[%s1969_s4 + $0xa8] sm:$0xff] %v1693_v14  }
  0xfc   : > { %1773 = vst [vmem:[%s1969_s4 + $0xe8] sm:$0xff] %v1733_v15   ;;  %v794_v18 = vpop.f32.mrf.mxu2  ;;  %v834_v19 = vpop.f32.mrf.mxu3 }
  0xfd   : > { %v716_v20 = vpop.f32.mrf.mxu0  ;;  %v756_v21 = vpop.f32.mrf.mxu1  ;;  %v1087_v30 = vadd.f32 %v1958_v37, %v794_v18  ;;  %v1103_v31 = vadd.f32 %v1958_v37, %v834_v19 }
  0xfe   : > { %v1056_v22 = vadd.f32 %v1958_v37, %v716_v20  ;;  %v1072_v23 = vadd.f32 %v1958_v37, %v756_v21 }
  0xff   : > { %v1151_v39 = vmax.f32 %v1087_v30, 0.0  ;;  %v1167_v40 = vmax.f32 %v1103_v31, 0.0 }
 0x100   : > { %v1120_v26 = vmax.f32 %v1056_v22, 0.0  ;;  %v1136_v27 = vmax.f32 %v1072_v23, 0.0 }
 0x102   : > { %v1618_v28 = vpack.c.bf16 %v1120_v26, %v1119_v24  ;;  %v1658_v29 = vpack.c.bf16 %v1136_v27, %v1135_v25 }
 0x104   : > { %1750 = vst [vmem:[%s1969_s4 + $0x30] sm:$0xff] %v1618_v28   ;;  %v796_v32 = vpop.f32.mrf.mxu2  ;;  %v836_v33 = vpop.f32.mrf.mxu3 }
 0x105   : > { %1758 = vst [vmem:[%s1969_s4 + $0x70] sm:$0xff] %v1658_v29   ;;  %v1088_v34 = vadd.f32 %v1958_v37, %v796_v32  ;;  %v1104_v35 = vadd.f32 %v1958_v37, %v836_v33  ;;  %v719_v36 = vpop.f32.mrf.mxu0  ;;  %v759_v38 = vpop.f32.mrf.mxu1 }
 0x106   : > { %v1057_v45 = vadd.f32 %v1958_v37, %v719_v36  ;;  %v1073_v46 = vadd.f32 %v1958_v37, %v759_v38 }
 0x107   : > { %v1152_v41 = vmax.f32 %v1088_v34, 0.0  ;;  %v1168_v42 = vmax.f32 %v1104_v35, 0.0 }
 0x108   : > { %v1121_v53 = vmax.f32 %v1057_v45, 0.0  ;;  %v1137_v54 = vmax.f32 %v1073_v46, 0.0 }
 0x109   : > { %v1698_v43 = vpack.c.bf16 %v1152_v41, %v1151_v39  ;;  %v1738_v44 = vpack.c.bf16 %v1168_v42, %v1167_v40 }
 0x10b   : > { %1766 = vst [vmem:[%s1969_s4 + $0xb0] sm:$0xff] %v1698_v43  }
 0x10c   : > { %1774 = vst [vmem:[%s1969_s4 + $0xf0] sm:$0xff] %v1738_v44   ;;  %v799_v47 = vpop.f32.mrf.mxu2  ;;  %v839_v48 = vpop.f32.mrf.mxu3 }
 0x10d   : > { %v721_v49 = vpop.f32.mrf.mxu0  ;;  %v761_v50 = vpop.f32.mrf.mxu1  ;;  %v1089_v59 = vadd.f32 %v1958_v37, %v799_v47  ;;  %v1105_v60 = vadd.f32 %v1958_v37, %v839_v48 }
 0x10e   : > { %v1058_v51 = vadd.f32 %v1958_v37, %v721_v49  ;;  %v1074_v52 = vadd.f32 %v1958_v37, %v761_v50 }
 0x10f   : > { %v1153_v1 = vmax.f32 %v1089_v59, 0.0  ;;  %v1169_v2 = vmax.f32 %v1105_v60, 0.0 }
 0x110   : > { %v1122_v55 = vmax.f32 %v1058_v51, 0.0  ;;  %v1138_v56 = vmax.f32 %v1074_v52, 0.0 }
 0x112   : > { %v1623_v57 = vpack.c.bf16 %v1122_v55, %v1121_v53  ;;  %v1663_v58 = vpack.c.bf16 %v1138_v56, %v1137_v54 }
 0x114   : > { %1751 = vst [vmem:[%s1969_s4 + $0x38] sm:$0xff] %v1623_v57   ;;  %v801_v61 = vpop.f32.mrf.mxu2  ;;  %v841_v62 = vpop.f32.mrf.mxu3 }
 0x115   : > { %1759 = vst [vmem:[%s1969_s4 + $0x78] sm:$0xff] %v1663_v58   ;;  %v1090_v63 = vadd.f32 %v1958_v37, %v801_v61  ;;  %v1106_v0 = vadd.f32 %v1958_v37, %v841_v62 }
 0x117   : > { %v1154_v3 = vmax.f32 %v1090_v63, 0.0  ;;  %v1170_v4 = vmax.f32 %v1106_v0, 0.0 }
 0x119   : > { %v1703_v5 = vpack.c.bf16 %v1154_v3, %v1153_v1  ;;  %v1743_v6 = vpack.c.bf16 %v1170_v4, %v1169_v2 }
 0x11b   : > { %1767 = vst [vmem:[%s1969_s4 + $0xb8] sm:$0xff] %v1703_v5  }
 0x11c   : > { %1775 = vst [vmem:[%s1969_s4 + $0xf8] sm:$0xff] %v1743_v6  }
 0x11d PF: > { %s13_s14 = sadd.s32 1, %s1832_s14   ;;  %s2076_s12 = smov %s1828_s13 }
 0x11e   : > { %p10_p5 = scmp.ge.s32.totalorder %s13_s14, 6   ;;  %s2077_s13 = smov %s2079_s15 }
 0x120   :  { %12 = sbr.rel (!%p10_p5) target bundleno = 2 (0x2), region = 70 }

// kernel: discriminator_forward.9
= control target key start
LH: loop header
LB: loop body
LE: loop exit
PB: predicated region body
PF: predicated region fallthrough
CT: control target
= control target key end

     0   :  { %s2618_s18 = smov 0   ;;  %s2620_s19 = smov 0   ;;  %s3075_s0 = inlined_call_operand.vmem [shape: bf16[512,1024], index: 0, kind: input, shape index: {}]   ;;  %s3076_s1 = inlined_call_operand.vmem [shape: bf16[1024,128], index: 1, kind: input, shape index: {}]   ;;  %s3077_s2 = inlined_call_operand.vmem [shape: f32[1,128], index: 2, kind: input, shape index: {}]   ;;  %s3078_s3 = inlined_call_operand.vmem [shape: f32[512,128], index: 3, kind: output, shape index: {0}]   ;;  %s3079_s4 = inlined_call_operand.vmem [shape: f32[32,128], index: 4, kind: output, shape index: {1}]   ;;  %s3080_s5 = inlined_call_operand.vmem [shape: f32[32,128], index: 5, kind: output, shape index: {2}]  }
   0x1   :  { %s2622_s20 = smov 0  }
   0x2 LB: > { %s28_s21 = sadd.s32 1, %s2582_s19  ;;  %p1888_p0 = scmp.ge.s32.totalorder %s2586_s20, 1  ;;  %s2586_s20 = sphi %s2622_s20, %s16_s20   ;;  %s2582_s19 = sphi %s2620_s19, %s3082_s19   ;;  %s2578_s18 = sphi %s2618_s18, %s3081_s18  }
   0x3   : > { %p30_p1 = scmp.ge.s32.totalorder %s28_s21, 4  ;;  %p213_p2 = scmp.lt.s32.totalorder %s2586_s20, 5 }
   0x5   : > { %s3084_s21 = smov (%p30_p1, %s28_s21), 0  ;;  %p214_p3 = pnand %p1888_p0, %p213_p2 }
   0x6   : > { %s1889_s25 = sshll.u32 (!%p214_p3), %s2578_s18, 4  ;;  %p272_p5 = scmp.lt.s32.totalorder (!%p214_p3), %s2578_s18, 3 }
   0x7   : > { %217 = sbr.rel (%p214_p3) target bundleno = 447 (0x1bf), region = 32  ;;  %p256_p4 = scmp.lt.s32.totalorder (!%p214_p3), %s1889_s25, 63 }
   0xc   : > { %v2482_v0 = vld [vmem:[%s3076_s1 + $0x38] sm:$0xff]  ;;  %v2481_v4 = vld [vmem:[%s3076_s1 + $0x30] sm:$0xff]  ;;  %v2480_v8 = vld [vmem:[%s3076_s1 + $0x28] sm:$0xff]  ;;  %s3086_s25 = smov (!%p256_p4, %s1889_s25), 63  ;;  %s3088_s18 = smov (!%p272_p5, %s2578_s18), 3 }
   0xd   : > { %v2490_v1 = vld [vmem:[%s3076_s1 + $0x78] sm:$0xff]  ;;  %1212 = vmatpush.bf16.msra.mxu0 %v2482_v0  ;;  %v2489_v5 = vld [vmem:[%s3076_s1 + $0x70] sm:$0xff]  ;;  %v2488_v9 = vld [vmem:[%s3076_s1 + $0x68] sm:$0xff]  ;;  %s2410_s30 = sshll.u32 %s3086_s25, 5 }
   0xe   : > { %v2498_v2 = vld [vmem:[%s3076_s1 + $0xb8] sm:$0xff]  ;;  %1261 = vmatpush.bf16.msra.mxu1 %v2490_v1  ;;  %v2497_v6 = vld [vmem:[%s3076_s1 + $0xb0] sm:$0xff]  ;;  %v2496_v10 = vld [vmem:[%s3076_s1 + $0xa8] sm:$0xff]  ;;  %s2723_s12 = scalar_lea.vmem %s3075_s0, %s2410_s30 }
   0xf   : > { %v2506_v3 = vld [vmem:[%s3076_s1 + $0xf8] sm:$0xff]  ;;  %1310 = vmatpush.bf16.msra.mxu2 %v2498_v2  ;;  %v2505_v7 = vld [vmem:[%s3076_s1 + $0xf0] sm:$0xff]  ;;  %v2504_v11 = vld [vmem:[%s3076_s1 + $0xe8] sm:$0xff] }
  0x10   : > { %1359 = vmatpush.bf16.msra.mxu3 %v2506_v3  ;;  %v2479_v12 = vld [vmem:[%s3076_s1 + $0x20] sm:$0xff]  ;;  %v2478_v16 = vld [vmem:[%s3076_s1 + $0x18] sm:$0xff]  ;;  %v2477_v20 = vld [vmem:[%s3076_s1 + $0x10] sm:$0xff] }
  0x11   : > { %1213 = vmatpush.bf16.msra.mxu0 %v2481_v4  ;;  %v2487_v13 = vld [vmem:[%s3076_s1 + $0x60] sm:$0xff]  ;;  %v2486_v17 = vld [vmem:[%s3076_s1 + $0x58] sm:$0xff]  ;;  %v2485_v21 = vld [vmem:[%s3076_s1 + $0x50] sm:$0xff] }
  0x12   : > { %1262 = vmatpush.bf16.msra.mxu1 %v2489_v5  ;;  %v2495_v14 = vld [vmem:[%s3076_s1 + $0xa0] sm:$0xff]  ;;  %v2494_v18 = vld [vmem:[%s3076_s1 + $0x98] sm:$0xff]  ;;  %v2493_v22 = vld [vmem:[%s3076_s1 + $0x90] sm:$0xff] }
  0x13   : > { %1311 = vmatpush.bf16.msra.mxu2 %v2497_v6  ;;  %v2503_v15 = vld [vmem:[%s3076_s1 + $0xe0] sm:$0xff]  ;;  %v2502_v19 = vld [vmem:[%s3076_s1 + $0xd8] sm:$0xff]  ;;  %v2501_v23 = vld [vmem:[%s3076_s1 + $0xd0] sm:$0xff] }
  0x14   : > { %1360 = vmatpush.bf16.msra.mxu3 %v2505_v7  ;;  %v2476_v24 = vld [vmem:[%s3076_s1 + $0x8] sm:$0xff]  ;;  %v2475_v28 = vld [vmem:[%s3076_s1] sm:$0xff]  ;;  %v2530_v40 = vld [vmem:[%s3076_s1 + $0x1b8] sm:$0xff] }
  0x15   : > { %1214 = vmatpush.bf16.msra.mxu0 %v2480_v8  ;;  %v2484_v25 = vld [vmem:[%s3076_s1 + $0x48] sm:$0xff]  ;;  %v2483_v29 = vld [vmem:[%s3076_s1 + $0x40] sm:$0xff]  ;;  %v2514_v41 = vld [vmem:[%s3076_s1 + $0x138] sm:$0xff] }
  0x16   : > { %1263 = vmatpush.bf16.msra.mxu1 %v2488_v9  ;;  %v2492_v26 = vld [vmem:[%s3076_s1 + $0x88] sm:$0xff]  ;;  %v2491_v30 = vld [vmem:[%s3076_s1 + $0x80] sm:$0xff]  ;;  %v2538_v46 = vld [vmem:[%s3076_s1 + $0x1f8] sm:$0xff] }
  0x17   : > { %1312 = vmatpush.bf16.msra.mxu2 %v2496_v10  ;;  %v2500_v27 = vld [vmem:[%s3076_s1 + $0xc8] sm:$0xff]  ;;  %v2499_v31 = vld [vmem:[%s3076_s1 + $0xc0] sm:$0xff]  ;;  %v2522_v47 = vld [vmem:[%s3076_s1 + $0x178] sm:$0xff] }
  0x18   : > { %1361 = vmatpush.bf16.msra.mxu3 %v2504_v11  ;;  %v1898_v32 = vld [vmem:[%s2723_s12] sm:$0xf]  ;;  %v2411_v34 = vld [vmem:[%s2723_s12 + $0x4] sm:$0xf]  ;;  %v1906_v36 = vld [vmem:[%s2723_s12 + $0x8] sm:$0xf] }
  0x19   : > { %1215 = vmatpush.bf16.msra.mxu0 %v2479_v12  ;;  %v2415_v33 = vld [vmem:[%s2723_s12 + $0x1c] sm:$0xf0]  ;;  %v1900_v35 = vld [vmem:[%s2723_s12 + $0x20] sm:$0xf0]  ;;  %v2416_v37 = vld [vmem:[%s2723_s12 + $0x24] sm:$0xf0] }
  0x1a   : > { %1264 = vmatpush.bf16.msra.mxu1 %v2487_v13  ;;  %v2412_v38 = vld [vmem:[%s2723_s12 + $0xc] sm:$0xf]  ;;  %v1899_v42 = vor.u32 %v2415_v33, %v1898_v32  ;;  %v1903_v43 = vor.u32 %v2411_v34, %v1900_v35  ;;  %v1907_v44 = vor.u32 %v2416_v37, %v1906_v36  ;;  %v2529_v48 = vld [vmem:[%s3076_s1 + $0x1b0] sm:$0xff]  ;;  %v1930_v56 = vld [vmem:[%s2723_s12 + $0x40] sm:$0xf] }
  0x1b   : > { %1313 = vmatpush.bf16.msra.mxu2 %v2495_v14  ;;  %v1908_v39 = vld [vmem:[%s2723_s12 + $0x28] sm:$0xf0]  ;;  %v2513_v49 = vld [vmem:[%s3076_s1 + $0x130] sm:$0xff]  ;;  %v2423_v57 = vld [vmem:[%s2723_s12 + $0x5c] sm:$0xf0] }
  0x1c   : > { %1362 = vmatpush.bf16.msra.mxu3 %v2503_v15  ;;  %v1911_v45 = vor.u32 %v2412_v38, %v1908_v39  ;;  %v2537_v50 = vld [vmem:[%s3076_s1 + $0x1f0] sm:$0xff]  ;;  %v2528_v52 = vld [vmem:[%s3076_s1 + $0x1a8] sm:$0xff]  ;;  %v2419_v58 = vld [vmem:[%s2723_s12 + $0x44] sm:$0xf]  ;;  %v1931_v0 = vor.u32 %v2423_v57, %v1930_v56 }
  0x1d   : > { %1216 = vmatpush.bf16.msra.mxu0 %v2478_v16  ;;  %v2521_v51 = vld [vmem:[%s3076_s1 + $0x170] sm:$0xff]  ;;  %v2512_v53 = vld [vmem:[%s3076_s1 + $0x128] sm:$0xff]  ;;  %v1932_v59 = vld [vmem:[%s2723_s12 + $0x60] sm:$0xf0] }
  0x1e   : > { %1265 = vmatpush.bf16.msra.mxu1 %v2486_v17  ;;  %v2536_v54 = vld [vmem:[%s3076_s1 + $0x1e8] sm:$0xff]  ;;  %v1935_v1 = vor.u32 %v2419_v58, %v1932_v59  ;;  %v2527_v4 = vld [vmem:[%s3076_s1 + $0x1a0] sm:$0xff]  ;;  %v2525_v36 = vld [vmem:[%s3076_s1 + $0x190] sm:$0xff] }
  0x1f   : > { %1314 = vmatpush.bf16.msra.mxu2 %v2494_v18  ;;  %v2520_v55 = vld [vmem:[%s3076_s1 + $0x168] sm:$0xff]  ;;  %v2511_v5 = vld [vmem:[%s3076_s1 + $0x120] sm:$0xff]  ;;  %v2509_v37 = vld [vmem:[%s3076_s1 + $0x110] sm:$0xff] }
  0x20   : > { %1363 = vmatpush.bf16.msra.mxu3 %v2502_v19  ;;  %v1938_v60 = vld [vmem:[%s2723_s12 + $0x48] sm:$0xf]  ;;  %v2420_v62 = vld [vmem:[%s2723_s12 + $0x4c] sm:$0xf]  ;;  %v2535_v6 = vld [vmem:[%s3076_s1 + $0x1e0] sm:$0xff] }
  0x21   : > { %1217 = vmatpush.bf16.msra.mxu0 %v2477_v20  ;;  %v2424_v61 = vld [vmem:[%s2723_s12 + $0x64] sm:$0xf0]  ;;  %v1940_v63 = vld [vmem:[%s2723_s12 + $0x68] sm:$0xf0]  ;;  %v2519_v7 = vld [vmem:[%s3076_s1 + $0x160] sm:$0xff] }
  0x22   : > { %1266 = vmatpush.bf16.msra.mxu1 %v2485_v21  ;;  %v1939_v2 = vor.u32 %v2424_v61, %v1938_v60  ;;  %v1943_v3 = vor.u32 %v2420_v62, %v1940_v63  ;;  %v1962_v8 = vld [vmem:[%s2723_s12 + $0x80] sm:$0xf]  ;;  %v2427_v10 = vld [vmem:[%s2723_s12 + $0x84] sm:$0xf]  ;;  %v1970_v12 = vld [vmem:[%s2723_s12 + $0x88] sm:$0xf] }
  0x23   : > { %1315 = vmatpush.bf16.msra.mxu2 %v2493_v22  ;;  %v2431_v9 = vld [vmem:[%s2723_s12 + $0x9c] sm:$0xf0]  ;;  %v1964_v11 = vld [vmem:[%s2723_s12 + $0xa0] sm:$0xf0]  ;;  %v2432_v13 = vld [vmem:[%s2723_s12 + $0xa4] sm:$0xf0] }
  0x24   : > { %1364 = vmatpush.bf16.msra.mxu3 %v2501_v23  ;;  %v2428_v14 = vld [vmem:[%s2723_s12 + $0x8c] sm:$0xf]  ;;  %v1963_v16 = vor.u32 %v2431_v9, %v1962_v8  ;;  %v1967_v17 = vor.u32 %v2427_v10, %v1964_v11  ;;  %v1971_v18 = vor.u32 %v2432_v13, %v1970_v12  ;;  %v2526_v20 = vld [vmem:[%s3076_s1 + $0x198] sm:$0xff]  ;;  %v2533_v38 = vld [vmem:[%s3076_s1 + $0x1d0] sm:$0xff] }
  0x25   : > { %1218 = vmatpush.bf16.msra.mxu0 %v2476_v24  ;;  %v1972_v15 = vld [vmem:[%s2723_s12 + $0xa8] sm:$0xf0]  ;;  %v2510_v21 = vld [vmem:[%s3076_s1 + $0x118] sm:$0xff]  ;;  %v1994_v24 = vld [vmem:[%s2723_s12 + $0xc0] sm:$0xf] }
  0x26   : > { %1267 = vmatpush.bf16.msra.mxu1 %v2484_v25  ;;  %v1975_v19 = vor.u32 %v2428_v14, %v1972_v15  ;;  %v2534_v22 = vld [vmem:[%s3076_s1 + $0x1d8] sm:$0xff]  ;;  %v2439_v25 = vld [vmem:[%s2723_s12 + $0xdc] sm:$0xf0]  ;;  %v2517_v39 = vld [vmem:[%s3076_s1 + $0x150] sm:$0xff] }
  0x27   : > { %1316 = vmatpush.bf16.msra.mxu2 %v2492_v26  ;;  %v2518_v23 = vld [vmem:[%s3076_s1 + $0x158] sm:$0xff]  ;;  %v2435_v26 = vld [vmem:[%s2723_s12 + $0xc4] sm:$0xf]  ;;  %v1995_v32 = vor.u32 %v2439_v25, %v1994_v24  ;;  %v2058_v56 = vld [vmem:[%s2723_s12 + $0x140] sm:$0xf] }
  0x28   : > { %1365 = vmatpush.bf16.msra.mxu3 %v2500_v27  ;;  %v1996_v27 = vld [vmem:[%s2723_s12 + $0xe0] sm:$0xf0]  ;;  %v2455_v57 = vld [vmem:[%s2723_s12 + $0x15c] sm:$0xf0]  ;;  %v2066_v60 = vld [vmem:[%s2723_s12 + $0x148] sm:$0xf] }
  0x29   : > { %1219 = vmatpush.bf16.msra.mxu0 %v2475_v28  ;;  %v2002_v28 = vld [vmem:[%s2723_s12 + $0xc8] sm:$0xf]  ;;  %v1999_v33 = vor.u32 %v2435_v26, %v1996_v27  ;;  %v2451_v58 = vld [vmem:[%s2723_s12 + $0x144] sm:$0xf]  ;;  %v2452_v62 = vld [vmem:[%s2723_s12 + $0x14c] sm:$0xf] }
  0x2a   : > { %1268 = vmatpush.bf16.msra.mxu1 %v2483_v29  ;;  %v2440_v29 = vld [vmem:[%s2723_s12 + $0xe4] sm:$0xf0]  ;;  %v2060_v59 = vld [vmem:[%s2723_s12 + $0x160] sm:$0xf0]  ;;  %v2068_v63 = vld [vmem:[%s2723_s12 + $0x168] sm:$0xf0] }
  0x2b   : > { %1317 = vmatpush.bf16.msra.mxu2 %v2491_v30  ;;  %v2436_v30 = vld [vmem:[%s2723_s12 + $0xcc] sm:$0xf]  ;;  %v2003_v34 = vor.u32 %v2440_v29, %v2002_v28  ;;  %v2456_v61 = vld [vmem:[%s2723_s12 + $0x164] sm:$0xf0]  ;;  %v2090_v8 = vld [vmem:[%s2723_s12 + $0x180] sm:$0xf] }
  0x2c   : > { %1366 = vmatpush.bf16.msra.mxu3 %v2499_v31  ;;  %1220 = vmatmul.bf16.vlgmr.msra.gmra.mxu0 %v1899_v42  ;;  %v2004_v31 = vld [vmem:[%s2723_s12 + $0xe8] sm:$0xf0]  ;;  %v2443_v42 = vld [vmem:[%s2723_s12 + $0x104] sm:$0xf]  ;;  %v2463_v9 = vld [vmem:[%s2723_s12 + $0x19c] sm:$0xf0] }
  0x2d   : > { %1408 = vmatpush.bf16.msrb.mxu0 %v2514_v41  ;;  %1269 = vmatmul.bf16.vlgmr.msra.gmra.mxu1 %v1903_v43  ;;  %v2007_v35 = vor.u32 %v2436_v30, %v2004_v31  ;;  %v2447_v41 = vld [vmem:[%s2723_s12 + $0x11c] sm:$0xf0]  ;;  %v2028_v43 = vld [vmem:[%s2723_s12 + $0x120] sm:$0xf0]  ;;  %v2098_v12 = vld [vmem:[%s2723_s12 + $0x188] sm:$0xf] }
  0x2e   : > { %1318 = vmatmul.bf16.vlgmr.msra.gmra.mxu2 %v1907_v44  ;;  %1457 = vmatpush.bf16.msrb.mxu1 %v2522_v47  ;;  %v2034_v44 = vld [vmem:[%s2723_s12 + $0x108] sm:$0xf]  ;;  %v2036_v47 = vld [vmem:[%s2723_s12 + $0x128] sm:$0xf0]  ;;  %v2459_v10 = vld [vmem:[%s2723_s12 + $0x184] sm:$0xf] }
  0x2f   : > { %1506 = vmatpush.bf16.msrb.mxu2 %v2530_v40  ;;  %1367 = vmatmul.bf16.vlgmr.msra.gmra.mxu3 %v1911_v45  ;;  %v2026_v40 = vld [vmem:[%s2723_s12 + $0x100] sm:$0xf]  ;;  %v2448_v45 = vld [vmem:[%s2723_s12 + $0x124] sm:$0xf0]  ;;  %v2092_v11 = vld [vmem:[%s2723_s12 + $0x1a0] sm:$0xf0] }
  0x30   : > { %1555 = vmatpush.bf16.msrb.mxu3 %v2538_v46  ;;  %v2444_v46 = vld [vmem:[%s2723_s12 + $0x10c] sm:$0xf]  ;;  %v2464_v13 = vld [vmem:[%s2723_s12 + $0x1a4] sm:$0xf0] }
  0x31   : > { %1409 = vmatpush.bf16.msrb.mxu0 %v2513_v49  ;;  %v2031_v49 = vor.u32 %v2443_v42, %v2028_v43  ;;  %v2460_v14 = vld [vmem:[%s2723_s12 + $0x18c] sm:$0xf]  ;;  %v2130_v24 = vld [vmem:[%s2723_s12 + $0x1c8] sm:$0xf] }
  0x32   : > { %1458 = vmatpush.bf16.msrb.mxu1 %v2521_v51  ;;  %v2039_v51 = vor.u32 %v2444_v46, %v2036_v47  ;;  %v2100_v15 = vld [vmem:[%s2723_s12 + $0x1a8] sm:$0xf0]  ;;  %v2472_v25 = vld [vmem:[%s2723_s12 + $0x1e4] sm:$0xf0] }
  0x33   : > { %1507 = vmatpush.bf16.msrb.mxu2 %v2529_v48  ;;  %v2027_v48 = vor.u32 %v2447_v41, %v2026_v40  ;;  %v2468_v26 = vld [vmem:[%s2723_s12 + $0x1cc] sm:$0xf]  ;;  %v2131_v30 = vor.u32 %v2472_v25, %v2130_v24 }
  0x34   : > { %1556 = vmatpush.bf16.msrb.mxu3 %v2537_v50  ;;  %v2035_v50 = vor.u32 %v2448_v45, %v2034_v44  ;;  %v2132_v27 = vld [vmem:[%s2723_s12 + $0x1e8] sm:$0xf0] }
  0x35   : > { %1410 = vmatpush.bf16.msrb.mxu0 %v2512_v53  ;;  %v2508_v53 = vld [vmem:[%s3076_s1 + $0x108] sm:$0xff]  ;;  %v2135_v31 = vor.u32 %v2468_v26, %v2132_v27 }
  0x36   : > { %1459 = vmatpush.bf16.msrb.mxu1 %v2520_v55  ;;  %v2516_v55 = vld [vmem:[%s3076_s1 + $0x148] sm:$0xff] }
  0x37   : > { %1508 = vmatpush.bf16.msrb.mxu2 %v2528_v52  ;;  %v2524_v52 = vld [vmem:[%s3076_s1 + $0x188] sm:$0xff] }
  0x38   : > { %1557 = vmatpush.bf16.msrb.mxu3 %v2536_v54  ;;  %v2532_v54 = vld [vmem:[%s3076_s1 + $0x1c8] sm:$0xff] }
  0x39   : > { %1411 = vmatpush.bf16.msrb.mxu0 %v2511_v5  ;;  %v2507_v5 = vld [vmem:[%s3076_s1 + $0x100] sm:$0xff] }
  0x3a   : > { %1460 = vmatpush.bf16.msrb.mxu1 %v2519_v7  ;;  %v2515_v7 = vld [vmem:[%s3076_s1 + $0x140] sm:$0xff] }
  0x3b   : > { %1509 = vmatpush.bf16.msrb.mxu2 %v2527_v4  ;;  %v2523_v4 = vld [vmem:[%s3076_s1 + $0x180] sm:$0xff] }
  0x3c   : > { %1225 = vmatmul.bf16.gmra.mxu0 %v1931_v0  ;;  %1558 = vmatpush.bf16.msrb.mxu3 %v2535_v6  ;;  %v2059_v0 = vor.u32 %v2455_v57, %v2058_v56  ;;  %v2531_v6 = vld [vmem:[%s3076_s1 + $0x1c0] sm:$0xff]  ;;  %v2421_v56 = vld [vmem:[%s2723_s12 + $0x54] sm:$0xf] }
  0x3d   : > { %1274 = vmatmul.bf16.gmra.mxu1 %v1935_v1  ;;  %1412 = vmatpush.bf16.msrb.mxu0 %v2510_v21  ;;  %v2063_v1 = vor.u32 %v2451_v58, %v2060_v59  ;;  %v2471_v21 = vld [vmem:[%s2723_s12 + $0x1dc] sm:$0xf0]  ;;  %v1948_v57 = vld [vmem:[%s2723_s12 + $0x70] sm:$0xf0]  ;;  %v1954_v58 = vld [vmem:[%s2723_s12 + $0x58] sm:$0xf] }
  0x3e   : > { %1323 = vmatmul.bf16.gmra.mxu2 %v1939_v2  ;;  %1461 = vmatpush.bf16.msrb.mxu1 %v2518_v23  ;;  %v2067_v2 = vor.u32 %v2456_v61, %v2066_v60  ;;  %v2124_v23 = vld [vmem:[%s2723_s12 + $0x1e0] sm:$0xf0]  ;;  %v2426_v59 = vld [vmem:[%s2723_s12 + $0x74] sm:$0xf0]  ;;  %v2422_v60 = vld [vmem:[%s2723_s12 + $0x5c] sm:$0xf] }
  0x3f   : > { %1372 = vmatmul.bf16.gmra.mxu3 %v1943_v3  ;;  %1510 = vmatpush.bf16.msrb.mxu2 %v2526_v20  ;;  %v2071_v3 = vor.u32 %v2452_v62, %v2068_v63  ;;  %v2122_v20 = vld [vmem:[%s2723_s12 + $0x1c0] sm:$0xf]  ;;  %v1956_v61 = vld [vmem:[%s2723_s12 + $0x78] sm:$0xf0] }
  0x40   : > { %1559 = vmatpush.bf16.msrb.mxu3 %v2534_v22  ;;  %v2467_v22 = vld [vmem:[%s2723_s12 + $0x1c4] sm:$0xf]  ;;  %v2123_v28 = vor.u32 %v2471_v21, %v2122_v20  ;;  %v1986_v20 = vld [vmem:[%s2723_s12 + $0x98] sm:$0xf] }
  0x41   : > { %1413 = vmatpush.bf16.msrb.mxu0 %v2509_v37  ;;  %v2127_v29 = vor.u32 %v2467_v22, %v2124_v23  ;;  %v2418_v37 = vld [vmem:[%s2723_s12 + $0x34] sm:$0xf0]  ;;  %v2430_v22 = vld [vmem:[%s2723_s12 + $0x9c] sm:$0xf] }
  0x42   : > { %1462 = vmatpush.bf16.msrb.mxu1 %v2517_v39  ;;  %v1924_v39 = vld [vmem:[%s2723_s12 + $0x38] sm:$0xf0]  ;;  %v2434_v21 = vld [vmem:[%s2723_s12 + $0xb4] sm:$0xf0] }
  0x43   : > { %1511 = vmatpush.bf16.msrb.mxu2 %v2525_v36  ;;  %v1922_v36 = vld [vmem:[%s2723_s12 + $0x18] sm:$0xf]  ;;  %v1988_v23 = vld [vmem:[%s2723_s12 + $0xb8] sm:$0xf0] }
  0x44   : > { %1560 = vmatpush.bf16.msrb.mxu3 %v2533_v38  ;;  %v2414_v38 = vld [vmem:[%s2723_s12 + $0x1c] sm:$0xf]  ;;  %v1923_v44 = vor.u32 %v2418_v37, %v1922_v36 }
  0x45   : > { %1414 = vmatpush.bf16.msrb.mxu0 %v2508_v53  ;;  %v1927_v45 = vor.u32 %v2414_v38, %v1924_v39 }
  0x46   : > { %1463 = vmatpush.bf16.msrb.mxu1 %v2516_v55  ;;  %v2425_v55 = vld [vmem:[%s2723_s12 + $0x6c] sm:$0xf0] }
  0x47   : > { %1512 = vmatpush.bf16.msrb.mxu2 %v2524_v52 }
  0x48   : > { %1561 = vmatpush.bf16.msrb.mxu3 %v2532_v54  ;;  %v1946_v54 = vld [vmem:[%s2723_s12 + $0x50] sm:$0xf] }
  0x49   : > { %1415 = vmatpush.bf16.msrb.mxu0 %v2507_v5  ;;  %v1955_v5 = vor.u32 %v2426_v59, %v1954_v58 }
  0x4a   : > { %1464 = vmatpush.bf16.msrb.mxu1 %v2515_v7 }
  0x4b   : > { %1513 = vmatpush.bf16.msrb.mxu2 %v2523_v4 }
  0x4c   : > { %1230 = vmatmul.bf16.gmra.mxu0 %v1963_v16  ;;  %1562 = vmatpush.bf16.msrb.mxu3 %v2531_v6  ;;  %v2091_v16 = vor.u32 %v2463_v9, %v2090_v8  ;;  %v1959_v6 = vor.u32 %v2422_v60, %v1956_v61 }
  0x4d   : > { %1279 = vmatmul.bf16.gmra.mxu1 %v1967_v17  ;;  %v2095_v17 = vor.u32 %v2459_v10, %v2092_v11 }
  0x4e   : > { %1328 = vmatmul.bf16.gmra.mxu2 %v1971_v18  ;;  %v2099_v18 = vor.u32 %v2464_v13, %v2098_v12 }
  0x4f   : > { %1377 = vmatmul.bf16.gmra.mxu3 %v1975_v19  ;;  %v2103_v19 = vor.u32 %v2460_v14, %v2100_v15 }
  0x5c   : > { %1235 = vmatmul.bf16.gmra.mxu0 %v1995_v32  ;;  %v1914_v32 = vld [vmem:[%s2723_s12 + $0x10] sm:$0xf] }
  0x5d   : > { %1284 = vmatmul.bf16.gmra.mxu1 %v1999_v33  ;;  %v2417_v33 = vld [vmem:[%s2723_s12 + $0x2c] sm:$0xf0] }
  0x5e   : > { %1333 = vmatmul.bf16.gmra.mxu2 %v2003_v34  ;;  %v2413_v34 = vld [vmem:[%s2723_s12 + $0x14] sm:$0xf]  ;;  %v1915_v40 = vor.u32 %v2417_v33, %v1914_v32  ;;  %v1991_v32 = vor.u32 %v2430_v22, %v1988_v23 }
  0x5f   : > { %1382 = vmatmul.bf16.gmra.mxu3 %v2007_v35  ;;  %v1916_v35 = vld [vmem:[%s2723_s12 + $0x30] sm:$0xf0] }
  0x60   : > { %v1919_v41 = vor.u32 %v2413_v34, %v1916_v35 }
  0x6c   : > { %1240 = vmatmul.bf16.gmra.mxu0 %v2027_v48 }
  0x6d   : > { %1289 = vmatmul.bf16.gmra.mxu1 %v2031_v49 }
  0x6e   : > { %1338 = vmatmul.bf16.gmra.mxu2 %v2035_v50 }
  0x6f   : > { %1387 = vmatmul.bf16.gmra.mxu3 %v2039_v51 }
  0x7c   : > { %1245 = vmatmul.bf16.gmra.mxu0 %v2059_v0  ;;  %v1947_v0 = vor.u32 %v2425_v55, %v1946_v54 }
  0x7d   : > { %1294 = vmatmul.bf16.gmra.mxu1 %v2063_v1  ;;  %v1951_v1 = vor.u32 %v2421_v56, %v1948_v57 }
  0x7e   : > { %1343 = vmatmul.bf16.gmra.mxu2 %v2067_v2 }
  0x7f   : > { %1392 = vmatmul.bf16.gmra.mxu3 %v2071_v3 }
  0x8c   : > { %1250 = vmatmul.bf16.gmra.mxu0 %v2091_v16  ;;  %v1978_v16 = vld [vmem:[%s2723_s12 + $0x90] sm:$0xf] }
  0x8d   : > { %1299 = vmatmul.bf16.gmra.mxu1 %v2095_v17  ;;  %v2433_v17 = vld [vmem:[%s2723_s12 + $0xac] sm:$0xf0] }
  0x8e   : > { %1348 = vmatmul.bf16.gmra.mxu2 %v2099_v18  ;;  %v2429_v18 = vld [vmem:[%s2723_s12 + $0x94] sm:$0xf]  ;;  %v1979_v26 = vor.u32 %v2433_v17, %v1978_v16 }
  0x8f   : > { %1397 = vmatmul.bf16.gmra.mxu3 %v2103_v19  ;;  %v1980_v19 = vld [vmem:[%s2723_s12 + $0xb0] sm:$0xf0] }
  0x90   : > { %v1983_v27 = vor.u32 %v2429_v18, %v1980_v19 }
  0x9c   : > { %1255 = vmatmul.bf16.gmra.mxu0 %v2123_v28 }
  0x9d   : > { %1304 = vmatmul.bf16.gmra.mxu1 %v2127_v29 }
  0x9e   : > { %1353 = vmatmul.bf16.gmra.mxu2 %v2131_v30 }
  0x9f   : > { %1402 = vmatmul.bf16.gmra.mxu3 %v2135_v31  ;;  %v1987_v31 = vor.u32 %v2434_v21, %v1986_v20 }
  0xa9   : > { %v1221_v42 = vpop.f32.mrf.mxu0 }
  0xaa   : > { %v1270_v43 = vpop.f32.mrf.mxu1 }
  0xab   : > { %v1271_v46 = vadd.f32 %v1270_v43, %v1221_v42  ;;  %v2010_v42 = vld [vmem:[%s2723_s12 + $0xd0] sm:$0xf] }
  0xac   : > { %1416 = vmatmul.bf16.vlgmr.msrb.gmra.mxu0 %v1915_v40  ;;  %v2441_v43 = vld [vmem:[%s2723_s12 + $0xec] sm:$0xf0] }
  0xad   : > { %1465 = vmatmul.bf16.vlgmr.msrb.gmra.mxu1 %v1919_v41 }
  0xae   : > { %1514 = vmatmul.bf16.vlgmr.msrb.gmra.mxu2 %v1923_v44  ;;  %v2437_v44 = vld [vmem:[%s2723_s12 + $0xd4] sm:$0xf] }
  0xaf   : > { %1563 = vmatmul.bf16.vlgmr.msrb.gmra.mxu3 %v1927_v45  ;;  %v2012_v45 = vld [vmem:[%s2723_s12 + $0xf0] sm:$0xf0] }
  0xb0   : > { %v2015_v54 = vor.u32 %v2437_v44, %v2012_v45 }
  0xb1   : > { %v1319_v47 = vpop.f32.mrf.mxu2  ;;  %v1223_v50 = vpop.f32.mrf.mxu0 }
  0xb2   : > { %v1368_v48 = vpop.f32.mrf.mxu3  ;;  %v1320_v49 = vadd.f32 %v1319_v47, %v1271_v46  ;;  %v1272_v51 = vpop.f32.mrf.mxu1  ;;  %v2018_v46 = vld [vmem:[%s2723_s12 + $0xd8] sm:$0xf] }
  0xb3   : > { %v1273_v52 = vadd.f32 %v1272_v51, %v1223_v50  ;;  %v2442_v47 = vld [vmem:[%s2723_s12 + $0xf4] sm:$0xf0] }
  0xb4   : > { %v2911_v53 = vadd.f32 %v1368_v48, %v1320_v49  ;;  %v2438_v48 = vld [vmem:[%s2723_s12 + $0xdc] sm:$0xf]  ;;  %v2019_v58 = vor.u32 %v2442_v47, %v2018_v46 }
  0xb5   : > { %v2020_v49 = vld [vmem:[%s2723_s12 + $0xf8] sm:$0xf0] }
  0xb6   : > { %v2023_v59 = vor.u32 %v2438_v48, %v2020_v49 }
  0xb9   : > { %v1321_v62 = vpop.f32.mrf.mxu2  ;;  %v1226_v3 = vpop.f32.mrf.mxu0 }
  0xba   : > { %v1370_v63 = vpop.f32.mrf.mxu3  ;;  %v1322_v2 = vadd.f32 %v1321_v62, %v1273_v52  ;;  %v1275_v4 = vpop.f32.mrf.mxu1  ;;  %v2011_v52 = vor.u32 %v2441_v43, %v2010_v42  ;;  %v2084_v42 = vld [vmem:[%s2723_s12 + $0x178] sm:$0xf0] }
  0xbb   : > { %v1276_v7 = vadd.f32 %v1275_v4, %v1226_v3 }
  0xbc   : > { %v2921_v8 = vadd.f32 %v1370_v63, %v1322_v2  ;;  %1421 = vmatmul.bf16.gmra.mxu0 %v1947_v0 }
  0xbd   : > { %1470 = vmatmul.bf16.gmra.mxu1 %v1951_v1 }
  0xbe   : > { %1519 = vmatmul.bf16.gmra.mxu2 %v1955_v5  ;;  %v2042_v5 = vld [vmem:[%s2723_s12 + $0x110] sm:$0xf] }
  0xbf   : > { %1568 = vmatmul.bf16.gmra.mxu3 %v1959_v6  ;;  %v2449_v6 = vld [vmem:[%s2723_s12 + $0x12c] sm:$0xf0] }
  0xc0   : > { %v2043_v17 = vor.u32 %v2449_v6, %v2042_v5  ;;  %v2466_v5 = vld [vmem:[%s2723_s12 + $0x1b4] sm:$0xf0]  ;;  %v2462_v6 = vld [vmem:[%s2723_s12 + $0x19c] sm:$0xf] }
  0xc1   : > { %v1324_v9 = vpop.f32.mrf.mxu2  ;;  %v1228_v12 = vpop.f32.mrf.mxu0 }
  0xc2   : > { %v1373_v10 = vpop.f32.mrf.mxu3  ;;  %v1325_v11 = vadd.f32 %v1324_v9, %v1276_v7  ;;  %v1277_v13 = vpop.f32.mrf.mxu1  ;;  %v2445_v7 = vld [vmem:[%s2723_s12 + $0x114] sm:$0xf] }
  0xc3   : > { %v1278_v14 = vadd.f32 %v1277_v13, %v1228_v12  ;;  %v2044_v9 = vld [vmem:[%s2723_s12 + $0x130] sm:$0xf0]  ;;  %v2446_v12 = vld [vmem:[%s2723_s12 + $0x11c] sm:$0xf] }
  0xc4   : > { %v2923_v15 = vadd.f32 %v1373_v10, %v1325_v11  ;;  %v2050_v10 = vld [vmem:[%s2723_s12 + $0x118] sm:$0xf]  ;;  %v2052_v13 = vld [vmem:[%s2723_s12 + $0x138] sm:$0xf0]  ;;  %v2047_v18 = vor.u32 %v2445_v7, %v2044_v9 }
  0xc5   : > { %v2450_v11 = vld [vmem:[%s2723_s12 + $0x134] sm:$0xf0]  ;;  %v2055_v23 = vor.u32 %v2446_v12, %v2052_v13  ;;  %v2116_v7 = vld [vmem:[%s2723_s12 + $0x1b8] sm:$0xf0] }
  0xc6   : > { %v2051_v22 = vor.u32 %v2450_v11, %v2050_v10 }
  0xc9   : > { %v1326_v24 = vpop.f32.mrf.mxu2  ;;  %v1231_v29 = vpop.f32.mrf.mxu0 }
  0xca   : > { %v1375_v25 = vpop.f32.mrf.mxu3  ;;  %v1327_v28 = vadd.f32 %v1326_v24, %v1278_v14  ;;  %v1280_v30 = vpop.f32.mrf.mxu1 }
  0xcb   : > { %v1281_v33 = vadd.f32 %v1280_v30, %v1231_v29 }
  0xcc   : > { %v2933_v34 = vadd.f32 %v1375_v25, %v1327_v28  ;;  %1426 = vmatmul.bf16.gmra.mxu0 %v1979_v26 }
  0xcd   : > { %1475 = vmatmul.bf16.gmra.mxu1 %v1983_v27 }
  0xce   : > { %1524 = vmatmul.bf16.gmra.mxu2 %v1987_v31 }
  0xcf   : > { %1573 = vmatmul.bf16.gmra.mxu3 %v1991_v32 }
  0xd1   : > { %v1329_v35 = vpop.f32.mrf.mxu2  ;;  %v1233_v38 = vpop.f32.mrf.mxu0 }
  0xd2   : > { %v1378_v36 = vpop.f32.mrf.mxu3  ;;  %v1330_v37 = vadd.f32 %v1329_v35, %v1281_v33  ;;  %v1282_v39 = vpop.f32.mrf.mxu1  ;;  %v2074_v33 = vld [vmem:[%s2723_s12 + $0x150] sm:$0xf] }
  0xd3   : > { %v1283_v40 = vadd.f32 %v1282_v39, %v1233_v38  ;;  %v2457_v35 = vld [vmem:[%s2723_s12 + $0x16c] sm:$0xf0]  ;;  %v2082_v38 = vld [vmem:[%s2723_s12 + $0x158] sm:$0xf] }
  0xd4   : > { %v2935_v41 = vadd.f32 %v1378_v36, %v1330_v37  ;;  %v2453_v36 = vld [vmem:[%s2723_s12 + $0x154] sm:$0xf]  ;;  %v2458_v39 = vld [vmem:[%s2723_s12 + $0x174] sm:$0xf0]  ;;  %v2075_v45 = vor.u32 %v2457_v35, %v2074_v33 }
  0xd5   : > { %v2076_v37 = vld [vmem:[%s2723_s12 + $0x170] sm:$0xf0]  ;;  %v2146_v35 = vld [vmem:[%s2723_s12 + $0x1d8] sm:$0xf] }
  0xd6   : > { %v2079_v46 = vor.u32 %v2453_v36, %v2076_v37  ;;  %v2140_v33 = vld [vmem:[%s2723_s12 + $0x1f0] sm:$0xf0]  ;;  %v2474_v36 = vld [vmem:[%s2723_s12 + $0x1f4] sm:$0xf0]  ;;  %v2470_v37 = vld [vmem:[%s2723_s12 + $0x1dc] sm:$0xf] }
  0xd9   : > { %v1331_v50 = vpop.f32.mrf.mxu2  ;;  %v1236_v56 = vpop.f32.mrf.mxu0 }
  0xda   : > { %v1380_v51 = vpop.f32.mrf.mxu3  ;;  %v1332_v55 = vadd.f32 %v1331_v50, %v1283_v40  ;;  %v1285_v57 = vpop.f32.mrf.mxu1  ;;  %v2454_v40 = vld [vmem:[%s2723_s12 + $0x15c] sm:$0xf]  ;;  %v2083_v50 = vor.u32 %v2458_v39, %v2082_v38 }
  0xdb   : > { %v1286_v60 = vadd.f32 %v1285_v57, %v1236_v56  ;;  %v2148_v38 = vld [vmem:[%s2723_s12 + $0x1f8] sm:$0xf0] }
  0xdc   : > { %v2945_v61 = vadd.f32 %v1380_v51, %v1332_v55  ;;  %1431 = vmatmul.bf16.gmra.mxu0 %v2011_v52  ;;  %v2087_v51 = vor.u32 %v2454_v40, %v2084_v42 }
  0xdd   : > { %1480 = vmatmul.bf16.gmra.mxu1 %v2015_v54 }
  0xde   : > { %1529 = vmatmul.bf16.gmra.mxu2 %v2019_v58 }
  0xdf   : > { %1578 = vmatmul.bf16.gmra.mxu3 %v2023_v59 }
  0xe1   : > { %v1334_v62 = vpop.f32.mrf.mxu2  ;;  %v1238_v1 = vpop.f32.mrf.mxu0 }
  0xe2   : > { %v1383_v63 = vpop.f32.mrf.mxu3  ;;  %v1335_v0 = vadd.f32 %v1334_v62, %v1286_v60  ;;  %v1287_v2 = vpop.f32.mrf.mxu1 }
  0xe3   : > { %v1288_v3 = vadd.f32 %v1287_v2, %v1238_v1  ;;  %v2461_v1 = vld [vmem:[%s2723_s12 + $0x194] sm:$0xf] }
  0xe4   : > { %v2947_v4 = vadd.f32 %v1383_v63, %v1335_v0  ;;  %v2106_v63 = vld [vmem:[%s2723_s12 + $0x190] sm:$0xf]  ;;  %v2108_v2 = vld [vmem:[%s2723_s12 + $0x1b0] sm:$0xf0] }
  0xe5   : > { %v2465_v0 = vld [vmem:[%s2723_s12 + $0x1ac] sm:$0xf0]  ;;  %v2111_v12 = vor.u32 %v2461_v1, %v2108_v2 }
  0xe6   : > { %v2107_v11 = vor.u32 %v2465_v0, %v2106_v63 }
  0xe9   : > { %v1336_v14 = vpop.f32.mrf.mxu2  ;;  %v1241_v20 = vpop.f32.mrf.mxu0 }
  0xea   : > { %v1385_v16 = vpop.f32.mrf.mxu3  ;;  %v1337_v19 = vadd.f32 %v1336_v14, %v1288_v3  ;;  %v1290_v21 = vpop.f32.mrf.mxu1  ;;  %v2114_v3 = vld [vmem:[%s2723_s12 + $0x198] sm:$0xf] }
  0xeb   : > { %v1291_v24 = vadd.f32 %v1290_v21, %v1241_v20 }
  0xec   : > { %v2957_v25 = vadd.f32 %v1385_v16, %v1337_v19  ;;  %1436 = vmatmul.bf16.gmra.mxu0 %v2043_v17  ;;  %v2115_v17 = vor.u32 %v2466_v5, %v2114_v3 }
  0xed   : > { %1485 = vmatmul.bf16.gmra.mxu1 %v2047_v18  ;;  %v2119_v18 = vor.u32 %v2462_v6, %v2116_v7 }
  0xee   : > { %1534 = vmatmul.bf16.gmra.mxu2 %v2051_v22 }
  0xef   : > { %1583 = vmatmul.bf16.gmra.mxu3 %v2055_v23 }
  0xf1   : > { %v1339_v26 = vpop.f32.mrf.mxu2  ;;  %v1243_v29 = vpop.f32.mrf.mxu0 }
  0xf2   : > { %v1388_v27 = vpop.f32.mrf.mxu3  ;;  %v1340_v28 = vadd.f32 %v1339_v26, %v1291_v24  ;;  %v1292_v30 = vpop.f32.mrf.mxu1 }
  0xf3   : > { %v1293_v31 = vadd.f32 %v1292_v30, %v1243_v29  ;;  %v2138_v29 = vld [vmem:[%s2723_s12 + $0x1d0] sm:$0xf] }
  0xf4   : > { %v2959_v32 = vadd.f32 %v1388_v27, %v1340_v28  ;;  %v2473_v30 = vld [vmem:[%s2723_s12 + $0x1ec] sm:$0xf0] }
  0xf5   : > { %v2139_v42 = vor.u32 %v2473_v30, %v2138_v29 }
  0xf9   : > { %v1341_v43 = vpop.f32.mrf.mxu2  ;;  %v1246_v48 = vpop.f32.mrf.mxu0 }
  0xfa   : > { %v1390_v44 = vpop.f32.mrf.mxu3  ;;  %v1342_v47 = vadd.f32 %v1341_v43, %v1293_v31  ;;  %v1295_v49 = vpop.f32.mrf.mxu1  ;;  %v2469_v31 = vld [vmem:[%s2723_s12 + $0x1d4] sm:$0xf]  ;;  %s1893_s12 = sshll.u32 %s3086_s25, 3  ;;  %s1894_s25 = sshll.u32 %s3088_s18, 3 }
  0xfb   : > { %v1296_v52 = vadd.f32 %v1295_v49, %v1246_v48  ;;  %v2143_v43 = vor.u32 %v2469_v31, %v2140_v33  ;;  %v2151_v48 = vor.u32 %v2470_v37, %v2148_v38  ;;  %s3010_s17 = scalar_lea.vmem %s3078_s3, %s1893_s12  ;;  %s275_s24 = scalar_lea.vmem %s3079_s4, %s1894_s25 }
  0xfc   : > { %v2969_v54 = vadd.f32 %v1390_v44, %v1342_v47  ;;  %1441 = vmatmul.bf16.gmra.mxu0 %v2075_v45  ;;  %v2147_v47 = vor.u32 %v2474_v36, %v2146_v35  ;;  %s279_s28 = scalar_lea.vmem %s3080_s5, %s1894_s25 }
  0xfd   : > { %1490 = vmatmul.bf16.gmra.mxu1 %v2079_v46 }
  0xfe   : > { %1539 = vmatmul.bf16.gmra.mxu2 %v2083_v50 }
  0xff   : > { %1588 = vmatmul.bf16.gmra.mxu3 %v2087_v51 }
 0x101   : > { %v1344_v55 = vpop.f32.mrf.mxu2  ;;  %v1248_v58 = vpop.f32.mrf.mxu0 }
 0x102   : > { %v1393_v56 = vpop.f32.mrf.mxu3  ;;  %v1345_v57 = vadd.f32 %v1344_v55, %v1296_v52  ;;  %v1297_v59 = vpop.f32.mrf.mxu1 }
 0x103   : > { %v1298_v60 = vadd.f32 %v1297_v59, %v1248_v58 }
 0x104   : > { %v2971_v62 = vadd.f32 %v1393_v56, %v1345_v57 }
 0x109   : > { %v1346_v9 = vpop.f32.mrf.mxu2  ;;  %v1251_v14 = vpop.f32.mrf.mxu0 }
 0x10a   : > { %v1395_v10 = vpop.f32.mrf.mxu3  ;;  %v1347_v13 = vadd.f32 %v1346_v9, %v1298_v60  ;;  %v1300_v16 = vpop.f32.mrf.mxu1 }
 0x10b   : > { %v1301_v19 = vadd.f32 %v1300_v16, %v1251_v14 }
 0x10c   : > { %v2981_v20 = vadd.f32 %v1395_v10, %v1347_v13  ;;  %1446 = vmatmul.bf16.gmra.mxu0 %v2107_v11  ;;  %v3004_v11 = vld [vmem:[%s3077_s2] ss:$0 sm:$0xff] }
 0x10d   : > { %1495 = vmatmul.bf16.gmra.mxu1 %v2111_v12 }
 0x10e   : > { %1544 = vmatmul.bf16.gmra.mxu2 %v2115_v17 }
 0x10f   : > { %1593 = vmatmul.bf16.gmra.mxu3 %v2119_v18 }
 0x111   : > { %v1349_v21 = vpop.f32.mrf.mxu2  ;;  %v1253_v24 = vpop.f32.mrf.mxu0 }
 0x112   : > { %v1398_v22 = vpop.f32.mrf.mxu3  ;;  %v1350_v23 = vadd.f32 %v1349_v21, %v1301_v19  ;;  %v1302_v26 = vpop.f32.mrf.mxu1 }
 0x113   : > { %v1303_v27 = vadd.f32 %v1302_v26, %v1253_v24 }
 0x114   : > { %v2983_v28 = vadd.f32 %v1398_v22, %v1350_v23 }
 0x119   : > { %v1351_v39 = vpop.f32.mrf.mxu2  ;;  %v1256_v45 = vpop.f32.mrf.mxu0 }
 0x11a   : > { %v1400_v40 = vpop.f32.mrf.mxu3  ;;  %v1352_v44 = vadd.f32 %v1351_v39, %v1303_v27  ;;  %v1305_v46 = vpop.f32.mrf.mxu1 }
 0x11b   : > { %v1306_v49 = vadd.f32 %v1305_v46, %v1256_v45 }
 0x11c   : > { %v2993_v50 = vadd.f32 %v1400_v40, %v1352_v44  ;;  %1451 = vmatmul.bf16.gmra.mxu0 %v2139_v42 }
 0x11d   : > { %1500 = vmatmul.bf16.gmra.mxu1 %v2143_v43 }
 0x11e   : > { %1549 = vmatmul.bf16.gmra.mxu2 %v2147_v47 }
 0x11f   : > { %1598 = vmatmul.bf16.gmra.mxu3 %v2151_v48 }
 0x121   : > { %v1354_v51 = vpop.f32.mrf.mxu2  ;;  %v1258_v56 = vpop.f32.mrf.mxu0 }
 0x122   : > { %v1403_v52 = vpop.f32.mrf.mxu3  ;;  %v1355_v55 = vadd.f32 %v1354_v51, %v1306_v49  ;;  %v1307_v57 = vpop.f32.mrf.mxu1 }
 0x123   : > { %v1308_v58 = vadd.f32 %v1307_v57, %v1258_v56 }
 0x124   : > { %v2995_v59 = vadd.f32 %v1403_v52, %v1355_v55 }
 0x129   : > { %v1356_v60 = vpop.f32.mrf.mxu2  ;;  %v1417_v1 = vpop.f32.mrf.mxu0 }
 0x12a   : > { %v1405_v63 = vpop.f32.mrf.mxu3  ;;  %v1357_v0 = vadd.f32 %v1356_v60, %v1308_v58  ;;  %v1466_v2 = vpop.f32.mrf.mxu1  ;;  %v1418_v5 = vadd.f32 %v1417_v1, %v2911_v53 }
 0x12c   : > { %v2997_v3 = vadd.f32 %v1405_v63, %v1357_v0  ;;  %v1467_v6 = vadd.f32 %v1466_v2, %v1418_v5 }
 0x131   : > { %v1515_v7 = vpop.f32.mrf.mxu2  ;;  %v1419_v12 = vpop.f32.mrf.mxu0 }
 0x132   : > { %v1564_v9 = vpop.f32.mrf.mxu3  ;;  %v1516_v10 = vadd.f32 %v1515_v7, %v1467_v6  ;;  %v1468_v13 = vpop.f32.mrf.mxu1  ;;  %v1420_v16 = vadd.f32 %v1419_v12, %v2921_v8 }
 0x134   : > { %v1565_v14 = vadd.f32 %v1564_v9, %v1516_v10  ;;  %v1469_v17 = vadd.f32 %v1468_v13, %v1420_v16 }
 0x136   : > { %v1719_v53 = vadd.f32 %v3004_v11, %v1565_v14  ;;  %v1676_v8 = vmul.f32 %v1565_v14, %v1565_v14 }
 0x138   : > { %1735 = vst [vmem:[%s3010_s17] sm:$0xff] %v1719_v53 }
 0x139   : > { %v1517_v18 = vpop.f32.mrf.mxu2  ;;  %v1422_v22 = vpop.f32.mrf.mxu0 }
 0x13a   : > { %v1566_v19 = vpop.f32.mrf.mxu3  ;;  %v1518_v21 = vadd.f32 %v1517_v18, %v1469_v17  ;;  %v1471_v23 = vpop.f32.mrf.mxu1  ;;  %v1423_v26 = vadd.f32 %v1422_v22, %v2923_v15 }
 0x13c   : > { %v1567_v24 = vadd.f32 %v1566_v19, %v1518_v21  ;;  %v1472_v33 = vadd.f32 %v1471_v23, %v1423_v26 }
 0x13e   : > { %v1655_v27 = vadd.f32 %v1567_v24, %v1565_v14  ;;  %v1677_v29 = vmul.f32 %v1567_v24, %v1567_v24  ;;  %v1720_v30 = vadd.f32 %v3004_v11, %v1567_v24 }
 0x140   : > { %v1692_v31 = vadd.f32 %v1677_v29, %v1676_v8  ;;  %1736 = vst [vmem:[%s3010_s17 + $0x8] sm:$0xff] %v1720_v30 }
 0x141   : > { %v1520_v35 = vpop.f32.mrf.mxu2  ;;  %v1424_v38 = vpop.f32.mrf.mxu0 }
 0x142   : > { %v1569_v36 = vpop.f32.mrf.mxu3  ;;  %v1521_v37 = vadd.f32 %v1520_v35, %v1472_v33  ;;  %v1473_v39 = vpop.f32.mrf.mxu1  ;;  %v1425_v42 = vadd.f32 %v1424_v38, %v2933_v34 }
 0x144   : > { %v1570_v40 = vadd.f32 %v1569_v36, %v1521_v37  ;;  %v1474_v46 = vadd.f32 %v1473_v39, %v1425_v42 }
 0x146   : > { %v1656_v43 = vadd.f32 %v1655_v27, %v1570_v40  ;;  %v1678_v44 = vmul.f32 %v1570_v40, %v1570_v40  ;;  %v1721_v15 = vadd.f32 %v3004_v11, %v1570_v40 }
 0x148   : > { %v1693_v45 = vadd.f32 %v1692_v31, %v1678_v44  ;;  %1737 = vst [vmem:[%s3010_s17 + $0x10] sm:$0xff] %v1721_v15 }
 0x149   : > { %v1522_v47 = vpop.f32.mrf.mxu2  ;;  %v1427_v51 = vpop.f32.mrf.mxu0 }
 0x14a   : > { %v1571_v48 = vpop.f32.mrf.mxu3  ;;  %v1523_v49 = vadd.f32 %v1522_v47, %v1474_v46  ;;  %v1476_v52 = vpop.f32.mrf.mxu1  ;;  %v1428_v56 = vadd.f32 %v1427_v51, %v2935_v41 }
 0x14c   : > { %v1572_v55 = vadd.f32 %v1571_v48, %v1523_v49  ;;  %v1477_v63 = vadd.f32 %v1476_v52, %v1428_v56 }
 0x14e   : > { %v1657_v57 = vadd.f32 %v1656_v43, %v1572_v55  ;;  %v1679_v58 = vmul.f32 %v1572_v55, %v1572_v55  ;;  %v1722_v34 = vadd.f32 %v3004_v11, %v1572_v55 }
 0x150   : > { %v1694_v60 = vadd.f32 %v1693_v45, %v1679_v58  ;;  %1738 = vst [vmem:[%s3010_s17 + $0x18] sm:$0xff] %v1722_v34 }
 0x151   : > { %v1525_v0 = vpop.f32.mrf.mxu2  ;;  %v1429_v5 = vpop.f32.mrf.mxu0 }
 0x152   : > { %v1574_v1 = vpop.f32.mrf.mxu3  ;;  %v1526_v2 = vadd.f32 %v1525_v0, %v1477_v63  ;;  %v1478_v6 = vpop.f32.mrf.mxu1  ;;  %v1430_v9 = vadd.f32 %v1429_v5, %v2945_v61 }
 0x154   : > { %v1575_v7 = vadd.f32 %v1574_v1, %v1526_v2  ;;  %v1479_v14 = vadd.f32 %v1478_v6, %v1430_v9 }
 0x156   : > { %v1658_v10 = vadd.f32 %v1657_v57, %v1575_v7  ;;  %v1680_v12 = vmul.f32 %v1575_v7, %v1575_v7  ;;  %v1723_v41 = vadd.f32 %v3004_v11, %v1575_v7 }
 0x158   : > { %v1695_v13 = vadd.f32 %v1694_v60, %v1680_v12  ;;  %1739 = vst [vmem:[%s3010_s17 + $0x20] sm:$0xff] %v1723_v41 }
 0x159   : > { %v1527_v16 = vpop.f32.mrf.mxu2  ;;  %v1432_v18 = vpop.f32.mrf.mxu0 }
 0x15a   : > { %v1576_v53 = vpop.f32.mrf.mxu3  ;;  %v1528_v17 = vadd.f32 %v1527_v16, %v1479_v14  ;;  %v1481_v19 = vpop.f32.mrf.mxu1  ;;  %v1433_v22 = vadd.f32 %v1432_v18, %v2947_v4 }
 0x15c   : > { %v1577_v21 = vadd.f32 %v1576_v53, %v1528_v17  ;;  %v1482_v8 = vadd.f32 %v1481_v19, %v1433_v22 }
 0x15e   : > { %v1659_v23 = vadd.f32 %v1658_v10, %v1577_v21  ;;  %v1681_v24 = vmul.f32 %v1577_v21, %v1577_v21  ;;  %v1724_v61 = vadd.f32 %v3004_v11, %v1577_v21 }
 0x160   : > { %v1696_v26 = vadd.f32 %v1695_v13, %v1681_v24  ;;  %1740 = vst [vmem:[%s3010_s17 + $0x28] sm:$0xff] %v1724_v61 }
 0x161   : > { %v1530_v27 = vpop.f32.mrf.mxu2  ;;  %v1434_v31 = vpop.f32.mrf.mxu0 }
 0x162   : > { %v1579_v29 = vpop.f32.mrf.mxu3  ;;  %v1531_v30 = vadd.f32 %v1530_v27, %v1482_v8  ;;  %v1483_v33 = vpop.f32.mrf.mxu1  ;;  %v1435_v36 = vadd.f32 %v1434_v31, %v2957_v25 }
 0x164   : > { %v1580_v35 = vadd.f32 %v1579_v29, %v1531_v30  ;;  %v1484_v40 = vadd.f32 %v1483_v33, %v1435_v36 }
 0x166   : > { %v1660_v37 = vadd.f32 %v1659_v23, %v1580_v35  ;;  %v1682_v38 = vmul.f32 %v1580_v35, %v1580_v35  ;;  %v1725_v4 = vadd.f32 %v3004_v11, %v1580_v35 }
 0x168   : > { %v1697_v39 = vadd.f32 %v1696_v26, %v1682_v38  ;;  %1741 = vst [vmem:[%s3010_s17 + $0x30] sm:$0xff] %v1725_v4 }
 0x169   : > { %v1532_v42 = vpop.f32.mrf.mxu2  ;;  %v1437_v15 = vpop.f32.mrf.mxu0 }
 0x16a   : > { %v1581_v43 = vpop.f32.mrf.mxu3  ;;  %v1533_v44 = vadd.f32 %v1532_v42, %v1484_v40  ;;  %v1486_v45 = vpop.f32.mrf.mxu1  ;;  %v1438_v47 = vadd.f32 %v1437_v15, %v2959_v32 }
 0x16c   : > { %v1582_v46 = vadd.f32 %v1581_v43, %v1533_v44  ;;  %v1487_v52 = vadd.f32 %v1486_v45, %v1438_v47 }
 0x16e   : > { %v1661_v48 = vadd.f32 %v1660_v37, %v1582_v46  ;;  %v1683_v49 = vmul.f32 %v1582_v46, %v1582_v46  ;;  %v1726_v25 = vadd.f32 %v3004_v11, %v1582_v46 }
 0x170   : > { %v1698_v51 = vadd.f32 %v1697_v39, %v1683_v49  ;;  %1742 = vst [vmem:[%s3010_s17 + $0x38] sm:$0xff] %v1726_v25 }
 0x171   : > { %v1535_v55 = vpop.f32.mrf.mxu2  ;;  %v1439_v58 = vpop.f32.mrf.mxu0 }
 0x172   : > { %v1584_v56 = vpop.f32.mrf.mxu3  ;;  %v1536_v57 = vadd.f32 %v1535_v55, %v1487_v52  ;;  %v1488_v34 = vpop.f32.mrf.mxu1  ;;  %v1440_v63 = vadd.f32 %v1439_v58, %v2969_v54 }
 0x174   : > { %v1585_v60 = vadd.f32 %v1584_v56, %v1536_v57  ;;  %v1489_v5 = vadd.f32 %v1488_v34, %v1440_v63 }
 0x176   : > { %v1662_v0 = vadd.f32 %v1661_v48, %v1585_v60  ;;  %v1684_v1 = vmul.f32 %v1585_v60, %v1585_v60  ;;  %v1727_v32 = vadd.f32 %v3004_v11, %v1585_v60 }
 0x178   : > { %v1699_v2 = vadd.f32 %v1698_v51, %v1684_v1  ;;  %1743 = vst [vmem:[%s3010_s17 + $0x40] sm:$0xff] %v1727_v32 }
 0x179   : > { %v1537_v6 = vpop.f32.mrf.mxu2  ;;  %v1442_v10 = vpop.f32.mrf.mxu0 }
 0x17a   : > { %v1586_v7 = vpop.f32.mrf.mxu3  ;;  %v1538_v9 = vadd.f32 %v1537_v6, %v1489_v5  ;;  %v1491_v12 = vpop.f32.mrf.mxu1  ;;  %v1443_v13 = vadd.f32 %v1442_v10, %v2971_v62 }
 0x17c   : > { %v1587_v41 = vadd.f32 %v1586_v7, %v1538_v9  ;;  %v1492_v17 = vadd.f32 %v1491_v12, %v1443_v13 }
 0x17e   : > { %v1663_v14 = vadd.f32 %v1662_v0, %v1587_v41  ;;  %v1685_v16 = vmul.f32 %v1587_v41, %v1587_v41  ;;  %v1728_v54 = vadd.f32 %v3004_v11, %v1587_v41 }
 0x180   : > { %v1700_v53 = vadd.f32 %v1699_v2, %v1685_v16  ;;  %1744 = vst [vmem:[%s3010_s17 + $0x48] sm:$0xff] %v1728_v54 }
 0x181   : > { %v1540_v18 = vpop.f32.mrf.mxu2  ;;  %v1444_v22 = vpop.f32.mrf.mxu0 }
 0x182   : > { %v1589_v19 = vpop.f32.mrf.mxu3  ;;  %v1541_v21 = vadd.f32 %v1540_v18, %v1492_v17  ;;  %v1493_v23 = vpop.f32.mrf.mxu1  ;;  %v1445_v61 = vadd.f32 %v1444_v22, %v2981_v20 }
 0x184   : > { %v1590_v24 = vadd.f32 %v1589_v19, %v1541_v21  ;;  %v1494_v29 = vadd.f32 %v1493_v23, %v1445_v61 }
 0x186   : > { %v1664_v26 = vadd.f32 %v1663_v14, %v1590_v24  ;;  %v1686_v8 = vmul.f32 %v1590_v24, %v1590_v24  ;;  %v1729_v62 = vadd.f32 %v3004_v11, %v1590_v24 }
 0x188   : > { %v1701_v27 = vadd.f32 %v1700_v53, %v1686_v8  ;;  %1745 = vst [vmem:[%s3010_s17 + $0x50] sm:$0xff] %v1729_v62 }
 0x189   : > { %v1542_v30 = vpop.f32.mrf.mxu2  ;;  %v1447_v35 = vpop.f32.mrf.mxu0 }
 0x18a   : > { %v1591_v31 = vpop.f32.mrf.mxu3  ;;  %v1543_v33 = vadd.f32 %v1542_v30, %v1494_v29  ;;  %v1496_v36 = vpop.f32.mrf.mxu1  ;;  %v1448_v38 = vadd.f32 %v1447_v35, %v2983_v28 }
 0x18c   : > { %v1592_v37 = vadd.f32 %v1591_v31, %v1543_v33  ;;  %v1497_v42 = vadd.f32 %v1496_v36, %v1448_v38 }
 0x18e   : > { %v1665_v4 = vadd.f32 %v1664_v26, %v1592_v37  ;;  %v1687_v39 = vmul.f32 %v1592_v37, %v1592_v37  ;;  %v1730_v20 = vadd.f32 %v3004_v11, %v1592_v37 }
 0x190   : > { %v1702_v40 = vadd.f32 %v1701_v27, %v1687_v39  ;;  %1746 = vst [vmem:[%s3010_s17 + $0x58] sm:$0xff] %v1730_v20 }
 0x191   : > { %v1545_v43 = vpop.f32.mrf.mxu2  ;;  %v1449_v45 = vpop.f32.mrf.mxu0 }
 0x192   : > { %v1594_v44 = vpop.f32.mrf.mxu3  ;;  %v1546_v15 = vadd.f32 %v1545_v43, %v1497_v42  ;;  %v1498_v46 = vpop.f32.mrf.mxu1  ;;  %v1450_v48 = vadd.f32 %v1449_v45, %v2993_v50 }
 0x194   : > { %v1595_v47 = vadd.f32 %v1594_v44, %v1546_v15  ;;  %v1499_v52 = vadd.f32 %v1498_v46, %v1450_v48 }
 0x196   : > { %v1666_v49 = vadd.f32 %v1665_v4, %v1595_v47  ;;  %v1688_v25 = vmul.f32 %v1595_v47, %v1595_v47  ;;  %v1731_v28 = vadd.f32 %v3004_v11, %v1595_v47 }
 0x198   : > { %v1703_v51 = vadd.f32 %v1702_v40, %v1688_v25  ;;  %1747 = vst [vmem:[%s3010_s17 + $0x60] sm:$0xff] %v1731_v28 }
 0x199   : > { %v1547_v55 = vpop.f32.mrf.mxu2  ;;  %v1452_v58 = vpop.f32.mrf.mxu0 }
 0x19a   : > { %v1596_v56 = vpop.f32.mrf.mxu3  ;;  %v1548_v57 = vadd.f32 %v1547_v55, %v1499_v52  ;;  %v1453_v60 = vadd.f32 %v1452_v58, %v2995_v59  ;;  %v1501_v63 = vpop.f32.mrf.mxu1 }
 0x19c   : > { %v1597_v34 = vadd.f32 %v1596_v56, %v1548_v57  ;;  %v1502_v2 = vadd.f32 %v1501_v63, %v1453_v60 }
 0x19e   : > { %v1667_v0 = vadd.f32 %v1666_v49, %v1597_v34  ;;  %v1689_v1 = vmul.f32 %v1597_v34, %v1597_v34  ;;  %v1732_v50 = vadd.f32 %v3004_v11, %v1597_v34 }
 0x1a0   : > { %v1704_v32 = vadd.f32 %v1703_v51, %v1689_v1  ;;  %1748 = vst [vmem:[%s3010_s17 + $0x68] sm:$0xff] %v1732_v50 }
 0x1a1   : > { %v1550_v5 = vpop.f32.mrf.mxu2  ;;  %v1454_v9 = vpop.f32.mrf.mxu0 }
 0x1a2   : > { %v1599_v6 = vpop.f32.mrf.mxu3  ;;  %v1551_v7 = vadd.f32 %v1550_v5, %v1502_v2  ;;  %v1455_v12 = vadd.f32 %v1454_v9, %v2997_v3  ;;  %v1503_v14 = vpop.f32.mrf.mxu1 }
 0x1a4   : > { %v1600_v10 = vadd.f32 %v1599_v6, %v1551_v7  ;;  %v1504_v54 = vadd.f32 %v1503_v14, %v1455_v12 }
 0x1a6   : > { %v1668_v41 = vadd.f32 %v1667_v0, %v1600_v10  ;;  %v1690_v13 = vmul.f32 %v1600_v10, %v1600_v10  ;;  %v1733_v59 = vadd.f32 %v3004_v11, %v1600_v10 }
 0x1a8   : > { %v1705_v16 = vadd.f32 %v1704_v32, %v1690_v13  ;;  %1749 = vst [vmem:[%s3010_s17 + $0x70] sm:$0xff] %v1733_v59 }
 0x1a9   : > { %v1552_v53 = vpop.f32.mrf.mxu2 }
 0x1aa   : > { %v1553_v17 = vadd.f32 %v1552_v53, %v1504_v54  ;;  %v1601_v18 = vpop.f32.mrf.mxu3 }
 0x1ac   : > { %v1602_v19 = vadd.f32 %v1601_v18, %v1553_v17 }
 0x1ae   : > { %v1669_v21 = vadd.f32 %v1668_v41, %v1602_v19  ;;  %v1691_v22 = vmul.f32 %v1602_v19, %v1602_v19  ;;  %v1734_v23 = vadd.f32 %v3004_v11, %v1602_v19 }
 0x1b0   : > { %v1670_v3 = vrot.slane %v1669_v21, 4  ;;  %v1706_v24 = vadd.f32 %v1705_v16, %v1691_v22  ;;  %1750 = vst [vmem:[%s3010_s17 + $0x78] sm:$0xff] %v1734_v23 }
 0x1b2   : > { %v1671_v61 = vadd.f32 %v1670_v3, %v1669_v21  ;;  %v1707_v26 = vrot.slane %v1706_v24, 4 }
 0x1b4   : > { %v1672_v8 = vrot.slane %v1671_v61, 2  ;;  %v1708_v62 = vadd.f32 %v1707_v26, %v1706_v24 }
 0x1b6   : > { %v1673_v27 = vadd.f32 %v1672_v8, %v1671_v61  ;;  %v1709_v29 = vrot.slane %v1708_v62, 2 }
 0x1b8   : > { %v1674_v30 = vrot.slane %v1673_v27, 1  ;;  %v1710_v31 = vadd.f32 %v1709_v29, %v1708_v62 }
 0x1ba   : > { %v1675_v33 = vadd.f32 %v1674_v30, %v1673_v27  ;;  %v1711_v35 = vrot.slane %v1710_v31, 1 }
 0x1bc   : > { %v1712_v11 = vadd.f32 %v1711_v35, %v1710_v31  ;;  %1713 = vst [vmem:[%s275_s24] sm:$0xff] %v1675_v33 }
 0x1be   : > { %1714 = vst [vmem:[%s279_s28] sm:$0xff] %v1712_v11 }
 0x1bf PF: > { %s16_s20 = sadd.s32 1, %s2586_s20   ;;  %s3081_s18 = smov %s2582_s19 }
 0x1c0   : > { %p13_p6 = scmp.ge.s32.totalorder %s16_s20, 6   ;;  %s3082_s19 = smov %s3084_s21 }
 0x1c2   :  { %15 = sbr.rel (!%p13_p6) target bundleno = 2 (0x2), region = 94 }

// kernel: discriminator_forward.10
= control target key start
LH: loop header
LB: loop body
LE: loop exit
PB: predicated region body
PF: predicated region fallthrough
CT: control target
= control target key end

     0   :  { %s430_s12 = smov 0   ;;  %s521_s0 = inlined_call_operand.vmem [shape: f32[512,128], index: 0, kind: input, shape index: {}]   ;;  %s522_s1 = inlined_call_operand.vmem [shape: f32[1,128], index: 1, kind: input, shape index: {}]   ;;  %s523_s2 = inlined_call_operand.vmem [shape: f32[1,128], index: 2, kind: input, shape index: {}]   ;;  %s524_s3 = inlined_call_operand.vmem [shape: bf16[512,128], index: 3, kind: output, shape index: {}]  }
   0x1 LB: > { %s334_s13 = sadd.s32 4294967295, %s408_s12   ;;  %p338_p0 = scmp.ge.s32.totalorder %s408_s12, 1  ;;  %s408_s12 = sphi %s430_s12, %s13_s12  }
   0x2   : > { %p138_p1 = scmp.lt.s32.totalorder %s408_s12, 5 }
   0x4   : > { %p139_p2 = pnand %p338_p0, %p138_p1 }
   0x5   : > { %s339_s14 = sshll.u32 (!%p139_p2), %s334_s13, 4 }
   0x6   : > { %142 = sbr.rel (%p139_p2) target bundleno = 35 (0x23), region = 32  ;;  %p163_p3 = scmp.lt.s32.totalorder (!%p139_p2), %s339_s14, 63 }
   0xb   : > { %s526_s14 = smov (!%p163_p3, %s339_s14), 63  ;;  %v443_v0 = vld [vmem:[%s522_s1] ss:$0 sm:$0xff] }
   0xc   : > { %s340_s17 = sshll.u32 %s526_s14, 3  ;;  %v454_v1 = vld [vmem:[%s523_s2] ss:$0 sm:$0xff]  ;;  %s342_s23 = sshll.u32 %s526_s14, 2 }
   0xd   : > { %s449_s20 = scalar_lea.vmem %s521_s0, %s340_s17  ;;  %s486_s26 = scalar_lea.vmem %s524_s3, %s342_s23 }
   0xe   : > { %v174_v2 = vld [vmem:[%s449_s20] sm:$0xff]  ;;  %v175_v3 = vld [vmem:[%s449_s20 + $0x8] sm:$0xff]  ;;  %v176_v4 = vld [vmem:[%s449_s20 + $0x10] sm:$0xff] }
   0xf   : > { %v194_v5 = vmul.f32 %v443_v0, %v174_v2  ;;  %v195_v6 = vmul.f32 %v443_v0, %v175_v3  ;;  %v177_v7 = vld [vmem:[%s449_s20 + $0x18] sm:$0xff]  ;;  %v196_v8 = vmul.f32 %v443_v0, %v176_v4  ;;  %v178_v9 = vld [vmem:[%s449_s20 + $0x20] sm:$0xff]  ;;  %v179_v10 = vld [vmem:[%s449_s20 + $0x28] sm:$0xff] }
  0x10   : > { %v197_v11 = vmul.f32 %v443_v0, %v177_v7  ;;  %v198_v12 = vmul.f32 %v443_v0, %v178_v9  ;;  %v199_v13 = vmul.f32 %v443_v0, %v179_v10  ;;  %v180_v14 = vld [vmem:[%s449_s20 + $0x30] sm:$0xff]  ;;  %v181_v15 = vld [vmem:[%s449_s20 + $0x38] sm:$0xff]  ;;  %v182_v24 = vld [vmem:[%s449_s20 + $0x40] sm:$0xff] }
  0x11   : > { %v214_v16 = vadd.f32 %v454_v1, %v194_v5  ;;  %v215_v17 = vadd.f32 %v454_v1, %v195_v6  ;;  %v216_v18 = vadd.f32 %v454_v1, %v196_v8  ;;  %v200_v19 = vmul.f32 %v443_v0, %v180_v14  ;;  %v183_v25 = vld [vmem:[%s449_s20 + $0x48] sm:$0xff]  ;;  %v184_v30 = vld [vmem:[%s449_s20 + $0x50] sm:$0xff]  ;;  %v185_v35 = vld [vmem:[%s449_s20 + $0x58] sm:$0xff] }
  0x12   : > { %v217_v20 = vadd.f32 %v454_v1, %v197_v11  ;;  %v218_v21 = vadd.f32 %v454_v1, %v198_v12  ;;  %v219_v22 = vadd.f32 %v454_v1, %v199_v13  ;;  %v201_v23 = vmul.f32 %v443_v0, %v181_v15  ;;  %v186_v36 = vld [vmem:[%s449_s20 + $0x60] sm:$0xff]  ;;  %v187_v41 = vld [vmem:[%s449_s20 + $0x68] sm:$0xff]  ;;  %v188_v42 = vld [vmem:[%s449_s20 + $0x70] sm:$0xff] }
  0x13   : > { %v230_v26 = vmax.f32 %v214_v16, 0.0  ;;  %v231_v27 = vmax.f32 %v215_v17, 0.0  ;;  %v232_v28 = vmax.f32 %v216_v18, 0.0  ;;  %v220_v29 = vadd.f32 %v454_v1, %v200_v19  ;;  %v189_v51 = vld [vmem:[%s449_s20 + $0x78] sm:$0xff] }
  0x14   : > { %v233_v31 = vmax.f32 %v217_v20, 0.0  ;;  %v234_v32 = vmax.f32 %v218_v21, 0.0  ;;  %v235_v33 = vmax.f32 %v219_v22, 0.0  ;;  %v221_v34 = vadd.f32 %v454_v1, %v201_v23 }
  0x15   : > { %v348_v37 = vpack.c.bf16 %v231_v27, %v230_v26  ;;  %v236_v38 = vmax.f32 %v220_v29, 0.0  ;;  %v202_v39 = vmul.f32 %v443_v0, %v182_v24  ;;  %v203_v40 = vmul.f32 %v443_v0, %v183_v25 }
  0x16   : > { %v353_v43 = vpack.c.bf16 %v233_v31, %v232_v28  ;;  %v358_v44 = vpack.c.bf16 %v235_v33, %v234_v32  ;;  %v237_v45 = vmax.f32 %v221_v34, 0.0  ;;  %v204_v46 = vmul.f32 %v443_v0, %v184_v30 }
  0x17   : > { %349 = vst [vmem:[%s486_s26] sm:$0xff] %v348_v37   ;;  %v222_v47 = vadd.f32 %v454_v1, %v202_v39  ;;  %v223_v48 = vadd.f32 %v454_v1, %v203_v40  ;;  %v205_v49 = vmul.f32 %v443_v0, %v185_v35  ;;  %v206_v50 = vmul.f32 %v443_v0, %v186_v36 }
  0x18   : > { %385 = vst [vmem:[%s486_s26 + $0x8] sm:$0xff] %v353_v43   ;;  %v363_v52 = vpack.c.bf16 %v237_v45, %v236_v38  ;;  %v224_v53 = vadd.f32 %v454_v1, %v204_v46  ;;  %v207_v54 = vmul.f32 %v443_v0, %v187_v41  ;;  %v208_v55 = vmul.f32 %v443_v0, %v188_v42 }
  0x19   : > { %386 = vst [vmem:[%s486_s26 + $0x10] sm:$0xff] %v358_v44   ;;  %v238_v56 = vmax.f32 %v222_v47, 0.0  ;;  %v239_v57 = vmax.f32 %v223_v48, 0.0  ;;  %v225_v58 = vadd.f32 %v454_v1, %v205_v49  ;;  %v226_v59 = vadd.f32 %v454_v1, %v206_v50 }
  0x1a   : > { %387 = vst [vmem:[%s486_s26 + $0x18] sm:$0xff] %v363_v52   ;;  %v240_v60 = vmax.f32 %v224_v53, 0.0  ;;  %v227_v61 = vadd.f32 %v454_v1, %v207_v54  ;;  %v209_v62 = vmul.f32 %v443_v0, %v189_v51  ;;  %v228_v63 = vadd.f32 %v454_v1, %v208_v55 }
  0x1b   : > { %v368_v2 = vpack.c.bf16 %v239_v57, %v238_v56  ;;  %v241_v3 = vmax.f32 %v225_v58, 0.0  ;;  %v242_v4 = vmax.f32 %v226_v59, 0.0 }
  0x1c   : > { %v243_v5 = vmax.f32 %v227_v61, 0.0  ;;  %v229_v6 = vadd.f32 %v454_v1, %v209_v62  ;;  %v244_v7 = vmax.f32 %v228_v63, 0.0 }
  0x1d   : > { %388 = vst [vmem:[%s486_s26 + $0x20] sm:$0xff] %v368_v2   ;;  %v373_v8 = vpack.c.bf16 %v241_v3, %v240_v60 }
  0x1e   : > { %v378_v9 = vpack.c.bf16 %v243_v5, %v242_v4  ;;  %v245_v10 = vmax.f32 %v229_v6, 0.0 }
  0x1f   : > { %389 = vst [vmem:[%s486_s26 + $0x28] sm:$0xff] %v373_v8  }
  0x20   : > { %390 = vst [vmem:[%s486_s26 + $0x30] sm:$0xff] %v378_v9   ;;  %v383_v11 = vpack.c.bf16 %v245_v10, %v244_v7 }
  0x22   : > { %391 = vst [vmem:[%s486_s26 + $0x38] sm:$0xff] %v383_v11  }
  0x23 PF: > { %s13_s12 = sadd.s32 1, %s408_s12  }
  0x24   : > { %p10_p4 = scmp.ge.s32.totalorder %s13_s12, 6  }
  0x26   :  { %12 = sbr.rel (!%p10_p4) target bundleno = 1 (0x1), region = 62 }

// kernel: discriminator_forward.12
= control target key start
LH: loop header
LB: loop body
LE: loop exit
PB: predicated region body
PF: predicated region fallthrough
CT: control target
= control target key end

     0   :  { %s340_s12 = smov 0   ;;  %s367_s0 = inlined_call_operand.vmem [shape: f32[128,256], index: 0, kind: input, shape index: {}]   ;;  %s368_s1 = inlined_call_operand.vmem [shape: f32[1,256], index: 1, kind: input, shape index: {}]   ;;  %s369_s2 = inlined_call_operand.vmem [shape: f32[1,256], index: 2, kind: input, shape index: {}]   ;;  %s370_s3 = inlined_call_operand.vmem [shape: bf16[128,256], index: 3, kind: output, shape index: {}]  }
   0x1 LB: > { %s289_s13 = sadd.s32 4294967295, %s318_s12   ;;  %p293_p0 = scmp.ge.s32.totalorder %s318_s12, 1  ;;  %s318_s12 = sphi %s340_s12, %s13_s12  }
   0x2   : > { %p139_p1 = scmp.lt.s32.totalorder %s318_s12, 5 }
   0x4   : > { %p140_p2 = pnand %p293_p0, %p139_p1 }
   0x5   : > { %s294_s14 = sshll.u32 (!%p140_p2), %s289_s13, 2 }
   0x6   : > { %143 = sbr.rel (%p140_p2) target bundleno = 27 (0x1b), region = 32  ;;  %p166_p3 = scmp.lt.s32.totalorder (!%p140_p2), %s294_s14, 15 }
   0xb   : > { %v187_v0 = vld [vmem:[%s368_s1] sm:$0x3]  ;;  %s372_s14 = smov (!%p166_p3, %s294_s14), 15 }
   0xc   : > { %v201_v1 = vld [vmem:[%s369_s2] sm:$0x3]  ;;  %v189_v2 = vperm.slane %v187_v0, 0  ;;  %v190_v3 = vperm.slane %v187_v0, 1  ;;  %s302_s19 = sshll.u32 %s372_s14, 4  ;;  %s303_s23 = sshll.u32 %s372_s14, 3 }
   0xd   : > { %s170_s22 = scalar_lea.vmem %s367_s0, %s302_s19  ;;  %v203_v4 = vperm.slane %v201_v1, 0  ;;  %v204_v5 = vperm.slane %v201_v1, 1  ;;  %s177_s26 = scalar_lea.vmem %s370_s3, %s303_s23 }
   0xe   : > { %v179_v6 = vld [vmem:[%s170_s22] sm:$0xff]  ;;  %v180_v7 = vld [vmem:[%s170_s22 + $0x8] sm:$0xff]  ;;  %v181_v8 = vld [vmem:[%s170_s22 + $0x10] sm:$0xff] }
   0xf   : > { %v193_v9 = vmul.f32 %v189_v2, %v179_v6  ;;  %v194_v10 = vmul.f32 %v190_v3, %v180_v7  ;;  %v182_v11 = vld [vmem:[%s170_s22 + $0x18] sm:$0xff]  ;;  %v195_v12 = vmul.f32 %v189_v2, %v181_v8  ;;  %v183_v13 = vld [vmem:[%s170_s22 + $0x20] sm:$0xff]  ;;  %v184_v14 = vld [vmem:[%s170_s22 + $0x28] sm:$0xff] }
  0x10   : > { %v196_v15 = vmul.f32 %v190_v3, %v182_v11  ;;  %v197_v16 = vmul.f32 %v189_v2, %v183_v13  ;;  %v198_v17 = vmul.f32 %v190_v3, %v184_v14  ;;  %v185_v18 = vld [vmem:[%s170_s22 + $0x30] sm:$0xff]  ;;  %v186_v19 = vld [vmem:[%s170_s22 + $0x38] sm:$0xff] }
  0x11   : > { %v207_v20 = vadd.f32 %v203_v4, %v193_v9  ;;  %v208_v21 = vadd.f32 %v204_v5, %v194_v10  ;;  %v209_v22 = vadd.f32 %v203_v4, %v195_v12  ;;  %v199_v23 = vmul.f32 %v189_v2, %v185_v18 }
  0x12   : > { %v210_v24 = vadd.f32 %v204_v5, %v196_v15  ;;  %v211_v25 = vadd.f32 %v203_v4, %v197_v16  ;;  %v212_v26 = vadd.f32 %v204_v5, %v198_v17  ;;  %v200_v27 = vmul.f32 %v190_v3, %v186_v19 }
  0x13   : > { %v215_v28 = vmax.f32 %v207_v20, 0.0  ;;  %v216_v29 = vmax.f32 %v208_v21, 0.0  ;;  %v217_v30 = vmax.f32 %v209_v22, 0.0  ;;  %v213_v31 = vadd.f32 %v203_v4, %v199_v23 }
  0x14   : > { %v218_v32 = vmax.f32 %v210_v24, 0.0  ;;  %v219_v33 = vmax.f32 %v211_v25, 0.0  ;;  %v220_v34 = vmax.f32 %v212_v26, 0.0  ;;  %v214_v35 = vadd.f32 %v204_v5, %v200_v27 }
  0x15   : > { %v223_v36 = vpack.c.bf16 %v216_v29, %v215_v28  ;;  %v221_v37 = vmax.f32 %v213_v31, 0.0 }
  0x16   : > { %v224_v38 = vpack.c.bf16 %v218_v32, %v217_v30  ;;  %v225_v39 = vpack.c.bf16 %v220_v34, %v219_v33  ;;  %v222_v40 = vmax.f32 %v214_v35, 0.0 }
  0x17   : > { %227 = vst [vmem:[%s177_s26] sm:$0xff] %v223_v36 }
  0x18   : > { %228 = vst [vmem:[%s177_s26 + $0x8] sm:$0xff] %v224_v38  ;;  %v226_v41 = vpack.c.bf16 %v222_v40, %v221_v37 }
  0x19   : > { %229 = vst [vmem:[%s177_s26 + $0x10] sm:$0xff] %v225_v39 }
  0x1a   : > { %230 = vst [vmem:[%s177_s26 + $0x18] sm:$0xff] %v226_v41 }
  0x1b PF: > { %s13_s12 = sadd.s32 1, %s318_s12  }
  0x1c   : > { %p10_p4 = scmp.ge.s32.totalorder %s13_s12, 6  }
  0x1e   :  { %12 = sbr.rel (!%p10_p4) target bundleno = 1 (0x1), region = 62 }

// kernel: discriminator_forward.11
= control target key start
LH: loop header
LB: loop body
LE: loop exit
PB: predicated region body
PF: predicated region fallthrough
CT: control target
= control target key end

     0   :  { %s2684_s18 = smov 0   ;;  %s2686_s19 = smov 0   ;;  %s3181_s0 = inlined_call_operand.vmem [shape: bf16[128,2048], index: 0, kind: input, shape index: {}]   ;;  %s3182_s1 = inlined_call_operand.vmem [shape: bf16[2048,256], index: 1, kind: input, shape index: {}]   ;;  %s3183_s2 = inlined_call_operand.vmem [shape: f32[1,256], index: 2, kind: input, shape index: {}]   ;;  %s3184_s3 = inlined_call_operand.vmem [shape: f32[128,256], index: 3, kind: output, shape index: {0}]   ;;  %s3185_s4 = inlined_call_operand.vmem [shape: f32[32,256], index: 4, kind: output, shape index: {1}]   ;;  %s3186_s5 = inlined_call_operand.vmem [shape: f32[32,256], index: 5, kind: output, shape index: {2}]  }
   0x1   :  { %s2688_s20 = smov 0   ;;  %s2690_s21 = smov 0  }
   0x2   :  { %s2692_s22 = smov 0   ;;  %s2694_s23 = smov 0  }
   0x3   :  { %s2696_s24 = smov 0  }
   0x4 LB: > { %s25_s25 = sadd.s32 1, %s2643_s22  ;;  %s28_s26 = sadd.s32 1, %s2647_s23  ;;  %s2651_s24 = sphi %s2696_s24, %s16_s24   ;;  %s2647_s23 = sphi %s2694_s23, %s3192_s23   ;;  %s2643_s22 = sphi %s2692_s22, %s3191_s22   ;;  %s2639_s21 = sphi %s2690_s21, %s3190_s21   ;;  %s2635_s20 = sphi %s2688_s20, %s3189_s20   ;;  %s2631_s19 = sphi %s2686_s19, %s3188_s19   ;;  %s2627_s18 = sphi %s2684_s18, %s3187_s18  }
   0x5   : > { %p26_p0 = scmp.ge.s32.totalorder %s25_s25, 2  ;;  %p44_p1 = scmp.ne.s32.totalorder %s2631_s19, %s2627_s18 }
   0x6   : > { %p45_p2 = scmp.eq.s32.totalorder %s2651_s24, 0  ;;  %s37_s30 = sadd.s32 1, %s2631_s19 }
   0x7   : > { %s3194_s25 = smov (%p26_p0, %s25_s25), 0  ;;  %s3196_s26 = smov (!%p26_p0, %s28_s26), %s2647_s23 }
   0x8   : > { %p46_p3 = por %p45_p2, %p44_p1  ;;  %p30_p4 = scmp.ge.s32.totalorder %s3196_s26, 4 }
   0x9   : > { %s33_s27 = ssub.s32 %s2643_s22, %s3194_s25  ;;  %p1793_p6 = scmp.ge.s32.totalorder %s2651_s24, 8 }
   0xa   : > { %s3198_s26 = smov (%p30_p4, %s3196_s26), 0 }
   0xb   : > { %s32_s28 = ssub.s32 %s2647_s23, %s3198_s26  ;;  %198 = sbr.rel (%p1793_p6) target bundleno = 39 (0x27), region = 20 }
   0xc   : > { %s34_s29 = sor.u32 %s33_s27, %s32_s28 }
   0xd   : > { %p35_p5 = scmp.eq.s32.totalorder %s34_s29, 0 }
   0xf   : > { %s2735_s6 = scalar_select %p35_p5, %s2631_s19, %s37_s30  }
  0x10   : > { %201 = sbr.rel (!%p46_p3) target bundleno = 39 (0x27), region = 24  ;;  %s203_s7 = sand.u32 (%p46_p3), 1, %s2631_s19  }
  0x11   : > { %s1796_s8 = sshll.u32 (%p46_p3), %s2643_s22, 3  ;;  %s1794_s9 = sshll.u32 (%p46_p3), %s203_s7, 7 }
  0x12   : > { %s2391_s10 = sshll.u32 (%p46_p3), %s2647_s23, 6  ;;  %s205_s16 = scalar_lea.vmem (%p46_p3), [#allocation3], %s1794_s9 }
  0x13   : > { %s209_s11 = sadd.s32 (%p46_p3), %s2391_s10, %s1796_s8 }
  0x14   : > { %s1798_s12 = sshll.u32 (%p46_p3), %s209_s11, 2 }
  0x15   : > { %s2744_s15 = scalar_lea.vmem %s3181_s0, %s1798_s12 }
  0x16   : > { %v224_v0 = vld [vmem:[%s2744_s15] sm:$0xff]  ;;  %v226_v1 = vld [vmem:[%s2744_s15 + $0x8] sm:$0xff]  ;;  %v228_v2 = vld [vmem:[%s2744_s15 + $0x10] sm:$0xff] }
  0x17   : > { %225 = vst [vmem:[%s205_s16] sm:$0xff] %v224_v0  ;;  %v230_v3 = vld [vmem:[%s2744_s15 + $0x18] sm:$0xff]  ;;  %v232_v4 = vld [vmem:[%s2744_s15 + $0x40] sm:$0xff]  ;;  %v234_v5 = vld [vmem:[%s2744_s15 + $0x48] sm:$0xff] }
  0x18   : > { %227 = vst [vmem:[%s205_s16 + $0x8] sm:$0xff] %v226_v1  ;;  %v236_v6 = vld [vmem:[%s2744_s15 + $0x50] sm:$0xff]  ;;  %v238_v7 = vld [vmem:[%s2744_s15 + $0x58] sm:$0xff]  ;;  %v240_v8 = vld [vmem:[%s2744_s15 + $0x80] sm:$0xff] }
  0x19   : > { %229 = vst [vmem:[%s205_s16 + $0x10] sm:$0xff] %v228_v2  ;;  %v242_v9 = vld [vmem:[%s2744_s15 + $0x88] sm:$0xff]  ;;  %v244_v10 = vld [vmem:[%s2744_s15 + $0x90] sm:$0xff]  ;;  %v246_v11 = vld [vmem:[%s2744_s15 + $0x98] sm:$0xff] }
  0x1a   : > { %231 = vst [vmem:[%s205_s16 + $0x18] sm:$0xff] %v230_v3  ;;  %v248_v12 = vld [vmem:[%s2744_s15 + $0xc0] sm:$0xff]  ;;  %v250_v13 = vld [vmem:[%s2744_s15 + $0xc8] sm:$0xff]  ;;  %v252_v14 = vld [vmem:[%s2744_s15 + $0xd0] sm:$0xff] }
  0x1b   : > { %233 = vst [vmem:[%s205_s16 + $0x20] sm:$0xff] %v232_v4  ;;  %v254_v15 = vld [vmem:[%s2744_s15 + $0xd8] sm:$0xff] }
  0x1c   : > { %235 = vst [vmem:[%s205_s16 + $0x28] sm:$0xff] %v234_v5 }
  0x1d   : > { %237 = vst [vmem:[%s205_s16 + $0x30] sm:$0xff] %v236_v6 }
  0x1e   : > { %239 = vst [vmem:[%s205_s16 + $0x38] sm:$0xff] %v238_v7 }
  0x1f   : > { %241 = vst [vmem:[%s205_s16 + $0x40] sm:$0xff] %v240_v8 }
  0x20   : > { %243 = vst [vmem:[%s205_s16 + $0x48] sm:$0xff] %v242_v9 }
  0x21   : > { %245 = vst [vmem:[%s205_s16 + $0x50] sm:$0xff] %v244_v10 }
  0x22   : > { %247 = vst [vmem:[%s205_s16 + $0x58] sm:$0xff] %v246_v11 }
  0x23   : > { %249 = vst [vmem:[%s205_s16 + $0x60] sm:$0xff] %v248_v12 }
  0x24   : > { %251 = vst [vmem:[%s205_s16 + $0x68] sm:$0xff] %v250_v13 }
  0x25   : > { %253 = vst [vmem:[%s205_s16 + $0x70] sm:$0xff] %v252_v14 }
  0x26   : > { %255 = vst [vmem:[%s205_s16 + $0x78] sm:$0xff] %v254_v15 }
  0x27 PF: > { %p1799_p7 = scmp.ge.s32.totalorder %s2651_s24, 1  ;;  %p270_p8 = scmp.lt.s32.totalorder %s2651_s24, 9 }
  0x29   : > { %p271_p9 = pnand %p1799_p7, %p270_p8 }
  0x2a   : > { %s277_s17 = sand.u32 (!%p271_p9), 1, %s2627_s18   ;;  %s1801_s27 = sshll.u32 (!%p271_p9), %s2635_s20, 7 }
  0x2b   : > { %274 = sbr.rel (%p271_p9) target bundleno = 386 (0x182), region = 51  ;;  %s1800_s28 = sshll.u32 (!%p271_p9), %s277_s17, 7 }
  0x2c   : > { %p324_p10 = scmp.lt.s32.totalorder (!%p271_p9), %s1801_s27, 255  ;;  %s1804_s29 = sshll.u32 (!%p271_p9), %s2639_s21, 2 }
  0x2d   : > { %p331_p11 = scmp.lt.s32.totalorder (!%p271_p9), %s1804_s29, 15  ;;  %p337_p12 = scmp.lt.s32.totalorder (!%p271_p9), %s2639_s21, 3 }
  0x2e   : > { %p1811_p13 = scmp.ne.s32.totalorder (!%p271_p9), %s2635_s20, 0 }
  0x30   : > { %s3200_s27 = smov (!%p324_p10, %s1801_s27), 255  ;;  %s3202_s29 = smov (!%p331_p11, %s1804_s29), 15 }
  0x31   : > { %s2392_s30 = sshll.u32 %s3200_s27, 3  ;;  %s3204_s21 = smov (!%p337_p12, %s2639_s21), 3 }
  0x32   : > { %s2771_s9 = scalar_lea.vmem %s3182_s1, %s2392_s30  ;;  %s2393_s10 = sshll.u32 %s3202_s29, 4 }
  0x33   : > { %s2777_s18 = scalar_lea.vmem %s3184_s3, %s2393_s10  ;;  %s2394_s13 = sshll.u32 %s3204_s21, 4 }
  0x34   : > { %s2782_s16 = scalar_lea.vmem %s3185_s4, %s2394_s13  ;;  %s2787_s7 = scalar_lea.vmem %s3186_s5, %s2394_s13 }
  0x35   : > { %s2789_s30 = scalar_lea.vmem [#allocation3], %s1800_s28  ;;  %350 = sbr.rel (%p1811_p13) target bundleno = 67 (0x43), region = 59 }
  0x3a   : > { %v2653_v16 = vmov 0.0  }
  0x3b   : > { %351 = vst [vmem:[#allocation2 + $0x30] sm:$0xff] %v2653_v16 }
  0x3c   : > { %352 = vst [vmem:[#allocation2] sm:$0xff] %v2653_v16 }
  0x3d   : > { %353 = vst [vmem:[#allocation2 + $0x18] sm:$0xff] %v2653_v16 }
  0x3e   : > { %354 = vst [vmem:[#allocation2 + $0x10] sm:$0xff] %v2653_v16 }
  0x3f   : > { %355 = vst [vmem:[#allocation2 + $0x8] sm:$0xff] %v2653_v16 }
  0x40   : > { %356 = vst [vmem:[#allocation2 + $0x20] sm:$0xff] %v2653_v16 }
  0x41   : > { %357 = vst [vmem:[#allocation2 + $0x28] sm:$0xff] %v2653_v16 }
  0x42   : > { %358 = vst [vmem:[#allocation2 + $0x38] sm:$0xff] %v2653_v16 }
  0x43 PF: > { %v1934_v17 = vld [vmem:[%s2771_s9 + $0x70] sm:$0xf]  ;;  %v2427_v18 = vld [vmem:[%s2771_s9 + $0x74] sm:$0xf0]  ;;  %v1926_v28 = vld [vmem:[%s2771_s9 + $0x60] sm:$0xf] }
  0x44   : > { %v1998_v19 = vld [vmem:[%s2771_s9 + $0xf0] sm:$0xf]  ;;  %v1935_v20 = vor.u32 %v2427_v18, %v1934_v17  ;;  %v2443_v21 = vld [vmem:[%s2771_s9 + $0xf4] sm:$0xf0]  ;;  %v2425_v30 = vld [vmem:[%s2771_s9 + $0x64] sm:$0xf0] }
  0x45   : > { %v2062_v22 = vld [vmem:[%s2771_s9 + $0x170] sm:$0xf]  ;;  %v2459_v23 = vld [vmem:[%s2771_s9 + $0x174] sm:$0xf0]  ;;  %v1999_v24 = vor.u32 %v2443_v21, %v1998_v19  ;;  %v1990_v31 = vld [vmem:[%s2771_s9 + $0xe0] sm:$0xf]  ;;  %v1927_v33 = vor.u32 %v2425_v30, %v1926_v28 }
  0x46   : > { %v2063_v25 = vor.u32 %v2459_v23, %v2062_v22  ;;  %v2126_v26 = vld [vmem:[%s2771_s9 + $0x1f0] sm:$0xf]  ;;  %v2475_v27 = vld [vmem:[%s2771_s9 + $0x1f4] sm:$0xf0]  ;;  %1231 = vmatpush.bf16.msra.mxu0 %v1935_v20  ;;  %v2441_v32 = vld [vmem:[%s2771_s9 + $0xe4] sm:$0xf0] }
  0x47   : > { %v2127_v29 = vor.u32 %v2475_v27, %v2126_v26  ;;  %1250 = vmatpush.bf16.msra.mxu1 %v1999_v24  ;;  %v1991_v34 = vor.u32 %v2441_v32, %v1990_v31  ;;  %v2054_v35 = vld [vmem:[%s2771_s9 + $0x160] sm:$0xf]  ;;  %v2457_v36 = vld [vmem:[%s2771_s9 + $0x164] sm:$0xf0]  ;;  %v1918_v40 = vld [vmem:[%s2771_s9 + $0x50] sm:$0xf] }
  0x48   : > { %1269 = vmatpush.bf16.msra.mxu2 %v2063_v25  ;;  %v2118_v37 = vld [vmem:[%s2771_s9 + $0x1e0] sm:$0xf]  ;;  %v2055_v38 = vor.u32 %v2457_v36, %v2054_v35  ;;  %v2473_v39 = vld [vmem:[%s2771_s9 + $0x1e4] sm:$0xf0]  ;;  %v2423_v41 = vld [vmem:[%s2771_s9 + $0x54] sm:$0xf0] }
  0x49   : > { %1288 = vmatpush.bf16.msra.mxu3 %v2127_v29  ;;  %v2119_v42 = vor.u32 %v2473_v39, %v2118_v37  ;;  %v1982_v43 = vld [vmem:[%s2771_s9 + $0xd0] sm:$0xf]  ;;  %v2439_v44 = vld [vmem:[%s2771_s9 + $0xd4] sm:$0xf0]  ;;  %v1919_v46 = vor.u32 %v2423_v41, %v1918_v40  ;;  %v1910_v52 = vld [vmem:[%s2771_s9 + $0x40] sm:$0xf] }
  0x4a   : > { %v2046_v45 = vld [vmem:[%s2771_s9 + $0x150] sm:$0xf]  ;;  %1232 = vmatpush.bf16.msra.mxu0 %v1927_v33  ;;  %v2455_v47 = vld [vmem:[%s2771_s9 + $0x154] sm:$0xf0]  ;;  %v1983_v50 = vor.u32 %v2439_v44, %v1982_v43  ;;  %v2421_v53 = vld [vmem:[%s2771_s9 + $0x44] sm:$0xf0] }
  0x4b   : > { %v2110_v48 = vld [vmem:[%s2771_s9 + $0x1d0] sm:$0xf]  ;;  %v2471_v49 = vld [vmem:[%s2771_s9 + $0x1d4] sm:$0xf0]  ;;  %1251 = vmatpush.bf16.msra.mxu1 %v1991_v34  ;;  %v2047_v51 = vor.u32 %v2455_v47, %v2046_v45  ;;  %v1974_v54 = vld [vmem:[%s2771_s9 + $0xc0] sm:$0xf]  ;;  %v1911_v61 = vor.u32 %v2421_v53, %v1910_v52 }
  0x4c   : > { %1270 = vmatpush.bf16.msra.mxu2 %v2055_v38  ;;  %v2111_v55 = vor.u32 %v2471_v49, %v2110_v48  ;;  %v2437_v56 = vld [vmem:[%s2771_s9 + $0xc4] sm:$0xf0]  ;;  %v2038_v57 = vld [vmem:[%s2771_s9 + $0x140] sm:$0xf]  ;;  %v1902_v0 = vld [vmem:[%s2771_s9 + $0x30] sm:$0xf] }
  0x4d   : > { %1289 = vmatpush.bf16.msra.mxu3 %v2119_v42  ;;  %v2453_v58 = vld [vmem:[%s2771_s9 + $0x144] sm:$0xf0]  ;;  %v2102_v59 = vld [vmem:[%s2771_s9 + $0x1c0] sm:$0xf]  ;;  %v1975_v62 = vor.u32 %v2437_v56, %v1974_v54  ;;  %v2419_v1 = vld [vmem:[%s2771_s9 + $0x34] sm:$0xf0] }
  0x4e   : > { %v2469_v60 = vld [vmem:[%s2771_s9 + $0x1c4] sm:$0xf0]  ;;  %1233 = vmatpush.bf16.msra.mxu0 %v1919_v46  ;;  %v2039_v63 = vor.u32 %v2453_v58, %v2038_v57  ;;  %v1966_v2 = vld [vmem:[%s2771_s9 + $0xb0] sm:$0xf]  ;;  %v2435_v4 = vld [vmem:[%s2771_s9 + $0xb4] sm:$0xf0]  ;;  %v1903_v9 = vor.u32 %v2419_v1, %v1902_v0 }
  0x4f   : > { %1252 = vmatpush.bf16.msra.mxu1 %v1983_v50  ;;  %v2103_v3 = vor.u32 %v2469_v60, %v2102_v59  ;;  %v2030_v5 = vld [vmem:[%s2771_s9 + $0x130] sm:$0xf]  ;;  %v2451_v6 = vld [vmem:[%s2771_s9 + $0x134] sm:$0xf0]  ;;  %v1967_v10 = vor.u32 %v2435_v4, %v1966_v2  ;;  %v1894_v12 = vld [vmem:[%s2771_s9 + $0x20] sm:$0xf] }
  0x50   : > { %1271 = vmatpush.bf16.msra.mxu2 %v2047_v51  ;;  %v2094_v7 = vld [vmem:[%s2771_s9 + $0x1b0] sm:$0xf]  ;;  %v2467_v8 = vld [vmem:[%s2771_s9 + $0x1b4] sm:$0xf0]  ;;  %v2031_v11 = vor.u32 %v2451_v6, %v2030_v5  ;;  %v2417_v13 = vld [vmem:[%s2771_s9 + $0x24] sm:$0xf0] }
  0x51   : > { %1290 = vmatpush.bf16.msra.mxu3 %v2111_v55  ;;  %v1958_v14 = vld [vmem:[%s2771_s9 + $0xa0] sm:$0xf]  ;;  %v2095_v15 = vor.u32 %v2467_v8, %v2094_v7  ;;  %v2433_v16 = vld [vmem:[%s2771_s9 + $0xa4] sm:$0xf0]  ;;  %v1895_v21 = vor.u32 %v2417_v13, %v1894_v12  ;;  %v1886_v24 = vld [vmem:[%s2771_s9 + $0x10] sm:$0xf] }
  0x52   : > { %1234 = vmatpush.bf16.msra.mxu0 %v1911_v61  ;;  %v2022_v17 = vld [vmem:[%s2771_s9 + $0x120] sm:$0xf]  ;;  %v2449_v18 = vld [vmem:[%s2771_s9 + $0x124] sm:$0xf0]  ;;  %v1959_v22 = vor.u32 %v2433_v16, %v1958_v14  ;;  %v2415_v25 = vld [vmem:[%s2771_s9 + $0x14] sm:$0xf0] }
  0x53   : > { %1253 = vmatpush.bf16.msra.mxu1 %v1975_v62  ;;  %v2086_v19 = vld [vmem:[%s2771_s9 + $0x1a0] sm:$0xf]  ;;  %v2465_v20 = vld [vmem:[%s2771_s9 + $0x1a4] sm:$0xf0]  ;;  %v2023_v23 = vor.u32 %v2449_v18, %v2022_v17  ;;  %v1950_v26 = vld [vmem:[%s2771_s9 + $0x90] sm:$0xf]  ;;  %v1887_v34 = vor.u32 %v2415_v25, %v1886_v24 }
  0x54   : > { %1272 = vmatpush.bf16.msra.mxu2 %v2039_v63  ;;  %v2087_v27 = vor.u32 %v2465_v20, %v2086_v19  ;;  %v2431_v28 = vld [vmem:[%s2771_s9 + $0x94] sm:$0xf0]  ;;  %v2014_v29 = vld [vmem:[%s2771_s9 + $0x110] sm:$0xf]  ;;  %v1878_v33 = vld [vmem:[%s2771_s9] sm:$0xf] }
  0x55   : > { %1291 = vmatpush.bf16.msra.mxu3 %v2103_v3  ;;  %v2447_v30 = vld [vmem:[%s2771_s9 + $0x114] sm:$0xf0]  ;;  %v2078_v31 = vld [vmem:[%s2771_s9 + $0x190] sm:$0xf]  ;;  %v2413_v35 = vld [vmem:[%s2771_s9 + $0x4] sm:$0xf0]  ;;  %v1951_v38 = vor.u32 %v2431_v28, %v1950_v26 }
  0x56   : > { %1235 = vmatpush.bf16.msra.mxu0 %v1903_v9  ;;  %v2463_v32 = vld [vmem:[%s2771_s9 + $0x194] sm:$0xf0]  ;;  %v1942_v36 = vld [vmem:[%s2771_s9 + $0x80] sm:$0xf]  ;;  %v2429_v37 = vld [vmem:[%s2771_s9 + $0x84] sm:$0xf0]  ;;  %v2015_v39 = vor.u32 %v2447_v30, %v2014_v29  ;;  %v1879_v51 = vor.u32 %v2413_v35, %v1878_v33 }
  0x57   : > { %1254 = vmatpush.bf16.msra.mxu1 %v1967_v10  ;;  %v2006_v40 = vld [vmem:[%s2771_s9 + $0x100] sm:$0xf]  ;;  %v2445_v41 = vld [vmem:[%s2771_s9 + $0x104] sm:$0xf0]  ;;  %v2079_v43 = vor.u32 %v2463_v32, %v2078_v31  ;;  %v2396_v47 = vld [vmem:[%s2789_s30 + $0x4] sm:$0xf]  ;;  %v1943_v55 = vor.u32 %v2429_v37, %v1942_v36 }
  0x58   : > { %1273 = vmatpush.bf16.msra.mxu2 %v2031_v11  ;;  %v2070_v42 = vld [vmem:[%s2771_s9 + $0x180] sm:$0xf]  ;;  %v2461_v44 = vld [vmem:[%s2771_s9 + $0x184] sm:$0xf0]  ;;  %v1816_v48 = vld [vmem:[%s2789_s30 + $0x20] sm:$0xf0]  ;;  %v2007_v56 = vor.u32 %v2445_v41, %v2006_v40 }
  0x59   : > { %1292 = vmatpush.bf16.msra.mxu3 %v2095_v15  ;;  %v1814_v45 = vld [vmem:[%s2789_s30] sm:$0xf]  ;;  %v2318_v49 = vld [vmem:[%s2771_s9 + $0x370] sm:$0xf]  ;;  %v2523_v50 = vld [vmem:[%s2771_s9 + $0x374] sm:$0xf0]  ;;  %v2071_v60 = vor.u32 %v2461_v44, %v2070_v42  ;;  %v2876_v6 = vor.u32 %v2396_v47, %v1816_v48 }
  0x5a   : > { %1236 = vmatpush.bf16.msra.mxu0 %v1895_v21  ;;  %v2400_v46 = vld [vmem:[%s2789_s30 + $0x1c] sm:$0xf0]  ;;  %v1822_v52 = vld [vmem:[%s2789_s30 + $0x8] sm:$0xf]  ;;  %v2254_v53 = vld [vmem:[%s2771_s9 + $0x2f0] sm:$0xf]  ;;  %v2319_v61 = vor.u32 %v2523_v50, %v2318_v49 }
  0x5b   : > { %1255 = vmatpush.bf16.msra.mxu1 %v1959_v22  ;;  %v2507_v54 = vld [vmem:[%s2771_s9 + $0x2f4] sm:$0xf0]  ;;  %v2401_v57 = vld [vmem:[%s2789_s30 + $0x24] sm:$0xf0]  ;;  %v2397_v58 = vld [vmem:[%s2789_s30 + $0xc] sm:$0xf]  ;;  %v2871_v1 = vor.u32 %v2400_v46, %v1814_v45 }
  0x5c   : > { %1274 = vmatpush.bf16.msra.mxu2 %v2023_v23  ;;  %v1824_v59 = vld [vmem:[%s2789_s30 + $0x28] sm:$0xf0]  ;;  %v2190_v62 = vld [vmem:[%s2771_s9 + $0x270] sm:$0xf]  ;;  %v2491_v63 = vld [vmem:[%s2771_s9 + $0x274] sm:$0xf0]  ;;  %v2255_v2 = vor.u32 %v2507_v54, %v2254_v53  ;;  %v2878_v7 = vor.u32 %v2401_v57, %v1822_v52 }
  0x5d   : > { %1293 = vmatpush.bf16.msra.mxu3 %v2087_v27  ;;  %v2382_v0 = vld [vmem:[%s2771_s9 + $0x3f0] sm:$0xf]  ;;  %v2539_v3 = vld [vmem:[%s2771_s9 + $0x3f4] sm:$0xf0]  ;;  %v2310_v4 = vld [vmem:[%s2771_s9 + $0x360] sm:$0xf]  ;;  %v2882_v10 = vor.u32 %v2397_v58, %v1824_v59  ;;  %v2191_v11 = vor.u32 %v2491_v63, %v2190_v62 }
  0x5e   : > { %1237 = vmatpush.bf16.msra.mxu0 %v1887_v34  ;;  %v2521_v5 = vld [vmem:[%s2771_s9 + $0x364] sm:$0xf0]  ;;  %v2246_v8 = vld [vmem:[%s2771_s9 + $0x2e0] sm:$0xf]  ;;  %v2383_v12 = vor.u32 %v2539_v3, %v2382_v0  ;;  %v2302_v19 = vld [vmem:[%s2771_s9 + $0x350] sm:$0xf] }
  0x5f   : > { %1256 = vmatpush.bf16.msra.mxu1 %v1951_v38  ;;  %v2505_v9 = vld [vmem:[%s2771_s9 + $0x2e4] sm:$0xf0]  ;;  %v2311_v13 = vor.u32 %v2521_v5, %v2310_v4  ;;  %v2182_v14 = vld [vmem:[%s2771_s9 + $0x260] sm:$0xf]  ;;  %v2519_v20 = vld [vmem:[%s2771_s9 + $0x354] sm:$0xf0] }
  0x60   : > { %1275 = vmatpush.bf16.msra.mxu2 %v2015_v39  ;;  %v2489_v15 = vld [vmem:[%s2771_s9 + $0x264] sm:$0xf0]  ;;  %v2374_v16 = vld [vmem:[%s2771_s9 + $0x3e0] sm:$0xf]  ;;  %v2247_v17 = vor.u32 %v2505_v9, %v2246_v8  ;;  %v2238_v21 = vld [vmem:[%s2771_s9 + $0x2d0] sm:$0xf]  ;;  %v2303_v25 = vor.u32 %v2519_v20, %v2302_v19 }
  0x61   : > { %1294 = vmatpush.bf16.msra.mxu3 %v2079_v43  ;;  %v2537_v18 = vld [vmem:[%s2771_s9 + $0x3e4] sm:$0xf0]  ;;  %v2503_v22 = vld [vmem:[%s2771_s9 + $0x2d4] sm:$0xf0]  ;;  %v2183_v23 = vor.u32 %v2489_v15, %v2182_v14  ;;  %v2174_v26 = vld [vmem:[%s2771_s9 + $0x250] sm:$0xf] }
  0x62   : > { %1238 = vmatpush.bf16.msra.mxu0 %v1879_v51  ;;  %v2375_v24 = vor.u32 %v2537_v18, %v2374_v16  ;;  %v2487_v27 = vld [vmem:[%s2771_s9 + $0x254] sm:$0xf0]  ;;  %v2366_v28 = vld [vmem:[%s2771_s9 + $0x3d0] sm:$0xf]  ;;  %v2239_v29 = vor.u32 %v2503_v22, %v2238_v21  ;;  %v2294_v31 = vld [vmem:[%s2771_s9 + $0x340] sm:$0xf] }
  0x63   : > { %1257 = vmatpush.bf16.msra.mxu1 %v1943_v55  ;;  %v2535_v30 = vld [vmem:[%s2771_s9 + $0x3d4] sm:$0xf0]  ;;  %v2517_v32 = vld [vmem:[%s2771_s9 + $0x344] sm:$0xf0]  ;;  %v2230_v33 = vld [vmem:[%s2771_s9 + $0x2c0] sm:$0xf]  ;;  %v2175_v35 = vor.u32 %v2487_v27, %v2174_v26 }
  0x64   : > { %1276 = vmatpush.bf16.msra.mxu2 %v2007_v56  ;;  %v2501_v34 = vld [vmem:[%s2771_s9 + $0x2c4] sm:$0xf0]  ;;  %v2166_v36 = vld [vmem:[%s2771_s9 + $0x240] sm:$0xf]  ;;  %v2367_v39 = vor.u32 %v2535_v30, %v2366_v28  ;;  %v2295_v40 = vor.u32 %v2517_v32, %v2294_v31  ;;  %v2404_v45 = vld [vmem:[%s2789_s30 + $0x44] sm:$0xf] }
  0x65   : > { %1295 = vmatpush.bf16.msra.mxu3 %v2071_v60  ;;  %1239 = vmatmul.bf16.vlgmr.msra.gmra.mxu0 %v2871_v1  ;;  %v2485_v37 = vld [vmem:[%s2771_s9 + $0x244] sm:$0xf0]  ;;  %v2358_v38 = vld [vmem:[%s2771_s9 + $0x3c0] sm:$0xf]  ;;  %v2231_v44 = vor.u32 %v2501_v34, %v2230_v33  ;;  %v1848_v46 = vld [vmem:[%s2789_s30 + $0x60] sm:$0xf0] }
  0x66   : > { %1258 = vmatmul.bf16.vlgmr.msra.gmra.mxu1 %v2876_v6  ;;  %1307 = vmatpush.bf16.msrb.mxu0 %v2191_v11  ;;  %v2533_v41 = vld [vmem:[%s2771_s9 + $0x3c4] sm:$0xf0]  ;;  %v1846_v42 = vld [vmem:[%s2789_s30 + $0x40] sm:$0xf]  ;;  %v2286_v47 = vld [vmem:[%s2771_s9 + $0x330] sm:$0xf]  ;;  %v2167_v52 = vor.u32 %v2485_v37, %v2166_v36  ;;  %v2928_v3 = vor.u32 %v2404_v45, %v1848_v46 }
  0x67   : > { %1326 = vmatpush.bf16.msrb.mxu1 %v2255_v2  ;;  %1277 = vmatmul.bf16.vlgmr.msra.gmra.mxu2 %v2878_v7  ;;  %v2408_v43 = vld [vmem:[%s2789_s30 + $0x5c] sm:$0xf0]  ;;  %v2515_v48 = vld [vmem:[%s2771_s9 + $0x334] sm:$0xf0]  ;;  %v1854_v49 = vld [vmem:[%s2789_s30 + $0x48] sm:$0xf]  ;;  %v2359_v56 = vor.u32 %v2533_v41, %v2358_v38 }
  0x68   : > { %1345 = vmatpush.bf16.msrb.mxu2 %v2319_v61  ;;  %1296 = vmatmul.bf16.vlgmr.msra.gmra.mxu3 %v2882_v10  ;;  %v2222_v50 = vld [vmem:[%s2771_s9 + $0x2b0] sm:$0xf]  ;;  %v2499_v51 = vld [vmem:[%s2771_s9 + $0x2b4] sm:$0xf0]  ;;  %v2409_v53 = vld [vmem:[%s2789_s30 + $0x64] sm:$0xf0]  ;;  %v2287_v57 = vor.u32 %v2515_v48, %v2286_v47  ;;  %v2923_v61 = vor.u32 %v2408_v43, %v1846_v42 }
  0x69   : > { %1364 = vmatpush.bf16.msrb.mxu3 %v2383_v12  ;;  %v2405_v54 = vld [vmem:[%s2789_s30 + $0x4c] sm:$0xf]  ;;  %v2158_v58 = vld [vmem:[%s2771_s9 + $0x230] sm:$0xf]  ;;  %v2483_v59 = vld [vmem:[%s2771_s9 + $0x234] sm:$0xf0]  ;;  %v2223_v62 = vor.u32 %v2499_v51, %v2222_v50  ;;  %v2930_v4 = vor.u32 %v2409_v53, %v1854_v49 }
  0x6a   : > { %1308 = vmatpush.bf16.msrb.mxu0 %v2183_v23  ;;  %v1856_v55 = vld [vmem:[%s2789_s30 + $0x68] sm:$0xf0]  ;;  %v2350_v60 = vld [vmem:[%s2771_s9 + $0x3b0] sm:$0xf]  ;;  %v2531_v63 = vld [vmem:[%s2771_s9 + $0x3b4] sm:$0xf0]  ;;  %v2159_v11 = vor.u32 %v2483_v59, %v2158_v58 }
  0x6b   : > { %1327 = vmatpush.bf16.msrb.mxu1 %v2247_v17  ;;  %v2278_v0 = vld [vmem:[%s2771_s9 + $0x320] sm:$0xf]  ;;  %v2513_v2 = vld [vmem:[%s2771_s9 + $0x324] sm:$0xf0]  ;;  %v2934_v9 = vor.u32 %v2405_v54, %v1856_v55  ;;  %v2351_v12 = vor.u32 %v2531_v63, %v2350_v60  ;;  %v2270_v19 = vld [vmem:[%s2771_s9 + $0x310] sm:$0xf] }
  0x6c   : > { %1346 = vmatpush.bf16.msrb.mxu2 %v2311_v13  ;;  %v2214_v5 = vld [vmem:[%s2771_s9 + $0x2a0] sm:$0xf]  ;;  %v2497_v8 = vld [vmem:[%s2771_s9 + $0x2a4] sm:$0xf0]  ;;  %v2279_v13 = vor.u32 %v2513_v2, %v2278_v0  ;;  %v2511_v20 = vld [vmem:[%s2771_s9 + $0x314] sm:$0xf0] }
  0x6d   : > { %1365 = vmatpush.bf16.msrb.mxu3 %v2375_v24  ;;  %v2150_v14 = vld [vmem:[%s2771_s9 + $0x220] sm:$0xf]  ;;  %v2481_v15 = vld [vmem:[%s2771_s9 + $0x224] sm:$0xf0]  ;;  %v2215_v17 = vor.u32 %v2497_v8, %v2214_v5  ;;  %v2206_v21 = vld [vmem:[%s2771_s9 + $0x290] sm:$0xf]  ;;  %v2271_v26 = vor.u32 %v2511_v20, %v2270_v19 }
  0x6e   : > { %1309 = vmatpush.bf16.msrb.mxu0 %v2175_v35  ;;  %v2342_v16 = vld [vmem:[%s2771_s9 + $0x3a0] sm:$0xf]  ;;  %v2529_v18 = vld [vmem:[%s2771_s9 + $0x3a4] sm:$0xf0]  ;;  %v2495_v22 = vld [vmem:[%s2771_s9 + $0x294] sm:$0xf0]  ;;  %v2151_v23 = vor.u32 %v2481_v15, %v2150_v14 }
  0x6f   : > { %1328 = vmatpush.bf16.msrb.mxu1 %v2239_v29  ;;  %v2142_v24 = vld [vmem:[%s2771_s9 + $0x210] sm:$0xf]  ;;  %v2479_v27 = vld [vmem:[%s2771_s9 + $0x214] sm:$0xf0]  ;;  %v2207_v30 = vor.u32 %v2495_v22, %v2206_v21  ;;  %v2262_v31 = vld [vmem:[%s2771_s9 + $0x300] sm:$0xf] }
  0x70   : > { %1347 = vmatpush.bf16.msrb.mxu2 %v2303_v25  ;;  %v2343_v25 = vor.u32 %v2529_v18, %v2342_v16  ;;  %v2334_v28 = vld [vmem:[%s2771_s9 + $0x390] sm:$0xf]  ;;  %v2527_v29 = vld [vmem:[%s2771_s9 + $0x394] sm:$0xf0]  ;;  %v2509_v32 = vld [vmem:[%s2771_s9 + $0x304] sm:$0xf0]  ;;  %v2143_v37 = vor.u32 %v2479_v27, %v2142_v24 }
  0x71   : > { %1366 = vmatpush.bf16.msrb.mxu3 %v2367_v39  ;;  %v2198_v33 = vld [vmem:[%s2771_s9 + $0x280] sm:$0xf]  ;;  %v2493_v34 = vld [vmem:[%s2771_s9 + $0x284] sm:$0xf0]  ;;  %v2458_v35 = vld [vmem:[%s2771_s9 + $0x174] sm:$0xf]  ;;  %v2335_v41 = vor.u32 %v2527_v29, %v2334_v28  ;;  %v2263_v42 = vor.u32 %v2509_v32, %v2262_v31 }
  0x72   : > { %1310 = vmatpush.bf16.msrb.mxu0 %v2167_v52  ;;  %v2064_v36 = vld [vmem:[%s2771_s9 + $0x178] sm:$0xf0]  ;;  %v2134_v38 = vld [vmem:[%s2771_s9 + $0x200] sm:$0xf]  ;;  %v2442_v39 = vld [vmem:[%s2771_s9 + $0xf4] sm:$0xf]  ;;  %v2199_v46 = vor.u32 %v2493_v34, %v2198_v33 }
  0x73   : > { %1329 = vmatpush.bf16.msrb.mxu1 %v2231_v44  ;;  %v2477_v43 = vld [vmem:[%s2771_s9 + $0x204] sm:$0xf0]  ;;  %v2326_v44 = vld [vmem:[%s2771_s9 + $0x380] sm:$0xf]  ;;  %v1830_v47 = vld [vmem:[%s2789_s30 + $0x10] sm:$0xf]  ;;  %v2067_v51 = vor.u32 %v2458_v35, %v2064_v36 }
  0x74   : > { %1348 = vmatpush.bf16.msrb.mxu2 %v2295_v40  ;;  %v2000_v40 = vld [vmem:[%s2771_s9 + $0xf8] sm:$0xf0]  ;;  %v2525_v45 = vld [vmem:[%s2771_s9 + $0x384] sm:$0xf0]  ;;  %v2402_v48 = vld [vmem:[%s2789_s30 + $0x2c] sm:$0xf0]  ;;  %v2135_v59 = vor.u32 %v2477_v43, %v2134_v38 }
  0x75   : > { %1367 = vmatpush.bf16.msrb.mxu3 %v2359_v56  ;;  %1244 = vmatmul.bf16.gmra.mxu0 %v2923_v61  ;;  %v2398_v49 = vld [vmem:[%s2789_s30 + $0x14] sm:$0xf]  ;;  %v1936_v53 = vld [vmem:[%s2771_s9 + $0x78] sm:$0xf0]  ;;  %v2003_v55 = vor.u32 %v2442_v39, %v2000_v40  ;;  %v2056_v58 = vld [vmem:[%s2771_s9 + $0x168] sm:$0xf0]  ;;  %v2327_v0 = vor.u32 %v2525_v45, %v2326_v44 }
  0x76   : > { %1263 = vmatmul.bf16.gmra.mxu1 %v2928_v3  ;;  %1311 = vmatpush.bf16.msrb.mxu0 %v2159_v11  ;;  %v1832_v50 = vld [vmem:[%s2789_s30 + $0x30] sm:$0xf0]  ;;  %v2128_v56 = vld [vmem:[%s2771_s9 + $0x1f8] sm:$0xf0]  ;;  %v1838_v60 = vld [vmem:[%s2789_s30 + $0x18] sm:$0xf] }
  0x77   : > { %1330 = vmatpush.bf16.msrb.mxu1 %v2223_v62  ;;  %1282 = vmatmul.bf16.gmra.mxu2 %v2930_v4  ;;  %v2426_v52 = vld [vmem:[%s2771_s9 + $0x74] sm:$0xf]  ;;  %v2403_v62 = vld [vmem:[%s2789_s30 + $0x34] sm:$0xf0]  ;;  %v2399_v63 = vld [vmem:[%s2789_s30 + $0x1c] sm:$0xf]  ;;  %v2985_v18 = vor.u32 %v2398_v49, %v1832_v50 }
  0x78   : > { %1349 = vmatpush.bf16.msrb.mxu2 %v2287_v57  ;;  %1301 = vmatmul.bf16.gmra.mxu3 %v2934_v9  ;;  %v2474_v54 = vld [vmem:[%s2771_s9 + $0x1f4] sm:$0xf]  ;;  %v2456_v57 = vld [vmem:[%s2771_s9 + $0x164] sm:$0xf]  ;;  %v1840_v2 = vld [vmem:[%s2789_s30 + $0x38] sm:$0xf0]  ;;  %v1939_v5 = vor.u32 %v2426_v52, %v1936_v53  ;;  %v2990_v22 = vor.u32 %v2403_v62, %v1838_v60 }
  0x79   : > { %1368 = vmatpush.bf16.msrb.mxu3 %v2351_v12  ;;  %v2424_v8 = vld [vmem:[%s2771_s9 + $0x64] sm:$0xf]  ;;  %v1928_v11 = vld [vmem:[%s2771_s9 + $0x68] sm:$0xf0]  ;;  %v2131_v12 = vor.u32 %v2474_v54, %v2128_v56  ;;  %v2454_v20 = vld [vmem:[%s2771_s9 + $0x154] sm:$0xf] }
  0x7a   : > { %1312 = vmatpush.bf16.msrb.mxu0 %v2151_v23  ;;  %v2440_v14 = vld [vmem:[%s2771_s9 + $0xe4] sm:$0xf]  ;;  %v1992_v15 = vld [vmem:[%s2771_s9 + $0xe8] sm:$0xf0]  ;;  %v2048_v21 = vld [vmem:[%s2771_s9 + $0x158] sm:$0xf0]  ;;  %v2992_v23 = vor.u32 %v2399_v63, %v1840_v2  ;;  %v1931_v24 = vor.u32 %v2424_v8, %v1928_v11 }
  0x7b   : > { %1331 = vmatpush.bf16.msrb.mxu1 %v2215_v17  ;;  %v2472_v16 = vld [vmem:[%s2771_s9 + $0x1e4] sm:$0xf]  ;;  %v2983_v17 = vor.u32 %v2402_v48, %v1830_v47  ;;  %v2120_v19 = vld [vmem:[%s2771_s9 + $0x1e8] sm:$0xf0]  ;;  %v1920_v27 = vld [vmem:[%s2771_s9 + $0x58] sm:$0xf0]  ;;  %v2051_v29 = vor.u32 %v2454_v20, %v2048_v21 }
  0x7c   : > { %1350 = vmatpush.bf16.msrb.mxu2 %v2279_v13  ;;  %v2059_v13 = vor.u32 %v2456_v57, %v2056_v58  ;;  %v2123_v28 = vor.u32 %v2472_v16, %v2120_v19  ;;  %v1984_v31 = vld [vmem:[%s2771_s9 + $0xd8] sm:$0xf0]  ;;  %v2470_v32 = vld [vmem:[%s2771_s9 + $0x1d4] sm:$0xf]  ;;  %v2452_v34 = vld [vmem:[%s2771_s9 + $0x144] sm:$0xf] }
  0x7d   : > { %1369 = vmatpush.bf16.msrb.mxu3 %v2343_v25  ;;  %v1995_v25 = vor.u32 %v2440_v14, %v1992_v15  ;;  %v2112_v33 = vld [vmem:[%s2771_s9 + $0x1d8] sm:$0xf0]  ;;  %v2040_v35 = vld [vmem:[%s2771_s9 + $0x148] sm:$0xf0]  ;;  %v2420_v38 = vld [vmem:[%s2771_s9 + $0x44] sm:$0xf] }
  0x7e   : > { %1313 = vmatpush.bf16.msrb.mxu0 %v2143_v37  ;;  %v1912_v39 = vld [vmem:[%s2771_s9 + $0x48] sm:$0xf0]  ;;  %v2115_v40 = vor.u32 %v2470_v32, %v2112_v33  ;;  %v2468_v44 = vld [vmem:[%s2771_s9 + $0x1c4] sm:$0xf]  ;;  %v2032_v47 = vld [vmem:[%s2771_s9 + $0x138] sm:$0xf0] }
  0x7f   : > { %1332 = vmatpush.bf16.msrb.mxu1 %v2207_v30  ;;  %v2438_v30 = vld [vmem:[%s2771_s9 + $0xd4] sm:$0xf]  ;;  %v1976_v43 = vld [vmem:[%s2771_s9 + $0xc8] sm:$0xf0]  ;;  %v1915_v48 = vor.u32 %v2420_v38, %v1912_v39  ;;  %v1862_v53 = vld [vmem:[%s2789_s30 + $0x50] sm:$0xf] }
  0x80   : > { %1351 = vmatpush.bf16.msrb.mxu2 %v2271_v26  ;;  %v2422_v26 = vld [vmem:[%s2771_s9 + $0x54] sm:$0xf]  ;;  %v1987_v37 = vor.u32 %v2438_v30, %v1984_v31  ;;  %v2104_v45 = vld [vmem:[%s2771_s9 + $0x1c8] sm:$0xf0]  ;;  %v2410_v54 = vld [vmem:[%s2789_s30 + $0x6c] sm:$0xf0] }
  0x81   : > { %1370 = vmatpush.bf16.msrb.mxu3 %v2335_v41  ;;  %v1923_v36 = vor.u32 %v2422_v26, %v1920_v27  ;;  %v2043_v41 = vor.u32 %v2452_v34, %v2040_v35  ;;  %v2418_v50 = vld [vmem:[%s2771_s9 + $0x34] sm:$0xf]  ;;  %v2107_v52 = vor.u32 %v2468_v44, %v2104_v45  ;;  %v2096_v62 = vld [vmem:[%s2771_s9 + $0x1b8] sm:$0xf0]  ;;  %v2448_v63 = vld [vmem:[%s2771_s9 + $0x124] sm:$0xf] }
  0x82   : > { %1314 = vmatpush.bf16.msrb.mxu0 %v2135_v59  ;;  %v1864_v56 = vld [vmem:[%s2789_s30 + $0x70] sm:$0xf0]  ;;  %v1968_v59 = vld [vmem:[%s2771_s9 + $0xb8] sm:$0xf0]  ;;  %v1870_v2 = vld [vmem:[%s2789_s30 + $0x58] sm:$0xf] }
  0x83   : > { %1333 = vmatpush.bf16.msrb.mxu1 %v2199_v46  ;;  %v2450_v46 = vld [vmem:[%s2771_s9 + $0x134] sm:$0xf]  ;;  %v2407_v8 = vld [vmem:[%s2789_s30 + $0x5c] sm:$0xf]  ;;  %v2416_v14 = vld [vmem:[%s2771_s9 + $0x24] sm:$0xf] }
  0x84   : > { %1352 = vmatpush.bf16.msrb.mxu2 %v2263_v42  ;;  %v2436_v42 = vld [vmem:[%s2771_s9 + $0xc4] sm:$0xf]  ;;  %v2035_v57 = vor.u32 %v2450_v46, %v2032_v47  ;;  %v2434_v58 = vld [vmem:[%s2771_s9 + $0xb4] sm:$0xf]  ;;  %v1872_v11 = vld [vmem:[%s2789_s30 + $0x78] sm:$0xf0] }
  0x85   : > { %1371 = vmatpush.bf16.msrb.mxu3 %v2327_v0  ;;  %1315 = vmatmul.bf16.vlgmr.msrb.gmra.mxu0 %v2983_v17  ;;  %v1979_v49 = vor.u32 %v2436_v42, %v1976_v43  ;;  %v2466_v60 = vld [vmem:[%s2771_s9 + $0x1b4] sm:$0xf]  ;;  %v2024_v0 = vld [vmem:[%s2771_s9 + $0x128] sm:$0xf0]  ;;  %v2432_v20 = vld [vmem:[%s2771_s9 + $0xa4] sm:$0xf]  ;;  %v3044_v31 = vor.u32 %v2407_v8, %v1872_v11 }
  0x86   : > { %1383 = vmatpush.bf16.msra.mxu0 %v1939_v5  ;;  %1334 = vmatmul.bf16.vlgmr.msrb.gmra.mxu1 %v2985_v18  ;;  %v2411_v5 = vld [vmem:[%s2789_s30 + $0x74] sm:$0xf0]  ;;  %v1896_v15 = vld [vmem:[%s2771_s9 + $0x28] sm:$0xf0]  ;;  %v2099_v16 = vor.u32 %v2466_v60, %v2096_v62  ;;  %v2027_v19 = vor.u32 %v2448_v63, %v2024_v0  ;;  %v2414_v34 = vld [vmem:[%s2771_s9 + $0x14] sm:$0xf] }
  0x87   : > { %1402 = vmatpush.bf16.msra.mxu1 %v2003_v55  ;;  %1353 = vmatmul.bf16.vlgmr.msrb.gmra.mxu2 %v2990_v22  ;;  %v2406_v55 = vld [vmem:[%s2789_s30 + $0x54] sm:$0xf]  ;;  %v1960_v21 = vld [vmem:[%s2771_s9 + $0xa8] sm:$0xf0]  ;;  %v3042_v30 = vor.u32 %v2411_v5, %v1870_v2  ;;  %v1899_v32 = vor.u32 %v2416_v14, %v1896_v15  ;;  %v1888_v35 = vld [vmem:[%s2771_s9 + $0x18] sm:$0xf0] }
  0x88   : > { %1421 = vmatpush.bf16.msra.mxu2 %v2067_v51  ;;  %1372 = vmatmul.bf16.vlgmr.msrb.gmra.mxu3 %v2992_v23  ;;  %v1904_v51 = vld [vmem:[%s2771_s9 + $0x38] sm:$0xf0]  ;;  %v3037_v26 = vor.u32 %v2406_v55, %v1864_v56  ;;  %v2088_v27 = vld [vmem:[%s2771_s9 + $0x1a8] sm:$0xf0]  ;;  %v1963_v33 = vor.u32 %v2432_v20, %v1960_v21  ;;  %v2430_v38 = vld [vmem:[%s2771_s9 + $0x94] sm:$0xf]  ;;  %v1891_v46 = vor.u32 %v2414_v34, %v1888_v35 }
  0x89   : > { %1440 = vmatpush.bf16.msra.mxu3 %v2131_v12  ;;  %v1907_v12 = vor.u32 %v2418_v50, %v1904_v51  ;;  %v1952_v39 = vld [vmem:[%s2771_s9 + $0x98] sm:$0xf0]  ;;  %v2444_v42 = vld [vmem:[%s2771_s9 + $0x104] sm:$0xf]  ;;  %v2008_v43 = vld [vmem:[%s2771_s9 + $0x108] sm:$0xf0] }
  0x8a   : > { %1384 = vmatpush.bf16.msra.mxu0 %v1931_v24  ;;  %v2464_v24 = vld [vmem:[%s2771_s9 + $0x1a4] sm:$0xf]  ;;  %v2522_v44 = vld [vmem:[%s2771_s9 + $0x374] sm:$0xf]  ;;  %v2320_v45 = vld [vmem:[%s2771_s9 + $0x378] sm:$0xf0]  ;;  %v1955_v47 = vor.u32 %v2430_v38, %v1952_v39 }
  0x8b   : > { %1403 = vmatpush.bf16.msra.mxu1 %v1995_v25  ;;  %v3035_v25 = vor.u32 %v2410_v54, %v1862_v53  ;;  %v2428_v50 = vld [vmem:[%s2771_s9 + $0x84] sm:$0xf]  ;;  %v1944_v53 = vld [vmem:[%s2771_s9 + $0x88] sm:$0xf0]  ;;  %v2323_v56 = vor.u32 %v2522_v44, %v2320_v45  ;;  %v2256_v60 = vld [vmem:[%s2771_s9 + $0x2f8] sm:$0xf0] }
  0x8c   : > { %1422 = vmatpush.bf16.msra.mxu2 %v2059_v13  ;;  %v1971_v13 = vor.u32 %v2434_v58, %v1968_v59  ;;  %v2460_v54 = vld [vmem:[%s2771_s9 + $0x184] sm:$0xf]  ;;  %v2072_v55 = vld [vmem:[%s2771_s9 + $0x188] sm:$0xf0]  ;;  %v2192_v58 = vld [vmem:[%s2771_s9 + $0x278] sm:$0xf0]  ;;  %v1947_v2 = vor.u32 %v2428_v50, %v1944_v53 }
  0x8d   : > { %1441 = vmatpush.bf16.msra.mxu3 %v2123_v28  ;;  %v2446_v28 = vld [vmem:[%s2771_s9 + $0x114] sm:$0xf]  ;;  %v2384_v63 = vld [vmem:[%s2771_s9 + $0x3f8] sm:$0xf0]  ;;  %v2520_v5 = vld [vmem:[%s2771_s9 + $0x364] sm:$0xf]  ;;  %v2075_v11 = vor.u32 %v2460_v54, %v2072_v55 }
  0x8e   : > { %1385 = vmatpush.bf16.msra.mxu0 %v1923_v36  ;;  %v2091_v36 = vor.u32 %v2464_v24, %v2088_v27  ;;  %v2506_v59 = vld [vmem:[%s2771_s9 + $0x2f4] sm:$0xf]  ;;  %v2312_v8 = vld [vmem:[%s2771_s9 + $0x368] sm:$0xf0]  ;;  %v2488_v15 = vld [vmem:[%s2771_s9 + $0x264] sm:$0xf] }
  0x8f   : > { %1404 = vmatpush.bf16.msra.mxu1 %v1987_v37  ;;  %v2538_v62 = vld [vmem:[%s2771_s9 + $0x3f4] sm:$0xf]  ;;  %v2504_v20 = vld [vmem:[%s2771_s9 + $0x2e4] sm:$0xf]  ;;  %v2248_v21 = vld [vmem:[%s2771_s9 + $0x2e8] sm:$0xf0] }
  0x90   : > { %1423 = vmatpush.bf16.msra.mxu2 %v2051_v29  ;;  %v2016_v29 = vld [vmem:[%s2771_s9 + $0x118] sm:$0xf0]  ;;  %v2387_v14 = vor.u32 %v2538_v62, %v2384_v63  ;;  %v2536_v27 = vld [vmem:[%s2771_s9 + $0x3e4] sm:$0xf]  ;;  %v2251_v35 = vor.u32 %v2504_v20, %v2248_v21  ;;  %v2296_v44 = vld [vmem:[%s2771_s9 + $0x348] sm:$0xf0] }
  0x91   : > { %1442 = vmatpush.bf16.msra.mxu3 %v2115_v40  ;;  %v2019_v37 = vor.u32 %v2446_v28, %v2016_v29  ;;  %v2462_v40 = vld [vmem:[%s2771_s9 + $0x194] sm:$0xf]  ;;  %v2376_v28 = vld [vmem:[%s2771_s9 + $0x3e8] sm:$0xf0]  ;;  %v2176_v34 = vld [vmem:[%s2771_s9 + $0x258] sm:$0xf0] }
  0x92   : > { %1386 = vmatpush.bf16.msra.mxu0 %v1915_v48  ;;  %v2412_v48 = vld [vmem:[%s2771_s9 + $0x4] sm:$0xf]  ;;  %v2518_v29 = vld [vmem:[%s2771_s9 + $0x354] sm:$0xf]  ;;  %v2240_v38 = vld [vmem:[%s2771_s9 + $0x2d8] sm:$0xf0] }
  0x93   : > { %1405 = vmatpush.bf16.msra.mxu1 %v1979_v49  ;;  %v1880_v49 = vld [vmem:[%s2771_s9 + $0x8] sm:$0xf0]  ;;  %v2484_v45 = vld [vmem:[%s2771_s9 + $0x244] sm:$0xf]  ;;  %v2482_v53 = vld [vmem:[%s2771_s9 + $0x234] sm:$0xf] }
  0x94   : > { %1424 = vmatpush.bf16.msra.mxu2 %v2043_v41  ;;  %v2080_v41 = vld [vmem:[%s2771_s9 + $0x198] sm:$0xf0]  ;;  %v1883_v0 = vor.u32 %v2412_v48, %v1880_v49  ;;  %v2530_v62 = vld [vmem:[%s2771_s9 + $0x3b4] sm:$0xf]  ;;  %v2344_v20 = vld [vmem:[%s2771_s9 + $0x3a8] sm:$0xf0] }
  0x95   : > { %1443 = vmatpush.bf16.msra.mxu3 %v2107_v52  ;;  %1320 = vmatmul.bf16.gmra.mxu0 %v3035_v25  ;;  %v2083_v51 = vor.u32 %v2462_v40, %v2080_v41  ;;  %v2011_v52 = vor.u32 %v2444_v42, %v2008_v43  ;;  %v2534_v41 = vld [vmem:[%s2771_s9 + $0x3d4] sm:$0xf]  ;;  %v2368_v42 = vld [vmem:[%s2771_s9 + $0x3d8] sm:$0xf0]  ;;  %v2516_v43 = vld [vmem:[%s2771_s9 + $0x344] sm:$0xf] }
  0x96   : > { %1387 = vmatpush.bf16.msra.mxu0 %v1907_v12  ;;  %1339 = vmatmul.bf16.gmra.mxu1 %v3037_v26  ;;  %v2371_v48 = vor.u32 %v2534_v41, %v2368_v42  ;;  %v2299_v49 = vor.u32 %v2516_v43, %v2296_v44  ;;  %v2160_v54 = vld [vmem:[%s2771_s9 + $0x238] sm:$0xf0]  ;;  %v2510_v21 = vld [vmem:[%s2771_s9 + $0x314] sm:$0xf]  ;;  %v2476_v41 = vld [vmem:[%s2771_s9 + $0x204] sm:$0xf] }
  0x97   : > { %1406 = vmatpush.bf16.msra.mxu1 %v1971_v13  ;;  %1358 = vmatmul.bf16.gmra.mxu2 %v3042_v30  ;;  %v2259_v13 = vor.u32 %v2506_v59, %v2256_v60  ;;  %v2163_v60 = vor.u32 %v2482_v53, %v2160_v54  ;;  %v2352_v63 = vld [vmem:[%s2771_s9 + $0x3b8] sm:$0xf0]  ;;  %v2136_v42 = vld [vmem:[%s2771_s9 + $0x208] sm:$0xf0]  ;;  %p2388_p0 = scmp.ne.s32.totalorder %s2635_s20, 1 }
  0x98   : > { %1425 = vmatpush.bf16.msra.mxu2 %v2035_v57  ;;  %1377 = vmatmul.bf16.gmra.mxu3 %v3044_v31  ;;  %v2490_v57 = vld [vmem:[%s2771_s9 + $0x274] sm:$0xf] }
  0x99   : > { %1444 = vmatpush.bf16.msra.mxu3 %v2099_v16  ;;  %v2195_v12 = vor.u32 %v2490_v57, %v2192_v58  ;;  %v2184_v16 = vld [vmem:[%s2771_s9 + $0x268] sm:$0xf0]  ;;  %v2498_v57 = vld [vmem:[%s2771_s9 + $0x2b4] sm:$0xf]  ;;  %v2224_v58 = vld [vmem:[%s2771_s9 + $0x2b8] sm:$0xf0] }
  0x9a   : > { %1388 = vmatpush.bf16.msra.mxu0 %v1899_v32  ;;  %v2187_v24 = vor.u32 %v2488_v15, %v2184_v16  ;;  %v2304_v32 = vld [vmem:[%s2771_s9 + $0x358] sm:$0xf0] }
  0x9b   : > { %1407 = vmatpush.bf16.msra.mxu1 %v1963_v33  ;;  %v2486_v33 = vld [vmem:[%s2771_s9 + $0x254] sm:$0xf]  ;;  %v2307_v39 = vor.u32 %v2518_v29, %v2304_v32 }
  0x9c   : > { %1426 = vmatpush.bf16.msra.mxu2 %v2027_v19  ;;  %v2315_v19 = vor.u32 %v2520_v5, %v2312_v8  ;;  %v2179_v40 = vor.u32 %v2486_v33, %v2176_v34  ;;  %v2480_v5 = vld [vmem:[%s2771_s9 + $0x224] sm:$0xf]  ;;  %v2152_v8 = vld [vmem:[%s2771_s9 + $0x228] sm:$0xf0]  ;;  %v2494_v33 = vld [vmem:[%s2771_s9 + $0x294] sm:$0xf] }
  0x9d   : > { %1445 = vmatpush.bf16.msra.mxu3 %v2091_v36  ;;  %v2379_v36 = vor.u32 %v2536_v27, %v2376_v28  ;;  %v2155_v16 = vor.u32 %v2480_v5, %v2152_v8  ;;  %v2478_v27 = vld [vmem:[%s2771_s9 + $0x214] sm:$0xf]  ;;  %v2144_v28 = vld [vmem:[%s2771_s9 + $0x218] sm:$0xf0] }
  0x9e   : > { %1389 = vmatpush.bf16.msra.mxu0 %v1891_v46  ;;  %v2168_v46 = vld [vmem:[%s2771_s9 + $0x248] sm:$0xf0]  ;;  %v2208_v34 = vld [vmem:[%s2771_s9 + $0x298] sm:$0xf0] }
  0x9f   : > { %1408 = vmatpush.bf16.msra.mxu1 %v1955_v47  ;;  %v2171_v50 = vor.u32 %v2484_v45, %v2168_v46  ;;  %v2211_v43 = vor.u32 %v2494_v33, %v2208_v34  ;;  %v2492_v45 = vld [vmem:[%s2771_s9 + $0x284] sm:$0xf]  ;;  %v2139_v46 = vor.u32 %v2476_v41, %v2136_v42  ;;  %v361_v33 = vld [vmem:[#allocation2 + $0x18] sm:$0xff] }
  0xa0   : > { %1427 = vmatpush.bf16.msra.mxu2 %v2019_v37  ;;  %v2502_v37 = vld [vmem:[%s2771_s9 + $0x2d4] sm:$0xf] }
  0xa1   : > { %1446 = vmatpush.bf16.msra.mxu3 %v2083_v51  ;;  %v2243_v47 = vor.u32 %v2502_v37, %v2240_v38  ;;  %v2532_v51 = vld [vmem:[%s2771_s9 + $0x3c4] sm:$0xf]  ;;  %v2526_v37 = vld [vmem:[%s2771_s9 + $0x394] sm:$0xf]  ;;  %v2336_v38 = vld [vmem:[%s2771_s9 + $0x398] sm:$0xf0] }
  0xa2   : > { %1390 = vmatpush.bf16.msra.mxu0 %v1883_v0  ;;  %v2512_v0 = vld [vmem:[%s2771_s9 + $0x324] sm:$0xf]  ;;  %v2339_v44 = vor.u32 %v2526_v37, %v2336_v38 }
  0xa3   : > { %1409 = vmatpush.bf16.msra.mxu1 %v1947_v2  ;;  %v2280_v2 = vld [vmem:[%s2771_s9 + $0x328] sm:$0xf0] }
  0xa4   : > { %1428 = vmatpush.bf16.msra.mxu2 %v2011_v52  ;;  %v2360_v52 = vld [vmem:[%s2771_s9 + $0x3c8] sm:$0xf0]  ;;  %v2283_v15 = vor.u32 %v2512_v0, %v2280_v2 }
  0xa5   : > { %1447 = vmatpush.bf16.msra.mxu3 %v2075_v11  ;;  %1391 = vmatmul.bf16.vlgmr.msra.gmra.mxu0 %v2871_v1  ;;  %v2500_v1 = vld [vmem:[%s2771_s9 + $0x2c4] sm:$0xf]  ;;  %v2227_v11 = vor.u32 %v2498_v57, %v2224_v58 }
  0xa6   : > { %1459 = vmatpush.bf16.msrb.mxu0 %v2195_v12  ;;  %1410 = vmatmul.bf16.vlgmr.msra.gmra.mxu1 %v2876_v6  ;;  %v2232_v6 = vld [vmem:[%s2771_s9 + $0x2c8] sm:$0xf0]  ;;  %v2355_v12 = vor.u32 %v2530_v62, %v2352_v63 }
  0xa7   : > { %1478 = vmatpush.bf16.msrb.mxu1 %v2259_v13  ;;  %1429 = vmatmul.bf16.vlgmr.msra.gmra.mxu2 %v2878_v7  ;;  %v2514_v7 = vld [vmem:[%s2771_s9 + $0x334] sm:$0xf]  ;;  %v2235_v55 = vor.u32 %v2500_v1, %v2232_v6  ;;  %v2496_v13 = vld [vmem:[%s2771_s9 + $0x2a4] sm:$0xf] }
  0xa8   : > { %1497 = vmatpush.bf16.msrb.mxu2 %v2323_v56  ;;  %1448 = vmatmul.bf16.vlgmr.msra.gmra.mxu3 %v2882_v10  ;;  %v2288_v10 = vld [vmem:[%s2771_s9 + $0x338] sm:$0xf0]  ;;  %v2363_v56 = vor.u32 %v2532_v51, %v2360_v52 }
  0xa9   : > { %1516 = vmatpush.bf16.msrb.mxu3 %v2387_v14  ;;  %v2291_v59 = vor.u32 %v2514_v7, %v2288_v10  ;;  %v2216_v14 = vld [vmem:[%s2771_s9 + $0x2a8] sm:$0xf0] }
  0xaa   : > { %1460 = vmatpush.bf16.msrb.mxu0 %v2187_v24  ;;  %v2272_v24 = vld [vmem:[%s2771_s9 + $0x318] sm:$0xf0]  ;;  %v2219_v29 = vor.u32 %v2496_v13, %v2216_v14 }
  0xab   : > { %1479 = vmatpush.bf16.msrb.mxu1 %v2251_v35  ;;  %v2275_v35 = vor.u32 %v2510_v21, %v2272_v24 }
  0xac   : > { %1498 = vmatpush.bf16.msrb.mxu2 %v2315_v19  ;;  %v2528_v19 = vld [vmem:[%s2771_s9 + $0x3a4] sm:$0xf] }
  0xad   : > { %1517 = vmatpush.bf16.msrb.mxu3 %v2379_v36  ;;  %v2347_v32 = vor.u32 %v2528_v19, %v2344_v20  ;;  %v2147_v36 = vor.u32 %v2478_v27, %v2144_v28 }
  0xae   : > { %1461 = vmatpush.bf16.msrb.mxu0 %v2179_v40  ;;  %v2264_v40 = vld [vmem:[%s2771_s9 + $0x308] sm:$0xf0] }
  0xaf   : > { %1480 = vmatpush.bf16.msrb.mxu1 %v2243_v47  ;;  %v2200_v47 = vld [vmem:[%s2771_s9 + $0x288] sm:$0xf0] }
  0xb0   : > { %1499 = vmatpush.bf16.msrb.mxu2 %v2307_v39  ;;  %v2508_v39 = vld [vmem:[%s2771_s9 + $0x304] sm:$0xf]  ;;  %v2203_v1 = vor.u32 %v2492_v45, %v2200_v47 }
  0xb1   : > { %1518 = vmatpush.bf16.msrb.mxu3 %v2371_v48  ;;  %v2328_v48 = vld [vmem:[%s2771_s9 + $0x388] sm:$0xf0] }
  0xb2   : > { %1462 = vmatpush.bf16.msrb.mxu0 %v2171_v50 }
  0xb3   : > { %1481 = vmatpush.bf16.msrb.mxu1 %v2235_v55 }
  0xb4   : > { %1500 = vmatpush.bf16.msrb.mxu2 %v2299_v49 }
  0xb5   : > { %1519 = vmatpush.bf16.msrb.mxu3 %v2363_v56  ;;  %1396 = vmatmul.bf16.gmra.mxu0 %v2923_v61  ;;  %v2267_v61 = vor.u32 %v2508_v39, %v2264_v40 }
  0xb6   : > { %1463 = vmatpush.bf16.msrb.mxu0 %v2163_v60  ;;  %1415 = vmatmul.bf16.gmra.mxu1 %v2928_v3  ;;  %v2524_v3 = vld [vmem:[%s2771_s9 + $0x384] sm:$0xf] }
  0xb7   : > { %1482 = vmatpush.bf16.msrb.mxu1 %v2227_v11  ;;  %1434 = vmatmul.bf16.gmra.mxu2 %v2930_v4  ;;  %v2331_v6 = vor.u32 %v2524_v3, %v2328_v48 }
  0xb8   : > { %1501 = vmatpush.bf16.msrb.mxu2 %v2291_v59  ;;  %1453 = vmatmul.bf16.gmra.mxu3 %v2934_v9 }
  0xb9   : > { %1520 = vmatpush.bf16.msrb.mxu3 %v2355_v12  ;;  %v359_v12 = vld [vmem:[#allocation2 + $0x30] sm:$0xff] }
  0xba   : > { %1464 = vmatpush.bf16.msrb.mxu0 %v2155_v16 }
  0xbb   : > { %1483 = vmatpush.bf16.msrb.mxu1 %v2219_v29 }
  0xbc   : > { %1502 = vmatpush.bf16.msrb.mxu2 %v2283_v15 }
  0xbd   : > { %1521 = vmatpush.bf16.msrb.mxu3 %v2347_v32 }
  0xbe   : > { %1465 = vmatpush.bf16.msrb.mxu0 %v2147_v36 }
  0xbf   : > { %1484 = vmatpush.bf16.msrb.mxu1 %v2211_v43 }
  0xc0   : > { %1503 = vmatpush.bf16.msrb.mxu2 %v2275_v35 }
  0xc1   : > { %1522 = vmatpush.bf16.msrb.mxu3 %v2339_v44 }
  0xc2   : > { %1466 = vmatpush.bf16.msrb.mxu0 %v2139_v46 }
  0xc3   : > { %1485 = vmatpush.bf16.msrb.mxu1 %v2203_v1 }
  0xc4   : > { %1504 = vmatpush.bf16.msrb.mxu2 %v2267_v61  ;;  %v363_v61 = vld [vmem:[#allocation2 + $0x8] sm:$0xff] }
  0xc5   : > { %1523 = vmatpush.bf16.msrb.mxu3 %v2331_v6  ;;  %1467 = vmatmul.bf16.vlgmr.msrb.gmra.mxu0 %v2983_v17 }
  0xc6   : > { %1486 = vmatmul.bf16.vlgmr.msrb.gmra.mxu1 %v2985_v18 }
  0xc7   : > { %1505 = vmatmul.bf16.vlgmr.msrb.gmra.mxu2 %v2990_v22 }
  0xc8   : > { %1524 = vmatmul.bf16.vlgmr.msrb.gmra.mxu3 %v2992_v23 }
  0xd5   : > { %1472 = vmatmul.bf16.gmra.mxu0 %v3035_v25 }
  0xd6   : > { %1491 = vmatmul.bf16.gmra.mxu1 %v3037_v26 }
  0xd7   : > { %1510 = vmatmul.bf16.gmra.mxu2 %v3042_v30 }
  0xd8   : > { %1529 = vmatmul.bf16.gmra.mxu3 %v3044_v31 }
  0xe2   : > { %v1240_v4 = vpop.f32.mrf.mxu0 }
  0xe3   : > { %v1259_v9 = vpop.f32.mrf.mxu1 }
  0xe4   : > { %v1260_v54 = vadd.f32 %v1259_v9, %v1240_v4 }
  0xea   : > { %v1278_v49 = vpop.f32.mrf.mxu2  ;;  %v1242_v51 = vpop.f32.mrf.mxu0 }
  0xeb   : > { %v1297_v50 = vpop.f32.mrf.mxu3  ;;  %v1261_v17 = vpop.f32.mrf.mxu1  ;;  %v1279_v26 = vadd.f32 %v1278_v49, %v1260_v54 }
  0xec   : > { %v1262_v58 = vadd.f32 %v1261_v17, %v1242_v51 }
  0xed   : > { %v1298_v56 = vadd.f32 %v1297_v50, %v1279_v26  ;;  %v365_v50 = vld [vmem:[#allocation2 + $0x28] sm:$0xff] }
  0xf2   : > { %v1280_v52 = vpop.f32.mrf.mxu2  ;;  %v1245_v7 = vpop.f32.mrf.mxu0 }
  0xf3   : > { %v1299_v18 = vpop.f32.mrf.mxu3  ;;  %v1264_v22 = vpop.f32.mrf.mxu1  ;;  %v1281_v60 = vadd.f32 %v1280_v52, %v1262_v58 }
  0xf4   : > { %v1265_v13 = vadd.f32 %v1264_v22, %v1245_v7 }
  0xf5   : > { %v1300_v2 = vadd.f32 %v1299_v18, %v1281_v60 }
  0xfa   : > { %v1283_v10 = vpop.f32.mrf.mxu2  ;;  %v1247_v53 = vpop.f32.mrf.mxu0 }
  0xfb   : > { %v1302_v23 = vpop.f32.mrf.mxu3  ;;  %v1266_v25 = vpop.f32.mrf.mxu1  ;;  %v1284_v16 = vadd.f32 %v1283_v10, %v1265_v13 }
  0xfc   : > { %v1267_v34 = vadd.f32 %v1266_v25, %v1247_v53 }
  0xfd   : > { %v1303_v27 = vadd.f32 %v1302_v23, %v1284_v16 }
 0x102   : > { %v1285_v55 = vpop.f32.mrf.mxu2  ;;  %v1316_v31 = vpop.f32.mrf.mxu0 }
 0x103   : > { %v1304_v30 = vpop.f32.mrf.mxu3  ;;  %v1335_v57 = vpop.f32.mrf.mxu1  ;;  %v1317_v59 = vadd.f32 %v1316_v31, %v1298_v56  ;;  %v1286_v37 = vadd.f32 %v1285_v55, %v1267_v34 }
 0x105   : > { %v1336_v62 = vadd.f32 %v1335_v57, %v1317_v59  ;;  %v1305_v42 = vadd.f32 %v1304_v30, %v1286_v37 }
 0x10a   : > { %v1354_v63 = vpop.f32.mrf.mxu2  ;;  %v1318_v8 = vpop.f32.mrf.mxu0 }
 0x10b   : > { %v1373_v0 = vpop.f32.mrf.mxu3  ;;  %v1355_v5 = vadd.f32 %v1354_v63, %v1336_v62  ;;  %v1337_v11 = vpop.f32.mrf.mxu1  ;;  %v1319_v15 = vadd.f32 %v1318_v8, %v1300_v2 }
 0x10d   : > { %v1374_v14 = vadd.f32 %v1373_v0, %v1355_v5  ;;  %v1338_v20 = vadd.f32 %v1337_v11, %v1319_v15  ;;  %v360_v15 = vld [vmem:[#allocation2] sm:$0xff] }
 0x10f   : > { %v1535_v19 = vadd.f32 %v1374_v14, %v359_v12 }
 0x111   : > { %1543 = vst [vmem:[#allocation2 + $0x30] sm:$0xff] %v1535_v19 }
 0x112   : > { %v1356_v21 = vpop.f32.mrf.mxu2  ;;  %v1321_v29 = vpop.f32.mrf.mxu0 }
 0x113   : > { %v1375_v24 = vpop.f32.mrf.mxu3  ;;  %v1357_v28 = vadd.f32 %v1356_v21, %v1338_v20  ;;  %v1340_v32 = vpop.f32.mrf.mxu1  ;;  %v1322_v36 = vadd.f32 %v1321_v29, %v1303_v27 }
 0x115   : > { %v1376_v35 = vadd.f32 %v1375_v24, %v1357_v28  ;;  %v1341_v39 = vadd.f32 %v1340_v32, %v1322_v36  ;;  %v362_v36 = vld [vmem:[#allocation2 + $0x10] sm:$0xff] }
 0x117   : > { %v1537_v38 = vadd.f32 %v1376_v35, %v361_v33 }
 0x119   : > { %1545 = vst [vmem:[#allocation2 + $0x18] sm:$0xff] %v1537_v38 }
 0x11a   : > { %v1359_v40 = vpop.f32.mrf.mxu2  ;;  %v1323_v44 = vpop.f32.mrf.mxu0 }
 0x11b   : > { %v1378_v41 = vpop.f32.mrf.mxu3  ;;  %v1360_v43 = vadd.f32 %v1359_v40, %v1341_v39  ;;  %v1342_v45 = vpop.f32.mrf.mxu1  ;;  %v1324_v47 = vadd.f32 %v1323_v44, %v1305_v42 }
 0x11d   : > { %v1379_v46 = vadd.f32 %v1378_v41, %v1360_v43  ;;  %v1343_v48 = vadd.f32 %v1342_v45, %v1324_v47 }
 0x11f   : > { %v1539_v3 = vadd.f32 %v1379_v46, %v363_v61 }
 0x121   : > { %1547 = vst [vmem:[#allocation2 + $0x8] sm:$0xff] %v1539_v3  ;;  %v364_v3 = vld [vmem:[#allocation2 + $0x20] sm:$0xff] }
 0x122   : > { %v1361_v1 = vpop.f32.mrf.mxu2  ;;  %v1392_v9 = vpop.f32.mrf.mxu0 }
 0x123   : > { %v1380_v6 = vpop.f32.mrf.mxu3  ;;  %v1362_v4 = vadd.f32 %v1361_v1, %v1343_v48  ;;  %v1411_v49 = vpop.f32.mrf.mxu1 }
 0x124   : > { %v1412_v56 = vadd.f32 %v1411_v49, %v1392_v9 }
 0x125   : > { %v1381_v51 = vadd.f32 %v1380_v6, %v1362_v4 }
 0x127   : > { %v1541_v17 = vadd.f32 %v1381_v51, %v365_v50  ;;  %v366_v51 = vld [vmem:[#allocation2 + $0x38] sm:$0xff] }
 0x129   : > { %1549 = vst [vmem:[#allocation2 + $0x28] sm:$0xff] %v1541_v17 }
 0x12a   : > { %v1430_v52 = vpop.f32.mrf.mxu2  ;;  %v1394_v7 = vpop.f32.mrf.mxu0 }
 0x12b   : > { %v1449_v18 = vpop.f32.mrf.mxu3  ;;  %v1413_v22 = vpop.f32.mrf.mxu1  ;;  %v1431_v31 = vadd.f32 %v1430_v52, %v1412_v56 }
 0x12c   : > { %v1414_v63 = vadd.f32 %v1413_v22, %v1394_v7 }
 0x12d   : > { %v1450_v59 = vadd.f32 %v1449_v18, %v1431_v31 }
 0x132   : > { %v1432_v10 = vpop.f32.mrf.mxu2  ;;  %v1397_v53 = vpop.f32.mrf.mxu0 }
 0x133   : > { %v1451_v23 = vpop.f32.mrf.mxu3  ;;  %v1416_v25 = vpop.f32.mrf.mxu1  ;;  %v1433_v2 = vadd.f32 %v1432_v10, %v1414_v63 }
 0x134   : > { %v1417_v19 = vadd.f32 %v1416_v25, %v1397_v53 }
 0x135   : > { %v1452_v12 = vadd.f32 %v1451_v23, %v1433_v2 }
 0x13a   : > { %v1435_v54 = vpop.f32.mrf.mxu2  ;;  %v1399_v55 = vpop.f32.mrf.mxu0 }
 0x13b   : > { %v1454_v26 = vpop.f32.mrf.mxu3  ;;  %v1418_v30 = vpop.f32.mrf.mxu1  ;;  %v1436_v24 = vadd.f32 %v1435_v54, %v1417_v19 }
 0x13c   : > { %v1419_v37 = vadd.f32 %v1418_v30, %v1399_v55 }
 0x13d   : > { %v1455_v33 = vadd.f32 %v1454_v26, %v1436_v24 }
 0x142   : > { %v1437_v57 = vpop.f32.mrf.mxu2  ;;  %v1468_v60 = vpop.f32.mrf.mxu0 }
 0x143   : > { %v1456_v58 = vpop.f32.mrf.mxu3  ;;  %v1487_v62 = vpop.f32.mrf.mxu1  ;;  %v1469_v0 = vadd.f32 %v1468_v60, %v1450_v59  ;;  %v1438_v41 = vadd.f32 %v1437_v57, %v1419_v37 }
 0x145   : > { %v1488_v5 = vadd.f32 %v1487_v62, %v1469_v0  ;;  %v1457_v61 = vadd.f32 %v1456_v58, %v1438_v41 }
 0x14a   : > { %v1506_v8 = vpop.f32.mrf.mxu2  ;;  %v1470_v14 = vpop.f32.mrf.mxu0 }
 0x14b   : > { %v1525_v11 = vpop.f32.mrf.mxu3  ;;  %v1507_v13 = vadd.f32 %v1506_v8, %v1488_v5  ;;  %v1489_v16 = vpop.f32.mrf.mxu1  ;;  %v1471_v21 = vadd.f32 %v1470_v14, %v1452_v12 }
 0x14d   : > { %v1526_v20 = vadd.f32 %v1525_v11, %v1507_v13  ;;  %v1490_v28 = vadd.f32 %v1489_v16, %v1471_v21 }
 0x14f   : > { %v1536_v27 = vadd.f32 %v1526_v20, %v360_v15 }
 0x151   : > { %1544 = vst [vmem:[#allocation2] sm:$0xff] %v1536_v27 }
 0x152   : > { %v1508_v29 = vpop.f32.mrf.mxu2  ;;  %v1473_v35 = vpop.f32.mrf.mxu0 }
 0x153   : > { %v1527_v32 = vpop.f32.mrf.mxu3  ;;  %v1509_v34 = vadd.f32 %v1508_v29, %v1490_v28  ;;  %v1474_v39 = vadd.f32 %v1473_v35, %v1455_v33  ;;  %v1492_v40 = vpop.f32.mrf.mxu1 }
 0x155   : > { %v1528_v38 = vadd.f32 %v1527_v32, %v1509_v34  ;;  %v1493_v43 = vadd.f32 %v1492_v40, %v1474_v39 }
 0x157   : > { %v1538_v42 = vadd.f32 %v1528_v38, %v362_v36 }
 0x159   : > { %1546 = vst [vmem:[#allocation2 + $0x10] sm:$0xff] %v1538_v42 }
 0x15a   : > { %v1511_v44 = vpop.f32.mrf.mxu2  ;;  %v1475_v47 = vpop.f32.mrf.mxu0 }
 0x15b   : > { %v1530_v45 = vpop.f32.mrf.mxu3  ;;  %v1512_v46 = vadd.f32 %v1511_v44, %v1493_v43  ;;  %v1476_v1 = vadd.f32 %v1475_v47, %v1457_v61  ;;  %v1494_v4 = vpop.f32.mrf.mxu1 }
 0x15d   : > { %v1531_v48 = vadd.f32 %v1530_v45, %v1512_v46  ;;  %v1495_v9 = vadd.f32 %v1494_v4, %v1476_v1 }
 0x15f   : > { %v1540_v6 = vadd.f32 %v1531_v48, %v364_v3 }
 0x161   : > { %1548 = vst [vmem:[#allocation2 + $0x20] sm:$0xff] %v1540_v6 }
 0x162   : > { %v1513_v49 = vpop.f32.mrf.mxu2 }
 0x163   : > { %v1514_v50 = vadd.f32 %v1513_v49, %v1495_v9  ;;  %v1532_v17 = vpop.f32.mrf.mxu3 }
 0x165   : > { %v1533_v52 = vadd.f32 %v1532_v17, %v1514_v50  ;;  %1554 = sbr.rel (%p2388_p0) target bundleno = 386 (0x182), region = 63 }
 0x167   : > { %v1542_v18 = vadd.f32 %v1533_v52, %v366_v51 }
 0x169   : > { %1550 = vst [vmem:[#allocation2 + $0x38] sm:$0xff] %v1542_v18 }
 0x16a   : > { %v1555_v7 = vld [vmem:[#allocation2 + $0x30] sm:$0xff]  ;;  %v1557_v22 = vld [vmem:[#allocation2 + $0x18] sm:$0xff]  ;;  %v1559_v10 = vld [vmem:[#allocation2 + $0x8] sm:$0xff] }
 0x16b   : > { %v1561_v23 = vld [vmem:[#allocation2 + $0x28] sm:$0xff]  ;;  %v1563_v53 = vadd.f32 %v1557_v22, %v1555_v7  ;;  %v1556_v25 = vld [vmem:[#allocation2] sm:$0xff]  ;;  %v1558_v54 = vld [vmem:[#allocation2 + $0x10] sm:$0xff]  ;;  %v1581_v26 = vmul.f32 %v1555_v7, %v1555_v7  ;;  %v1583_v55 = vmul.f32 %v1557_v22, %v1557_v22  ;;  %v1585_v30 = vmul.f32 %v1559_v10, %v1559_v10 }
 0x16c   : > { %v1560_v56 = vld [vmem:[#allocation2 + $0x20] sm:$0xff]  ;;  %v1572_v57 = vadd.f32 %v1558_v54, %v1556_v25  ;;  %v1587_v58 = vmul.f32 %v1561_v23, %v1561_v23  ;;  %v1582_v59 = vmul.f32 %v1556_v25, %v1556_v25  ;;  %v1584_v60 = vmul.f32 %v1558_v54, %v1558_v54 }
 0x16d   : > { %v1611_v62 = vld [vmem:[%s3183_s2] sm:$0x3]  ;;  %v1564_v63 = vadd.f32 %v1563_v53, %v1559_v10  ;;  %v1589_v0 = vadd.f32 %v1583_v55, %v1581_v26  ;;  %v1586_v2 = vmul.f32 %v1560_v56, %v1560_v56 }
 0x16e   : > { %v1573_v8 = vadd.f32 %v1572_v57, %v1560_v56  ;;  %v1598_v11 = vadd.f32 %v1584_v60, %v1582_v59  ;;  %v1613_v12 = vperm.slane %v1611_v62, 0  ;;  %v1614_v13 = vperm.slane %v1611_v62, 1 }
 0x16f   : > { %v1565_v14 = vadd.f32 %v1564_v63, %v1561_v23  ;;  %v1590_v15 = vadd.f32 %v1589_v0, %v1585_v30 }
 0x170   : > { %v1562_v31 = vld [vmem:[#allocation2 + $0x38] sm:$0xff]  ;;  %v1599_v19 = vadd.f32 %v1598_v11, %v1586_v2  ;;  %v1617_v20 = vadd.f32 %v1613_v12, %v1555_v7  ;;  %v1618_v21 = vadd.f32 %v1614_v13, %v1556_v25  ;;  %v1619_v28 = vadd.f32 %v1613_v12, %v1557_v22 }
 0x171   : > { %v1588_v5 = vmul.f32 %v1562_v31, %v1562_v31  ;;  %v1574_v16 = vadd.f32 %v1573_v8, %v1562_v31  ;;  %v1566_v24 = vrot.slane %v1565_v14, 4  ;;  %v1591_v27 = vadd.f32 %v1590_v15, %v1587_v58 }
 0x172   : > { %v1620_v29 = vadd.f32 %v1614_v13, %v1558_v54  ;;  %1625 = vst [vmem:[%s2777_s18] sm:$0xff] %v1617_v20  ;;  %v1621_v34 = vadd.f32 %v1613_v12, %v1559_v10  ;;  %v1622_v37 = vadd.f32 %v1614_v13, %v1560_v56  ;;  %v1623_v40 = vadd.f32 %v1613_v12, %v1561_v23 }
 0x173   : > { %v1575_v32 = vrot.slane %v1574_v16, 4  ;;  %v1600_v33 = vadd.f32 %v1599_v19, %v1588_v5  ;;  %v1567_v35 = vadd.f32 %v1566_v24, %v1565_v14  ;;  %v1592_v36 = vrot.slane %v1591_v27, 4  ;;  %1626 = vst [vmem:[%s2777_s18 + $0x8] sm:$0xff] %v1618_v21 }
 0x174   : > { %1627 = vst [vmem:[%s2777_s18 + $0x10] sm:$0xff] %v1619_v28  ;;  %v1624_v43 = vadd.f32 %v1614_v13, %v1562_v31 }
 0x175   : > { %v1576_v38 = vadd.f32 %v1575_v32, %v1574_v16  ;;  %v1601_v39 = vrot.slane %v1600_v33, 4  ;;  %v1568_v41 = vrot.slane %v1567_v35, 2  ;;  %v1593_v42 = vadd.f32 %v1592_v36, %v1591_v27  ;;  %1628 = vst [vmem:[%s2777_s18 + $0x18] sm:$0xff] %v1620_v29 }
 0x176   : > { %1629 = vst [vmem:[%s2777_s18 + $0x20] sm:$0xff] %v1621_v34 }
 0x177   : > { %v1577_v44 = vrot.slane %v1576_v38, 2  ;;  %v1602_v45 = vadd.f32 %v1601_v39, %v1600_v33  ;;  %v1569_v61 = vadd.f32 %v1568_v41, %v1567_v35  ;;  %v1594_v46 = vrot.slane %v1593_v42, 2  ;;  %1630 = vst [vmem:[%s2777_s18 + $0x28] sm:$0xff] %v1622_v37 }
 0x178   : > { %1631 = vst [vmem:[%s2777_s18 + $0x30] sm:$0xff] %v1623_v40 }
 0x179   : > { %v1578_v47 = vadd.f32 %v1577_v44, %v1576_v38  ;;  %v1603_v3 = vrot.slane %v1602_v45, 2  ;;  %v1570_v48 = vrot.slane %v1569_v61, 1  ;;  %v1595_v1 = vadd.f32 %v1594_v46, %v1593_v42  ;;  %1632 = vst [vmem:[%s2777_s18 + $0x38] sm:$0xff] %v1624_v43 }
 0x17b   : > { %v1579_v6 = vrot.slane %v1578_v47, 1  ;;  %v1604_v4 = vadd.f32 %v1603_v3, %v1602_v45  ;;  %v1571_v9 = vadd.f32 %v1570_v48, %v1569_v61  ;;  %v1596_v49 = vrot.slane %v1595_v1, 1 }
 0x17d   : > { %v1580_v50 = vadd.f32 %v1579_v6, %v1578_v47  ;;  %v1605_v51 = vrot.slane %v1604_v4, 1  ;;  %1607 = vst [vmem:[%s2782_s16] sm:$0xff] %v1571_v9  ;;  %v1597_v17 = vadd.f32 %v1596_v49, %v1595_v1 }
 0x17f   : > { %1608 = vst [vmem:[%s2782_s16 + $0x8] sm:$0xff] %v1580_v50  ;;  %v1606_v52 = vadd.f32 %v1605_v51, %v1604_v4 }
 0x180   : > { %1609 = vst [vmem:[%s2787_s7] sm:$0xff] %v1597_v17 }
 0x181   : > { %1610 = vst [vmem:[%s2787_s7 + $0x8] sm:$0xff] %v1606_v52 }
 0x182 PF: > { %s16_s24 = sadd.s32 1, %s2651_s24   ;;  %s3187_s18 = smov %s2631_s19 }
 0x183   : > { %p13_p1 = scmp.ge.s32.totalorder %s16_s24, 10   ;;  %s3188_s19 = smov %s2735_s6 }
 0x184   : > { %s3189_s20 = smov %s2643_s22  ;;  %s3190_s21 = smov %s2647_s23 }
 0x185   : > { %s3191_s22 = smov %s3194_s25  ;;  %s3192_s23 = smov %s3198_s26 }
 0x186   :  { %15 = sbr.rel (!%p13_p1) target bundleno = 4 (0x4), region = 125 }

// kernel: discriminator_forward.14
= control target key start
LH: loop header
LB: loop body
LE: loop exit
PB: predicated region body
PF: predicated region fallthrough
CT: control target
= control target key end

     0   :  { %s348_s12 = smov 0   ;;  %s375_s0 = inlined_call_operand.vmem [shape: f32[32,512], index: 0, kind: input, shape index: {}]   ;;  %s376_s1 = inlined_call_operand.vmem [shape: f32[1,512], index: 1, kind: input, shape index: {}]   ;;  %s377_s2 = inlined_call_operand.vmem [shape: f32[1,512], index: 2, kind: input, shape index: {}]   ;;  %s378_s3 = inlined_call_operand.vmem [shape: bf16[32,512], index: 3, kind: output, shape index: {}]  }
   0x1 LB: > { %s297_s13 = sadd.s32 4294967295, %s326_s12   ;;  %p301_p0 = scmp.ge.s32.totalorder %s326_s12, 1  ;;  %s326_s12 = sphi %s348_s12, %s13_s12  }
   0x2   : > { %p139_p1 = scmp.lt.s32.totalorder %s326_s12, 3 }
   0x4   : > { %p140_p2 = pnand %p301_p0, %p139_p1 }
   0x5   : > { %s302_s14 = sshll.u32 (!%p140_p2), %s297_s13, 1 }
   0x6   : > { %143 = sbr.rel (%p140_p2) target bundleno = 27 (0x1b), region = 32  ;;  %p166_p3 = scmp.lt.s32.totalorder (!%p140_p2), %s302_s14, 3 }
   0xb   : > { %v187_v0 = vld [vmem:[%s376_s1] sm:$0xf]  ;;  %s380_s14 = smov (!%p166_p3, %s302_s14), 3 }
   0xc   : > { %v205_v1 = vld [vmem:[%s377_s2] sm:$0xf]  ;;  %v189_v2 = vperm.slane %v187_v0, 0  ;;  %v190_v3 = vperm.slane %v187_v0, 1  ;;  %v191_v4 = vperm.slane %v187_v0, 2  ;;  %s310_s19 = sshll.u32 %s380_s14, 5 }
   0xd   : > { %v192_v5 = vperm.slane %v187_v0, 3  ;;  %s170_s22 = scalar_lea.vmem %s375_s0, %s310_s19  ;;  %v207_v6 = vperm.slane %v205_v1, 0  ;;  %v208_v7 = vperm.slane %v205_v1, 1  ;;  %v209_v8 = vperm.slane %v205_v1, 2  ;;  %s311_s23 = sshll.u32 %s380_s14, 4 }
   0xe   : > { %v179_v9 = vld [vmem:[%s170_s22] sm:$0xff]  ;;  %v180_v10 = vld [vmem:[%s170_s22 + $0x8] sm:$0xff]  ;;  %v181_v11 = vld [vmem:[%s170_s22 + $0x10] sm:$0xff]  ;;  %v210_v12 = vperm.slane %v205_v1, 3  ;;  %s177_s26 = scalar_lea.vmem %s378_s3, %s311_s23 }
   0xf   : > { %v197_v13 = vmul.f32 %v189_v2, %v179_v9  ;;  %v198_v14 = vmul.f32 %v190_v3, %v180_v10  ;;  %v182_v15 = vld [vmem:[%s170_s22 + $0x18] sm:$0xff]  ;;  %v199_v16 = vmul.f32 %v191_v4, %v181_v11  ;;  %v183_v17 = vld [vmem:[%s170_s22 + $0x20] sm:$0xff]  ;;  %v184_v18 = vld [vmem:[%s170_s22 + $0x28] sm:$0xff] }
  0x10   : > { %v200_v19 = vmul.f32 %v192_v5, %v182_v15  ;;  %v201_v20 = vmul.f32 %v189_v2, %v183_v17  ;;  %v202_v21 = vmul.f32 %v190_v3, %v184_v18  ;;  %v185_v22 = vld [vmem:[%s170_s22 + $0x30] sm:$0xff]  ;;  %v186_v23 = vld [vmem:[%s170_s22 + $0x38] sm:$0xff] }
  0x11   : > { %v215_v24 = vadd.f32 %v207_v6, %v197_v13  ;;  %v216_v25 = vadd.f32 %v208_v7, %v198_v14  ;;  %v217_v26 = vadd.f32 %v209_v8, %v199_v16  ;;  %v203_v27 = vmul.f32 %v191_v4, %v185_v22 }
  0x12   : > { %v218_v28 = vadd.f32 %v210_v12, %v200_v19  ;;  %v219_v29 = vadd.f32 %v207_v6, %v201_v20  ;;  %v220_v30 = vadd.f32 %v208_v7, %v202_v21  ;;  %v204_v31 = vmul.f32 %v192_v5, %v186_v23 }
  0x13   : > { %v223_v32 = vmax.f32 %v215_v24, 0.0  ;;  %v224_v33 = vmax.f32 %v216_v25, 0.0  ;;  %v225_v34 = vmax.f32 %v217_v26, 0.0  ;;  %v221_v35 = vadd.f32 %v209_v8, %v203_v27 }
  0x14   : > { %v226_v36 = vmax.f32 %v218_v28, 0.0  ;;  %v227_v37 = vmax.f32 %v219_v29, 0.0  ;;  %v228_v38 = vmax.f32 %v220_v30, 0.0  ;;  %v222_v39 = vadd.f32 %v210_v12, %v204_v31 }
  0x15   : > { %v231_v40 = vpack.c.bf16 %v224_v33, %v223_v32  ;;  %v229_v41 = vmax.f32 %v221_v35, 0.0 }
  0x16   : > { %v232_v42 = vpack.c.bf16 %v226_v36, %v225_v34  ;;  %v233_v43 = vpack.c.bf16 %v228_v38, %v227_v37  ;;  %v230_v44 = vmax.f32 %v222_v39, 0.0 }
  0x17   : > { %235 = vst [vmem:[%s177_s26] sm:$0xff] %v231_v40 }
  0x18   : > { %236 = vst [vmem:[%s177_s26 + $0x8] sm:$0xff] %v232_v42  ;;  %v234_v45 = vpack.c.bf16 %v230_v44, %v229_v41 }
  0x19   : > { %237 = vst [vmem:[%s177_s26 + $0x10] sm:$0xff] %v233_v43 }
  0x1a   : > { %238 = vst [vmem:[%s177_s26 + $0x18] sm:$0xff] %v234_v45 }
  0x1b PF: > { %s13_s12 = sadd.s32 1, %s326_s12  }
  0x1c   : > { %p10_p4 = scmp.ge.s32.totalorder %s13_s12, 4  }
  0x1e   :  { %12 = sbr.rel (!%p10_p4) target bundleno = 1 (0x1), region = 62 }

// kernel: discriminator_forward.13
= control target key start
LH: loop header
LB: loop body
LE: loop exit
PB: predicated region body
PF: predicated region fallthrough
CT: control target
= control target key end

     0   :  { %s4160_s18 = smov 0   ;;  %s4162_s19 = smov 0   ;;  %s4913_s0 = inlined_call_operand.vmem [shape: bf16[32,4096], index: 0, kind: input, shape index: {}]   ;;  %s4914_s1 = inlined_call_operand.vmem [shape: bf16[4096,512], index: 1, kind: input, shape index: {}]   ;;  %s4915_s2 = inlined_call_operand.vmem [shape: f32[1,512], index: 2, kind: input, shape index: {}]   ;;  %s4916_s3 = inlined_call_operand.vmem [shape: f32[32,512], index: 3, kind: output, shape index: {0}]   ;;  %s4917_s4 = inlined_call_operand.vmem [shape: f32[16,512], index: 4, kind: output, shape index: {1}]   ;;  %s4918_s5 = inlined_call_operand.vmem [shape: f32[16,512], index: 5, kind: output, shape index: {2}]  }
   0x1   :  { %s4164_s20 = smov 0   ;;  %s4166_s21 = smov 0  }
   0x2   :  { %s4168_s22 = smov 0   ;;  %s4170_s23 = smov 0  }
   0x3   :  { %s4172_s24 = smov 0  }
   0x4 LB: > { %s25_s25 = sadd.s32 1, %s4119_s22  ;;  %s28_s26 = sadd.s32 1, %s4123_s23  ;;  %s4127_s24 = sphi %s4172_s24, %s16_s24   ;;  %s4123_s23 = sphi %s4170_s23, %s4924_s23   ;;  %s4119_s22 = sphi %s4168_s22, %s4923_s22   ;;  %s4115_s21 = sphi %s4166_s21, %s4922_s21   ;;  %s4111_s20 = sphi %s4164_s20, %s4921_s20   ;;  %s4107_s19 = sphi %s4162_s19, %s4920_s19   ;;  %s4103_s18 = sphi %s4160_s18, %s4919_s18  }
   0x5   : > { %p26_p0 = scmp.ge.s32.totalorder %s25_s25, 4  ;;  %p44_p1 = scmp.ne.s32.totalorder %s4107_s19, %s4103_s18 }
   0x6   : > { %p45_p2 = scmp.eq.s32.totalorder %s4127_s24, 0  ;;  %s37_s30 = sadd.s32 1, %s4107_s19 }
   0x7   : > { %s4926_s25 = smov (%p26_p0, %s25_s25), 0  ;;  %s4928_s26 = smov (!%p26_p0, %s28_s26), %s4123_s23 }
   0x8   : > { %p46_p3 = por %p45_p2, %p44_p1  ;;  %p30_p4 = scmp.ge.s32.totalorder %s4928_s26, 2 }
   0x9   : > { %s33_s27 = ssub.s32 %s4119_s22, %s4926_s25  ;;  %p2669_p6 = scmp.ge.s32.totalorder %s4127_s24, 8 }
   0xa   : > { %s4930_s26 = smov (%p30_p4, %s4928_s26), 0 }
   0xb   : > { %s32_s28 = ssub.s32 %s4123_s23, %s4930_s26  ;;  %198 = sbr.rel (%p2669_p6) target bundleno = 31 (0x1f), region = 20 }
   0xc   : > { %s34_s29 = sor.u32 %s33_s27, %s32_s28 }
   0xd   : > { %p35_p5 = scmp.eq.s32.totalorder %s34_s29, 0 }
   0xf   : > { %s4211_s6 = scalar_select %p35_p5, %s4107_s19, %s37_s30  }
  0x10   : > { %201 = sbr.rel (!%p46_p3) target bundleno = 31 (0x1f), region = 24  ;;  %s203_s7 = sand.u32 (%p46_p3), 1, %s4107_s19  }
  0x11   : > { %s2672_s8 = sshll.u32 (%p46_p3), %s4119_s22, 3  ;;  %s2670_s9 = sshll.u32 (%p46_p3), %s203_s7, 6 }
  0x12   : > { %s3747_s10 = sshll.u32 (%p46_p3), %s4123_s23, 6  ;;  %s205_s16 = scalar_lea.vmem (%p46_p3), [#allocation3], %s2670_s9 }
  0x13   : > { %s209_s11 = sadd.s32 (%p46_p3), %s3747_s10, %s2672_s8 }
  0x14   : > { %s2674_s12 = sshll.u32 (%p46_p3), %s209_s11, 2 }
  0x15   : > { %s211_s15 = scalar_lea.vmem %s4913_s0, %s2674_s12 }
  0x16   : > { %v224_v0 = vld [vmem:[%s211_s15] sm:$0xff]  ;;  %v226_v1 = vld [vmem:[%s211_s15 + $0x8] sm:$0xff]  ;;  %v228_v2 = vld [vmem:[%s211_s15 + $0x10] sm:$0xff] }
  0x17   : > { %225 = vst [vmem:[%s205_s16] sm:$0xff] %v224_v0  ;;  %v230_v3 = vld [vmem:[%s211_s15 + $0x18] sm:$0xff]  ;;  %v232_v4 = vld [vmem:[%s211_s15 + $0x80] sm:$0xff]  ;;  %v234_v5 = vld [vmem:[%s211_s15 + $0x88] sm:$0xff] }
  0x18   : > { %227 = vst [vmem:[%s205_s16 + $0x8] sm:$0xff] %v226_v1  ;;  %v236_v6 = vld [vmem:[%s211_s15 + $0x90] sm:$0xff]  ;;  %v238_v7 = vld [vmem:[%s211_s15 + $0x98] sm:$0xff] }
  0x19   : > { %229 = vst [vmem:[%s205_s16 + $0x10] sm:$0xff] %v228_v2 }
  0x1a   : > { %231 = vst [vmem:[%s205_s16 + $0x18] sm:$0xff] %v230_v3 }
  0x1b   : > { %233 = vst [vmem:[%s205_s16 + $0x20] sm:$0xff] %v232_v4 }
  0x1c   : > { %235 = vst [vmem:[%s205_s16 + $0x28] sm:$0xff] %v234_v5 }
  0x1d   : > { %237 = vst [vmem:[%s205_s16 + $0x30] sm:$0xff] %v236_v6 }
  0x1e   : > { %239 = vst [vmem:[%s205_s16 + $0x38] sm:$0xff] %v238_v7 }
  0x1f PF: > { %p2675_p7 = scmp.ge.s32.totalorder %s4127_s24, 1  ;;  %p254_p8 = scmp.lt.s32.totalorder %s4127_s24, 9 }
  0x21   : > { %p255_p9 = pnand %p2675_p7, %p254_p8 }
  0x22   : > { %s261_s17 = sand.u32 (!%p255_p9), 1, %s4103_s18   ;;  %s2677_s27 = sshll.u32 (!%p255_p9), %s4111_s20, 7 }
  0x23   : > { %258 = sbr.rel (%p255_p9) target bundleno = 495 (0x1ef), region = 51  ;;  %s2676_s28 = sshll.u32 (!%p255_p9), %s261_s17, 6 }
  0x24   : > { %p308_p10 = scmp.lt.s32.totalorder (!%p255_p9), %s2677_s27, 511  ;;  %s2680_s29 = sshll.u32 (!%p255_p9), %s4115_s21, 1 }
  0x25   : > { %p315_p11 = scmp.lt.s32.totalorder (!%p255_p9), %s2680_s29, 3  ;;  %p321_p12 = scmp.lt.s32.totalorder (!%p255_p9), %s4115_s21, 1 }
  0x26   : > { %p2687_p13 = scmp.ne.s32.totalorder (!%p255_p9), %s4111_s20, 0 }
  0x28   : > { %s4932_s27 = smov (!%p308_p10, %s2677_s27), 511  ;;  %s4934_s29 = smov (!%p315_p11, %s2680_s29), 3 }
  0x29   : > { %s3748_s30 = sshll.u32 %s4932_s27, 4  ;;  %s4936_s21 = smov (!%p321_p12, %s4115_s21), 1 }
  0x2a   : > { %s4229_s9 = scalar_lea.vmem %s4914_s1, %s3748_s30  ;;  %s3749_s10 = sshll.u32 %s4934_s29, 5 }
  0x2b   : > { %s4235_s18 = scalar_lea.vmem %s4916_s3, %s3749_s10  ;;  %s3750_s13 = sshll.u32 %s4936_s21, 5 }
  0x2c   : > { %s4240_s16 = scalar_lea.vmem %s4917_s4, %s3750_s13  ;;  %s4245_s7 = scalar_lea.vmem %s4918_s5, %s3750_s13 }
  0x2d   : > { %s4247_s30 = scalar_lea.vmem [#allocation3], %s2676_s28  ;;  %334 = sbr.rel (%p2687_p13) target bundleno = 59 (0x3b), region = 59 }
  0x32   : > { %v4129_v8 = vmov 0.0  }
  0x33   : > { %335 = vst [vmem:[#allocation2 + $0x30] sm:$0xff] %v4129_v8 }
  0x34   : > { %336 = vst [vmem:[#allocation2] sm:$0xff] %v4129_v8 }
  0x35   : > { %337 = vst [vmem:[#allocation2 + $0x18] sm:$0xff] %v4129_v8 }
  0x36   : > { %338 = vst [vmem:[#allocation2 + $0x10] sm:$0xff] %v4129_v8 }
  0x37   : > { %339 = vst [vmem:[#allocation2 + $0x8] sm:$0xff] %v4129_v8 }
  0x38   : > { %340 = vst [vmem:[#allocation2 + $0x20] sm:$0xff] %v4129_v8 }
  0x39   : > { %341 = vst [vmem:[#allocation2 + $0x28] sm:$0xff] %v4129_v8 }
  0x3a   : > { %342 = vst [vmem:[#allocation2 + $0x38] sm:$0xff] %v4129_v8 }
  0x3b PF: > { %v2834_v9 = vld [vmem:[%s4229_s9 + $0xe0] sm:$0xf]  ;;  %v3790_v10 = vld [vmem:[%s4229_s9 + $0xec] sm:$0xf0]  ;;  %p3744_p0 = scmp.ne.s32.totalorder %s4111_s20, 3 }
  0x3c   : > { %v2962_v11 = vld [vmem:[%s4229_s9 + $0x1e0] sm:$0xf]  ;;  %v2835_v12 = vor.u32 %v3790_v10, %v2834_v9  ;;  %v3822_v13 = vld [vmem:[%s4229_s9 + $0x1ec] sm:$0xf0] }
  0x3d   : > { %v3090_v14 = vld [vmem:[%s4229_s9 + $0x2e0] sm:$0xf]  ;;  %v3854_v15 = vld [vmem:[%s4229_s9 + $0x2ec] sm:$0xf0]  ;;  %v2963_v16 = vor.u32 %v3822_v13, %v2962_v11 }
  0x3e   : > { %v3091_v17 = vor.u32 %v3854_v15, %v3090_v14  ;;  %v3218_v18 = vld [vmem:[%s4229_s9 + $0x3e0] sm:$0xf]  ;;  %v3886_v19 = vld [vmem:[%s4229_s9 + $0x3ec] sm:$0xf0]  ;;  %1935 = vmatpush.bf16.msra.mxu0 %v2835_v12 }
  0x3f   : > { %v2818_v20 = vld [vmem:[%s4229_s9 + $0xc0] sm:$0xf]  ;;  %v3219_v21 = vor.u32 %v3886_v19, %v3218_v18  ;;  %v3786_v22 = vld [vmem:[%s4229_s9 + $0xcc] sm:$0xf0]  ;;  %1949 = vmatpush.bf16.msra.mxu1 %v2963_v16 }
  0x40   : > { %v2946_v23 = vld [vmem:[%s4229_s9 + $0x1c0] sm:$0xf]  ;;  %v3818_v24 = vld [vmem:[%s4229_s9 + $0x1cc] sm:$0xf0]  ;;  %1963 = vmatpush.bf16.msra.mxu2 %v3091_v17  ;;  %v2819_v25 = vor.u32 %v3786_v22, %v2818_v20 }
  0x41   : > { %v2947_v26 = vor.u32 %v3818_v24, %v2946_v23  ;;  %v3074_v27 = vld [vmem:[%s4229_s9 + $0x2c0] sm:$0xf]  ;;  %v3850_v28 = vld [vmem:[%s4229_s9 + $0x2cc] sm:$0xf0]  ;;  %1977 = vmatpush.bf16.msra.mxu3 %v3219_v21 }
  0x42   : > { %v3202_v29 = vld [vmem:[%s4229_s9 + $0x3c0] sm:$0xf]  ;;  %v3075_v30 = vor.u32 %v3850_v28, %v3074_v27  ;;  %v3882_v31 = vld [vmem:[%s4229_s9 + $0x3cc] sm:$0xf0]  ;;  %1936 = vmatpush.bf16.msra.mxu0 %v2819_v25 }
  0x43   : > { %v2802_v32 = vld [vmem:[%s4229_s9 + $0xa0] sm:$0xf]  ;;  %v3782_v33 = vld [vmem:[%s4229_s9 + $0xac] sm:$0xf0]  ;;  %v3203_v34 = vor.u32 %v3882_v31, %v3202_v29  ;;  %1950 = vmatpush.bf16.msra.mxu1 %v2947_v26 }
  0x44   : > { %v2930_v35 = vld [vmem:[%s4229_s9 + $0x1a0] sm:$0xf]  ;;  %v3814_v36 = vld [vmem:[%s4229_s9 + $0x1ac] sm:$0xf0]  ;;  %v2803_v38 = vor.u32 %v3782_v33, %v2802_v32  ;;  %1964 = vmatpush.bf16.msra.mxu2 %v3075_v30 }
  0x45   : > { %v3058_v37 = vld [vmem:[%s4229_s9 + $0x2a0] sm:$0xf]  ;;  %v3846_v39 = vld [vmem:[%s4229_s9 + $0x2ac] sm:$0xf0]  ;;  %v2931_v42 = vor.u32 %v3814_v36, %v2930_v35  ;;  %1978 = vmatpush.bf16.msra.mxu3 %v3203_v34 }
  0x46   : > { %v3186_v40 = vld [vmem:[%s4229_s9 + $0x3a0] sm:$0xf]  ;;  %v3878_v41 = vld [vmem:[%s4229_s9 + $0x3ac] sm:$0xf0]  ;;  %v3059_v43 = vor.u32 %v3846_v39, %v3058_v37  ;;  %1937 = vmatpush.bf16.msra.mxu0 %v2803_v38 }
  0x47   : > { %v2786_v44 = vld [vmem:[%s4229_s9 + $0x80] sm:$0xf]  ;;  %v3778_v45 = vld [vmem:[%s4229_s9 + $0x8c] sm:$0xf0]  ;;  %v3187_v47 = vor.u32 %v3878_v41, %v3186_v40  ;;  %1951 = vmatpush.bf16.msra.mxu1 %v2931_v42 }
  0x48   : > { %v2914_v46 = vld [vmem:[%s4229_s9 + $0x180] sm:$0xf]  ;;  %v3810_v48 = vld [vmem:[%s4229_s9 + $0x18c] sm:$0xf0]  ;;  %v2787_v53 = vor.u32 %v3778_v45, %v2786_v44  ;;  %1965 = vmatpush.bf16.msra.mxu2 %v3059_v43 }
  0x49   : > { %v3042_v49 = vld [vmem:[%s4229_s9 + $0x280] sm:$0xf]  ;;  %v3842_v50 = vld [vmem:[%s4229_s9 + $0x28c] sm:$0xf0]  ;;  %v2915_v54 = vor.u32 %v3810_v48, %v2914_v46  ;;  %1979 = vmatpush.bf16.msra.mxu3 %v3187_v47 }
  0x4a   : > { %v3170_v51 = vld [vmem:[%s4229_s9 + $0x380] sm:$0xf]  ;;  %v3874_v52 = vld [vmem:[%s4229_s9 + $0x38c] sm:$0xf0]  ;;  %v3043_v55 = vor.u32 %v3842_v50, %v3042_v49  ;;  %1938 = vmatpush.bf16.msra.mxu0 %v2787_v53 }
  0x4b   : > { %v2770_v56 = vld [vmem:[%s4229_s9 + $0x60] sm:$0xf]  ;;  %v3774_v57 = vld [vmem:[%s4229_s9 + $0x6c] sm:$0xf0]  ;;  %v3171_v59 = vor.u32 %v3874_v52, %v3170_v51  ;;  %1952 = vmatpush.bf16.msra.mxu1 %v2915_v54 }
  0x4c   : > { %v2898_v58 = vld [vmem:[%s4229_s9 + $0x160] sm:$0xf]  ;;  %v3806_v60 = vld [vmem:[%s4229_s9 + $0x16c] sm:$0xf0]  ;;  %v2771_v1 = vor.u32 %v3774_v57, %v2770_v56  ;;  %1966 = vmatpush.bf16.msra.mxu2 %v3043_v55 }
  0x4d   : > { %v3026_v61 = vld [vmem:[%s4229_s9 + $0x260] sm:$0xf]  ;;  %v3838_v62 = vld [vmem:[%s4229_s9 + $0x26c] sm:$0xf0]  ;;  %v2899_v2 = vor.u32 %v3806_v60, %v2898_v58  ;;  %1980 = vmatpush.bf16.msra.mxu3 %v3171_v59 }
  0x4e   : > { %v3154_v63 = vld [vmem:[%s4229_s9 + $0x360] sm:$0xf]  ;;  %v3870_v0 = vld [vmem:[%s4229_s9 + $0x36c] sm:$0xf0]  ;;  %v3027_v3 = vor.u32 %v3838_v62, %v3026_v61  ;;  %1939 = vmatpush.bf16.msra.mxu0 %v2771_v1 }
  0x4f   : > { %v2754_v4 = vld [vmem:[%s4229_s9 + $0x40] sm:$0xf]  ;;  %v3770_v5 = vld [vmem:[%s4229_s9 + $0x4c] sm:$0xf0]  ;;  %v3155_v7 = vor.u32 %v3870_v0, %v3154_v63  ;;  %1953 = vmatpush.bf16.msra.mxu1 %v2899_v2  ;;  %v2698_v63 = vld [vmem:[%s4247_s30 + $0x8] sm:$0xf] }
  0x50   : > { %v2882_v6 = vld [vmem:[%s4229_s9 + $0x140] sm:$0xf]  ;;  %v3802_v8 = vld [vmem:[%s4229_s9 + $0x14c] sm:$0xf0]  ;;  %v2755_v13 = vor.u32 %v3770_v5, %v2754_v4  ;;  %1967 = vmatpush.bf16.msra.mxu2 %v3027_v3  ;;  %v3757_v4 = vld [vmem:[%s4247_s30 + $0x24] sm:$0xf0] }
  0x51   : > { %v3010_v9 = vld [vmem:[%s4229_s9 + $0x240] sm:$0xf]  ;;  %v3834_v10 = vld [vmem:[%s4229_s9 + $0x24c] sm:$0xf0]  ;;  %v2883_v14 = vor.u32 %v3802_v8, %v2882_v6  ;;  %1981 = vmatpush.bf16.msra.mxu3 %v3155_v7 }
  0x52   : > { %v3138_v11 = vld [vmem:[%s4229_s9 + $0x340] sm:$0xf]  ;;  %v3866_v12 = vld [vmem:[%s4229_s9 + $0x34c] sm:$0xf0]  ;;  %v3011_v15 = vor.u32 %v3834_v10, %v3010_v9  ;;  %1940 = vmatpush.bf16.msra.mxu0 %v2755_v13  ;;  %v4341_v10 = vor.u32 %v3757_v4, %v2698_v63 }
  0x53   : > { %v2738_v16 = vld [vmem:[%s4229_s9 + $0x20] sm:$0xf]  ;;  %v3766_v17 = vld [vmem:[%s4229_s9 + $0x2c] sm:$0xf0]  ;;  %v3139_v19 = vor.u32 %v3866_v12, %v3138_v11  ;;  %1954 = vmatpush.bf16.msra.mxu1 %v2883_v14 }
  0x54   : > { %v2866_v18 = vld [vmem:[%s4229_s9 + $0x120] sm:$0xf]  ;;  %v3798_v20 = vld [vmem:[%s4229_s9 + $0x12c] sm:$0xf0]  ;;  %v2739_v25 = vor.u32 %v3766_v17, %v2738_v16  ;;  %1968 = vmatpush.bf16.msra.mxu2 %v3011_v15  ;;  %v3752_v15 = vld [vmem:[%s4247_s30 + $0x4] sm:$0xf] }
  0x55   : > { %v2994_v21 = vld [vmem:[%s4229_s9 + $0x220] sm:$0xf]  ;;  %v3830_v22 = vld [vmem:[%s4229_s9 + $0x22c] sm:$0xf0]  ;;  %v2867_v28 = vor.u32 %v3798_v20, %v2866_v18  ;;  %1982 = vmatpush.bf16.msra.mxu3 %v3139_v19  ;;  %v2692_v16 = vld [vmem:[%s4247_s30 + $0x20] sm:$0xf0] }
  0x56   : > { %v3122_v23 = vld [vmem:[%s4229_s9 + $0x320] sm:$0xf]  ;;  %v3862_v24 = vld [vmem:[%s4229_s9 + $0x32c] sm:$0xf0]  ;;  %v2995_v29 = vor.u32 %v3830_v22, %v2994_v21  ;;  %1941 = vmatpush.bf16.msra.mxu0 %v2739_v25  ;;  %v3753_v17 = vld [vmem:[%s4247_s30 + $0xc] sm:$0xf]  ;;  %v4351_v19 = vor.u32 %v3752_v15, %v2692_v16 }
  0x57   : > { %v2722_v26 = vld [vmem:[%s4229_s9] sm:$0xf]  ;;  %v3762_v27 = vld [vmem:[%s4229_s9 + $0xc] sm:$0xf0]  ;;  %v3123_v33 = vor.u32 %v3862_v24, %v3122_v23  ;;  %1955 = vmatpush.bf16.msra.mxu1 %v2867_v28  ;;  %v2700_v20 = vld [vmem:[%s4247_s30 + $0x28] sm:$0xf0] }
  0x58   : > { %v2850_v30 = vld [vmem:[%s4229_s9 + $0x100] sm:$0xf]  ;;  %v3794_v31 = vld [vmem:[%s4229_s9 + $0x10c] sm:$0xf0]  ;;  %v2723_v40 = vor.u32 %v3762_v27, %v2722_v26  ;;  %1969 = vmatpush.bf16.msra.mxu2 %v2995_v29  ;;  %v4357_v26 = vor.u32 %v3753_v17, %v2700_v20 }
  0x59   : > { %v2978_v32 = vld [vmem:[%s4229_s9 + $0x200] sm:$0xf]  ;;  %v3826_v34 = vld [vmem:[%s4229_s9 + $0x20c] sm:$0xf0]  ;;  %v2851_v44 = vor.u32 %v3794_v31, %v2850_v30  ;;  %1983 = vmatpush.bf16.msra.mxu3 %v3123_v33 }
  0x5a   : > { %v3106_v35 = vld [vmem:[%s4229_s9 + $0x300] sm:$0xf]  ;;  %v3858_v36 = vld [vmem:[%s4229_s9 + $0x30c] sm:$0xf0]  ;;  %v2979_v45 = vor.u32 %v3826_v34, %v2978_v32  ;;  %1942 = vmatpush.bf16.msra.mxu0 %v2723_v40 }
  0x5b   : > { %v3346_v37 = vld [vmem:[%s4229_s9 + $0x4e0] sm:$0xf]  ;;  %v3918_v38 = vld [vmem:[%s4229_s9 + $0x4ec] sm:$0xf0]  ;;  %v3107_v48 = vor.u32 %v3858_v36, %v3106_v35  ;;  %1956 = vmatpush.bf16.msra.mxu1 %v2851_v44 }
  0x5c   : > { %v3474_v39 = vld [vmem:[%s4229_s9 + $0x5e0] sm:$0xf]  ;;  %v3950_v41 = vld [vmem:[%s4229_s9 + $0x5ec] sm:$0xf0]  ;;  %v3347_v49 = vor.u32 %v3918_v38, %v3346_v37  ;;  %1970 = vmatpush.bf16.msra.mxu2 %v2979_v45 }
  0x5d   : > { %v3602_v42 = vld [vmem:[%s4229_s9 + $0x6e0] sm:$0xf]  ;;  %v3982_v43 = vld [vmem:[%s4229_s9 + $0x6ec] sm:$0xf0]  ;;  %v3475_v52 = vor.u32 %v3950_v41, %v3474_v39  ;;  %1984 = vmatpush.bf16.msra.mxu3 %v3107_v48 }
  0x5e   : > { %v3730_v46 = vld [vmem:[%s4229_s9 + $0x7e0] sm:$0xf]  ;;  %v4014_v47 = vld [vmem:[%s4229_s9 + $0x7ec] sm:$0xf0]  ;;  %v3603_v53 = vor.u32 %v3982_v43, %v3602_v42  ;;  %1991 = vmatpush.bf16.msrb.mxu0 %v3347_v49  ;;  %1957 = vmatmul.bf16.vlgmr.msra.gmra.mxu1 %v4351_v19 }
  0x5f   : > { %v3330_v50 = vld [vmem:[%s4229_s9 + $0x4c0] sm:$0xf]  ;;  %v3914_v51 = vld [vmem:[%s4229_s9 + $0x4cc] sm:$0xf0]  ;;  %v3731_v57 = vor.u32 %v4014_v47, %v3730_v46  ;;  %2005 = vmatpush.bf16.msrb.mxu1 %v3475_v52  ;;  %1971 = vmatmul.bf16.vlgmr.msra.gmra.mxu2 %v4341_v10 }
  0x60   : > { %v3458_v54 = vld [vmem:[%s4229_s9 + $0x5c0] sm:$0xf]  ;;  %v3946_v55 = vld [vmem:[%s4229_s9 + $0x5cc] sm:$0xf0]  ;;  %v3331_v0 = vor.u32 %v3914_v51, %v3330_v50  ;;  %2019 = vmatpush.bf16.msrb.mxu2 %v3603_v53  ;;  %1985 = vmatmul.bf16.vlgmr.msra.gmra.mxu3 %v4357_v26 }
  0x61   : > { %v3586_v56 = vld [vmem:[%s4229_s9 + $0x6c0] sm:$0xf]  ;;  %v3978_v58 = vld [vmem:[%s4229_s9 + $0x6cc] sm:$0xf0]  ;;  %v3459_v5 = vor.u32 %v3946_v55, %v3458_v54  ;;  %2033 = vmatpush.bf16.msrb.mxu3 %v3731_v57 }
  0x62   : > { %v3714_v59 = vld [vmem:[%s4229_s9 + $0x7c0] sm:$0xf]  ;;  %v4010_v60 = vld [vmem:[%s4229_s9 + $0x7cc] sm:$0xf0]  ;;  %v3587_v6 = vor.u32 %v3978_v58, %v3586_v56  ;;  %1992 = vmatpush.bf16.msrb.mxu0 %v3331_v0 }
  0x63   : > { %v2690_v61 = vld [vmem:[%s4247_s30] sm:$0xf]  ;;  %v3910_v2 = vld [vmem:[%s4229_s9 + $0x4ac] sm:$0xf0]  ;;  %v3715_v11 = vor.u32 %v4010_v60, %v3714_v59  ;;  %2006 = vmatpush.bf16.msrb.mxu1 %v3459_v5 }
  0x64   : > { %v3756_v62 = vld [vmem:[%s4247_s30 + $0x1c] sm:$0xf0]  ;;  %v3942_v8 = vld [vmem:[%s4229_s9 + $0x5ac] sm:$0xf0]  ;;  %2020 = vmatpush.bf16.msrb.mxu2 %v3587_v6 }
  0x65   : > { %v3314_v1 = vld [vmem:[%s4229_s9 + $0x4a0] sm:$0xf]  ;;  %v4335_v3 = vor.u32 %v3756_v62, %v2690_v61  ;;  %v3974_v12 = vld [vmem:[%s4229_s9 + $0x6ac] sm:$0xf0]  ;;  %2034 = vmatpush.bf16.msrb.mxu3 %v3715_v11 }
  0x66   : > { %v3442_v7 = vld [vmem:[%s4229_s9 + $0x5a0] sm:$0xf]  ;;  %v4006_v14 = vld [vmem:[%s4229_s9 + $0x7ac] sm:$0xf0]  ;;  %v3315_v18 = vor.u32 %v3910_v2, %v3314_v1 }
  0x67   : > { %v3570_v9 = vld [vmem:[%s4229_s9 + $0x6a0] sm:$0xf]  ;;  %1943 = vmatmul.bf16.vlgmr.msra.gmra.mxu0 %v4335_v3  ;;  %v3443_v21 = vor.u32 %v3942_v8, %v3442_v7  ;;  %v3906_v24 = vld [vmem:[%s4229_s9 + $0x48c] sm:$0xf0] }
  0x68   : > { %v3698_v13 = vld [vmem:[%s4229_s9 + $0x7a0] sm:$0xf]  ;;  %v3571_v22 = vor.u32 %v3974_v12, %v3570_v9  ;;  %v3938_v28 = vld [vmem:[%s4229_s9 + $0x58c] sm:$0xf0]  ;;  %1993 = vmatpush.bf16.msrb.mxu0 %v3315_v18  ;;  %v3788_v18 = vld [vmem:[%s4229_s9 + $0xe4] sm:$0xf] }
  0x69   : > { %v3298_v23 = vld [vmem:[%s4229_s9 + $0x480] sm:$0xf]  ;;  %v3699_v27 = vor.u32 %v4006_v14, %v3698_v13  ;;  %v3970_v30 = vld [vmem:[%s4229_s9 + $0x68c] sm:$0xf0]  ;;  %2007 = vmatpush.bf16.msrb.mxu1 %v3443_v21  ;;  %v2836_v21 = vld [vmem:[%s4229_s9 + $0xf0] sm:$0xf0] }
  0x6a   : > { %v3426_v25 = vld [vmem:[%s4229_s9 + $0x580] sm:$0xf]  ;;  %v4002_v32 = vld [vmem:[%s4229_s9 + $0x78c] sm:$0xf0]  ;;  %v3299_v33 = vor.u32 %v3906_v24, %v3298_v23  ;;  %2021 = vmatpush.bf16.msrb.mxu2 %v3571_v22  ;;  %v3820_v22 = vld [vmem:[%s4229_s9 + $0x1e4] sm:$0xf] }
  0x6b   : > { %v3554_v29 = vld [vmem:[%s4229_s9 + $0x680] sm:$0xf]  ;;  %v3427_v34 = vor.u32 %v3938_v28, %v3426_v25  ;;  %v3902_v37 = vld [vmem:[%s4229_s9 + $0x46c] sm:$0xf0]  ;;  %2035 = vmatpush.bf16.msrb.mxu3 %v3699_v27  ;;  %v2964_v23 = vld [vmem:[%s4229_s9 + $0x1f0] sm:$0xf0] }
  0x6c   : > { %v3682_v31 = vld [vmem:[%s4229_s9 + $0x780] sm:$0xf]  ;;  %v3555_v35 = vor.u32 %v3970_v30, %v3554_v29  ;;  %v3934_v40 = vld [vmem:[%s4229_s9 + $0x56c] sm:$0xf0]  ;;  %1994 = vmatpush.bf16.msrb.mxu0 %v3299_v33  ;;  %v3852_v24 = vld [vmem:[%s4229_s9 + $0x2e4] sm:$0xf] }
  0x6d   : > { %v3282_v36 = vld [vmem:[%s4229_s9 + $0x460] sm:$0xf]  ;;  %v3683_v39 = vor.u32 %v4002_v32, %v3682_v31  ;;  %v3966_v42 = vld [vmem:[%s4229_s9 + $0x66c] sm:$0xf0]  ;;  %2008 = vmatpush.bf16.msrb.mxu1 %v3427_v34  ;;  %v3092_v25 = vld [vmem:[%s4229_s9 + $0x2f0] sm:$0xf0] }
  0x6e   : > { %v3410_v38 = vld [vmem:[%s4229_s9 + $0x560] sm:$0xf]  ;;  %v3998_v44 = vld [vmem:[%s4229_s9 + $0x76c] sm:$0xf0]  ;;  %v3283_v45 = vor.u32 %v3902_v37, %v3282_v36  ;;  %2022 = vmatpush.bf16.msrb.mxu2 %v3555_v35  ;;  %v3884_v27 = vld [vmem:[%s4229_s9 + $0x3e4] sm:$0xf] }
  0x6f   : > { %v3538_v41 = vld [vmem:[%s4229_s9 + $0x660] sm:$0xf]  ;;  %v3411_v46 = vor.u32 %v3934_v40, %v3410_v38  ;;  %v3898_v49 = vld [vmem:[%s4229_s9 + $0x44c] sm:$0xf0]  ;;  %2036 = vmatpush.bf16.msrb.mxu3 %v3683_v39  ;;  %v3220_v29 = vld [vmem:[%s4229_s9 + $0x3f0] sm:$0xf0]  ;;  %v2839_v38 = vor.u32 %v3788_v18, %v2836_v21 }
  0x70   : > { %v3666_v43 = vld [vmem:[%s4229_s9 + $0x760] sm:$0xf]  ;;  %v3539_v47 = vor.u32 %v3966_v42, %v3538_v41  ;;  %v3930_v52 = vld [vmem:[%s4229_s9 + $0x54c] sm:$0xf0]  ;;  %1995 = vmatpush.bf16.msrb.mxu0 %v3283_v45  ;;  %v2714_v34 = vld [vmem:[%s4247_s30 + $0x18] sm:$0xf]  ;;  %v2967_v42 = vor.u32 %v3820_v22, %v2964_v23 }
  0x71   : > { %v3266_v48 = vld [vmem:[%s4229_s9 + $0x440] sm:$0xf]  ;;  %v3667_v51 = vor.u32 %v3998_v44, %v3666_v43  ;;  %v3962_v54 = vld [vmem:[%s4229_s9 + $0x64c] sm:$0xf0]  ;;  %2009 = vmatpush.bf16.msrb.mxu1 %v3411_v46  ;;  %v3759_v35 = vld [vmem:[%s4247_s30 + $0x34] sm:$0xf0]  ;;  %v3095_v43 = vor.u32 %v3852_v24, %v3092_v25 }
  0x72   : > { %v3394_v50 = vld [vmem:[%s4229_s9 + $0x540] sm:$0xf]  ;;  %v3994_v56 = vld [vmem:[%s4229_s9 + $0x74c] sm:$0xf0]  ;;  %v3267_v57 = vor.u32 %v3898_v49, %v3266_v48  ;;  %2023 = vmatpush.bf16.msrb.mxu2 %v3539_v47  ;;  %v3754_v36 = vld [vmem:[%s4247_s30 + $0x14] sm:$0xf]  ;;  %v3223_v47 = vor.u32 %v3884_v27, %v3220_v29 }
  0x73   : > { %v3522_v53 = vld [vmem:[%s4229_s9 + $0x640] sm:$0xf]  ;;  %v3395_v59 = vor.u32 %v3930_v52, %v3394_v50  ;;  %v3894_v61 = vld [vmem:[%s4229_s9 + $0x42c] sm:$0xf0]  ;;  %2037 = vmatpush.bf16.msrb.mxu3 %v3667_v51  ;;  %v2708_v39 = vld [vmem:[%s4247_s30 + $0x30] sm:$0xf0]  ;;  %v4422_v52 = vor.u32 %v3759_v35, %v2714_v34 }
  0x74   : > { %v3650_v55 = vld [vmem:[%s4229_s9 + $0x740] sm:$0xf]  ;;  %v3523_v60 = vor.u32 %v3962_v54, %v3522_v53  ;;  %v3926_v63 = vld [vmem:[%s4229_s9 + $0x52c] sm:$0xf0]  ;;  %1996 = vmatpush.bf16.msrb.mxu0 %v3267_v57  ;;  %v3755_v40 = vld [vmem:[%s4247_s30 + $0x1c] sm:$0xf]  ;;  %v4424_v53 = vor.u32 %v3754_v36, %v2708_v39 }
  0x75   : > { %v3250_v58 = vld [vmem:[%s4229_s9 + $0x420] sm:$0xf]  ;;  %v3651_v0 = vor.u32 %v3994_v56, %v3650_v55  ;;  %v3958_v2 = vld [vmem:[%s4229_s9 + $0x62c] sm:$0xf0]  ;;  %2010 = vmatpush.bf16.msrb.mxu1 %v3395_v59  ;;  %v2716_v41 = vld [vmem:[%s4247_s30 + $0x38] sm:$0xf0] }
  0x76   : > { %v3378_v62 = vld [vmem:[%s4229_s9 + $0x520] sm:$0xf]  ;;  %v3990_v5 = vld [vmem:[%s4229_s9 + $0x72c] sm:$0xf0]  ;;  %v3251_v8 = vor.u32 %v3894_v61, %v3250_v58  ;;  %2024 = vmatpush.bf16.msrb.mxu2 %v3523_v60  ;;  %v3784_v44 = vld [vmem:[%s4229_s9 + $0xc4] sm:$0xf]  ;;  %v4428_v56 = vor.u32 %v3755_v40, %v2716_v41 }
  0x77   : > { %v3506_v1 = vld [vmem:[%s4229_s9 + $0x620] sm:$0xf]  ;;  %v3890_v7 = vld [vmem:[%s4229_s9 + $0x40c] sm:$0xf0]  ;;  %v3379_v14 = vor.u32 %v3926_v63, %v3378_v62  ;;  %2038 = vmatpush.bf16.msrb.mxu3 %v3651_v0  ;;  %v2820_v45 = vld [vmem:[%s4229_s9 + $0xd0] sm:$0xf0] }
  0x78   : > { %v3634_v4 = vld [vmem:[%s4229_s9 + $0x720] sm:$0xf]  ;;  %v3922_v11 = vld [vmem:[%s4229_s9 + $0x50c] sm:$0xf0]  ;;  %v3507_v15 = vor.u32 %v3958_v2, %v3506_v1  ;;  %1997 = vmatpush.bf16.msrb.mxu0 %v3251_v8  ;;  %v3816_v46 = vld [vmem:[%s4229_s9 + $0x1c4] sm:$0xf]  ;;  %v2823_v57 = vor.u32 %v3784_v44, %v2820_v45 }
  0x79   : > { %v3234_v6 = vld [vmem:[%s4229_s9 + $0x400] sm:$0xf]  ;;  %v3954_v13 = vld [vmem:[%s4229_s9 + $0x60c] sm:$0xf0]  ;;  %v3635_v20 = vor.u32 %v3990_v5, %v3634_v4  ;;  %2011 = vmatpush.bf16.msrb.mxu1 %v3379_v14  ;;  %v2948_v49 = vld [vmem:[%s4229_s9 + $0x1d0] sm:$0xf0] }
  0x7a   : > { %v3362_v9 = vld [vmem:[%s4229_s9 + $0x500] sm:$0xf]  ;;  %v3986_v17 = vld [vmem:[%s4229_s9 + $0x70c] sm:$0xf0]  ;;  %v3235_v28 = vor.u32 %v3890_v7, %v3234_v6  ;;  %2025 = vmatpush.bf16.msrb.mxu2 %v3507_v15  ;;  %v3848_v50 = vld [vmem:[%s4229_s9 + $0x2c4] sm:$0xf]  ;;  %v2951_v58 = vor.u32 %v3816_v46, %v2948_v49 }
  0x7b   : > { %v3490_v12 = vld [vmem:[%s4229_s9 + $0x600] sm:$0xf]  ;;  %v2706_v30 = vld [vmem:[%s4247_s30 + $0x10] sm:$0xf]  ;;  %v3363_v32 = vor.u32 %v3922_v11, %v3362_v9  ;;  %2039 = vmatpush.bf16.msrb.mxu3 %v3635_v20  ;;  %v3076_v51 = vld [vmem:[%s4229_s9 + $0x2d0] sm:$0xf0] }
  0x7c   : > { %v3618_v16 = vld [vmem:[%s4229_s9 + $0x700] sm:$0xf]  ;;  %v3758_v31 = vld [vmem:[%s4247_s30 + $0x2c] sm:$0xf0]  ;;  %v3491_v33 = vor.u32 %v3954_v13, %v3490_v12  ;;  %1998 = vmatpush.bf16.msrb.mxu0 %v3235_v28  ;;  %v3880_v54 = vld [vmem:[%s4229_s9 + $0x3c4] sm:$0xf]  ;;  %v3079_v59 = vor.u32 %v3848_v50, %v3076_v51 }
  0x7d   : > { %v3619_v37 = vor.u32 %v3986_v17, %v3618_v16  ;;  %v4417_v48 = vor.u32 %v3758_v31, %v2706_v30  ;;  %2012 = vmatpush.bf16.msrb.mxu1 %v3363_v32  ;;  %v3204_v55 = vld [vmem:[%s4229_s9 + $0x3d0] sm:$0xf0]  ;;  %v3780_v60 = vld [vmem:[%s4229_s9 + $0xa4] sm:$0xf] }
  0x7e   : > { %2026 = vmatpush.bf16.msrb.mxu2 %v3491_v33  ;;  %v2804_v61 = vld [vmem:[%s4229_s9 + $0xb0] sm:$0xf0]  ;;  %v3812_v62 = vld [vmem:[%s4229_s9 + $0x1a4] sm:$0xf]  ;;  %v3207_v63 = vor.u32 %v3880_v54, %v3204_v55 }
  0x7f   : > { %2040 = vmatpush.bf16.msrb.mxu3 %v3619_v37  ;;  %1999 = vmatmul.bf16.vlgmr.msrb.gmra.mxu0 %v4417_v48  ;;  %v2932_v0 = vld [vmem:[%s4229_s9 + $0x1b0] sm:$0xf0]  ;;  %v3844_v1 = vld [vmem:[%s4229_s9 + $0x2a4] sm:$0xf]  ;;  %v2807_v6 = vor.u32 %v3780_v60, %v2804_v61 }
  0x80   : > { %2047 = vmatpush.bf16.msra.mxu0 %v2839_v38  ;;  %v3060_v2 = vld [vmem:[%s4229_s9 + $0x2b0] sm:$0xf0]  ;;  %2013 = vmatmul.bf16.vlgmr.msrb.gmra.mxu1 %v4424_v53  ;;  %v3876_v4 = vld [vmem:[%s4229_s9 + $0x3a4] sm:$0xf]  ;;  %v2935_v7 = vor.u32 %v3812_v62, %v2932_v0 }
  0x81   : > { %2061 = vmatpush.bf16.msra.mxu1 %v2967_v42  ;;  %2027 = vmatmul.bf16.vlgmr.msrb.gmra.mxu2 %v4422_v52  ;;  %v3188_v5 = vld [vmem:[%s4229_s9 + $0x3b0] sm:$0xf0]  ;;  %v3063_v8 = vor.u32 %v3844_v1, %v3060_v2  ;;  %v3776_v9 = vld [vmem:[%s4229_s9 + $0x84] sm:$0xf] }
  0x82   : > { %2075 = vmatpush.bf16.msra.mxu2 %v3095_v43  ;;  %2041 = vmatmul.bf16.vlgmr.msrb.gmra.mxu3 %v4428_v56  ;;  %v2788_v11 = vld [vmem:[%s4229_s9 + $0x90] sm:$0xf0]  ;;  %v3808_v12 = vld [vmem:[%s4229_s9 + $0x184] sm:$0xf]  ;;  %v3191_v13 = vor.u32 %v3876_v4, %v3188_v5 }
  0x83   : > { %2089 = vmatpush.bf16.msra.mxu3 %v3223_v47  ;;  %v2916_v14 = vld [vmem:[%s4229_s9 + $0x190] sm:$0xf0]  ;;  %v3840_v15 = vld [vmem:[%s4229_s9 + $0x284] sm:$0xf]  ;;  %v2791_v20 = vor.u32 %v3776_v9, %v2788_v11 }
  0x84   : > { %2048 = vmatpush.bf16.msra.mxu0 %v2823_v57  ;;  %v3044_v16 = vld [vmem:[%s4229_s9 + $0x290] sm:$0xf0]  ;;  %v3872_v17 = vld [vmem:[%s4229_s9 + $0x384] sm:$0xf]  ;;  %v2919_v21 = vor.u32 %v3808_v12, %v2916_v14 }
  0x85   : > { %2062 = vmatpush.bf16.msra.mxu1 %v2951_v58  ;;  %v3172_v18 = vld [vmem:[%s4229_s9 + $0x390] sm:$0xf0]  ;;  %v3047_v22 = vor.u32 %v3840_v15, %v3044_v16  ;;  %v3772_v23 = vld [vmem:[%s4229_s9 + $0x64] sm:$0xf] }
  0x86   : > { %2076 = vmatpush.bf16.msra.mxu2 %v3079_v59  ;;  %v2772_v24 = vld [vmem:[%s4229_s9 + $0x70] sm:$0xf0]  ;;  %v3804_v25 = vld [vmem:[%s4229_s9 + $0x164] sm:$0xf]  ;;  %v3175_v27 = vor.u32 %v3872_v17, %v3172_v18 }
  0x87   : > { %2090 = vmatpush.bf16.msra.mxu3 %v3207_v63  ;;  %v2900_v28 = vld [vmem:[%s4229_s9 + $0x170] sm:$0xf0]  ;;  %v3836_v29 = vld [vmem:[%s4229_s9 + $0x264] sm:$0xf]  ;;  %v2775_v33 = vor.u32 %v3772_v23, %v2772_v24 }
  0x88   : > { %2049 = vmatpush.bf16.msra.mxu0 %v2807_v6  ;;  %v3028_v30 = vld [vmem:[%s4229_s9 + $0x270] sm:$0xf0]  ;;  %v3868_v31 = vld [vmem:[%s4229_s9 + $0x364] sm:$0xf]  ;;  %v2903_v34 = vor.u32 %v3804_v25, %v2900_v28 }
  0x89   : > { %2063 = vmatpush.bf16.msra.mxu1 %v2935_v7  ;;  %v3156_v32 = vld [vmem:[%s4229_s9 + $0x370] sm:$0xf0]  ;;  %v3031_v35 = vor.u32 %v3836_v29, %v3028_v30  ;;  %v3768_v36 = vld [vmem:[%s4229_s9 + $0x44] sm:$0xf] }
  0x8a   : > { %2077 = vmatpush.bf16.msra.mxu2 %v3063_v8  ;;  %v2756_v37 = vld [vmem:[%s4229_s9 + $0x50] sm:$0xf0]  ;;  %v3800_v38 = vld [vmem:[%s4229_s9 + $0x144] sm:$0xf]  ;;  %v3159_v39 = vor.u32 %v3868_v31, %v3156_v32 }
  0x8b   : > { %2091 = vmatpush.bf16.msra.mxu3 %v3191_v13  ;;  %v2884_v40 = vld [vmem:[%s4229_s9 + $0x150] sm:$0xf0]  ;;  %v3832_v41 = vld [vmem:[%s4229_s9 + $0x244] sm:$0xf]  ;;  %v2759_v45 = vor.u32 %v3768_v36, %v2756_v37 }
  0x8c   : > { %2050 = vmatpush.bf16.msra.mxu0 %v2791_v20  ;;  %v3012_v42 = vld [vmem:[%s4229_s9 + $0x250] sm:$0xf0]  ;;  %v3864_v43 = vld [vmem:[%s4229_s9 + $0x344] sm:$0xf]  ;;  %v2887_v46 = vor.u32 %v3800_v38, %v2884_v40 }
  0x8d   : > { %2064 = vmatpush.bf16.msra.mxu1 %v2919_v21  ;;  %v3140_v44 = vld [vmem:[%s4229_s9 + $0x350] sm:$0xf0]  ;;  %v3015_v47 = vor.u32 %v3832_v41, %v3012_v42  ;;  %v3764_v49 = vld [vmem:[%s4229_s9 + $0x24] sm:$0xf] }
  0x8e   : > { %2078 = vmatpush.bf16.msra.mxu2 %v3047_v22  ;;  %v2740_v50 = vld [vmem:[%s4229_s9 + $0x30] sm:$0xf0]  ;;  %v3796_v51 = vld [vmem:[%s4229_s9 + $0x124] sm:$0xf]  ;;  %v3143_v54 = vor.u32 %v3864_v43, %v3140_v44 }
  0x8f   : > { %2092 = vmatpush.bf16.msra.mxu3 %v3175_v27  ;;  %v2868_v55 = vld [vmem:[%s4229_s9 + $0x130] sm:$0xf0]  ;;  %v3828_v57 = vld [vmem:[%s4229_s9 + $0x224] sm:$0xf]  ;;  %v2743_v61 = vor.u32 %v3764_v49, %v2740_v50 }
  0x90   : > { %2051 = vmatpush.bf16.msra.mxu0 %v2775_v33  ;;  %v2996_v58 = vld [vmem:[%s4229_s9 + $0x230] sm:$0xf0]  ;;  %v3860_v59 = vld [vmem:[%s4229_s9 + $0x324] sm:$0xf]  ;;  %v2871_v0 = vor.u32 %v3796_v51, %v2868_v55 }
  0x91   : > { %2065 = vmatpush.bf16.msra.mxu1 %v2903_v34  ;;  %v3124_v60 = vld [vmem:[%s4229_s9 + $0x330] sm:$0xf0]  ;;  %v3760_v62 = vld [vmem:[%s4229_s9 + $0x4] sm:$0xf]  ;;  %v2999_v1 = vor.u32 %v3828_v57, %v2996_v58 }
  0x92   : > { %2079 = vmatpush.bf16.msra.mxu2 %v3031_v35  ;;  %v2724_v63 = vld [vmem:[%s4229_s9 + $0x10] sm:$0xf0]  ;;  %v3792_v2 = vld [vmem:[%s4229_s9 + $0x104] sm:$0xf]  ;;  %v3127_v6 = vor.u32 %v3860_v59, %v3124_v60 }
  0x93   : > { %2093 = vmatpush.bf16.msra.mxu3 %v3159_v39  ;;  %v2852_v4 = vld [vmem:[%s4229_s9 + $0x110] sm:$0xf0]  ;;  %v3824_v5 = vld [vmem:[%s4229_s9 + $0x204] sm:$0xf]  ;;  %v2727_v14 = vor.u32 %v3760_v62, %v2724_v63 }
  0x94   : > { %2052 = vmatpush.bf16.msra.mxu0 %v2759_v45  ;;  %v2980_v7 = vld [vmem:[%s4229_s9 + $0x210] sm:$0xf0]  ;;  %v3856_v8 = vld [vmem:[%s4229_s9 + $0x304] sm:$0xf]  ;;  %v2855_v18 = vor.u32 %v3792_v2, %v2852_v4 }
  0x95   : > { %2066 = vmatpush.bf16.msra.mxu1 %v2887_v46  ;;  %v3108_v9 = vld [vmem:[%s4229_s9 + $0x310] sm:$0xf0]  ;;  %v3916_v11 = vld [vmem:[%s4229_s9 + $0x4e4] sm:$0xf]  ;;  %v2983_v20 = vor.u32 %v3824_v5, %v2980_v7 }
  0x96   : > { %2080 = vmatpush.bf16.msra.mxu2 %v3015_v47  ;;  %v3348_v12 = vld [vmem:[%s4229_s9 + $0x4f0] sm:$0xf0]  ;;  %v3948_v13 = vld [vmem:[%s4229_s9 + $0x5e4] sm:$0xf]  ;;  %v3111_v23 = vor.u32 %v3856_v8, %v3108_v9 }
  0x97   : > { %2094 = vmatpush.bf16.msra.mxu3 %v3143_v54  ;;  %v3476_v15 = vld [vmem:[%s4229_s9 + $0x5f0] sm:$0xf0]  ;;  %v3980_v16 = vld [vmem:[%s4229_s9 + $0x6e4] sm:$0xf]  ;;  %v3351_v24 = vor.u32 %v3916_v11, %v3348_v12 }
  0x98   : > { %2053 = vmatpush.bf16.msra.mxu0 %v2743_v61  ;;  %v3604_v17 = vld [vmem:[%s4229_s9 + $0x6f0] sm:$0xf0]  ;;  %v4012_v21 = vld [vmem:[%s4229_s9 + $0x7e4] sm:$0xf]  ;;  %v3479_v25 = vor.u32 %v3948_v13, %v3476_v15 }
  0x99   : > { %2067 = vmatpush.bf16.msra.mxu1 %v2871_v0  ;;  %v3732_v22 = vld [vmem:[%s4229_s9 + $0x7f0] sm:$0xf0]  ;;  %v3607_v27 = vor.u32 %v3980_v16, %v3604_v17  ;;  %v3912_v28 = vld [vmem:[%s4229_s9 + $0x4c4] sm:$0xf] }
  0x9a   : > { %2081 = vmatpush.bf16.msra.mxu2 %v2999_v1  ;;  %v3332_v29 = vld [vmem:[%s4229_s9 + $0x4d0] sm:$0xf0]  ;;  %v3944_v30 = vld [vmem:[%s4229_s9 + $0x5c4] sm:$0xf]  ;;  %v3735_v31 = vor.u32 %v4012_v21, %v3732_v22 }
  0x9b   : > { %2095 = vmatpush.bf16.msra.mxu3 %v3127_v6  ;;  %v3460_v32 = vld [vmem:[%s4229_s9 + $0x5d0] sm:$0xf0]  ;;  %v3976_v33 = vld [vmem:[%s4229_s9 + $0x6c4] sm:$0xf]  ;;  %v3335_v37 = vor.u32 %v3912_v28, %v3332_v29 }
  0x9c   : > { %2054 = vmatpush.bf16.msra.mxu0 %v2727_v14  ;;  %v3588_v34 = vld [vmem:[%s4229_s9 + $0x6d0] sm:$0xf0]  ;;  %v4008_v35 = vld [vmem:[%s4229_s9 + $0x7c4] sm:$0xf]  ;;  %v3463_v38 = vor.u32 %v3944_v30, %v3460_v32 }
  0x9d   : > { %2068 = vmatpush.bf16.msra.mxu1 %v2855_v18  ;;  %v3716_v36 = vld [vmem:[%s4229_s9 + $0x7d0] sm:$0xf0]  ;;  %v3591_v39 = vor.u32 %v3976_v33, %v3588_v34  ;;  %v3908_v40 = vld [vmem:[%s4229_s9 + $0x4a4] sm:$0xf] }
  0x9e   : > { %2082 = vmatpush.bf16.msra.mxu2 %v2983_v20  ;;  %v3316_v41 = vld [vmem:[%s4229_s9 + $0x4b0] sm:$0xf0]  ;;  %v3940_v42 = vld [vmem:[%s4229_s9 + $0x5a4] sm:$0xf]  ;;  %v3719_v43 = vor.u32 %v4008_v35, %v3716_v36 }
  0x9f   : > { %2096 = vmatpush.bf16.msra.mxu3 %v3111_v23  ;;  %v3444_v44 = vld [vmem:[%s4229_s9 + $0x5b0] sm:$0xf0]  ;;  %v3972_v45 = vld [vmem:[%s4229_s9 + $0x6a4] sm:$0xf]  ;;  %2055 = vmatmul.bf16.vlgmr.msra.gmra.mxu0 %v4335_v3  ;;  %v3319_v50 = vor.u32 %v3908_v40, %v3316_v41 }
  0xa0   : > { %2103 = vmatpush.bf16.msrb.mxu0 %v3351_v24  ;;  %v3572_v46 = vld [vmem:[%s4229_s9 + $0x6b0] sm:$0xf0]  ;;  %v4004_v47 = vld [vmem:[%s4229_s9 + $0x7a4] sm:$0xf]  ;;  %2069 = vmatmul.bf16.vlgmr.msra.gmra.mxu1 %v4351_v19  ;;  %v3447_v51 = vor.u32 %v3940_v42, %v3444_v44 }
  0xa1   : > { %2117 = vmatpush.bf16.msrb.mxu1 %v3479_v25  ;;  %v3700_v49 = vld [vmem:[%s4229_s9 + $0x7b0] sm:$0xf0]  ;;  %2083 = vmatmul.bf16.vlgmr.msra.gmra.mxu2 %v4341_v10  ;;  %v3575_v54 = vor.u32 %v3972_v45, %v3572_v46  ;;  %v3904_v55 = vld [vmem:[%s4229_s9 + $0x484] sm:$0xf] }
  0xa2   : > { %2131 = vmatpush.bf16.msrb.mxu2 %v3607_v27  ;;  %2097 = vmatmul.bf16.vlgmr.msra.gmra.mxu3 %v4357_v26  ;;  %v3300_v57 = vld [vmem:[%s4229_s9 + $0x490] sm:$0xf0]  ;;  %v3936_v58 = vld [vmem:[%s4229_s9 + $0x584] sm:$0xf]  ;;  %v3703_v59 = vor.u32 %v4004_v47, %v3700_v49 }
  0xa3   : > { %2145 = vmatpush.bf16.msrb.mxu3 %v3735_v31  ;;  %v3428_v60 = vld [vmem:[%s4229_s9 + $0x590] sm:$0xf0]  ;;  %v3968_v61 = vld [vmem:[%s4229_s9 + $0x684] sm:$0xf]  ;;  %v3303_v1 = vor.u32 %v3904_v55, %v3300_v57  ;;  %v2842_v57 = vld [vmem:[%s4229_s9 + $0xe8] sm:$0xf] }
  0xa4   : > { %2104 = vmatpush.bf16.msrb.mxu0 %v3335_v37  ;;  %v3556_v62 = vld [vmem:[%s4229_s9 + $0x690] sm:$0xf0]  ;;  %v4000_v63 = vld [vmem:[%s4229_s9 + $0x784] sm:$0xf]  ;;  %v3431_v2 = vor.u32 %v3936_v58, %v3428_v60  ;;  %v3791_v58 = vld [vmem:[%s4229_s9 + $0xf4] sm:$0xf0] }
  0xa5   : > { %2118 = vmatpush.bf16.msrb.mxu1 %v3463_v38  ;;  %v3684_v0 = vld [vmem:[%s4229_s9 + $0x790] sm:$0xf0]  ;;  %v3559_v4 = vor.u32 %v3968_v61, %v3556_v62  ;;  %v3900_v5 = vld [vmem:[%s4229_s9 + $0x464] sm:$0xf]  ;;  %v3823_v61 = vld [vmem:[%s4229_s9 + $0x1f4] sm:$0xf0] }
  0xa6   : > { %2132 = vmatpush.bf16.msrb.mxu2 %v3591_v39  ;;  %v3284_v6 = vld [vmem:[%s4229_s9 + $0x470] sm:$0xf0]  ;;  %v3932_v7 = vld [vmem:[%s4229_s9 + $0x564] sm:$0xf]  ;;  %v3687_v8 = vor.u32 %v4000_v63, %v3684_v0  ;;  %v3098_v62 = vld [vmem:[%s4229_s9 + $0x2e8] sm:$0xf] }
  0xa7   : > { %2146 = vmatpush.bf16.msrb.mxu3 %v3719_v43  ;;  %v3412_v9 = vld [vmem:[%s4229_s9 + $0x570] sm:$0xf0]  ;;  %v3964_v11 = vld [vmem:[%s4229_s9 + $0x664] sm:$0xf]  ;;  %v3287_v15 = vor.u32 %v3900_v5, %v3284_v6  ;;  %v3855_v63 = vld [vmem:[%s4229_s9 + $0x2f4] sm:$0xf0]  ;;  %v2843_v6 = vor.u32 %v3791_v58, %v2842_v57 }
  0xa8   : > { %2105 = vmatpush.bf16.msrb.mxu0 %v3319_v50  ;;  %v3540_v12 = vld [vmem:[%s4229_s9 + $0x670] sm:$0xf0]  ;;  %v3996_v13 = vld [vmem:[%s4229_s9 + $0x764] sm:$0xf]  ;;  %v3415_v16 = vor.u32 %v3932_v7, %v3412_v9  ;;  %v2826_v9 = vld [vmem:[%s4229_s9 + $0xc8] sm:$0xf] }
  0xa9   : > { %2119 = vmatpush.bf16.msrb.mxu1 %v3447_v51  ;;  %v3668_v14 = vld [vmem:[%s4229_s9 + $0x770] sm:$0xf0]  ;;  %v3543_v17 = vor.u32 %v3964_v11, %v3540_v12  ;;  %v3896_v18 = vld [vmem:[%s4229_s9 + $0x444] sm:$0xf]  ;;  %v3787_v11 = vld [vmem:[%s4229_s9 + $0xd4] sm:$0xf0] }
  0xaa   : > { %2133 = vmatpush.bf16.msrb.mxu2 %v3575_v54  ;;  %v3268_v20 = vld [vmem:[%s4229_s9 + $0x450] sm:$0xf0]  ;;  %v3928_v21 = vld [vmem:[%s4229_s9 + $0x544] sm:$0xf]  ;;  %v3671_v22 = vor.u32 %v3996_v13, %v3668_v14  ;;  %v2954_v12 = vld [vmem:[%s4229_s9 + $0x1c8] sm:$0xf] }
  0xab   : > { %2147 = vmatpush.bf16.msrb.mxu3 %v3703_v59  ;;  %v3396_v23 = vld [vmem:[%s4229_s9 + $0x550] sm:$0xf0]  ;;  %v3960_v24 = vld [vmem:[%s4229_s9 + $0x644] sm:$0xf]  ;;  %v3271_v29 = vor.u32 %v3896_v18, %v3268_v20  ;;  %v2970_v59 = vld [vmem:[%s4229_s9 + $0x1e8] sm:$0xf]  ;;  %v2827_v20 = vor.u32 %v3787_v11, %v2826_v9 }
  0xac   : > { %2106 = vmatpush.bf16.msrb.mxu0 %v3303_v1  ;;  %v3524_v25 = vld [vmem:[%s4229_s9 + $0x650] sm:$0xf0]  ;;  %v3992_v27 = vld [vmem:[%s4229_s9 + $0x744] sm:$0xf]  ;;  %v3399_v30 = vor.u32 %v3928_v21, %v3396_v23  ;;  %v2971_v7 = vor.u32 %v3823_v61, %v2970_v59  ;;  %v3819_v14 = vld [vmem:[%s4229_s9 + $0x1d4] sm:$0xf0] }
  0xad   : > { %2120 = vmatpush.bf16.msrb.mxu1 %v3431_v2  ;;  %v3652_v28 = vld [vmem:[%s4229_s9 + $0x750] sm:$0xf0]  ;;  %v3527_v31 = vor.u32 %v3960_v24, %v3524_v25  ;;  %v3892_v32 = vld [vmem:[%s4229_s9 + $0x424] sm:$0xf]  ;;  %v3226_v2 = vld [vmem:[%s4229_s9 + $0x3e8] sm:$0xf]  ;;  %v2955_v21 = vor.u32 %v3819_v14, %v2954_v12 }
  0xae   : > { %2134 = vmatpush.bf16.msrb.mxu2 %v3559_v4  ;;  %v3252_v33 = vld [vmem:[%s4229_s9 + $0x430] sm:$0xf0]  ;;  %v3924_v34 = vld [vmem:[%s4229_s9 + $0x524] sm:$0xf]  ;;  %v3655_v35 = vor.u32 %v3992_v27, %v3652_v28  ;;  %v3887_v4 = vld [vmem:[%s4229_s9 + $0x3f4] sm:$0xf0] }
  0xaf   : > { %2148 = vmatpush.bf16.msrb.mxu3 %v3687_v8  ;;  %v3380_v36 = vld [vmem:[%s4229_s9 + $0x530] sm:$0xf0]  ;;  %v3956_v37 = vld [vmem:[%s4229_s9 + $0x624] sm:$0xf]  ;;  %v3255_v41 = vor.u32 %v3892_v32, %v3252_v33  ;;  %v3099_v8 = vor.u32 %v3855_v63, %v3098_v62  ;;  %v3227_v13 = vor.u32 %v3887_v4, %v3226_v2  ;;  %v3883_v18 = vld [vmem:[%s4229_s9 + $0x3d4] sm:$0xf0] }
  0xb0   : > { %2107 = vmatpush.bf16.msrb.mxu0 %v3287_v15  ;;  %v3508_v38 = vld [vmem:[%s4229_s9 + $0x630] sm:$0xf0]  ;;  %v3988_v39 = vld [vmem:[%s4229_s9 + $0x724] sm:$0xf]  ;;  %v3383_v44 = vor.u32 %v3924_v34, %v3380_v36  ;;  %v3082_v15 = vld [vmem:[%s4229_s9 + $0x2c8] sm:$0xf] }
  0xb1   : > { %2121 = vmatpush.bf16.msrb.mxu1 %v3415_v16  ;;  %v3636_v40 = vld [vmem:[%s4229_s9 + $0x730] sm:$0xf0]  ;;  %v3888_v42 = vld [vmem:[%s4229_s9 + $0x404] sm:$0xf]  ;;  %v3511_v45 = vor.u32 %v3956_v37, %v3508_v38  ;;  %v3851_v16 = vld [vmem:[%s4229_s9 + $0x2d4] sm:$0xf0] }
  0xb2   : > { %2135 = vmatpush.bf16.msrb.mxu2 %v3543_v17  ;;  %v3236_v43 = vld [vmem:[%s4229_s9 + $0x410] sm:$0xf0]  ;;  %v3920_v46 = vld [vmem:[%s4229_s9 + $0x504] sm:$0xf]  ;;  %v3639_v50 = vor.u32 %v3988_v39, %v3636_v40  ;;  %v3210_v17 = vld [vmem:[%s4229_s9 + $0x3c8] sm:$0xf] }
  0xb3   : > { %2149 = vmatpush.bf16.msrb.mxu3 %v3671_v22  ;;  %v3364_v47 = vld [vmem:[%s4229_s9 + $0x510] sm:$0xf0]  ;;  %v3952_v49 = vld [vmem:[%s4229_s9 + $0x604] sm:$0xf]  ;;  %v3239_v60 = vor.u32 %v3888_v42, %v3236_v43  ;;  %v3083_v22 = vor.u32 %v3851_v16, %v3082_v15  ;;  %v2810_v23 = vld [vmem:[%s4229_s9 + $0xa8] sm:$0xf]  ;;  %v3211_v27 = vor.u32 %v3883_v18, %v3210_v17 }
  0xb4   : > { %2108 = vmatpush.bf16.msrb.mxu0 %v3271_v29  ;;  %v3492_v51 = vld [vmem:[%s4229_s9 + $0x610] sm:$0xf0]  ;;  %v3984_v54 = vld [vmem:[%s4229_s9 + $0x704] sm:$0xf]  ;;  %v3367_v0 = vor.u32 %v3920_v46, %v3364_v47  ;;  %v3783_v24 = vld [vmem:[%s4229_s9 + $0xb4] sm:$0xf0] }
  0xb5   : > { %2122 = vmatpush.bf16.msrb.mxu1 %v3399_v30  ;;  %v3620_v55 = vld [vmem:[%s4229_s9 + $0x710] sm:$0xf0]  ;;  %v3495_v1 = vor.u32 %v3952_v49, %v3492_v51  ;;  %v2938_v25 = vld [vmem:[%s4229_s9 + $0x1a8] sm:$0xf]  ;;  %v3815_v28 = vld [vmem:[%s4229_s9 + $0x1b4] sm:$0xf0]  ;;  %v2811_v33 = vor.u32 %v3783_v24, %v2810_v23 }
  0xb6   : > { %2136 = vmatpush.bf16.msrb.mxu2 %v3527_v31  ;;  %v3623_v5 = vor.u32 %v3984_v54, %v3620_v55  ;;  %v3066_v29 = vld [vmem:[%s4229_s9 + $0x2a8] sm:$0xf]  ;;  %v3847_v30 = vld [vmem:[%s4229_s9 + $0x2b4] sm:$0xf0]  ;;  %v2939_v34 = vor.u32 %v3815_v28, %v2938_v25 }
  0xb7   : > { %2150 = vmatpush.bf16.msrb.mxu3 %v3655_v35  ;;  %v3194_v31 = vld [vmem:[%s4229_s9 + $0x3a8] sm:$0xf]  ;;  %v3879_v32 = vld [vmem:[%s4229_s9 + $0x3b4] sm:$0xf0]  ;;  %v3067_v35 = vor.u32 %v3847_v30, %v3066_v29 }
  0xb8   : > { %2109 = vmatpush.bf16.msrb.mxu0 %v3255_v41  ;;  %v2794_v36 = vld [vmem:[%s4229_s9 + $0x88] sm:$0xf]  ;;  %v3779_v37 = vld [vmem:[%s4229_s9 + $0x94] sm:$0xf0]  ;;  %v3195_v39 = vor.u32 %v3879_v32, %v3194_v31 }
  0xb9   : > { %2123 = vmatpush.bf16.msrb.mxu1 %v3383_v44  ;;  %v2922_v38 = vld [vmem:[%s4229_s9 + $0x188] sm:$0xf]  ;;  %v3811_v40 = vld [vmem:[%s4229_s9 + $0x194] sm:$0xf0] }
  0xba   : > { %2137 = vmatpush.bf16.msrb.mxu2 %v3511_v45  ;;  %v3050_v41 = vld [vmem:[%s4229_s9 + $0x288] sm:$0xf]  ;;  %v3843_v42 = vld [vmem:[%s4229_s9 + $0x294] sm:$0xf0]  ;;  %v2795_v45 = vor.u32 %v3779_v37, %v2794_v36  ;;  %v2923_v46 = vor.u32 %v3811_v40, %v2922_v38 }
  0xbb   : > { %2151 = vmatpush.bf16.msrb.mxu3 %v3639_v50  ;;  %v3178_v43 = vld [vmem:[%s4229_s9 + $0x388] sm:$0xf]  ;;  %v3875_v44 = vld [vmem:[%s4229_s9 + $0x394] sm:$0xf0]  ;;  %v3051_v47 = vor.u32 %v3843_v42, %v3050_v41 }
  0xbc   : > { %2110 = vmatpush.bf16.msrb.mxu0 %v3239_v60  ;;  %v2778_v49 = vld [vmem:[%s4229_s9 + $0x68] sm:$0xf]  ;;  %v3775_v50 = vld [vmem:[%s4229_s9 + $0x74] sm:$0xf0]  ;;  %v3179_v54 = vor.u32 %v3875_v44, %v3178_v43 }
  0xbd   : > { %2124 = vmatpush.bf16.msrb.mxu1 %v3367_v0  ;;  %v2906_v51 = vld [vmem:[%s4229_s9 + $0x168] sm:$0xf]  ;;  %v3807_v55 = vld [vmem:[%s4229_s9 + $0x174] sm:$0xf0]  ;;  %v2779_v61 = vor.u32 %v3775_v50, %v2778_v49 }
  0xbe   : > { %2138 = vmatpush.bf16.msrb.mxu2 %v3495_v1  ;;  %v3034_v57 = vld [vmem:[%s4229_s9 + $0x268] sm:$0xf]  ;;  %v3839_v58 = vld [vmem:[%s4229_s9 + $0x274] sm:$0xf0]  ;;  %v2907_v62 = vor.u32 %v3807_v55, %v2906_v51 }
  0xbf   : > { %2152 = vmatpush.bf16.msrb.mxu3 %v3623_v5  ;;  %2111 = vmatmul.bf16.vlgmr.msrb.gmra.mxu0 %v4417_v48  ;;  %v3162_v59 = vld [vmem:[%s4229_s9 + $0x368] sm:$0xf]  ;;  %v3871_v60 = vld [vmem:[%s4229_s9 + $0x374] sm:$0xf0]  ;;  %v3035_v63 = vor.u32 %v3839_v58, %v3034_v57 }
  0xc0   : > { %2159 = vmatpush.bf16.msra.mxu0 %v2843_v6  ;;  %2125 = vmatmul.bf16.vlgmr.msrb.gmra.mxu1 %v4424_v53  ;;  %v2762_v0 = vld [vmem:[%s4229_s9 + $0x48] sm:$0xf]  ;;  %v3771_v1 = vld [vmem:[%s4229_s9 + $0x54] sm:$0xf0]  ;;  %v3163_v4 = vor.u32 %v3871_v60, %v3162_v59 }
  0xc1   : > { %2173 = vmatpush.bf16.msra.mxu1 %v2971_v7  ;;  %2139 = vmatmul.bf16.vlgmr.msrb.gmra.mxu2 %v4422_v52  ;;  %v2890_v2 = vld [vmem:[%s4229_s9 + $0x148] sm:$0xf]  ;;  %v3803_v5 = vld [vmem:[%s4229_s9 + $0x154] sm:$0xf0]  ;;  %v2763_v11 = vor.u32 %v3771_v1, %v2762_v0 }
  0xc2   : > { %2187 = vmatpush.bf16.msra.mxu2 %v3099_v8  ;;  %2153 = vmatmul.bf16.vlgmr.msrb.gmra.mxu3 %v4428_v56  ;;  %v3018_v6 = vld [vmem:[%s4229_s9 + $0x248] sm:$0xf]  ;;  %v3835_v7 = vld [vmem:[%s4229_s9 + $0x254] sm:$0xf0]  ;;  %v2891_v12 = vor.u32 %v3803_v5, %v2890_v2 }
  0xc3   : > { %2201 = vmatpush.bf16.msra.mxu3 %v3227_v13  ;;  %v3146_v8 = vld [vmem:[%s4229_s9 + $0x348] sm:$0xf]  ;;  %v3867_v9 = vld [vmem:[%s4229_s9 + $0x354] sm:$0xf0]  ;;  %v3019_v13 = vor.u32 %v3835_v7, %v3018_v6 }
  0xc4   : > { %2160 = vmatpush.bf16.msra.mxu0 %v2827_v20  ;;  %v2746_v14 = vld [vmem:[%s4229_s9 + $0x28] sm:$0xf]  ;;  %v3767_v15 = vld [vmem:[%s4229_s9 + $0x34] sm:$0xf0]  ;;  %v3147_v17 = vor.u32 %v3867_v9, %v3146_v8 }
  0xc5   : > { %2174 = vmatpush.bf16.msra.mxu1 %v2955_v21  ;;  %v2874_v16 = vld [vmem:[%s4229_s9 + $0x128] sm:$0xf]  ;;  %v3799_v18 = vld [vmem:[%s4229_s9 + $0x134] sm:$0xf0]  ;;  %v2747_v24 = vor.u32 %v3767_v15, %v2746_v14 }
  0xc6   : > { %2188 = vmatpush.bf16.msra.mxu2 %v3083_v22  ;;  %v3002_v20 = vld [vmem:[%s4229_s9 + $0x228] sm:$0xf]  ;;  %v3831_v21 = vld [vmem:[%s4229_s9 + $0x234] sm:$0xf0]  ;;  %v2875_v28 = vor.u32 %v3799_v18, %v2874_v16 }
  0xc7   : > { %2202 = vmatpush.bf16.msra.mxu3 %v3211_v27  ;;  %v3130_v22 = vld [vmem:[%s4229_s9 + $0x328] sm:$0xf]  ;;  %v3863_v23 = vld [vmem:[%s4229_s9 + $0x334] sm:$0xf0]  ;;  %v3003_v29 = vor.u32 %v3831_v21, %v3002_v20 }
  0xc8   : > { %2161 = vmatpush.bf16.msra.mxu0 %v2811_v33  ;;  %v2730_v25 = vld [vmem:[%s4229_s9 + $0x8] sm:$0xf]  ;;  %v3763_v27 = vld [vmem:[%s4229_s9 + $0x14] sm:$0xf0]  ;;  %v3131_v33 = vor.u32 %v3863_v23, %v3130_v22 }
  0xc9   : > { %2175 = vmatpush.bf16.msra.mxu1 %v2939_v34  ;;  %v2858_v30 = vld [vmem:[%s4229_s9 + $0x108] sm:$0xf]  ;;  %v3795_v31 = vld [vmem:[%s4229_s9 + $0x114] sm:$0xf0]  ;;  %v2731_v40 = vor.u32 %v3763_v27, %v2730_v25 }
  0xca   : > { %2189 = vmatpush.bf16.msra.mxu2 %v3067_v35  ;;  %v2986_v32 = vld [vmem:[%s4229_s9 + $0x208] sm:$0xf]  ;;  %v3827_v34 = vld [vmem:[%s4229_s9 + $0x214] sm:$0xf0]  ;;  %v2859_v44 = vor.u32 %v3795_v31, %v2858_v30 }
  0xcb   : > { %2203 = vmatpush.bf16.msra.mxu3 %v3195_v39  ;;  %v3114_v35 = vld [vmem:[%s4229_s9 + $0x308] sm:$0xf]  ;;  %v3859_v36 = vld [vmem:[%s4229_s9 + $0x314] sm:$0xf0] }
  0xcc   : > { %2162 = vmatpush.bf16.msra.mxu0 %v2795_v45  ;;  %v3354_v37 = vld [vmem:[%s4229_s9 + $0x4e8] sm:$0xf]  ;;  %v3919_v38 = vld [vmem:[%s4229_s9 + $0x4f4] sm:$0xf0]  ;;  %v2987_v45 = vor.u32 %v3827_v34, %v2986_v32  ;;  %v3115_v49 = vor.u32 %v3859_v36, %v3114_v35 }
  0xcd   : > { %2176 = vmatpush.bf16.msra.mxu1 %v2923_v46  ;;  %v3482_v39 = vld [vmem:[%s4229_s9 + $0x5e8] sm:$0xf]  ;;  %v3951_v41 = vld [vmem:[%s4229_s9 + $0x5f4] sm:$0xf0]  ;;  %v3355_v50 = vor.u32 %v3919_v38, %v3354_v37 }
  0xce   : > { %2190 = vmatpush.bf16.msra.mxu2 %v3051_v47  ;;  %v3610_v42 = vld [vmem:[%s4229_s9 + $0x6e8] sm:$0xf]  ;;  %v3983_v43 = vld [vmem:[%s4229_s9 + $0x6f4] sm:$0xf0]  ;;  %v3483_v51 = vor.u32 %v3951_v41, %v3482_v39 }
  0xcf   : > { %2204 = vmatpush.bf16.msra.mxu3 %v3179_v54  ;;  %v3738_v46 = vld [vmem:[%s4229_s9 + $0x7e8] sm:$0xf]  ;;  %v4015_v47 = vld [vmem:[%s4229_s9 + $0x7f4] sm:$0xf0]  ;;  %v3611_v54 = vor.u32 %v3983_v43, %v3610_v42 }
  0xd0   : > { %2163 = vmatpush.bf16.msra.mxu0 %v2779_v61  ;;  %v3338_v55 = vld [vmem:[%s4229_s9 + $0x4c8] sm:$0xf]  ;;  %v3915_v57 = vld [vmem:[%s4229_s9 + $0x4d4] sm:$0xf0]  ;;  %v3739_v59 = vor.u32 %v4015_v47, %v3738_v46 }
  0xd1   : > { %2177 = vmatpush.bf16.msra.mxu1 %v2907_v62  ;;  %v3466_v58 = vld [vmem:[%s4229_s9 + $0x5c8] sm:$0xf]  ;;  %v3947_v60 = vld [vmem:[%s4229_s9 + $0x5d4] sm:$0xf0]  ;;  %v3339_v1 = vor.u32 %v3915_v57, %v3338_v55 }
  0xd2   : > { %2191 = vmatpush.bf16.msra.mxu2 %v3035_v63  ;;  %v3594_v61 = vld [vmem:[%s4229_s9 + $0x6c8] sm:$0xf]  ;;  %v3979_v62 = vld [vmem:[%s4229_s9 + $0x6d4] sm:$0xf0]  ;;  %v3467_v2 = vor.u32 %v3947_v60, %v3466_v58 }
  0xd3   : > { %2205 = vmatpush.bf16.msra.mxu3 %v3163_v4  ;;  %v3722_v63 = vld [vmem:[%s4229_s9 + $0x7c8] sm:$0xf]  ;;  %v4011_v0 = vld [vmem:[%s4229_s9 + $0x7d4] sm:$0xf0]  ;;  %v3595_v4 = vor.u32 %v3979_v62, %v3594_v61 }
  0xd4   : > { %2164 = vmatpush.bf16.msra.mxu0 %v2763_v11  ;;  %v3322_v5 = vld [vmem:[%s4229_s9 + $0x4a8] sm:$0xf]  ;;  %v3911_v6 = vld [vmem:[%s4229_s9 + $0x4b4] sm:$0xf0]  ;;  %v3723_v8 = vor.u32 %v4011_v0, %v3722_v63 }
  0xd5   : > { %2178 = vmatpush.bf16.msra.mxu1 %v2891_v12  ;;  %v3450_v7 = vld [vmem:[%s4229_s9 + $0x5a8] sm:$0xf]  ;;  %v3943_v9 = vld [vmem:[%s4229_s9 + $0x5b4] sm:$0xf0]  ;;  %v3323_v15 = vor.u32 %v3911_v6, %v3322_v5 }
  0xd6   : > { %2192 = vmatpush.bf16.msra.mxu2 %v3019_v13  ;;  %v3578_v11 = vld [vmem:[%s4229_s9 + $0x6a8] sm:$0xf]  ;;  %v3975_v12 = vld [vmem:[%s4229_s9 + $0x6b4] sm:$0xf0]  ;;  %v3451_v16 = vor.u32 %v3943_v9, %v3450_v7 }
  0xd7   : > { %2206 = vmatpush.bf16.msra.mxu3 %v3147_v17  ;;  %v3706_v13 = vld [vmem:[%s4229_s9 + $0x7a8] sm:$0xf]  ;;  %v4007_v14 = vld [vmem:[%s4229_s9 + $0x7b4] sm:$0xf0]  ;;  %v3579_v17 = vor.u32 %v3975_v12, %v3578_v11 }
  0xd8   : > { %2165 = vmatpush.bf16.msra.mxu0 %v2747_v24  ;;  %v3306_v18 = vld [vmem:[%s4229_s9 + $0x488] sm:$0xf]  ;;  %v3907_v20 = vld [vmem:[%s4229_s9 + $0x494] sm:$0xf0]  ;;  %v3707_v22 = vor.u32 %v4007_v14, %v3706_v13 }
  0xd9   : > { %2179 = vmatpush.bf16.msra.mxu1 %v2875_v28  ;;  %v3434_v21 = vld [vmem:[%s4229_s9 + $0x588] sm:$0xf]  ;;  %v3939_v23 = vld [vmem:[%s4229_s9 + $0x594] sm:$0xf0] }
  0xda   : > { %2193 = vmatpush.bf16.msra.mxu2 %v3003_v29  ;;  %v3562_v24 = vld [vmem:[%s4229_s9 + $0x688] sm:$0xf]  ;;  %v3971_v25 = vld [vmem:[%s4229_s9 + $0x694] sm:$0xf0]  ;;  %v3307_v29 = vor.u32 %v3907_v20, %v3306_v18  ;;  %v3435_v30 = vor.u32 %v3939_v23, %v3434_v21  ;;  %v2844_v23 = vld [vmem:[%s4229_s9 + $0xf8] sm:$0xf0] }
  0xdb   : > { %2207 = vmatpush.bf16.msra.mxu3 %v3131_v33  ;;  %v3690_v27 = vld [vmem:[%s4229_s9 + $0x788] sm:$0xf]  ;;  %v4003_v28 = vld [vmem:[%s4229_s9 + $0x794] sm:$0xf0]  ;;  %v3563_v31 = vor.u32 %v3971_v25, %v3562_v24  ;;  %v1958_v5 = vpop.f32.mrf.mxu1  ;;  %v3821_v24 = vld [vmem:[%s4229_s9 + $0x1ec] sm:$0xf] }
  0xdc   : > { %2166 = vmatpush.bf16.msra.mxu0 %v2731_v40  ;;  %v3290_v32 = vld [vmem:[%s4229_s9 + $0x468] sm:$0xf]  ;;  %v3903_v33 = vld [vmem:[%s4229_s9 + $0x474] sm:$0xf0]  ;;  %v3691_v35 = vor.u32 %v4003_v28, %v3690_v27  ;;  %v2972_v27 = vld [vmem:[%s4229_s9 + $0x1f8] sm:$0xf0] }
  0xdd   : > { %2180 = vmatpush.bf16.msra.mxu1 %v2859_v44  ;;  %v3418_v34 = vld [vmem:[%s4229_s9 + $0x568] sm:$0xf]  ;;  %v3935_v36 = vld [vmem:[%s4229_s9 + $0x574] sm:$0xf0]  ;;  %v3291_v41 = vor.u32 %v3903_v33, %v3290_v32  ;;  %v3853_v28 = vld [vmem:[%s4229_s9 + $0x2ec] sm:$0xf] }
  0xde   : > { %2194 = vmatpush.bf16.msra.mxu2 %v2987_v45  ;;  %v3546_v37 = vld [vmem:[%s4229_s9 + $0x668] sm:$0xf]  ;;  %v3967_v38 = vld [vmem:[%s4229_s9 + $0x674] sm:$0xf0]  ;;  %v3419_v42 = vor.u32 %v3935_v36, %v3418_v34  ;;  %v3885_v33 = vld [vmem:[%s4229_s9 + $0x3ec] sm:$0xf] }
  0xdf   : > { %2208 = vmatpush.bf16.msra.mxu3 %v3115_v49  ;;  %2167 = vmatmul.bf16.vlgmr.msra.gmra.mxu0 %v4335_v3  ;;  %v3674_v39 = vld [vmem:[%s4229_s9 + $0x768] sm:$0xf]  ;;  %v3999_v40 = vld [vmem:[%s4229_s9 + $0x774] sm:$0xf0]  ;;  %v3547_v43 = vor.u32 %v3967_v38, %v3546_v37  ;;  %v3228_v34 = vld [vmem:[%s4229_s9 + $0x3f8] sm:$0xf0] }
  0xe0   : > { %2215 = vmatpush.bf16.msrb.mxu0 %v3355_v50  ;;  %2181 = vmatmul.bf16.vlgmr.msra.gmra.mxu1 %v4351_v19  ;;  %v3274_v44 = vld [vmem:[%s4229_s9 + $0x448] sm:$0xf]  ;;  %v3899_v45 = vld [vmem:[%s4229_s9 + $0x454] sm:$0xf0]  ;;  %v3675_v47 = vor.u32 %v3999_v40, %v3674_v39  ;;  %v2975_v39 = vor.u32 %v3821_v24, %v2972_v27  ;;  %v3180_v24 = vld [vmem:[%s4229_s9 + $0x398] sm:$0xf0] }
  0xe1   : > { %2229 = vmatpush.bf16.msrb.mxu1 %v3483_v51  ;;  %2195 = vmatmul.bf16.vlgmr.msra.gmra.mxu2 %v4341_v10  ;;  %v3402_v46 = vld [vmem:[%s4229_s9 + $0x548] sm:$0xf]  ;;  %v3931_v49 = vld [vmem:[%s4229_s9 + $0x554] sm:$0xf0]  ;;  %v3275_v57 = vor.u32 %v3899_v45, %v3274_v44  ;;  %v3817_v44 = vld [vmem:[%s4229_s9 + $0x1cc] sm:$0xf]  ;;  %v3231_v45 = vor.u32 %v3885_v33, %v3228_v34 }
  0xe2   : > { %2243 = vmatpush.bf16.msrb.mxu2 %v3611_v54  ;;  %2209 = vmatmul.bf16.vlgmr.msra.gmra.mxu3 %v4357_v26  ;;  %v3530_v50 = vld [vmem:[%s4229_s9 + $0x648] sm:$0xf]  ;;  %v3963_v51 = vld [vmem:[%s4229_s9 + $0x654] sm:$0xf0]  ;;  %v3403_v58 = vor.u32 %v3931_v49, %v3402_v46  ;;  %v2956_v46 = vld [vmem:[%s4229_s9 + $0x1d8] sm:$0xf0] }
  0xe3   : > { %2257 = vmatpush.bf16.msrb.mxu3 %v3739_v59  ;;  %v3658_v54 = vld [vmem:[%s4229_s9 + $0x748] sm:$0xf]  ;;  %v3995_v55 = vld [vmem:[%s4229_s9 + $0x754] sm:$0xf0]  ;;  %v3531_v59 = vor.u32 %v3963_v51, %v3530_v50  ;;  %v3084_v49 = vld [vmem:[%s4229_s9 + $0x2d8] sm:$0xf0]  ;;  %v1960_v50 = vpop.f32.mrf.mxu1 }
  0xe4   : > { %2216 = vmatpush.bf16.msrb.mxu0 %v3339_v1  ;;  %v1944_v60 = vpop.f32.mrf.mxu0  ;;  %v3258_v61 = vld [vmem:[%s4229_s9 + $0x428] sm:$0xf]  ;;  %v3895_v62 = vld [vmem:[%s4229_s9 + $0x434] sm:$0xf0]  ;;  %v3659_v0 = vor.u32 %v3995_v55, %v3658_v54  ;;  %v3881_v51 = vld [vmem:[%s4229_s9 + $0x3cc] sm:$0xf] }
  0xe5   : > { %2230 = vmatpush.bf16.msrb.mxu1 %v3467_v2  ;;  %v3386_v63 = vld [vmem:[%s4229_s9 + $0x528] sm:$0xf]  ;;  %v3927_v1 = vld [vmem:[%s4229_s9 + $0x534] sm:$0xf0]  ;;  %v1959_v36 = vadd.f32 %v1958_v5, %v1944_v60  ;;  %v3212_v54 = vld [vmem:[%s4229_s9 + $0x3d8] sm:$0xf0] }
  0xe6   : > { %2244 = vmatpush.bf16.msrb.mxu2 %v3595_v4  ;;  %v3514_v2 = vld [vmem:[%s4229_s9 + $0x628] sm:$0xf]  ;;  %v3959_v4 = vld [vmem:[%s4229_s9 + $0x634] sm:$0xf0]  ;;  %v3387_v12 = vor.u32 %v3927_v1, %v3386_v63  ;;  %v3781_v60 = vld [vmem:[%s4229_s9 + $0xac] sm:$0xf]  ;;  %v3215_v63 = vor.u32 %v3881_v51, %v3212_v54 }
  0xe7   : > { %2258 = vmatpush.bf16.msrb.mxu3 %v3723_v8  ;;  %v3642_v6 = vld [vmem:[%s4229_s9 + $0x728] sm:$0xf]  ;;  %v3991_v7 = vld [vmem:[%s4229_s9 + $0x734] sm:$0xf0]  ;;  %v3259_v8 = vor.u32 %v3895_v62, %v3258_v61  ;;  %v3515_v13 = vor.u32 %v3959_v4, %v3514_v2  ;;  %v2812_v61 = vld [vmem:[%s4229_s9 + $0xb8] sm:$0xf0] }
  0xe8   : > { %2217 = vmatpush.bf16.msrb.mxu0 %v3323_v15  ;;  %v3242_v9 = vld [vmem:[%s4229_s9 + $0x408] sm:$0xf]  ;;  %v3891_v11 = vld [vmem:[%s4229_s9 + $0x414] sm:$0xf0]  ;;  %v3813_v62 = vld [vmem:[%s4229_s9 + $0x1ac] sm:$0xf] }
  0xe9   : > { %2231 = vmatpush.bf16.msrb.mxu1 %v3451_v16  ;;  %v3370_v14 = vld [vmem:[%s4229_s9 + $0x508] sm:$0xf]  ;;  %v3923_v15 = vld [vmem:[%s4229_s9 + $0x514] sm:$0xf0]  ;;  %v3243_v25 = vor.u32 %v3891_v11, %v3242_v9  ;;  %v3845_v1 = vld [vmem:[%s4229_s9 + $0x2ac] sm:$0xf] }
  0xea   : > { %2245 = vmatpush.bf16.msrb.mxu2 %v3579_v17  ;;  %v3498_v16 = vld [vmem:[%s4229_s9 + $0x608] sm:$0xf]  ;;  %v3643_v17 = vor.u32 %v3991_v7, %v3642_v6  ;;  %v3955_v18 = vld [vmem:[%s4229_s9 + $0x614] sm:$0xf0]  ;;  %v3068_v2 = vld [vmem:[%s4229_s9 + $0x2b8] sm:$0xf0]  ;;  %v2815_v7 = vor.u32 %v3781_v60, %v2812_v61 }
  0xeb   : > { %2259 = vmatpush.bf16.msrb.mxu3 %v3707_v22  ;;  %v3626_v20 = vld [vmem:[%s4229_s9 + $0x708] sm:$0xf]  ;;  %v3987_v21 = vld [vmem:[%s4229_s9 + $0x714] sm:$0xf0]  ;;  %v3789_v22 = vld [vmem:[%s4229_s9 + $0xec] sm:$0xf]  ;;  %v3499_v32 = vor.u32 %v3955_v18, %v3498_v16  ;;  %v3071_v11 = vor.u32 %v3845_v1, %v3068_v2 }
  0xec   : > { %2218 = vmatpush.bf16.msrb.mxu0 %v3307_v29  ;;  %v3100_v29 = vld [vmem:[%s4229_s9 + $0x2f8] sm:$0xf0]  ;;  %v3627_v37 = vor.u32 %v3987_v21, %v3626_v20  ;;  %v2847_v38 = vor.u32 %v3789_v22, %v2844_v23  ;;  %v3877_v4 = vld [vmem:[%s4229_s9 + $0x3ac] sm:$0xf] }
  0xed   : > { %2232 = vmatpush.bf16.msrb.mxu1 %v3435_v30  ;;  %v1972_v30 = vpop.f32.mrf.mxu2  ;;  %v3103_v40 = vor.u32 %v3853_v28, %v3100_v29  ;;  %v3196_v5 = vld [vmem:[%s4229_s9 + $0x3b8] sm:$0xf0]  ;;  %v3841_v18 = vld [vmem:[%s4229_s9 + $0x28c] sm:$0xf] }
  0xee   : > { %2246 = vmatpush.bf16.msrb.mxu2 %v3563_v31  ;;  %v3371_v31 = vor.u32 %v3923_v15, %v3370_v14  ;;  %v1973_v55 = vadd.f32 %v1972_v30, %v1959_v36  ;;  %v2796_v14 = vld [vmem:[%s4229_s9 + $0x98] sm:$0xf0]  ;;  %v3809_v15 = vld [vmem:[%s4229_s9 + $0x18c] sm:$0xf]  ;;  %v3199_v16 = vor.u32 %v3877_v4, %v3196_v5 }
  0xef   : > { %2260 = vmatpush.bf16.msrb.mxu3 %v3691_v35  ;;  %v1986_v35 = vpop.f32.mrf.mxu3  ;;  %v3052_v20 = vld [vmem:[%s4229_s9 + $0x298] sm:$0xf0]  ;;  %v3873_v23 = vld [vmem:[%s4229_s9 + $0x38c] sm:$0xf] }
  0xf0   : > { %2219 = vmatpush.bf16.msrb.mxu0 %v3291_v41  ;;  %v1946_v41 = vpop.f32.mrf.mxu0  ;;  %v1987_v6 = vadd.f32 %v1986_v35, %v1973_v55  ;;  %v3055_v30 = vor.u32 %v3841_v18, %v3052_v20  ;;  %v3805_v33 = vld [vmem:[%s4229_s9 + $0x16c] sm:$0xf]  ;;  %v3183_v34 = vor.u32 %v3873_v23, %v3180_v24  ;;  %v2908_v35 = vld [vmem:[%s4229_s9 + $0x178] sm:$0xf0] }
  0xf1   : > { %2233 = vmatpush.bf16.msrb.mxu1 %v3419_v42  ;;  %v3785_v42 = vld [vmem:[%s4229_s9 + $0xcc] sm:$0xf]  ;;  %v1961_v21 = vadd.f32 %v1960_v50, %v1946_v41  ;;  %v3164_v41 = vld [vmem:[%s4229_s9 + $0x378] sm:$0xf0] }
  0xf2   : > { %2247 = vmatpush.bf16.msrb.mxu2 %v3547_v43  ;;  %v2828_v43 = vld [vmem:[%s4229_s9 + $0xd8] sm:$0xf0]  ;;  %v3837_v36 = vld [vmem:[%s4229_s9 + $0x26c] sm:$0xf] }
  0xf3   : > { %2261 = vmatpush.bf16.msrb.mxu3 %v3675_v47  ;;  %v3849_v47 = vld [vmem:[%s4229_s9 + $0x2cc] sm:$0xf]  ;;  %v3020_v55 = vld [vmem:[%s4229_s9 + $0x258] sm:$0xf0] }
  0xf4   : > { %2220 = vmatpush.bf16.msrb.mxu0 %v3275_v57  ;;  %v2831_v57 = vor.u32 %v3785_v42, %v2828_v43  ;;  %v3769_v43 = vld [vmem:[%s4229_s9 + $0x4c] sm:$0xf] }
  0xf5   : > { %2234 = vmatpush.bf16.msrb.mxu1 %v3403_v58  ;;  %v2959_v58 = vor.u32 %v3817_v44, %v2956_v46  ;;  %v2911_v44 = vor.u32 %v3805_v33, %v2908_v35  ;;  %v2764_v46 = vld [vmem:[%s4229_s9 + $0x58] sm:$0xf0]  ;;  %v3833_v54 = vld [vmem:[%s4229_s9 + $0x24c] sm:$0xf] }
  0xf6   : > { %2248 = vmatpush.bf16.msrb.mxu2 %v3531_v59  ;;  %v3087_v59 = vor.u32 %v3849_v47, %v3084_v49  ;;  %v3801_v47 = vld [vmem:[%s4229_s9 + $0x14c] sm:$0xf]  ;;  %v2892_v49 = vld [vmem:[%s4229_s9 + $0x158] sm:$0xf0]  ;;  %v3023_v5 = vor.u32 %v3833_v54, %v3020_v55 }
  0xf7   : > { %2262 = vmatpush.bf16.msrb.mxu3 %v3659_v0  ;;  %v2940_v0 = vld [vmem:[%s4229_s9 + $0x1b8] sm:$0xf0]  ;;  %v3865_v61 = vld [vmem:[%s4229_s9 + $0x34c] sm:$0xf]  ;;  %v2895_v1 = vor.u32 %v3801_v47, %v2892_v49 }
  0xf8   : > { %2221 = vmatpush.bf16.msrb.mxu0 %v3259_v8  ;;  %v1974_v8 = vpop.f32.mrf.mxu2  ;;  %v2943_v9 = vor.u32 %v3813_v62, %v2940_v0  ;;  %v3148_v62 = vld [vmem:[%s4229_s9 + $0x358] sm:$0xf0]  ;;  %v2767_v0 = vor.u32 %v3769_v43, %v2764_v46  ;;  %v3761_v20 = vld [vmem:[%s4229_s9 + $0xc] sm:$0xf] }
  0xf9   : > { %2235 = vmatpush.bf16.msrb.mxu1 %v3387_v12  ;;  %v1988_v12 = vpop.f32.mrf.mxu3  ;;  %v3857_v33 = vld [vmem:[%s4229_s9 + $0x30c] sm:$0xf]  ;;  %v3612_v43 = vld [vmem:[%s4229_s9 + $0x6f8] sm:$0xf0] }
  0xfa   : > { %2249 = vmatpush.bf16.msrb.mxu2 %v3515_v13  ;;  %v3777_v13 = vld [vmem:[%s4229_s9 + $0x8c] sm:$0xf]  ;;  %v3740_v49 = vld [vmem:[%s4229_s9 + $0x7f8] sm:$0xf0] }
  0xfb   : > { %2263 = vmatpush.bf16.msrb.mxu3 %v3643_v17  ;;  %v2924_v17 = vld [vmem:[%s4229_s9 + $0x198] sm:$0xf0]  ;;  %v2799_v27 = vor.u32 %v3777_v13, %v2796_v14  ;;  %v3829_v13 = vld [vmem:[%s4229_s9 + $0x22c] sm:$0xf] }
  0xfc   : > { %2222 = vmatpush.bf16.msrb.mxu0 %v3243_v25  ;;  %v2000_v22 = vpop.f32.mrf.mxu0  ;;  %v2927_v29 = vor.u32 %v3809_v15, %v2924_v17  ;;  %v3004_v14 = vld [vmem:[%s4229_s9 + $0x238] sm:$0xf0]  ;;  %v4013_v47 = vld [vmem:[%s4229_s9 + $0x7ec] sm:$0xf] }
  0xfd   : > { %2236 = vmatpush.bf16.msrb.mxu1 %v3371_v31  ;;  %v2001_v25 = vadd.f32 %v2000_v22, %v1987_v6  ;;  %v2014_v28 = vpop.f32.mrf.mxu1  ;;  %v3773_v31 = vld [vmem:[%s4229_s9 + $0x6c] sm:$0xf]  ;;  %v3132_v17 = vld [vmem:[%s4229_s9 + $0x338] sm:$0xf0] }
  0xfe   : > { %2250 = vmatpush.bf16.msrb.mxu2 %v3499_v32  ;;  %v2780_v32 = vld [vmem:[%s4229_s9 + $0x78] sm:$0xf0]  ;;  %v3765_v6 = vld [vmem:[%s4229_s9 + $0x2c] sm:$0xf] }
  0xff   : > { %2264 = vmatpush.bf16.msrb.mxu3 %v3627_v37  ;;  %2223 = vmatmul.bf16.vlgmr.msrb.gmra.mxu0 %v4417_v48  ;;  %v3036_v37 = vld [vmem:[%s4229_s9 + $0x278] sm:$0xf0]  ;;  %v2783_v42 = vor.u32 %v3773_v31, %v2780_v32  ;;  %v3793_v22 = vld [vmem:[%s4229_s9 + $0x10c] sm:$0xf] }
 0x100   : > { %2271 = vmatpush.bf16.msra.mxu0 %v2847_v38  ;;  %2237 = vmatmul.bf16.vlgmr.msrb.gmra.mxu1 %v4424_v53  ;;  %v1975_v38 = vadd.f32 %v1974_v8, %v1961_v21  ;;  %v3797_v8 = vld [vmem:[%s4229_s9 + $0x12c] sm:$0xf]  ;;  %v2732_v21 = vld [vmem:[%s4229_s9 + $0x18] sm:$0xf0] }
 0x101   : > { %2285 = vmatpush.bf16.msra.mxu1 %v2975_v39  ;;  %2251 = vmatmul.bf16.vlgmr.msrb.gmra.mxu2 %v4422_v52  ;;  %v2015_v39 = vadd.f32 %v2014_v28, %v2001_v25  ;;  %v3007_v25 = vor.u32 %v3829_v13, %v3004_v14  ;;  %v3825_v28 = vld [vmem:[%s4229_s9 + $0x20c] sm:$0xf]  ;;  %v2988_v32 = vld [vmem:[%s4229_s9 + $0x218] sm:$0xf0] }
 0x102   : > { %2299 = vmatpush.bf16.msra.mxu2 %v3103_v40  ;;  %2265 = vmatmul.bf16.vlgmr.msrb.gmra.mxu3 %v4428_v56  ;;  %v3869_v40 = vld [vmem:[%s4229_s9 + $0x36c] sm:$0xf]  ;;  %v2991_v46 = vor.u32 %v3825_v28, %v2988_v32  ;;  %v3580_v14 = vld [vmem:[%s4229_s9 + $0x6b8] sm:$0xf0] }
 0x103   : > { %2313 = vmatpush.bf16.msra.mxu3 %v3231_v45  ;;  %v3039_v45 = vor.u32 %v3837_v36, %v3036_v37  ;;  %v3167_v50 = vor.u32 %v3869_v40, %v3164_v41  ;;  %v347_v31 = vld [vmem:[#allocation2 + $0x8] sm:$0xff]  ;;  %v2735_v40 = vor.u32 %v3761_v20, %v2732_v21  ;;  %v3484_v41 = vld [vmem:[%s4229_s9 + $0x5f8] sm:$0xf0] }
 0x104   : > { %2272 = vmatpush.bf16.msra.mxu0 %v2831_v57  ;;  %v2028_v51 = vpop.f32.mrf.mxu2  ;;  %v1989_v57 = vadd.f32 %v1988_v12, %v1975_v38  ;;  %v2876_v12 = vld [vmem:[%s4229_s9 + $0x138] sm:$0xf0]  ;;  %v3917_v37 = vld [vmem:[%s4229_s9 + $0x4ec] sm:$0xf] }
 0x105   : > { %2286 = vmatpush.bf16.msra.mxu1 %v2959_v58  ;;  %v2029_v58 = vadd.f32 %v2028_v51, %v2015_v39  ;;  %v2042_v60 = vpop.f32.mrf.mxu3  ;;  %v2879_v24 = vor.u32 %v3797_v8, %v2876_v12  ;;  %v3356_v38 = vld [vmem:[%s4229_s9 + $0x4f8] sm:$0xf0]  ;;  %v3949_v39 = vld [vmem:[%s4229_s9 + $0x5ec] sm:$0xf] }
 0x106   : > { %2300 = vmatpush.bf16.msra.mxu2 %v3087_v59  ;;  %v2002_v59 = vpop.f32.mrf.mxu0  ;;  %v3359_v51 = vor.u32 %v3917_v37, %v3356_v38  ;;  %v3487_v55 = vor.u32 %v3949_v39, %v3484_v41  ;;  %v3324_v8 = vld [vmem:[%s4229_s9 + $0x4b8] sm:$0xf0]  ;;  %v3973_v13 = vld [vmem:[%s4229_s9 + $0x6ac] sm:$0xf] }
 0x107   : > { %2314 = vmatpush.bf16.msra.mxu3 %v3215_v63  ;;  %v343_v63 = vld [vmem:[#allocation2 + $0x30] sm:$0xff]  ;;  %v2003_v2 = vadd.f32 %v2002_v59, %v1989_v57  ;;  %v2043_v4 = vadd.f32 %v2042_v60, %v2029_v58  ;;  %v3913_v58 = vld [vmem:[%s4229_s9 + $0x4cc] sm:$0xf]  ;;  %v3340_v59 = vld [vmem:[%s4229_s9 + $0x4d8] sm:$0xf0] }
 0x108   : > { %2273 = vmatpush.bf16.msra.mxu0 %v2815_v7  ;;  %v2748_v7 = vld [vmem:[%s4229_s9 + $0x38] sm:$0xf0]  ;;  %v3945_v60 = vld [vmem:[%s4229_s9 + $0x5cc] sm:$0xf] }
 0x109   : > { %2287 = vmatpush.bf16.msra.mxu1 %v2943_v9  ;;  %v3151_v9 = vor.u32 %v3865_v61, %v3148_v62  ;;  %v2383_v15 = vadd.f32 %v2043_v4, %v343_v63  ;;  %v2751_v18 = vor.u32 %v3765_v6, %v2748_v7  ;;  %v3743_v61 = vor.u32 %v4013_v47, %v3740_v49  ;;  %v3468_v62 = vld [vmem:[%s4229_s9 + $0x5d8] sm:$0xf0]  ;;  %v3977_v63 = vld [vmem:[%s4229_s9 + $0x6cc] sm:$0xf] }
 0x10a   : > { %2301 = vmatpush.bf16.msra.mxu2 %v3071_v11  ;;  %v2016_v11 = vpop.f32.mrf.mxu1  ;;  %v3343_v4 = vor.u32 %v3913_v58, %v3340_v59  ;;  %v3909_v7 = vld [vmem:[%s4229_s9 + $0x4ac] sm:$0xf]  ;;  %v3452_v12 = vld [vmem:[%s4229_s9 + $0x5b8] sm:$0xf0] }
 0x10b   : > { %2315 = vmatpush.bf16.msra.mxu3 %v3199_v16  ;;  %v3861_v16 = vld [vmem:[%s4229_s9 + $0x32c] sm:$0xf]  ;;  %2391 = vst [vmem:[#allocation2 + $0x30] sm:$0xff] %v2383_v15  ;;  %v2017_v23 = vadd.f32 %v2016_v11, %v2003_v2  ;;  %v3724_v2 = vld [vmem:[%s4229_s9 + $0x7d8] sm:$0xf0] }
 0x10c   : > { %2274 = vmatpush.bf16.msra.mxu0 %v2799_v27  ;;  %v2860_v27 = vld [vmem:[%s4229_s9 + $0x118] sm:$0xf0]  ;;  %v4005_v15 = vld [vmem:[%s4229_s9 + $0x7ac] sm:$0xf] }
 0x10d   : > { %2288 = vmatpush.bf16.msra.mxu1 %v2927_v29  ;;  %v3135_v29 = vor.u32 %v3861_v16, %v3132_v17  ;;  %v2044_v36 = vpop.f32.mrf.mxu3  ;;  %v3708_v16 = vld [vmem:[%s4229_s9 + $0x7b8] sm:$0xf0]  ;;  %v3327_v17 = vor.u32 %v3909_v7, %v3324_v8  ;;  %v3905_v20 = vld [vmem:[%s4229_s9 + $0x48c] sm:$0xf] }
 0x10e   : > { %2302 = vmatpush.bf16.msra.mxu2 %v3055_v30  ;;  %v2030_v30 = vpop.f32.mrf.mxu2  ;;  %v3937_v21 = vld [vmem:[%s4229_s9 + $0x58c] sm:$0xf]  ;;  %v3676_v38 = vld [vmem:[%s4229_s9 + $0x778] sm:$0xf0] }
 0x10f   : > { %2316 = vmatpush.bf16.msra.mxu3 %v3183_v34  ;;  %v3116_v34 = vld [vmem:[%s4229_s9 + $0x318] sm:$0xf0]  ;;  %v2031_v35 = vadd.f32 %v2030_v30, %v2017_v23  ;;  %v3901_v30 = vld [vmem:[%s4229_s9 + $0x46c] sm:$0xf] }
 0x110   : > { %2275 = vmatpush.bf16.msra.mxu0 %v2783_v42  ;;  %v3981_v42 = vld [vmem:[%s4229_s9 + $0x6ec] sm:$0xf]  ;;  %v3436_v23 = vld [vmem:[%s4229_s9 + $0x598] sm:$0xf0] }
 0x111   : > { %2289 = vmatpush.bf16.msra.mxu1 %v2911_v44  ;;  %v2045_v44 = vadd.f32 %v2044_v36, %v2031_v35  ;;  %v3615_v57 = vor.u32 %v3981_v42, %v3612_v43  ;;  %v3439_v28 = vor.u32 %v3937_v21, %v3436_v23  ;;  %v3933_v32 = vld [vmem:[%s4229_s9 + $0x56c] sm:$0xf]  ;;  %v3548_v36 = vld [vmem:[%s4229_s9 + $0x678] sm:$0xf0] }
 0x112   : > { %2303 = vmatpush.bf16.msra.mxu2 %v3039_v45  ;;  %v2863_v45 = vor.u32 %v3793_v22, %v2860_v27  ;;  %v3711_v22 = vor.u32 %v4005_v15, %v3708_v16  ;;  %v3965_v35 = vld [vmem:[%s4229_s9 + $0x66c] sm:$0xf]  ;;  %v3276_v43 = vld [vmem:[%s4229_s9 + $0x458] sm:$0xf0] }
 0x113   : > { %2317 = vmatpush.bf16.msra.mxu3 %v3167_v50  ;;  %v3119_v50 = vor.u32 %v3857_v33, %v3116_v34  ;;  %v2387_v54 = vadd.f32 %v2045_v44, %v347_v31  ;;  %v3292_v31 = vld [vmem:[%s4229_s9 + $0x478] sm:$0xf0]  ;;  %v3997_v37 = vld [vmem:[%s4229_s9 + $0x76c] sm:$0xf]  ;;  %v3551_v41 = vor.u32 %v3965_v35, %v3548_v36 }
 0x114   : > { %2276 = vmatpush.bf16.msra.mxu0 %v2767_v0  ;;  %v3596_v0 = vld [vmem:[%s4229_s9 + $0x6d8] sm:$0xf0]  ;;  %v3295_v39 = vor.u32 %v3901_v30, %v3292_v31  ;;  %v3897_v42 = vld [vmem:[%s4229_s9 + $0x44c] sm:$0xf] }
 0x115   : > { %2290 = vmatpush.bf16.msra.mxu1 %v2895_v1  ;;  %2395 = vst [vmem:[#allocation2 + $0x8] sm:$0xff] %v2387_v54  ;;  %v4009_v1 = vld [vmem:[%s4229_s9 + $0x7cc] sm:$0xf]  ;;  %v3599_v6 = vor.u32 %v3977_v63, %v3596_v0  ;;  %v3420_v34 = vld [vmem:[%s4229_s9 + $0x578] sm:$0xf0]  ;;  %v3279_v54 = vor.u32 %v3897_v42, %v3276_v43 }
 0x116   : > { %2304 = vmatpush.bf16.msra.mxu2 %v3023_v5  ;;  %v3471_v5 = vor.u32 %v3945_v60, %v3468_v62  ;;  %v3727_v11 = vor.u32 %v4009_v1, %v3724_v2  ;;  %v3929_v44 = vld [vmem:[%s4229_s9 + $0x54c] sm:$0xf]  ;;  %v3532_v49 = vld [vmem:[%s4229_s9 + $0x658] sm:$0xf0] }
 0x117   : > { %2318 = vmatpush.bf16.msra.mxu3 %v3151_v9  ;;  %v3941_v9 = vld [vmem:[%s4229_s9 + $0x5ac] sm:$0xf]  ;;  %v3260_v60 = vld [vmem:[%s4229_s9 + $0x438] sm:$0xf0] }
 0x118   : > { %2277 = vmatpush.bf16.msra.mxu0 %v2751_v18  ;;  %v3583_v18 = vor.u32 %v3973_v13, %v3580_v14  ;;  %v3961_v47 = vld [vmem:[%s4229_s9 + $0x64c] sm:$0xf]  ;;  %v3388_v63 = vld [vmem:[%s4229_s9 + $0x538] sm:$0xf0] }
 0x119   : > { %2291 = vmatpush.bf16.msra.mxu1 %v2879_v24  ;;  %v3564_v24 = vld [vmem:[%s4229_s9 + $0x698] sm:$0xf0]  ;;  %v3893_v59 = vld [vmem:[%s4229_s9 + $0x42c] sm:$0xf] }
 0x11a   : > { %2305 = vmatpush.bf16.msra.mxu2 %v3007_v25  ;;  %v4001_v25 = vld [vmem:[%s4229_s9 + $0x78c] sm:$0xf]  ;;  %v3516_v1 = vld [vmem:[%s4229_s9 + $0x638] sm:$0xf0] }
 0x11b   : > { %2319 = vmatpush.bf16.msra.mxu3 %v3135_v29  ;;  %v3957_v0 = vld [vmem:[%s4229_s9 + $0x62c] sm:$0xf]  ;;  %v3372_v14 = vld [vmem:[%s4229_s9 + $0x518] sm:$0xf0] }
 0x11c   : > { %2278 = vmatpush.bf16.msra.mxu0 %v2735_v40  ;;  %v3423_v40 = vor.u32 %v3933_v32, %v3420_v34  ;;  %v2056_v58 = vpop.f32.mrf.mxu0  ;;  %v3519_v8 = vor.u32 %v3957_v0, %v3516_v1  ;;  %v3953_v15 = vld [vmem:[%s4229_s9 + $0x60c] sm:$0xf]  ;;  %v3500_v16 = vld [vmem:[%s4229_s9 + $0x618] sm:$0xf0] }
 0x11d   : > { %2292 = vmatpush.bf16.msra.mxu1 %v2863_v45  ;;  %v3679_v45 = vor.u32 %v3997_v37, %v3676_v38  ;;  %v2070_v2 = vpop.f32.mrf.mxu1  ;;  %v3503_v21 = vor.u32 %v3953_v15, %v3500_v16 }
 0x11e   : > { %2306 = vmatpush.bf16.msra.mxu2 %v2991_v46  ;;  %v3404_v46 = vld [vmem:[%s4229_s9 + $0x558] sm:$0xf0]  ;;  %v2071_v23 = vadd.f32 %v2070_v2, %v2056_v58 }
 0x11f   : > { %2320 = vmatpush.bf16.msra.mxu3 %v3119_v50  ;;  %2279 = vmatmul.bf16.vlgmr.msra.gmra.mxu0 %v4335_v3  ;;  %v3969_v3 = vld [vmem:[%s4229_s9 + $0x68c] sm:$0xf] }
 0x120   : > { %2327 = vmatpush.bf16.msrb.mxu0 %v3359_v51  ;;  %2293 = vmatmul.bf16.vlgmr.msra.gmra.mxu1 %v4351_v19  ;;  %v3692_v19 = vld [vmem:[%s4229_s9 + $0x798] sm:$0xf0]  ;;  %v3567_v29 = vor.u32 %v3969_v3, %v3564_v24  ;;  %v3993_v50 = vld [vmem:[%s4229_s9 + $0x74c] sm:$0xf] }
 0x121   : > { %2341 = vmatpush.bf16.msrb.mxu1 %v3487_v55  ;;  %2307 = vmatmul.bf16.vlgmr.msra.gmra.mxu2 %v4341_v10  ;;  %v3455_v10 = vor.u32 %v3941_v9, %v3452_v12  ;;  %v3695_v33 = vor.u32 %v4001_v25, %v3692_v19  ;;  %v3660_v51 = vld [vmem:[%s4229_s9 + $0x758] sm:$0xf0]  ;;  %v3407_v55 = vor.u32 %v3929_v44, %v3404_v46  ;;  %v3889_v9 = vld [vmem:[%s4229_s9 + $0x40c] sm:$0xf]  ;;  %v348_v46 = vld [vmem:[#allocation2 + $0x20] sm:$0xff] }
 0x122   : > { %2355 = vmatpush.bf16.msrb.mxu2 %v3615_v57  ;;  %2321 = vmatmul.bf16.vlgmr.msra.gmra.mxu3 %v4357_v26  ;;  %v3308_v26 = vld [vmem:[%s4229_s9 + $0x498] sm:$0xf0]  ;;  %v3535_v57 = vor.u32 %v3961_v47, %v3532_v49  ;;  %v3663_v62 = vor.u32 %v3993_v50, %v3660_v51  ;;  %v3921_v12 = vld [vmem:[%s4229_s9 + $0x50c] sm:$0xf] }
 0x123   : > { %2369 = vmatpush.bf16.msrb.mxu3 %v3743_v61  ;;  %v3311_v27 = vor.u32 %v3905_v20, %v3308_v26  ;;  %v3925_v61 = vld [vmem:[%s4229_s9 + $0x52c] sm:$0xf]  ;;  %v3375_v26 = vor.u32 %v3921_v12, %v3372_v14 }
 0x124   : > { %2328 = vmatpush.bf16.msrb.mxu0 %v3343_v4  ;;  %v3989_v4 = vld [vmem:[%s4229_s9 + $0x72c] sm:$0xf]  ;;  %v3391_v7 = vor.u32 %v3925_v61, %v3388_v63  ;;  %v2084_v20 = vpop.f32.mrf.mxu2  ;;  %v2058_v24 = vpop.f32.mrf.mxu0 }
 0x125   : > { %2342 = vmatpush.bf16.msrb.mxu1 %v3471_v5  ;;  %v3644_v5 = vld [vmem:[%s4229_s9 + $0x738] sm:$0xf0]  ;;  %v2072_v25 = vpop.f32.mrf.mxu1  ;;  %v2085_v19 = vadd.f32 %v2084_v20, %v2071_v23 }
 0x126   : > { %2356 = vmatpush.bf16.msrb.mxu2 %v3599_v6  ;;  %v3263_v6 = vor.u32 %v3893_v59, %v3260_v60  ;;  %v3647_v13 = vor.u32 %v3989_v4, %v3644_v5  ;;  %v2073_v30 = vadd.f32 %v2072_v25, %v2058_v24 }
 0x127   : > { %2370 = vmatpush.bf16.msrb.mxu3 %v3727_v11  ;;  %v3244_v11 = vld [vmem:[%s4229_s9 + $0x418] sm:$0xf0] }
 0x128   : > { %2329 = vmatpush.bf16.msrb.mxu0 %v3327_v17  ;;  %v3985_v17 = vld [vmem:[%s4229_s9 + $0x70c] sm:$0xf] }
 0x129   : > { %2343 = vmatpush.bf16.msrb.mxu1 %v3455_v10  ;;  %v3628_v10 = vld [vmem:[%s4229_s9 + $0x718] sm:$0xf0] }
 0x12a   : > { %2357 = vmatpush.bf16.msrb.mxu2 %v3583_v18  ;;  %v3247_v18 = vor.u32 %v3889_v9, %v3244_v11  ;;  %v3631_v3 = vor.u32 %v3985_v17, %v3628_v10 }
 0x12b   : > { %2371 = vmatpush.bf16.msrb.mxu3 %v3711_v22  ;;  %v2098_v22 = vpop.f32.mrf.mxu3 }
 0x12c   : > { %2330 = vmatpush.bf16.msrb.mxu0 %v3311_v27  ;;  %v2099_v27 = vadd.f32 %v2098_v22, %v2085_v19 }
 0x12d   : > { %2344 = vmatpush.bf16.msrb.mxu1 %v3439_v28  ;;  %v2086_v28 = vpop.f32.mrf.mxu2 }
 0x12e   : > { %2358 = vmatpush.bf16.msrb.mxu2 %v3567_v29  ;;  %v2087_v34 = vadd.f32 %v2086_v28, %v2073_v30 }
 0x12f   : > { %2372 = vmatpush.bf16.msrb.mxu3 %v3695_v33 }
 0x130   : > { %2331 = vmatpush.bf16.msrb.mxu0 %v3295_v39 }
 0x131   : > { %2345 = vmatpush.bf16.msrb.mxu1 %v3423_v40  ;;  %v344_v40 = vld [vmem:[#allocation2] sm:$0xff] }
 0x132   : > { %2359 = vmatpush.bf16.msrb.mxu2 %v3551_v41 }
 0x133   : > { %2373 = vmatpush.bf16.msrb.mxu3 %v3679_v45  ;;  %v2100_v29 = vpop.f32.mrf.mxu3 }
 0x134   : > { %2332 = vmatpush.bf16.msrb.mxu0 %v3279_v54  ;;  %v2101_v37 = vadd.f32 %v2100_v29, %v2087_v34 }
 0x135   : > { %2346 = vmatpush.bf16.msrb.mxu1 %v3407_v55 }
 0x136   : > { %2360 = vmatpush.bf16.msrb.mxu2 %v3535_v57 }
 0x137   : > { %2374 = vmatpush.bf16.msrb.mxu3 %v3663_v62 }
 0x138   : > { %2333 = vmatpush.bf16.msrb.mxu0 %v3263_v6 }
 0x139   : > { %2347 = vmatpush.bf16.msrb.mxu1 %v3391_v7 }
 0x13a   : > { %2361 = vmatpush.bf16.msrb.mxu2 %v3519_v8 }
 0x13b   : > { %2375 = vmatpush.bf16.msrb.mxu3 %v3647_v13  ;;  %v345_v13 = vld [vmem:[#allocation2 + $0x18] sm:$0xff] }
 0x13c   : > { %2334 = vmatpush.bf16.msrb.mxu0 %v3247_v18  ;;  %v2112_v31 = vpop.f32.mrf.mxu0 }
 0x13d   : > { %2348 = vmatpush.bf16.msrb.mxu1 %v3375_v26  ;;  %v2113_v32 = vadd.f32 %v2112_v31, %v2099_v27  ;;  %v2126_v33 = vpop.f32.mrf.mxu1 }
 0x13e   : > { %2362 = vmatpush.bf16.msrb.mxu2 %v3503_v21  ;;  %v349_v21 = vld [vmem:[#allocation2 + $0x28] sm:$0xff] }
 0x13f   : > { %2376 = vmatpush.bf16.msrb.mxu3 %v3631_v3  ;;  %2335 = vmatmul.bf16.vlgmr.msrb.gmra.mxu0 %v4417_v48  ;;  %v2127_v35 = vadd.f32 %v2126_v33, %v2113_v32 }
 0x140   : > { %2349 = vmatmul.bf16.vlgmr.msrb.gmra.mxu1 %v4424_v53 }
 0x141   : > { %2363 = vmatmul.bf16.vlgmr.msrb.gmra.mxu2 %v4422_v52 }
 0x142   : > { %2377 = vmatmul.bf16.vlgmr.msrb.gmra.mxu3 %v4428_v56 }
 0x144   : > { %v2140_v36 = vpop.f32.mrf.mxu2  ;;  %v2114_v39 = vpop.f32.mrf.mxu0 }
 0x145   : > { %v2141_v38 = vadd.f32 %v2140_v36, %v2127_v35  ;;  %v2154_v48 = vpop.f32.mrf.mxu3  ;;  %v2115_v53 = vadd.f32 %v2114_v39, %v2101_v37  ;;  %v2128_v52 = vpop.f32.mrf.mxu1 }
 0x147   : > { %v2155_v41 = vadd.f32 %v2154_v48, %v2141_v38  ;;  %v2129_v56 = vadd.f32 %v2128_v52, %v2115_v53 }
 0x149   : > { %v2384_v42 = vadd.f32 %v2155_v41, %v344_v40 }
 0x14b   : > { %2392 = vst [vmem:[#allocation2] sm:$0xff] %v2384_v42  ;;  %v346_v42 = vld [vmem:[#allocation2 + $0x10] sm:$0xff] }
 0x14c   : > { %v2142_v43 = vpop.f32.mrf.mxu2 }
 0x14d   : > { %v2143_v44 = vadd.f32 %v2142_v43, %v2129_v56  ;;  %v2156_v45 = vpop.f32.mrf.mxu3 }
 0x14f   : > { %v2157_v47 = vadd.f32 %v2156_v45, %v2143_v44 }
 0x151   : > { %v2388_v49 = vadd.f32 %v2157_v47, %v348_v46 }
 0x153   : > { %2396 = vst [vmem:[#allocation2 + $0x20] sm:$0xff] %v2388_v49 }
 0x15c   : > { %v2168_v50 = vpop.f32.mrf.mxu0 }
 0x15d   : > { %v2182_v51 = vpop.f32.mrf.mxu1 }
 0x15e   : > { %v2183_v57 = vadd.f32 %v2182_v51, %v2168_v50  ;;  %v350_v50 = vld [vmem:[#allocation2 + $0x38] sm:$0xff] }
 0x164   : > { %v2196_v54 = vpop.f32.mrf.mxu2  ;;  %v2170_v58 = vpop.f32.mrf.mxu0 }
 0x165   : > { %v2210_v55 = vpop.f32.mrf.mxu3  ;;  %v2184_v59 = vpop.f32.mrf.mxu1  ;;  %v2197_v60 = vadd.f32 %v2196_v54, %v2183_v57 }
 0x166   : > { %v2185_v0 = vadd.f32 %v2184_v59, %v2170_v58 }
 0x167   : > { %v2211_v61 = vadd.f32 %v2210_v55, %v2197_v60 }
 0x16c   : > { %v2198_v62 = vpop.f32.mrf.mxu2 }
 0x16d   : > { %v2212_v63 = vpop.f32.mrf.mxu3  ;;  %v2199_v5 = vadd.f32 %v2198_v62, %v2185_v0 }
 0x16f   : > { %v2213_v8 = vadd.f32 %v2212_v63, %v2199_v5 }
 0x17c   : > { %v2224_v1 = vpop.f32.mrf.mxu0 }
 0x17d   : > { %v2225_v2 = vadd.f32 %v2224_v1, %v2211_v61  ;;  %v2238_v4 = vpop.f32.mrf.mxu1 }
 0x17f   : > { %v2239_v6 = vadd.f32 %v2238_v4, %v2225_v2 }
 0x184   : > { %v2252_v7 = vpop.f32.mrf.mxu2  ;;  %v2226_v11 = vpop.f32.mrf.mxu0 }
 0x185   : > { %v2253_v9 = vadd.f32 %v2252_v7, %v2239_v6  ;;  %v2266_v12 = vpop.f32.mrf.mxu3  ;;  %v2227_v14 = vadd.f32 %v2226_v11, %v2213_v8  ;;  %v2240_v16 = vpop.f32.mrf.mxu1 }
 0x187   : > { %v2267_v15 = vadd.f32 %v2266_v12, %v2253_v9  ;;  %v2241_v10 = vadd.f32 %v2240_v16, %v2227_v14 }
 0x189   : > { %v2385_v17 = vadd.f32 %v2267_v15, %v345_v13 }
 0x18b   : > { %2393 = vst [vmem:[#allocation2 + $0x18] sm:$0xff] %v2385_v17 }
 0x18c   : > { %v2254_v18 = vpop.f32.mrf.mxu2 }
 0x18d   : > { %v2255_v20 = vadd.f32 %v2254_v18, %v2241_v10  ;;  %v2268_v26 = vpop.f32.mrf.mxu3 }
 0x18f   : > { %v2269_v22 = vadd.f32 %v2268_v26, %v2255_v20 }
 0x191   : > { %v2389_v23 = vadd.f32 %v2269_v22, %v349_v21 }
 0x193   : > { %2397 = vst [vmem:[#allocation2 + $0x28] sm:$0xff] %v2389_v23 }
 0x19c   : > { %v2280_v3 = vpop.f32.mrf.mxu0 }
 0x19d   : > { %v2294_v24 = vpop.f32.mrf.mxu1 }
 0x19e   : > { %v2295_v27 = vadd.f32 %v2294_v24, %v2280_v3 }
 0x1a4   : > { %v2308_v25 = vpop.f32.mrf.mxu2  ;;  %v2282_v28 = vpop.f32.mrf.mxu0 }
 0x1a5   : > { %v2322_v19 = vpop.f32.mrf.mxu3  ;;  %v2296_v29 = vpop.f32.mrf.mxu1  ;;  %v2309_v30 = vadd.f32 %v2308_v25, %v2295_v27 }
 0x1a6   : > { %v2297_v33 = vadd.f32 %v2296_v29, %v2282_v28 }
 0x1a7   : > { %v2323_v32 = vadd.f32 %v2322_v19, %v2309_v30 }
 0x1ac   : > { %v2310_v31 = vpop.f32.mrf.mxu2 }
 0x1ad   : > { %v2324_v34 = vpop.f32.mrf.mxu3  ;;  %v2311_v38 = vadd.f32 %v2310_v31, %v2297_v33 }
 0x1af   : > { %v2325_v40 = vadd.f32 %v2324_v34, %v2311_v38 }
 0x1bc   : > { %v2336_v35 = vpop.f32.mrf.mxu0 }
 0x1bd   : > { %v2337_v36 = vadd.f32 %v2336_v35, %v2323_v32  ;;  %v2350_v37 = vpop.f32.mrf.mxu1 }
 0x1bf   : > { %v2351_v39 = vadd.f32 %v2350_v37, %v2337_v36 }
 0x1c4   : > { %v2364_v48 = vpop.f32.mrf.mxu2  ;;  %v2338_v52 = vpop.f32.mrf.mxu0 }
 0x1c5   : > { %v2365_v53 = vadd.f32 %v2364_v48, %v2351_v39  ;;  %v2378_v41 = vpop.f32.mrf.mxu3  ;;  %v2339_v43 = vadd.f32 %v2338_v52, %v2325_v40  ;;  %v2352_v45 = vpop.f32.mrf.mxu1 }
 0x1c7   : > { %v2379_v56 = vadd.f32 %v2378_v41, %v2365_v53  ;;  %v2353_v46 = vadd.f32 %v2352_v45, %v2339_v43 }
 0x1c9   : > { %v2386_v44 = vadd.f32 %v2379_v56, %v346_v42 }
 0x1cb   : > { %2394 = vst [vmem:[#allocation2 + $0x10] sm:$0xff] %v2386_v44 }
 0x1cc   : > { %v2366_v47 = vpop.f32.mrf.mxu2 }
 0x1cd   : > { %v2367_v49 = vadd.f32 %v2366_v47, %v2353_v46  ;;  %v2380_v51 = vpop.f32.mrf.mxu3 }
 0x1cf   : > { %v2381_v54 = vadd.f32 %v2380_v51, %v2367_v49  ;;  %2402 = sbr.rel (%p3744_p0) target bundleno = 495 (0x1ef), region = 63 }
 0x1d1   : > { %v2390_v55 = vadd.f32 %v2381_v54, %v350_v50 }
 0x1d3   : > { %2398 = vst [vmem:[#allocation2 + $0x38] sm:$0xff] %v2390_v55 }
 0x1d4   : > { %v2403_v57 = vld [vmem:[#allocation2 + $0x30] sm:$0xff]  ;;  %v4827_v58 = vld [vmem:[#allocation2 + $0x8] sm:$0xff]  ;;  %v4832_v59 = vld [vmem:[%s4915_s2] sm:$0xf] }
 0x1d5   : > { %v2411_v60 = vadd.f32 %v4827_v58, %v2403_v57  ;;  %v2439_v61 = vmul.f32 %v2403_v57, %v2403_v57  ;;  %v2485_v62 = vperm.slane %v4832_v59, 0  ;;  %v2404_v63 = vld [vmem:[#allocation2] sm:$0xff]  ;;  %v2486_v1 = vperm.slane %v4832_v59, 1  ;;  %v2405_v2 = vld [vmem:[#allocation2 + $0x18] sm:$0xff]  ;;  %v4840_v6 = vld [vmem:[#allocation2 + $0x28] sm:$0xff] }
 0x1d6   : > { %v4836_v0 = vld [vmem:[#allocation2 + $0x20] sm:$0xff]  ;;  %v2440_v5 = vmul.f32 %v2404_v63, %v2404_v63  ;;  %v2441_v7 = vmul.f32 %v2405_v2, %v2405_v2  ;;  %v2487_v8 = vperm.slane %v4832_v59, 2  ;;  %v2406_v9 = vld [vmem:[#allocation2 + $0x10] sm:$0xff]  ;;  %v2425_v14 = vadd.f32 %v4840_v6, %v2405_v2 }
 0x1d7   : > { %v2418_v4 = vadd.f32 %v4836_v0, %v2404_v63  ;;  %v2493_v12 = vadd.f32 %v2485_v62, %v2403_v57  ;;  %v2494_v13 = vadd.f32 %v2486_v1, %v2404_v63  ;;  %v2442_v17 = vmul.f32 %v2406_v9, %v2406_v9 }
 0x1d8   : > { %v2495_v16 = vadd.f32 %v2487_v8, %v2405_v2  ;;  %v2488_v10 = vperm.slane %v4832_v59, 3  ;;  %v2412_v18 = vrot.slane %v2411_v60, 4  ;;  %v2426_v26 = vrot.slane %v2425_v14, 4 }
 0x1d9   : > { %2501 = vst [vmem:[%s4235_s18] sm:$0xff] %v2493_v12  ;;  %v2419_v20 = vrot.slane %v2418_v4, 4  ;;  %v2443_v22 = vmul.f32 %v4827_v58, %v4827_v58  ;;  %v2444_v24 = vmul.f32 %v4836_v0, %v4836_v0  ;;  %v2445_v25 = vmul.f32 %v4840_v6, %v4840_v6 }
 0x1da   : > { %v4843_v11 = vld [vmem:[#allocation2 + $0x38] sm:$0xff]  ;;  %2502 = vst [vmem:[%s4235_s18 + $0x8] sm:$0xff] %v2494_v13  ;;  %v2496_v23 = vadd.f32 %v2488_v10, %v2406_v9  ;;  %v2413_v3 = vadd.f32 %v2412_v18, %v2411_v60  ;;  %v2427_v27 = vadd.f32 %v2426_v26, %v2425_v14  ;;  %v2499_v26 = vadd.f32 %v2487_v8, %v4840_v6 }
 0x1db   : > { %v2432_v15 = vadd.f32 %v4843_v11, %v2406_v9  ;;  %2503 = vst [vmem:[%s4235_s18 + $0x10] sm:$0xff] %v2495_v16  ;;  %v2420_v19 = vadd.f32 %v2419_v20, %v2418_v4  ;;  %v2447_v29 = vadd.f32 %v2443_v22, %v2439_v61  ;;  %v2454_v31 = vadd.f32 %v2444_v24, %v2440_v5 }
 0x1dc   : > { %2504 = vst [vmem:[%s4235_s18 + $0x18] sm:$0xff] %v2496_v23  ;;  %v2414_v30 = vrot.slane %v2413_v3, 2  ;;  %v2461_v32 = vadd.f32 %v2445_v25, %v2441_v7  ;;  %v2446_v33 = vmul.f32 %v4843_v11, %v4843_v11  ;;  %v2428_v35 = vrot.slane %v2427_v27, 2 }
 0x1dd   : > { %v2433_v21 = vrot.slane %v2432_v15, 4  ;;  %v2421_v34 = vrot.slane %v2420_v19, 2  ;;  %v2448_v37 = vrot.slane %v2447_v29, 4  ;;  %v2455_v39 = vrot.slane %v2454_v31, 4  ;;  %2507 = vst [vmem:[%s4235_s18 + $0x30] sm:$0xff] %v2499_v26 }
 0x1de   : > { %v2415_v38 = vadd.f32 %v2414_v30, %v2413_v3  ;;  %v2462_v48 = vrot.slane %v2461_v32, 4  ;;  %v2468_v40 = vadd.f32 %v2446_v33, %v2442_v17  ;;  %v2429_v41 = vadd.f32 %v2428_v35, %v2427_v27 }
 0x1df   : > { %v2434_v28 = vadd.f32 %v2433_v21, %v2432_v15  ;;  %v2422_v53 = vadd.f32 %v2421_v34, %v2420_v19  ;;  %v2449_v42 = vadd.f32 %v2448_v37, %v2447_v29  ;;  %v2456_v43 = vadd.f32 %v2455_v39, %v2454_v31 }
 0x1e0   : > { %v2416_v56 = vrot.slane %v2415_v38, 1  ;;  %v2463_v44 = vadd.f32 %v2462_v48, %v2461_v32  ;;  %v2469_v45 = vrot.slane %v2468_v40, 4  ;;  %v2430_v47 = vrot.slane %v2429_v41, 1 }
 0x1e1   : > { %v2435_v36 = vrot.slane %v2434_v28, 2  ;;  %v2423_v46 = vrot.slane %v2422_v53, 1  ;;  %v2450_v50 = vrot.slane %v2449_v42, 2  ;;  %v2457_v54 = vrot.slane %v2456_v43, 2 }
 0x1e2   : > { %v2417_v51 = vadd.f32 %v2416_v56, %v2415_v38  ;;  %v2464_v55 = vrot.slane %v2463_v44, 2  ;;  %v2470_v57 = vadd.f32 %v2469_v45, %v2468_v40  ;;  %v2431_v61 = vadd.f32 %v2430_v47, %v2429_v41 }
 0x1e3   : > { %v2436_v52 = vadd.f32 %v2435_v36, %v2434_v28  ;;  %v2424_v60 = vadd.f32 %v2423_v46, %v2422_v53  ;;  %v2451_v2 = vadd.f32 %v2450_v50, %v2449_v42  ;;  %v2458_v4 = vadd.f32 %v2457_v54, %v2456_v43 }
 0x1e4   : > { %2475 = vst [vmem:[%s4240_s16] sm:$0xff] %v2417_v51  ;;  %v2465_v5 = vadd.f32 %v2464_v55, %v2463_v44  ;;  %v2471_v7 = vrot.slane %v2470_v57, 2  ;;  %v2497_v9 = vadd.f32 %v2485_v62, %v4827_v58  ;;  %v2498_v58 = vadd.f32 %v2486_v1, %v4836_v0 }
 0x1e5   : > { %v2437_v49 = vrot.slane %v2436_v52, 1  ;;  %2476 = vst [vmem:[%s4240_s16 + $0x8] sm:$0xff] %v2424_v60  ;;  %v2452_v12 = vrot.slane %v2451_v2, 1  ;;  %v2459_v13 = vrot.slane %v2458_v4, 1  ;;  %v2500_v21 = vadd.f32 %v2488_v10, %v4843_v11 }
 0x1e6   : > { %2477 = vst [vmem:[%s4240_s16 + $0x10] sm:$0xff] %v2431_v61  ;;  %v2466_v14 = vrot.slane %v2465_v5, 1  ;;  %v2472_v15 = vadd.f32 %v2471_v7, %v2470_v57 }
 0x1e7   : > { %v2438_v63 = vadd.f32 %v2437_v49, %v2436_v52  ;;  %v2453_v16 = vadd.f32 %v2452_v12, %v2451_v2  ;;  %v2460_v17 = vadd.f32 %v2459_v13, %v2458_v4  ;;  %2505 = vst [vmem:[%s4235_s18 + $0x20] sm:$0xff] %v2497_v9 }
 0x1e8   : > { %v2467_v18 = vadd.f32 %v2466_v14, %v2465_v5  ;;  %v2473_v20 = vrot.slane %v2472_v15, 1  ;;  %2506 = vst [vmem:[%s4235_s18 + $0x28] sm:$0xff] %v2498_v58 }
 0x1e9   : > { %2478 = vst [vmem:[%s4240_s16 + $0x18] sm:$0xff] %v2438_v63 }
 0x1ea   : > { %2479 = vst [vmem:[%s4245_s7] sm:$0xff] %v2453_v16  ;;  %v2474_v62 = vadd.f32 %v2473_v20, %v2472_v15 }
 0x1eb   : > { %2480 = vst [vmem:[%s4245_s7 + $0x8] sm:$0xff] %v2460_v17 }
 0x1ec   : > { %2481 = vst [vmem:[%s4245_s7 + $0x10] sm:$0xff] %v2467_v18 }
 0x1ed   : > { %2482 = vst [vmem:[%s4245_s7 + $0x18] sm:$0xff] %v2474_v62 }
 0x1ee   : > { %2508 = vst [vmem:[%s4235_s18 + $0x38] sm:$0xff] %v2500_v21 }
 0x1ef PF: > { %s16_s24 = sadd.s32 1, %s4127_s24   ;;  %s4919_s18 = smov %s4107_s19 }
 0x1f0   : > { %p13_p1 = scmp.ge.s32.totalorder %s16_s24, 10   ;;  %s4920_s19 = smov %s4211_s6 }
 0x1f1   : > { %s4921_s20 = smov %s4119_s22  ;;  %s4922_s21 = smov %s4123_s23 }
 0x1f2   : > { %s4923_s22 = smov %s4926_s25  ;;  %s4924_s23 = smov %s4930_s26 }
 0x1f3   :  { %15 = sbr.rel (!%p13_p1) target bundleno = 4 (0x4), region = 125 }

// kernel: discriminator_forward.15
= control target key start
LH: loop header
LB: loop body
LE: loop exit
PB: predicated region body
PF: predicated region fallthrough
CT: control target
= control target key end

     0   :  { %s9480_s1 = inlined_call_operand.vmem [shape: bf16[8192,128], index: 1, kind: input, shape index: {}]   ;;  %s9481_s0 = inlined_call_operand.vmem [shape: bf16[8,8192], index: 0, kind: input, shape index: {}]   ;;  %s9482_s2 = inlined_call_operand.vmem [shape: f32[1,128], index: 2, kind: input, shape index: {}]   ;;  %s9483_s3 = inlined_call_operand.vmem [shape: f32[8,128], index: 3, kind: output, shape index: {}]  }
   0x1   :  { %v7282_v0 = vld [vmem:[%s9480_s1 + $0x38] sm:$0xff]  ;;  %v7281_v4 = vld [vmem:[%s9480_s1 + $0x30] sm:$0xff]  ;;  %v7280_v8 = vld [vmem:[%s9480_s1 + $0x28] sm:$0xff] }
   0x2   :  { %v7290_v1 = vld [vmem:[%s9480_s1 + $0x78] sm:$0xff]  ;;  %4370 = vmatpush.bf16.msra.mxu0 %v7282_v0  ;;  %v7289_v5 = vld [vmem:[%s9480_s1 + $0x70] sm:$0xff]  ;;  %v7288_v9 = vld [vmem:[%s9480_s1 + $0x68] sm:$0xff] }
   0x3   :  { %v7298_v2 = vld [vmem:[%s9480_s1 + $0xb8] sm:$0xff]  ;;  %4383 = vmatpush.bf16.msra.mxu1 %v7290_v1  ;;  %v7297_v6 = vld [vmem:[%s9480_s1 + $0xb0] sm:$0xff]  ;;  %v7296_v10 = vld [vmem:[%s9480_s1 + $0xa8] sm:$0xff] }
   0x4   :  { %v7306_v3 = vld [vmem:[%s9480_s1 + $0xf8] sm:$0xff]  ;;  %4396 = vmatpush.bf16.msra.mxu2 %v7298_v2  ;;  %v7305_v7 = vld [vmem:[%s9480_s1 + $0xf0] sm:$0xff]  ;;  %v7304_v11 = vld [vmem:[%s9480_s1 + $0xe8] sm:$0xff] }
   0x5   :  { %4409 = vmatpush.bf16.msra.mxu3 %v7306_v3  ;;  %v7279_v12 = vld [vmem:[%s9480_s1 + $0x20] sm:$0xff]  ;;  %v7278_v16 = vld [vmem:[%s9480_s1 + $0x18] sm:$0xff]  ;;  %v7277_v20 = vld [vmem:[%s9480_s1 + $0x10] sm:$0xff] }
   0x6   :  { %4371 = vmatpush.bf16.msra.mxu0 %v7281_v4  ;;  %v7287_v13 = vld [vmem:[%s9480_s1 + $0x60] sm:$0xff]  ;;  %v7286_v17 = vld [vmem:[%s9480_s1 + $0x58] sm:$0xff]  ;;  %v7285_v21 = vld [vmem:[%s9480_s1 + $0x50] sm:$0xff] }
   0x7   :  { %4384 = vmatpush.bf16.msra.mxu1 %v7289_v5  ;;  %v7295_v14 = vld [vmem:[%s9480_s1 + $0xa0] sm:$0xff]  ;;  %v7294_v18 = vld [vmem:[%s9480_s1 + $0x98] sm:$0xff]  ;;  %v7293_v22 = vld [vmem:[%s9480_s1 + $0x90] sm:$0xff] }
   0x8   :  { %4397 = vmatpush.bf16.msra.mxu2 %v7297_v6  ;;  %v7303_v15 = vld [vmem:[%s9480_s1 + $0xe0] sm:$0xff]  ;;  %v7302_v19 = vld [vmem:[%s9480_s1 + $0xd8] sm:$0xff]  ;;  %v7301_v23 = vld [vmem:[%s9480_s1 + $0xd0] sm:$0xff] }
   0x9   :  { %4410 = vmatpush.bf16.msra.mxu3 %v7305_v7  ;;  %v7276_v24 = vld [vmem:[%s9480_s1 + $0x8] sm:$0xff]  ;;  %v14_v29 = vld [vmem:[%s9481_s0] sm:$0xff]  ;;  %v7314_v38 = vld [vmem:[%s9480_s1 + $0x138] sm:$0xff] }
   0xa   :  { %4372 = vmatpush.bf16.msra.mxu0 %v7280_v8  ;;  %v7284_v25 = vld [vmem:[%s9480_s1 + $0x48] sm:$0xff]  ;;  %v7275_v30 = vld [vmem:[%s9480_s1] sm:$0xff]  ;;  %v1106_v33 = vunpack.c.l.b16 %v14_v29  ;;  %v1107_v37 = vunpack.c.h.b16 %v14_v29  ;;  %v7322_v39 = vld [vmem:[%s9480_s1 + $0x178] sm:$0xff] }
   0xb   :  { %4385 = vmatpush.bf16.msra.mxu1 %v7288_v9  ;;  %v7292_v26 = vld [vmem:[%s9480_s1 + $0x88] sm:$0xff]  ;;  %v7283_v31 = vld [vmem:[%s9480_s1 + $0x40] sm:$0xff]  ;;  %v7330_v40 = vld [vmem:[%s9480_s1 + $0x1b8] sm:$0xff] }
   0xc   :  { %4398 = vmatpush.bf16.msra.mxu2 %v7296_v10  ;;  %v7300_v27 = vld [vmem:[%s9480_s1 + $0xc8] sm:$0xff]  ;;  %v7291_v34 = vld [vmem:[%s9480_s1 + $0x80] sm:$0xff]  ;;  %v7338_v41 = vld [vmem:[%s9480_s1 + $0x1f8] sm:$0xff]  ;;  %v1170_v43 = vpack.c.b16 %v1106_v33, %v1106_v33  ;;  %v1171_v45 = vpack.c.b16 %v1107_v37, %v1107_v37 }
   0xd   :  { %4411 = vmatpush.bf16.msra.mxu3 %v7304_v11  ;;  %v15_v28 = vld [vmem:[%s9481_s0 + $0x8] sm:$0xff]  ;;  %v7299_v35 = vld [vmem:[%s9480_s1 + $0xc0] sm:$0xff]  ;;  %v7313_v46 = vld [vmem:[%s9480_s1 + $0x130] sm:$0xff] }
   0xe   :  { %4373 = vmatpush.bf16.msra.mxu0 %v7279_v12  ;;  %v1108_v32 = vunpack.c.l.b16 %v15_v28  ;;  %v1109_v36 = vunpack.c.h.b16 %v15_v28  ;;  %v7321_v47 = vld [vmem:[%s9480_s1 + $0x170] sm:$0xff]  ;;  %v7312_v50 = vld [vmem:[%s9480_s1 + $0x128] sm:$0xff]  ;;  %v7311_v54 = vld [vmem:[%s9480_s1 + $0x120] sm:$0xff] }
   0xf   :  { %4386 = vmatpush.bf16.msra.mxu1 %v7287_v13  ;;  %v7329_v48 = vld [vmem:[%s9480_s1 + $0x1b0] sm:$0xff]  ;;  %v7320_v51 = vld [vmem:[%s9480_s1 + $0x168] sm:$0xff]  ;;  %v7319_v55 = vld [vmem:[%s9480_s1 + $0x160] sm:$0xff] }
  0x10   :  { %4399 = vmatpush.bf16.msra.mxu2 %v7295_v14  ;;  %v1172_v42 = vpack.c.b16 %v1108_v32, %v1108_v32  ;;  %v1173_v44 = vpack.c.b16 %v1109_v36, %v1109_v36  ;;  %v7337_v49 = vld [vmem:[%s9480_s1 + $0x1f0] sm:$0xff]  ;;  %v7328_v52 = vld [vmem:[%s9480_s1 + $0x1a8] sm:$0xff]  ;;  %v7327_v56 = vld [vmem:[%s9480_s1 + $0x1a0] sm:$0xff] }
  0x11   :  { %4412 = vmatpush.bf16.msra.mxu3 %v7303_v15  ;;  %v7336_v53 = vld [vmem:[%s9480_s1 + $0x1e8] sm:$0xff]  ;;  %v7335_v57 = vld [vmem:[%s9480_s1 + $0x1e0] sm:$0xff]  ;;  %v7310_v58 = vld [vmem:[%s9480_s1 + $0x118] sm:$0xff] }
  0x12   :  { %4374 = vmatpush.bf16.msra.mxu0 %v7278_v16  ;;  %v7318_v59 = vld [vmem:[%s9480_s1 + $0x158] sm:$0xff]  ;;  %v7309_v62 = vld [vmem:[%s9480_s1 + $0x110] sm:$0xff]  ;;  %v7308_v2 = vld [vmem:[%s9480_s1 + $0x108] sm:$0xff] }
  0x13   :  { %4387 = vmatpush.bf16.msra.mxu1 %v7286_v17  ;;  %v7326_v60 = vld [vmem:[%s9480_s1 + $0x198] sm:$0xff]  ;;  %v7317_v63 = vld [vmem:[%s9480_s1 + $0x150] sm:$0xff]  ;;  %v7316_v3 = vld [vmem:[%s9480_s1 + $0x148] sm:$0xff] }
  0x14   :  { %4400 = vmatpush.bf16.msra.mxu2 %v7294_v18  ;;  %v7334_v61 = vld [vmem:[%s9480_s1 + $0x1d8] sm:$0xff]  ;;  %v7325_v0 = vld [vmem:[%s9480_s1 + $0x190] sm:$0xff]  ;;  %v7324_v4 = vld [vmem:[%s9480_s1 + $0x188] sm:$0xff] }
  0x15   :  { %4413 = vmatpush.bf16.msra.mxu3 %v7302_v19  ;;  %v7333_v1 = vld [vmem:[%s9480_s1 + $0x1d0] sm:$0xff]  ;;  %v7332_v5 = vld [vmem:[%s9480_s1 + $0x1c8] sm:$0xff]  ;;  %v17_v6 = vld [vmem:[%s9481_s0 + $0x18] sm:$0xff] }
  0x16   :  { %4375 = vmatpush.bf16.msra.mxu0 %v7277_v20  ;;  %v16_v7 = vld [vmem:[%s9481_s0 + $0x10] sm:$0xff]  ;;  %v7307_v8 = vld [vmem:[%s9480_s1 + $0x100] sm:$0xff]  ;;  %v1112_v10 = vunpack.c.l.b16 %v17_v6  ;;  %v1113_v14 = vunpack.c.h.b16 %v17_v6  ;;  %v7346_v16 = vld [vmem:[%s9480_s1 + $0x238] sm:$0xff] }
  0x17   :  { %4388 = vmatpush.bf16.msra.mxu1 %v7285_v21  ;;  %v7315_v9 = vld [vmem:[%s9480_s1 + $0x140] sm:$0xff]  ;;  %v1110_v11 = vunpack.c.l.b16 %v16_v7  ;;  %v1111_v15 = vunpack.c.h.b16 %v16_v7  ;;  %v7354_v17 = vld [vmem:[%s9480_s1 + $0x278] sm:$0xff]  ;;  %v7344_v28 = vld [vmem:[%s9480_s1 + $0x228] sm:$0xff] }
  0x18   :  { %4401 = vmatpush.bf16.msra.mxu2 %v7293_v22  ;;  %v7323_v12 = vld [vmem:[%s9480_s1 + $0x180] sm:$0xff]  ;;  %v7362_v18 = vld [vmem:[%s9480_s1 + $0x2b8] sm:$0xff]  ;;  %v1176_v20 = vpack.c.b16 %v1112_v10, %v1112_v10  ;;  %v1177_v22 = vpack.c.b16 %v1113_v14, %v1113_v14  ;;  %v7352_v29 = vld [vmem:[%s9480_s1 + $0x268] sm:$0xff] }
  0x19   :  { %4414 = vmatpush.bf16.msra.mxu3 %v7301_v23  ;;  %v7331_v13 = vld [vmem:[%s9480_s1 + $0x1c0] sm:$0xff]  ;;  %v7370_v19 = vld [vmem:[%s9480_s1 + $0x2f8] sm:$0xff]  ;;  %v1174_v21 = vpack.c.b16 %v1110_v11, %v1110_v11  ;;  %v1175_v23 = vpack.c.b16 %v1111_v15, %v1111_v15  ;;  %v7376_v6 = vld [vmem:[%s9480_s1 + $0x328] sm:$0xff] }
  0x1a   :  { %4376 = vmatpush.bf16.msra.mxu0 %v7276_v24  ;;  %v7345_v24 = vld [vmem:[%s9480_s1 + $0x230] sm:$0xff]  ;;  %v7343_v32 = vld [vmem:[%s9480_s1 + $0x220] sm:$0xff]  ;;  %v7342_v36 = vld [vmem:[%s9480_s1 + $0x218] sm:$0xff] }
  0x1b   :  { %4389 = vmatpush.bf16.msra.mxu1 %v7284_v25  ;;  %v7353_v25 = vld [vmem:[%s9480_s1 + $0x270] sm:$0xff]  ;;  %v7351_v33 = vld [vmem:[%s9480_s1 + $0x260] sm:$0xff]  ;;  %v7350_v37 = vld [vmem:[%s9480_s1 + $0x258] sm:$0xff] }
  0x1c   :  { %4402 = vmatpush.bf16.msra.mxu2 %v7292_v26  ;;  %v7361_v26 = vld [vmem:[%s9480_s1 + $0x2b0] sm:$0xff]  ;;  %v7384_v7 = vld [vmem:[%s9480_s1 + $0x368] sm:$0xff]  ;;  %v7375_v10 = vld [vmem:[%s9480_s1 + $0x320] sm:$0xff] }
  0x1d   :  { %4415 = vmatpush.bf16.msra.mxu3 %v7300_v27  ;;  %v7369_v27 = vld [vmem:[%s9480_s1 + $0x2f0] sm:$0xff]  ;;  %v7383_v11 = vld [vmem:[%s9480_s1 + $0x360] sm:$0xff]  ;;  %v7374_v14 = vld [vmem:[%s9480_s1 + $0x318] sm:$0xff] }
  0x1e   :  { %4377 = vmatpush.bf16.msra.mxu0 %v7275_v30  ;;  %v7360_v30 = vld [vmem:[%s9480_s1 + $0x2a8] sm:$0xff]  ;;  %v7382_v15 = vld [vmem:[%s9480_s1 + $0x358] sm:$0xff] }
  0x1f   :  { %4390 = vmatpush.bf16.msra.mxu1 %v7283_v31  ;;  %v7368_v31 = vld [vmem:[%s9480_s1 + $0x2e8] sm:$0xff] }
  0x20   :  { %4403 = vmatpush.bf16.msra.mxu2 %v7291_v34  ;;  %v7359_v34 = vld [vmem:[%s9480_s1 + $0x2a0] sm:$0xff] }
  0x21   :  { %4416 = vmatpush.bf16.msra.mxu3 %v7299_v35  ;;  %4378 = vmatmul.bf16.vlgmr.msra.gmra.mxu0 %v1170_v43  ;;  %v7367_v35 = vld [vmem:[%s9480_s1 + $0x2e0] sm:$0xff]  ;;  %v7365_v43 = vld [vmem:[%s9480_s1 + $0x2d0] sm:$0xff] }
  0x22   :  { %4422 = vmatpush.bf16.msrb.mxu0 %v7314_v38  ;;  %4391 = vmatmul.bf16.vlgmr.msra.gmra.mxu1 %v1171_v45  ;;  %v7358_v38 = vld [vmem:[%s9480_s1 + $0x298] sm:$0xff]  ;;  %v7348_v45 = vld [vmem:[%s9480_s1 + $0x248] sm:$0xff] }
  0x23   :  { %4435 = vmatpush.bf16.msrb.mxu1 %v7322_v39  ;;  %4404 = vmatmul.bf16.vlgmr.msra.gmra.mxu2 %v1172_v42  ;;  %v7366_v39 = vld [vmem:[%s9480_s1 + $0x2d8] sm:$0xff]  ;;  %v7357_v42 = vld [vmem:[%s9480_s1 + $0x290] sm:$0xff] }
  0x24   :  { %4448 = vmatpush.bf16.msrb.mxu2 %v7330_v40  ;;  %4417 = vmatmul.bf16.vlgmr.msra.gmra.mxu3 %v1173_v44  ;;  %v7341_v40 = vld [vmem:[%s9480_s1 + $0x210] sm:$0xff]  ;;  %v7340_v44 = vld [vmem:[%s9480_s1 + $0x208] sm:$0xff] }
  0x25   :  { %4461 = vmatpush.bf16.msrb.mxu3 %v7338_v41  ;;  %v7349_v41 = vld [vmem:[%s9480_s1 + $0x250] sm:$0xff] }
  0x26   :  { %4423 = vmatpush.bf16.msrb.mxu0 %v7313_v46  ;;  %v7356_v46 = vld [vmem:[%s9480_s1 + $0x288] sm:$0xff] }
  0x27   :  { %4436 = vmatpush.bf16.msrb.mxu1 %v7321_v47  ;;  %v7364_v47 = vld [vmem:[%s9480_s1 + $0x2c8] sm:$0xff] }
  0x28   :  { %4449 = vmatpush.bf16.msrb.mxu2 %v7329_v48  ;;  %v18_v48 = vld [vmem:[%s9481_s0 + $0x20] sm:$0xff] }
  0x29   :  { %4462 = vmatpush.bf16.msrb.mxu3 %v7337_v49  ;;  %v19_v49 = vld [vmem:[%s9481_s0 + $0x28] sm:$0xff] }
  0x2a   :  { %4424 = vmatpush.bf16.msrb.mxu0 %v7312_v50  ;;  %v7339_v50 = vld [vmem:[%s9480_s1 + $0x200] sm:$0xff] }
  0x2b   :  { %4437 = vmatpush.bf16.msrb.mxu1 %v7320_v51  ;;  %v7347_v51 = vld [vmem:[%s9480_s1 + $0x240] sm:$0xff] }
  0x2c   :  { %4450 = vmatpush.bf16.msrb.mxu2 %v7328_v52  ;;  %v1114_v52 = vunpack.c.l.b16 %v18_v48 }
  0x2d   :  { %4463 = vmatpush.bf16.msrb.mxu3 %v7336_v53  ;;  %v1116_v53 = vunpack.c.l.b16 %v19_v49 }
  0x2e   :  { %4425 = vmatpush.bf16.msrb.mxu0 %v7311_v54  ;;  %v7355_v54 = vld [vmem:[%s9480_s1 + $0x280] sm:$0xff] }
  0x2f   :  { %4438 = vmatpush.bf16.msrb.mxu1 %v7319_v55  ;;  %v7363_v55 = vld [vmem:[%s9480_s1 + $0x2c0] sm:$0xff] }
  0x30   :  { %4451 = vmatpush.bf16.msrb.mxu2 %v7327_v56  ;;  %v1115_v56 = vunpack.c.h.b16 %v18_v48  ;;  %v7408_v48 = vld [vmem:[%s9480_s1 + $0x428] sm:$0xff] }
  0x31   :  { %4464 = vmatpush.bf16.msrb.mxu3 %v7335_v57  ;;  %v1117_v57 = vunpack.c.h.b16 %v19_v49  ;;  %v7416_v49 = vld [vmem:[%s9480_s1 + $0x468] sm:$0xff] }
  0x32   :  { %4426 = vmatpush.bf16.msrb.mxu0 %v7310_v58  ;;  %v7378_v58 = vld [vmem:[%s9480_s1 + $0x338] sm:$0xff] }
  0x33   :  { %4439 = vmatpush.bf16.msrb.mxu1 %v7318_v59  ;;  %v7386_v59 = vld [vmem:[%s9480_s1 + $0x378] sm:$0xff] }
  0x34   :  { %4452 = vmatpush.bf16.msrb.mxu2 %v7326_v60  ;;  %v7394_v60 = vld [vmem:[%s9480_s1 + $0x3b8] sm:$0xff] }
  0x35   :  { %4465 = vmatpush.bf16.msrb.mxu3 %v7334_v61  ;;  %v7402_v61 = vld [vmem:[%s9480_s1 + $0x3f8] sm:$0xff] }
  0x36   :  { %4427 = vmatpush.bf16.msrb.mxu0 %v7309_v62  ;;  %v1178_v62 = vpack.c.b16 %v1114_v52, %v1114_v52  ;;  %v7407_v52 = vld [vmem:[%s9480_s1 + $0x420] sm:$0xff] }
  0x37   :  { %4440 = vmatpush.bf16.msrb.mxu1 %v7317_v63  ;;  %v1180_v63 = vpack.c.b16 %v1116_v53, %v1116_v53  ;;  %v7415_v53 = vld [vmem:[%s9480_s1 + $0x460] sm:$0xff] }
  0x38   :  { %4453 = vmatpush.bf16.msrb.mxu2 %v7325_v0  ;;  %v1179_v0 = vpack.c.b16 %v1115_v56, %v1115_v56  ;;  %v7406_v56 = vld [vmem:[%s9480_s1 + $0x418] sm:$0xff] }
  0x39   :  { %4466 = vmatpush.bf16.msrb.mxu3 %v7333_v1  ;;  %v1181_v1 = vpack.c.b16 %v1117_v57, %v1117_v57  ;;  %v7414_v57 = vld [vmem:[%s9480_s1 + $0x458] sm:$0xff] }
  0x3a   :  { %4428 = vmatpush.bf16.msrb.mxu0 %v7308_v2  ;;  %v7377_v2 = vld [vmem:[%s9480_s1 + $0x330] sm:$0xff] }
  0x3b   :  { %4441 = vmatpush.bf16.msrb.mxu1 %v7316_v3  ;;  %v7385_v3 = vld [vmem:[%s9480_s1 + $0x370] sm:$0xff] }
  0x3c   :  { %4454 = vmatpush.bf16.msrb.mxu2 %v7324_v4  ;;  %v7393_v4 = vld [vmem:[%s9480_s1 + $0x3b0] sm:$0xff] }
  0x3d   :  { %4467 = vmatpush.bf16.msrb.mxu3 %v7332_v5  ;;  %v7401_v5 = vld [vmem:[%s9480_s1 + $0x3f0] sm:$0xff] }
  0x3e   :  { %4429 = vmatpush.bf16.msrb.mxu0 %v7307_v8  ;;  %v7392_v8 = vld [vmem:[%s9480_s1 + $0x3a8] sm:$0xff] }
  0x3f   :  { %4442 = vmatpush.bf16.msrb.mxu1 %v7315_v9  ;;  %v7400_v9 = vld [vmem:[%s9480_s1 + $0x3e8] sm:$0xff] }
  0x40   :  { %4455 = vmatpush.bf16.msrb.mxu2 %v7323_v12  ;;  %v7391_v12 = vld [vmem:[%s9480_s1 + $0x3a0] sm:$0xff] }
  0x41   :  { %4468 = vmatpush.bf16.msrb.mxu3 %v7331_v13  ;;  %4430 = vmatmul.bf16.vlgmr.msrb.gmra.mxu0 %v1174_v21  ;;  %v7399_v13 = vld [vmem:[%s9480_s1 + $0x3e0] sm:$0xff]  ;;  %v7397_v21 = vld [vmem:[%s9480_s1 + $0x3d0] sm:$0xff] }
  0x42   :  { %4474 = vmatpush.bf16.msra.mxu0 %v7346_v16  ;;  %4443 = vmatmul.bf16.vlgmr.msrb.gmra.mxu1 %v1175_v23  ;;  %v7390_v16 = vld [vmem:[%s9480_s1 + $0x398] sm:$0xff]  ;;  %v7380_v23 = vld [vmem:[%s9480_s1 + $0x348] sm:$0xff] }
  0x43   :  { %4487 = vmatpush.bf16.msra.mxu1 %v7354_v17  ;;  %4456 = vmatmul.bf16.vlgmr.msrb.gmra.mxu2 %v1176_v20  ;;  %v7398_v17 = vld [vmem:[%s9480_s1 + $0x3d8] sm:$0xff]  ;;  %v7389_v20 = vld [vmem:[%s9480_s1 + $0x390] sm:$0xff] }
  0x44   :  { %4500 = vmatpush.bf16.msra.mxu2 %v7362_v18  ;;  %4469 = vmatmul.bf16.vlgmr.msrb.gmra.mxu3 %v1177_v22  ;;  %v7373_v18 = vld [vmem:[%s9480_s1 + $0x310] sm:$0xff]  ;;  %v7372_v22 = vld [vmem:[%s9480_s1 + $0x308] sm:$0xff] }
  0x45   :  { %4513 = vmatpush.bf16.msra.mxu3 %v7370_v19  ;;  %v7381_v19 = vld [vmem:[%s9480_s1 + $0x350] sm:$0xff] }
  0x46   :  { %4475 = vmatpush.bf16.msra.mxu0 %v7345_v24  ;;  %v7388_v24 = vld [vmem:[%s9480_s1 + $0x388] sm:$0xff] }
  0x47   :  { %4488 = vmatpush.bf16.msra.mxu1 %v7353_v25  ;;  %v7396_v25 = vld [vmem:[%s9480_s1 + $0x3c8] sm:$0xff] }
  0x48   :  { %4501 = vmatpush.bf16.msra.mxu2 %v7361_v26  ;;  %v20_v26 = vld [vmem:[%s9481_s0 + $0x30] sm:$0xff] }
  0x49   :  { %4514 = vmatpush.bf16.msra.mxu3 %v7369_v27  ;;  %v21_v27 = vld [vmem:[%s9481_s0 + $0x38] sm:$0xff] }
  0x4a   :  { %4476 = vmatpush.bf16.msra.mxu0 %v7344_v28  ;;  %v7371_v28 = vld [vmem:[%s9480_s1 + $0x300] sm:$0xff] }
  0x4b   :  { %4489 = vmatpush.bf16.msra.mxu1 %v7352_v29  ;;  %v7379_v29 = vld [vmem:[%s9480_s1 + $0x340] sm:$0xff] }
  0x4c   :  { %4502 = vmatpush.bf16.msra.mxu2 %v7360_v30  ;;  %v1118_v30 = vunpack.c.l.b16 %v20_v26 }
  0x4d   :  { %4515 = vmatpush.bf16.msra.mxu3 %v7368_v31  ;;  %v1120_v31 = vunpack.c.l.b16 %v21_v27 }
  0x4e   :  { %4477 = vmatpush.bf16.msra.mxu0 %v7343_v32  ;;  %v7387_v32 = vld [vmem:[%s9480_s1 + $0x380] sm:$0xff] }
  0x4f   :  { %4490 = vmatpush.bf16.msra.mxu1 %v7351_v33  ;;  %v7395_v33 = vld [vmem:[%s9480_s1 + $0x3c0] sm:$0xff] }
  0x50   :  { %4503 = vmatpush.bf16.msra.mxu2 %v7359_v34  ;;  %v1119_v34 = vunpack.c.h.b16 %v20_v26  ;;  %v7440_v26 = vld [vmem:[%s9480_s1 + $0x528] sm:$0xff] }
  0x51   :  { %4516 = vmatpush.bf16.msra.mxu3 %v7367_v35  ;;  %v1121_v35 = vunpack.c.h.b16 %v21_v27  ;;  %v7448_v27 = vld [vmem:[%s9480_s1 + $0x568] sm:$0xff] }
  0x52   :  { %4478 = vmatpush.bf16.msra.mxu0 %v7342_v36  ;;  %v7410_v36 = vld [vmem:[%s9480_s1 + $0x438] sm:$0xff] }
  0x53   :  { %4491 = vmatpush.bf16.msra.mxu1 %v7350_v37  ;;  %v7418_v37 = vld [vmem:[%s9480_s1 + $0x478] sm:$0xff] }
  0x54   :  { %4504 = vmatpush.bf16.msra.mxu2 %v7358_v38  ;;  %v7426_v38 = vld [vmem:[%s9480_s1 + $0x4b8] sm:$0xff] }
  0x55   :  { %4517 = vmatpush.bf16.msra.mxu3 %v7366_v39  ;;  %v7434_v39 = vld [vmem:[%s9480_s1 + $0x4f8] sm:$0xff] }
  0x56   :  { %4479 = vmatpush.bf16.msra.mxu0 %v7341_v40  ;;  %v1182_v40 = vpack.c.b16 %v1118_v30, %v1118_v30  ;;  %v7464_v30 = vld [vmem:[%s9480_s1 + $0x5e8] sm:$0xff] }
  0x57   :  { %4492 = vmatpush.bf16.msra.mxu1 %v7349_v41  ;;  %v1184_v41 = vpack.c.b16 %v1120_v31, %v1120_v31 }
  0x58   :  { %4505 = vmatpush.bf16.msra.mxu2 %v7357_v42  ;;  %v1183_v42 = vpack.c.b16 %v1119_v34, %v1119_v34 }
  0x59   :  { %4518 = vmatpush.bf16.msra.mxu3 %v7365_v43  ;;  %v1185_v43 = vpack.c.b16 %v1121_v35, %v1121_v35 }
  0x5a   :  { %4480 = vmatpush.bf16.msra.mxu0 %v7340_v44  ;;  %v7409_v44 = vld [vmem:[%s9480_s1 + $0x430] sm:$0xff] }
  0x5b   :  { %4493 = vmatpush.bf16.msra.mxu1 %v7348_v45  ;;  %v7417_v45 = vld [vmem:[%s9480_s1 + $0x470] sm:$0xff] }
  0x5c   :  { %4506 = vmatpush.bf16.msra.mxu2 %v7356_v46  ;;  %v7425_v46 = vld [vmem:[%s9480_s1 + $0x4b0] sm:$0xff] }
  0x5d   :  { %4519 = vmatpush.bf16.msra.mxu3 %v7364_v47  ;;  %v7433_v47 = vld [vmem:[%s9480_s1 + $0x4f0] sm:$0xff] }
  0x5e   :  { %4481 = vmatpush.bf16.msra.mxu0 %v7339_v50  ;;  %v7424_v50 = vld [vmem:[%s9480_s1 + $0x4a8] sm:$0xff] }
  0x5f   :  { %4494 = vmatpush.bf16.msra.mxu1 %v7347_v51  ;;  %v7432_v51 = vld [vmem:[%s9480_s1 + $0x4e8] sm:$0xff] }
  0x60   :  { %4507 = vmatpush.bf16.msra.mxu2 %v7355_v54  ;;  %v7423_v54 = vld [vmem:[%s9480_s1 + $0x4a0] sm:$0xff] }
  0x61   :  { %4520 = vmatpush.bf16.msra.mxu3 %v7363_v55  ;;  %4482 = vmatmul.bf16.vlgmr.msra.gmra.mxu0 %v1178_v62  ;;  %v7431_v55 = vld [vmem:[%s9480_s1 + $0x4e0] sm:$0xff]  ;;  %v7421_v62 = vld [vmem:[%s9480_s1 + $0x490] sm:$0xff] }
  0x62   :  { %4526 = vmatpush.bf16.msrb.mxu0 %v7378_v58  ;;  %4495 = vmatmul.bf16.vlgmr.msra.gmra.mxu1 %v1179_v0  ;;  %v7422_v58 = vld [vmem:[%s9480_s1 + $0x498] sm:$0xff]  ;;  %v7404_v0 = vld [vmem:[%s9480_s1 + $0x408] sm:$0xff] }
  0x63   :  { %4539 = vmatpush.bf16.msrb.mxu1 %v7386_v59  ;;  %4508 = vmatmul.bf16.vlgmr.msra.gmra.mxu2 %v1180_v63  ;;  %v7430_v59 = vld [vmem:[%s9480_s1 + $0x4d8] sm:$0xff]  ;;  %v7429_v63 = vld [vmem:[%s9480_s1 + $0x4d0] sm:$0xff] }
  0x64   :  { %4552 = vmatpush.bf16.msrb.mxu2 %v7394_v60  ;;  %4521 = vmatmul.bf16.vlgmr.msra.gmra.mxu3 %v1181_v1  ;;  %v7405_v60 = vld [vmem:[%s9480_s1 + $0x410] sm:$0xff]  ;;  %v7412_v1 = vld [vmem:[%s9480_s1 + $0x448] sm:$0xff] }
  0x65   :  { %4565 = vmatpush.bf16.msrb.mxu3 %v7402_v61  ;;  %v7413_v61 = vld [vmem:[%s9480_s1 + $0x450] sm:$0xff] }
  0x66   :  { %4527 = vmatpush.bf16.msrb.mxu0 %v7377_v2  ;;  %v7420_v2 = vld [vmem:[%s9480_s1 + $0x488] sm:$0xff] }
  0x67   :  { %4540 = vmatpush.bf16.msrb.mxu1 %v7385_v3  ;;  %v7428_v3 = vld [vmem:[%s9480_s1 + $0x4c8] sm:$0xff] }
  0x68   :  { %4553 = vmatpush.bf16.msrb.mxu2 %v7393_v4  ;;  %v22_v4 = vld [vmem:[%s9481_s0 + $0x40] sm:$0xff] }
  0x69   :  { %4566 = vmatpush.bf16.msrb.mxu3 %v7401_v5  ;;  %v23_v5 = vld [vmem:[%s9481_s0 + $0x48] sm:$0xff] }
  0x6a   :  { %4528 = vmatpush.bf16.msrb.mxu0 %v7376_v6  ;;  %v7403_v6 = vld [vmem:[%s9480_s1 + $0x400] sm:$0xff] }
  0x6b   :  { %4541 = vmatpush.bf16.msrb.mxu1 %v7384_v7  ;;  %v7411_v7 = vld [vmem:[%s9480_s1 + $0x440] sm:$0xff] }
  0x6c   :  { %4554 = vmatpush.bf16.msrb.mxu2 %v7392_v8  ;;  %v1122_v8 = vunpack.c.l.b16 %v22_v4 }
  0x6d   :  { %4567 = vmatpush.bf16.msrb.mxu3 %v7400_v9  ;;  %v1124_v9 = vunpack.c.l.b16 %v23_v5 }
  0x6e   :  { %4529 = vmatpush.bf16.msrb.mxu0 %v7375_v10  ;;  %v7419_v10 = vld [vmem:[%s9480_s1 + $0x480] sm:$0xff] }
  0x6f   :  { %4542 = vmatpush.bf16.msrb.mxu1 %v7383_v11  ;;  %v7427_v11 = vld [vmem:[%s9480_s1 + $0x4c0] sm:$0xff] }
  0x70   :  { %4555 = vmatpush.bf16.msrb.mxu2 %v7391_v12  ;;  %v1123_v12 = vunpack.c.h.b16 %v22_v4 }
  0x71   :  { %4568 = vmatpush.bf16.msrb.mxu3 %v7399_v13  ;;  %v1125_v13 = vunpack.c.h.b16 %v23_v5  ;;  %v7474_v5 = vld [vmem:[%s9480_s1 + $0x638] sm:$0xff] }
  0x72   :  { %4530 = vmatpush.bf16.msrb.mxu0 %v7374_v14  ;;  %v7442_v14 = vld [vmem:[%s9480_s1 + $0x538] sm:$0xff] }
  0x73   :  { %4543 = vmatpush.bf16.msrb.mxu1 %v7382_v15  ;;  %v7450_v15 = vld [vmem:[%s9480_s1 + $0x578] sm:$0xff] }
  0x74   :  { %4556 = vmatpush.bf16.msrb.mxu2 %v7390_v16  ;;  %v7458_v16 = vld [vmem:[%s9480_s1 + $0x5b8] sm:$0xff] }
  0x75   :  { %4569 = vmatpush.bf16.msrb.mxu3 %v7398_v17  ;;  %v7466_v17 = vld [vmem:[%s9480_s1 + $0x5f8] sm:$0xff] }
  0x76   :  { %4531 = vmatpush.bf16.msrb.mxu0 %v7373_v18  ;;  %v1186_v18 = vpack.c.b16 %v1122_v8, %v1122_v8  ;;  %v7498_v8 = vld [vmem:[%s9480_s1 + $0x6f8] sm:$0xff] }
  0x77   :  { %4544 = vmatpush.bf16.msrb.mxu1 %v7381_v19  ;;  %v1188_v19 = vpack.c.b16 %v1124_v9, %v1124_v9 }
  0x78   :  { %4557 = vmatpush.bf16.msrb.mxu2 %v7389_v20  ;;  %v1187_v20 = vpack.c.b16 %v1123_v12, %v1123_v12 }
  0x79   :  { %4570 = vmatpush.bf16.msrb.mxu3 %v7397_v21  ;;  %v1189_v21 = vpack.c.b16 %v1125_v13, %v1125_v13  ;;  %v7473_v13 = vld [vmem:[%s9480_s1 + $0x630] sm:$0xff] }
  0x7a   :  { %4532 = vmatpush.bf16.msrb.mxu0 %v7372_v22  ;;  %v7441_v22 = vld [vmem:[%s9480_s1 + $0x530] sm:$0xff] }
  0x7b   :  { %4545 = vmatpush.bf16.msrb.mxu1 %v7380_v23  ;;  %v7449_v23 = vld [vmem:[%s9480_s1 + $0x570] sm:$0xff] }
  0x7c   :  { %4558 = vmatpush.bf16.msrb.mxu2 %v7388_v24  ;;  %v7457_v24 = vld [vmem:[%s9480_s1 + $0x5b0] sm:$0xff] }
  0x7d   :  { %4571 = vmatpush.bf16.msrb.mxu3 %v7396_v25  ;;  %v7465_v25 = vld [vmem:[%s9480_s1 + $0x5f0] sm:$0xff] }
  0x7e   :  { %4533 = vmatpush.bf16.msrb.mxu0 %v7371_v28  ;;  %v7787_v28 = vld [vmem:[%s9482_s2] ss:$0 sm:$0xff] }
  0x7f   :  { %4546 = vmatpush.bf16.msrb.mxu1 %v7379_v29  ;;  %v7456_v29 = vld [vmem:[%s9480_s1 + $0x5a8] sm:$0xff] }
  0x80   :  { %4559 = vmatpush.bf16.msrb.mxu2 %v7387_v32  ;;  %v7439_v32 = vld [vmem:[%s9480_s1 + $0x520] sm:$0xff] }
  0x81   :  { %4572 = vmatpush.bf16.msrb.mxu3 %v7395_v33  ;;  %4534 = vmatmul.bf16.vlgmr.msrb.gmra.mxu0 %v1182_v40  ;;  %v7447_v33 = vld [vmem:[%s9480_s1 + $0x560] sm:$0xff]  ;;  %v7446_v40 = vld [vmem:[%s9480_s1 + $0x558] sm:$0xff] }
  0x82   :  { %4578 = vmatpush.bf16.msra.mxu0 %v7410_v36  ;;  %4547 = vmatmul.bf16.vlgmr.msrb.gmra.mxu1 %v1183_v42  ;;  %v7455_v36 = vld [vmem:[%s9480_s1 + $0x5a0] sm:$0xff]  ;;  %v7462_v42 = vld [vmem:[%s9480_s1 + $0x5d8] sm:$0xff] }
  0x83   :  { %4591 = vmatpush.bf16.msra.mxu1 %v7418_v37  ;;  %4560 = vmatmul.bf16.vlgmr.msrb.gmra.mxu2 %v1184_v41  ;;  %v7463_v37 = vld [vmem:[%s9480_s1 + $0x5e0] sm:$0xff]  ;;  %v7454_v41 = vld [vmem:[%s9480_s1 + $0x598] sm:$0xff] }
  0x84   :  { %4604 = vmatpush.bf16.msra.mxu2 %v7426_v38  ;;  %4573 = vmatmul.bf16.vlgmr.msrb.gmra.mxu3 %v1185_v43 }
  0x85   :  { %4617 = vmatpush.bf16.msra.mxu3 %v7434_v39  ;;  %v7438_v39 = vld [vmem:[%s9480_s1 + $0x518] sm:$0xff] }
  0x86   :  { %4579 = vmatpush.bf16.msra.mxu0 %v7409_v44 }
  0x87   :  { %4592 = vmatpush.bf16.msra.mxu1 %v7417_v45 }
  0x88   :  { %4605 = vmatpush.bf16.msra.mxu2 %v7425_v46 }
  0x89   :  { %4618 = vmatpush.bf16.msra.mxu3 %v7433_v47  ;;  %v7437_v47 = vld [vmem:[%s9480_s1 + $0x510] sm:$0xff] }
  0x8a   :  { %4580 = vmatpush.bf16.msra.mxu0 %v7408_v48  ;;  %v7445_v48 = vld [vmem:[%s9480_s1 + $0x550] sm:$0xff] }
  0x8b   :  { %4593 = vmatpush.bf16.msra.mxu1 %v7416_v49 }
  0x8c   :  { %4606 = vmatpush.bf16.msra.mxu2 %v7424_v50 }
  0x8d   :  { %4619 = vmatpush.bf16.msra.mxu3 %v7432_v51  ;;  %v7453_v51 = vld [vmem:[%s9480_s1 + $0x590] sm:$0xff] }
  0x8e   :  { %4581 = vmatpush.bf16.msra.mxu0 %v7407_v52  ;;  %v7461_v52 = vld [vmem:[%s9480_s1 + $0x5d0] sm:$0xff] }
  0x8f   :  { %4594 = vmatpush.bf16.msra.mxu1 %v7415_v53  ;;  %v7436_v53 = vld [vmem:[%s9480_s1 + $0x508] sm:$0xff] }
  0x90   :  { %4607 = vmatpush.bf16.msra.mxu2 %v7423_v54  ;;  %v7444_v54 = vld [vmem:[%s9480_s1 + $0x548] sm:$0xff] }
  0x91   :  { %4620 = vmatpush.bf16.msra.mxu3 %v7431_v55  ;;  %v7452_v55 = vld [vmem:[%s9480_s1 + $0x588] sm:$0xff] }
  0x92   :  { %4582 = vmatpush.bf16.msra.mxu0 %v7406_v56  ;;  %v7460_v56 = vld [vmem:[%s9480_s1 + $0x5c8] sm:$0xff] }
  0x93   :  { %4595 = vmatpush.bf16.msra.mxu1 %v7414_v57  ;;  %v24_v57 = vld [vmem:[%s9481_s0 + $0x50] sm:$0xff] }
  0x94   :  { %4608 = vmatpush.bf16.msra.mxu2 %v7422_v58  ;;  %v25_v58 = vld [vmem:[%s9481_s0 + $0x58] sm:$0xff] }
  0x95   :  { %4621 = vmatpush.bf16.msra.mxu3 %v7430_v59  ;;  %v1129_v4 = vunpack.c.h.b16 %v25_v58 }
  0x96   :  { %4583 = vmatpush.bf16.msra.mxu0 %v7405_v60 }
  0x97   :  { %4596 = vmatpush.bf16.msra.mxu1 %v7413_v61  ;;  %v7435_v61 = vld [vmem:[%s9480_s1 + $0x500] sm:$0xff]  ;;  %v1193_v12 = vpack.c.b16 %v1129_v4, %v1129_v4  ;;  %v7513_v4 = vld [vmem:[%s9480_s1 + $0x770] sm:$0xff] }
  0x98   :  { %4609 = vmatpush.bf16.msra.mxu2 %v7421_v62  ;;  %v7443_v62 = vld [vmem:[%s9480_s1 + $0x540] sm:$0xff] }
  0x99   :  { %4622 = vmatpush.bf16.msra.mxu3 %v7429_v63  ;;  %v1126_v63 = vunpack.c.l.b16 %v24_v57 }
  0x9a   :  { %4584 = vmatpush.bf16.msra.mxu0 %v7404_v0  ;;  %v1128_v0 = vunpack.c.l.b16 %v25_v58 }
  0x9b   :  { %4597 = vmatpush.bf16.msra.mxu1 %v7412_v1  ;;  %v7451_v1 = vld [vmem:[%s9480_s1 + $0x580] sm:$0xff]  ;;  %v1190_v9 = vpack.c.b16 %v1126_v63, %v1126_v63 }
  0x9c   :  { %4610 = vmatpush.bf16.msra.mxu2 %v7420_v2  ;;  %v7459_v2 = vld [vmem:[%s9480_s1 + $0x5c0] sm:$0xff] }
  0x9d   :  { %4623 = vmatpush.bf16.msra.mxu3 %v7428_v3  ;;  %v1127_v3 = vunpack.c.h.b16 %v24_v57 }
  0x9e   :  { %4585 = vmatpush.bf16.msra.mxu0 %v7403_v6  ;;  %v4379_v31 = vpop.f32.mrf.mxu0  ;;  %v7482_v6 = vld [vmem:[%s9480_s1 + $0x678] sm:$0xff] }
  0x9f   :  { %4598 = vmatpush.bf16.msra.mxu1 %v7411_v7  ;;  %v4380_v34 = vadd.f32 %v7787_v28, %v4379_v31  ;;  %v4392_v35 = vpop.f32.mrf.mxu1  ;;  %v7490_v7 = vld [vmem:[%s9480_s1 + $0x6b8] sm:$0xff] }
  0xa0   :  { %4611 = vmatpush.bf16.msra.mxu2 %v7419_v10  ;;  %v1192_v10 = vpack.c.b16 %v1128_v0, %v1128_v0  ;;  %v7486_v31 = vld [vmem:[%s9480_s1 + $0x698] sm:$0xff] }
  0xa1   :  { %4624 = vmatpush.bf16.msra.mxu3 %v7427_v11  ;;  %4586 = vmatmul.bf16.vlgmr.msra.gmra.mxu0 %v1186_v18  ;;  %v4393_v38 = vadd.f32 %v4392_v35, %v4380_v34  ;;  %v1191_v11 = vpack.c.b16 %v1127_v3, %v1127_v3  ;;  %v7480_v18 = vld [vmem:[%s9480_s1 + $0x668] sm:$0xff]  ;;  %v7505_v3 = vld [vmem:[%s9480_s1 + $0x730] sm:$0xff] }
  0xa2   :  { %4630 = vmatpush.bf16.msrb.mxu0 %v7442_v14  ;;  %4599 = vmatmul.bf16.vlgmr.msra.gmra.mxu1 %v1187_v20  ;;  %v7481_v14 = vld [vmem:[%s9480_s1 + $0x670] sm:$0xff]  ;;  %v7496_v20 = vld [vmem:[%s9480_s1 + $0x6e8] sm:$0xff] }
  0xa3   :  { %4643 = vmatpush.bf16.msrb.mxu1 %v7450_v15  ;;  %4612 = vmatmul.bf16.vlgmr.msra.gmra.mxu2 %v1188_v19  ;;  %v7489_v15 = vld [vmem:[%s9480_s1 + $0x6b0] sm:$0xff]  ;;  %v7488_v19 = vld [vmem:[%s9480_s1 + $0x6a8] sm:$0xff] }
  0xa4   :  { %4656 = vmatpush.bf16.msrb.mxu2 %v7458_v16  ;;  %4625 = vmatmul.bf16.vlgmr.msra.gmra.mxu3 %v1189_v21  ;;  %v7497_v16 = vld [vmem:[%s9480_s1 + $0x6f0] sm:$0xff] }
  0xa5   :  { %4669 = vmatpush.bf16.msrb.mxu3 %v7466_v17  ;;  %v7472_v17 = vld [vmem:[%s9480_s1 + $0x628] sm:$0xff] }
  0xa6   :  { %4631 = vmatpush.bf16.msrb.mxu0 %v7441_v22  ;;  %v4405_v43 = vpop.f32.mrf.mxu2  ;;  %v4381_v46 = vpop.f32.mrf.mxu0  ;;  %v7471_v22 = vld [vmem:[%s9480_s1 + $0x620] sm:$0xff] }
  0xa7   :  { %4644 = vmatpush.bf16.msrb.mxu1 %v7449_v23  ;;  %v4406_v44 = vadd.f32 %v4405_v43, %v4393_v38  ;;  %v4418_v45 = vpop.f32.mrf.mxu3  ;;  %v4394_v50 = vpop.f32.mrf.mxu1  ;;  %v7479_v23 = vld [vmem:[%s9480_s1 + $0x660] sm:$0xff]  ;;  %v7477_v38 = vld [vmem:[%s9480_s1 + $0x650] sm:$0xff]  ;;  %v7468_v43 = vld [vmem:[%s9480_s1 + $0x608] sm:$0xff] }
  0xa8   :  { %4657 = vmatpush.bf16.msrb.mxu2 %v7457_v24  ;;  %v7492_v46 = vld [vmem:[%s9480_s1 + $0x6c8] sm:$0xff] }
  0xa9   :  { %4670 = vmatpush.bf16.msrb.mxu3 %v7465_v25  ;;  %v8391_v49 = vadd.f32 %v4418_v45, %v4406_v44  ;;  %v7476_v44 = vld [vmem:[%s9480_s1 + $0x648] sm:$0xff] }
  0xaa   :  { %4632 = vmatpush.bf16.msrb.mxu0 %v7440_v26  ;;  %v7487_v26 = vld [vmem:[%s9480_s1 + $0x6a0] sm:$0xff]  ;;  %v7484_v45 = vld [vmem:[%s9480_s1 + $0x688] sm:$0xff] }
  0xab   :  { %4645 = vmatpush.bf16.msrb.mxu1 %v7448_v27  ;;  %v7495_v27 = vld [vmem:[%s9480_s1 + $0x6e0] sm:$0xff] }
  0xac   :  { %4658 = vmatpush.bf16.msrb.mxu2 %v7456_v29  ;;  %v7470_v29 = vld [vmem:[%s9480_s1 + $0x618] sm:$0xff] }
  0xad   :  { %4671 = vmatpush.bf16.msrb.mxu3 %v7464_v30  ;;  %v7478_v30 = vld [vmem:[%s9480_s1 + $0x658] sm:$0xff] }
  0xae   :  { %4633 = vmatpush.bf16.msrb.mxu0 %v7439_v32  ;;  %v4407_v59 = vpop.f32.mrf.mxu2  ;;  %v7494_v32 = vld [vmem:[%s9480_s1 + $0x6d8] sm:$0xff] }
  0xaf   :  { %4646 = vmatpush.bf16.msrb.mxu1 %v7447_v33  ;;  %v4420_v60 = vpop.f32.mrf.mxu3  ;;  %v7506_v59 = vld [vmem:[%s9480_s1 + $0x738] sm:$0xff] }
  0xb0   :  { %4659 = vmatpush.bf16.msrb.mxu2 %v7455_v36  ;;  %v7514_v60 = vld [vmem:[%s9480_s1 + $0x778] sm:$0xff] }
  0xb1   :  { %4672 = vmatpush.bf16.msrb.mxu3 %v7463_v37  ;;  %v7469_v37 = vld [vmem:[%s9480_s1 + $0x610] sm:$0xff] }
  0xb2   :  { %4634 = vmatpush.bf16.msrb.mxu0 %v7438_v39 }
  0xb3   :  { %4647 = vmatpush.bf16.msrb.mxu1 %v7446_v40 }
  0xb4   :  { %4660 = vmatpush.bf16.msrb.mxu2 %v7454_v41  ;;  %v7485_v41 = vld [vmem:[%s9480_s1 + $0x690] sm:$0xff] }
  0xb5   :  { %4673 = vmatpush.bf16.msrb.mxu3 %v7462_v42  ;;  %v7493_v42 = vld [vmem:[%s9480_s1 + $0x6d0] sm:$0xff] }
  0xb6   :  { %4635 = vmatpush.bf16.msrb.mxu0 %v7437_v47  ;;  %v26_v47 = vld [vmem:[%s9481_s0 + $0x60] sm:$0xff] }
  0xb7   :  { %4648 = vmatpush.bf16.msrb.mxu1 %v7445_v48  ;;  %v27_v48 = vld [vmem:[%s9481_s0 + $0x68] sm:$0xff]  ;;  %v1131_v57 = vunpack.c.h.b16 %v26_v47 }
  0xb8   :  { %4661 = vmatpush.bf16.msrb.mxu2 %v7453_v51  ;;  %v7467_v51 = vld [vmem:[%s9480_s1 + $0x600] sm:$0xff]  ;;  %v1133_v58 = vunpack.c.h.b16 %v27_v48 }
  0xb9   :  { %4674 = vmatpush.bf16.msrb.mxu3 %v7461_v52  ;;  %v7475_v52 = vld [vmem:[%s9480_s1 + $0x640] sm:$0xff] }
  0xba   :  { %4636 = vmatpush.bf16.msrb.mxu0 %v7436_v53  ;;  %v1130_v53 = vunpack.c.l.b16 %v26_v47 }
  0xbb   :  { %4649 = vmatpush.bf16.msrb.mxu1 %v7444_v54  ;;  %v1132_v54 = vunpack.c.l.b16 %v27_v48 }
  0xbc   :  { %4662 = vmatpush.bf16.msrb.mxu2 %v7452_v55  ;;  %v7483_v55 = vld [vmem:[%s9480_s1 + $0x680] sm:$0xff]  ;;  %v1194_v63 = vpack.c.b16 %v1130_v53, %v1130_v53 }
  0xbd   :  { %4675 = vmatpush.bf16.msrb.mxu3 %v7460_v56  ;;  %v7491_v56 = vld [vmem:[%s9480_s1 + $0x6c0] sm:$0xff]  ;;  %v1196_v0 = vpack.c.b16 %v1132_v54, %v1132_v54 }
  0xbe   :  { %4637 = vmatpush.bf16.msrb.mxu0 %v7435_v61  ;;  %v4431_v21 = vpop.f32.mrf.mxu0  ;;  %v7522_v61 = vld [vmem:[%s9480_s1 + $0x7b8] sm:$0xff] }
  0xbf   :  { %4650 = vmatpush.bf16.msrb.mxu1 %v7443_v62  ;;  %v4432_v24 = vadd.f32 %v4431_v21, %v8391_v49  ;;  %v4444_v25 = vpop.f32.mrf.mxu1  ;;  %v7530_v62 = vld [vmem:[%s9480_s1 + $0x7f8] sm:$0xff] }
  0xc0   :  { %4663 = vmatpush.bf16.msrb.mxu2 %v7451_v1  ;;  %v1195_v1 = vpack.c.b16 %v1131_v57, %v1131_v57  ;;  %v7518_v21 = vld [vmem:[%s9480_s1 + $0x798] sm:$0xff]  ;;  %v7537_v57 = vld [vmem:[%s9480_s1 + $0x830] sm:$0xff] }
  0xc1   :  { %4676 = vmatpush.bf16.msrb.mxu3 %v7459_v2  ;;  %4638 = vmatmul.bf16.vlgmr.msrb.gmra.mxu0 %v1190_v9  ;;  %v4445_v28 = vadd.f32 %v4444_v25, %v4432_v24  ;;  %v1197_v2 = vpack.c.b16 %v1133_v58, %v1133_v58  ;;  %v7520_v9 = vld [vmem:[%s9480_s1 + $0x7a8] sm:$0xff]  ;;  %v7545_v58 = vld [vmem:[%s9480_s1 + $0x870] sm:$0xff] }
  0xc2   :  { %4682 = vmatpush.bf16.msra.mxu0 %v7474_v5  ;;  %4651 = vmatmul.bf16.vlgmr.msrb.gmra.mxu1 %v1191_v11  ;;  %v7521_v5 = vld [vmem:[%s9480_s1 + $0x7b0] sm:$0xff] }
  0xc3   :  { %4695 = vmatpush.bf16.msra.mxu1 %v7482_v6  ;;  %4664 = vmatmul.bf16.vlgmr.msrb.gmra.mxu2 %v1192_v10  ;;  %v7529_v6 = vld [vmem:[%s9480_s1 + $0x7f0] sm:$0xff]  ;;  %v7528_v10 = vld [vmem:[%s9480_s1 + $0x7e8] sm:$0xff] }
  0xc4   :  { %4708 = vmatpush.bf16.msra.mxu2 %v7490_v7  ;;  %4677 = vmatmul.bf16.vlgmr.msrb.gmra.mxu3 %v1193_v12  ;;  %v7504_v7 = vld [vmem:[%s9480_s1 + $0x728] sm:$0xff] }
  0xc5   :  { %4721 = vmatpush.bf16.msra.mxu3 %v7498_v8  ;;  %v7512_v8 = vld [vmem:[%s9480_s1 + $0x768] sm:$0xff] }
  0xc6   :  { %4683 = vmatpush.bf16.msra.mxu0 %v7473_v13  ;;  %v4457_v33 = vpop.f32.mrf.mxu2  ;;  %v4433_v36 = vpop.f32.mrf.mxu0  ;;  %v7503_v13 = vld [vmem:[%s9480_s1 + $0x720] sm:$0xff] }
  0xc7   :  { %4696 = vmatpush.bf16.msra.mxu1 %v7481_v14  ;;  %v4458_v34 = vadd.f32 %v4457_v33, %v4445_v28  ;;  %v4470_v35 = vpop.f32.mrf.mxu3  ;;  %v4446_v40 = vpop.f32.mrf.mxu1  ;;  %v7511_v14 = vld [vmem:[%s9480_s1 + $0x760] sm:$0xff]  ;;  %v7501_v28 = vld [vmem:[%s9480_s1 + $0x710] sm:$0xff]  ;;  %v7500_v33 = vld [vmem:[%s9480_s1 + $0x708] sm:$0xff] }
  0xc8   :  { %4709 = vmatpush.bf16.msra.mxu2 %v7489_v15  ;;  %v7524_v36 = vld [vmem:[%s9480_s1 + $0x7c8] sm:$0xff] }
  0xc9   :  { %4722 = vmatpush.bf16.msra.mxu3 %v7497_v16  ;;  %v8496_v39 = vadd.f32 %v4470_v35, %v4458_v34  ;;  %v7519_v16 = vld [vmem:[%s9480_s1 + $0x7a0] sm:$0xff]  ;;  %v7508_v34 = vld [vmem:[%s9480_s1 + $0x748] sm:$0xff] }
  0xca   :  { %4684 = vmatpush.bf16.msra.mxu0 %v7472_v17  ;;  %v7527_v17 = vld [vmem:[%s9480_s1 + $0x7e0] sm:$0xff]  ;;  %v7516_v35 = vld [vmem:[%s9480_s1 + $0x788] sm:$0xff] }
  0xcb   :  { %4697 = vmatpush.bf16.msra.mxu1 %v7480_v18 }
  0xcc   :  { %4710 = vmatpush.bf16.msra.mxu2 %v7488_v19  ;;  %v7502_v19 = vld [vmem:[%s9480_s1 + $0x718] sm:$0xff] }
  0xcd   :  { %4723 = vmatpush.bf16.msra.mxu3 %v7496_v20  ;;  %v7510_v20 = vld [vmem:[%s9480_s1 + $0x758] sm:$0xff] }
  0xce   :  { %4685 = vmatpush.bf16.msra.mxu0 %v7471_v22  ;;  %v4459_v49 = vpop.f32.mrf.mxu2  ;;  %v7526_v22 = vld [vmem:[%s9480_s1 + $0x7d8] sm:$0xff] }
  0xcf   :  { %4698 = vmatpush.bf16.msra.mxu1 %v7479_v23  ;;  %v4472_v50 = vpop.f32.mrf.mxu3  ;;  %v7538_v49 = vld [vmem:[%s9480_s1 + $0x838] sm:$0xff] }
  0xd0   :  { %4711 = vmatpush.bf16.msra.mxu2 %v7487_v26  ;;  %v7546_v50 = vld [vmem:[%s9480_s1 + $0x878] sm:$0xff] }
  0xd1   :  { %4724 = vmatpush.bf16.msra.mxu3 %v7495_v27 }
  0xd2   :  { %4686 = vmatpush.bf16.msra.mxu0 %v7470_v29  ;;  %v7509_v29 = vld [vmem:[%s9480_s1 + $0x750] sm:$0xff] }
  0xd3   :  { %4699 = vmatpush.bf16.msra.mxu1 %v7478_v30 }
  0xd4   :  { %4712 = vmatpush.bf16.msra.mxu2 %v7486_v31  ;;  %v7517_v31 = vld [vmem:[%s9480_s1 + $0x790] sm:$0xff] }
  0xd5   :  { %4725 = vmatpush.bf16.msra.mxu3 %v7494_v32  ;;  %v7525_v32 = vld [vmem:[%s9480_s1 + $0x7d0] sm:$0xff] }
  0xd6   :  { %4687 = vmatpush.bf16.msra.mxu0 %v7469_v37  ;;  %v28_v37 = vld [vmem:[%s9481_s0 + $0x70] sm:$0xff] }
  0xd7   :  { %4700 = vmatpush.bf16.msra.mxu1 %v7477_v38  ;;  %v29_v38 = vld [vmem:[%s9481_s0 + $0x78] sm:$0xff]  ;;  %v1135_v47 = vunpack.c.h.b16 %v28_v37 }
  0xd8   :  { %4713 = vmatpush.bf16.msra.mxu2 %v7485_v41  ;;  %v7499_v41 = vld [vmem:[%s9480_s1 + $0x700] sm:$0xff]  ;;  %v1137_v48 = vunpack.c.h.b16 %v29_v38 }
  0xd9   :  { %4726 = vmatpush.bf16.msra.mxu3 %v7493_v42  ;;  %v7507_v42 = vld [vmem:[%s9480_s1 + $0x740] sm:$0xff] }
  0xda   :  { %4688 = vmatpush.bf16.msra.mxu0 %v7468_v43  ;;  %v1134_v43 = vunpack.c.l.b16 %v28_v37 }
  0xdb   :  { %4701 = vmatpush.bf16.msra.mxu1 %v7476_v44  ;;  %v1136_v44 = vunpack.c.l.b16 %v29_v38 }
  0xdc   :  { %4714 = vmatpush.bf16.msra.mxu2 %v7484_v45  ;;  %v7515_v45 = vld [vmem:[%s9480_s1 + $0x780] sm:$0xff]  ;;  %v1198_v53 = vpack.c.b16 %v1134_v43, %v1134_v43 }
  0xdd   :  { %4727 = vmatpush.bf16.msra.mxu3 %v7492_v46  ;;  %v7523_v46 = vld [vmem:[%s9480_s1 + $0x7c0] sm:$0xff]  ;;  %v1200_v54 = vpack.c.b16 %v1136_v44, %v1136_v44 }
  0xde   :  { %4689 = vmatpush.bf16.msra.mxu0 %v7467_v51  ;;  %v4483_v11 = vpop.f32.mrf.mxu0  ;;  %v7554_v51 = vld [vmem:[%s9480_s1 + $0x8b8] sm:$0xff] }
  0xdf   :  { %4702 = vmatpush.bf16.msra.mxu1 %v7475_v52  ;;  %v4484_v12 = vadd.f32 %v4483_v11, %v8496_v39  ;;  %v4496_v15 = vpop.f32.mrf.mxu1  ;;  %v7562_v52 = vld [vmem:[%s9480_s1 + $0x8f8] sm:$0xff] }
  0xe0   :  { %4715 = vmatpush.bf16.msra.mxu2 %v7483_v55  ;;  %v1199_v55 = vpack.c.b16 %v1135_v47, %v1135_v47  ;;  %v7550_v11 = vld [vmem:[%s9480_s1 + $0x898] sm:$0xff]  ;;  %v7569_v47 = vld [vmem:[%s9480_s1 + $0x930] sm:$0xff] }
  0xe1   :  { %4728 = vmatpush.bf16.msra.mxu3 %v7491_v56  ;;  %4690 = vmatmul.bf16.vlgmr.msra.gmra.mxu0 %v1194_v63  ;;  %v4497_v18 = vadd.f32 %v4496_v15, %v4484_v12  ;;  %v1201_v56 = vpack.c.b16 %v1137_v48, %v1137_v48  ;;  %v7552_v63 = vld [vmem:[%s9480_s1 + $0x8a8] sm:$0xff]  ;;  %v7558_v12 = vld [vmem:[%s9480_s1 + $0x8d8] sm:$0xff]  ;;  %v7577_v48 = vld [vmem:[%s9480_s1 + $0x970] sm:$0xff] }
  0xe2   :  { %4734 = vmatpush.bf16.msrb.mxu0 %v7506_v59  ;;  %4703 = vmatmul.bf16.vlgmr.msra.gmra.mxu1 %v1195_v1  ;;  %v7553_v59 = vld [vmem:[%s9480_s1 + $0x8b0] sm:$0xff] }
  0xe3   :  { %4747 = vmatpush.bf16.msrb.mxu1 %v7514_v60  ;;  %4716 = vmatmul.bf16.vlgmr.msra.gmra.mxu2 %v1196_v0  ;;  %v7561_v60 = vld [vmem:[%s9480_s1 + $0x8f0] sm:$0xff]  ;;  %v7560_v0 = vld [vmem:[%s9480_s1 + $0x8e8] sm:$0xff] }
  0xe4   :  { %4760 = vmatpush.bf16.msrb.mxu2 %v7522_v61  ;;  %4729 = vmatmul.bf16.vlgmr.msra.gmra.mxu3 %v1197_v2  ;;  %v7536_v61 = vld [vmem:[%s9480_s1 + $0x828] sm:$0xff] }
  0xe5   :  { %4773 = vmatpush.bf16.msrb.mxu3 %v7530_v62  ;;  %v7544_v62 = vld [vmem:[%s9480_s1 + $0x868] sm:$0xff] }
  0xe6   :  { %4735 = vmatpush.bf16.msrb.mxu0 %v7505_v3  ;;  %v4509_v23 = vpop.f32.mrf.mxu2  ;;  %v4485_v26 = vpop.f32.mrf.mxu0  ;;  %v7535_v3 = vld [vmem:[%s9480_s1 + $0x820] sm:$0xff] }
  0xe7   :  { %4748 = vmatpush.bf16.msrb.mxu1 %v7513_v4  ;;  %v4510_v24 = vadd.f32 %v4509_v23, %v4497_v18  ;;  %v4522_v25 = vpop.f32.mrf.mxu3  ;;  %v4498_v30 = vpop.f32.mrf.mxu1  ;;  %v7543_v4 = vld [vmem:[%s9480_s1 + $0x860] sm:$0xff]  ;;  %v7533_v18 = vld [vmem:[%s9480_s1 + $0x810] sm:$0xff]  ;;  %v7532_v23 = vld [vmem:[%s9480_s1 + $0x808] sm:$0xff] }
  0xe8   :  { %4761 = vmatpush.bf16.msrb.mxu2 %v7521_v5  ;;  %v7556_v26 = vld [vmem:[%s9480_s1 + $0x8c8] sm:$0xff] }
  0xe9   :  { %4774 = vmatpush.bf16.msrb.mxu3 %v7529_v6  ;;  %v8595_v27 = vadd.f32 %v4522_v25, %v4510_v24  ;;  %v7551_v6 = vld [vmem:[%s9480_s1 + $0x8a0] sm:$0xff]  ;;  %v7540_v24 = vld [vmem:[%s9480_s1 + $0x848] sm:$0xff] }
  0xea   :  { %4736 = vmatpush.bf16.msrb.mxu0 %v7504_v7  ;;  %v7559_v7 = vld [vmem:[%s9480_s1 + $0x8e0] sm:$0xff]  ;;  %v7548_v25 = vld [vmem:[%s9480_s1 + $0x888] sm:$0xff] }
  0xeb   :  { %4749 = vmatpush.bf16.msrb.mxu1 %v7512_v8 }
  0xec   :  { %4762 = vmatpush.bf16.msrb.mxu2 %v7520_v9  ;;  %v7534_v9 = vld [vmem:[%s9480_s1 + $0x818] sm:$0xff] }
  0xed   :  { %4775 = vmatpush.bf16.msrb.mxu3 %v7528_v10  ;;  %v7542_v10 = vld [vmem:[%s9480_s1 + $0x858] sm:$0xff] }
  0xee   :  { %4737 = vmatpush.bf16.msrb.mxu0 %v7503_v13  ;;  %v4511_v39 = vpop.f32.mrf.mxu2 }
  0xef   :  { %4750 = vmatpush.bf16.msrb.mxu1 %v7511_v14  ;;  %v4524_v40 = vpop.f32.mrf.mxu3  ;;  %v7570_v39 = vld [vmem:[%s9480_s1 + $0x938] sm:$0xff] }
  0xf0   :  { %4763 = vmatpush.bf16.msrb.mxu2 %v7519_v16  ;;  %v7578_v40 = vld [vmem:[%s9480_s1 + $0x978] sm:$0xff] }
  0xf1   :  { %4776 = vmatpush.bf16.msrb.mxu3 %v7527_v17 }
  0xf2   :  { %4738 = vmatpush.bf16.msrb.mxu0 %v7502_v19  ;;  %v7541_v19 = vld [vmem:[%s9480_s1 + $0x850] sm:$0xff] }
  0xf3   :  { %4751 = vmatpush.bf16.msrb.mxu1 %v7510_v20 }
  0xf4   :  { %4764 = vmatpush.bf16.msrb.mxu2 %v7518_v21  ;;  %v7549_v21 = vld [vmem:[%s9480_s1 + $0x890] sm:$0xff] }
  0xf5   :  { %4777 = vmatpush.bf16.msrb.mxu3 %v7526_v22  ;;  %v7557_v22 = vld [vmem:[%s9480_s1 + $0x8d0] sm:$0xff] }
  0xf6   :  { %4739 = vmatpush.bf16.msrb.mxu0 %v7501_v28  ;;  %v31_v28 = vld [vmem:[%s9481_s0 + $0x88] sm:$0xff] }
  0xf7   :  { %4752 = vmatpush.bf16.msrb.mxu1 %v7509_v29  ;;  %v1141_v38 = vunpack.c.h.b16 %v31_v28 }
  0xf8   :  { %4765 = vmatpush.bf16.msrb.mxu2 %v7517_v31  ;;  %v7531_v31 = vld [vmem:[%s9480_s1 + $0x800] sm:$0xff] }
  0xf9   :  { %4778 = vmatpush.bf16.msrb.mxu3 %v7525_v32  ;;  %v7539_v32 = vld [vmem:[%s9480_s1 + $0x840] sm:$0xff] }
  0xfa   :  { %4740 = vmatpush.bf16.msrb.mxu0 %v7500_v33 }
  0xfb   :  { %4753 = vmatpush.bf16.msrb.mxu1 %v7508_v34  ;;  %v1140_v34 = vunpack.c.l.b16 %v31_v28 }
  0xfc   :  { %4766 = vmatpush.bf16.msrb.mxu2 %v7516_v35  ;;  %v7547_v35 = vld [vmem:[%s9480_s1 + $0x880] sm:$0xff] }
  0xfd   :  { %4779 = vmatpush.bf16.msrb.mxu3 %v7524_v36  ;;  %v7555_v36 = vld [vmem:[%s9480_s1 + $0x8c0] sm:$0xff]  ;;  %v1204_v44 = vpack.c.b16 %v1140_v34, %v1140_v34 }
  0xfe   :  { %4741 = vmatpush.bf16.msrb.mxu0 %v7499_v41  ;;  %v4535_v1 = vpop.f32.mrf.mxu0  ;;  %v7586_v41 = vld [vmem:[%s9480_s1 + $0x9b8] sm:$0xff] }
  0xff   :  { %4754 = vmatpush.bf16.msrb.mxu1 %v7507_v42  ;;  %v4536_v2 = vadd.f32 %v4535_v1, %v8595_v27  ;;  %v4548_v5 = vpop.f32.mrf.mxu1  ;;  %v30_v27 = vld [vmem:[%s9481_s0 + $0x80] sm:$0xff]  ;;  %v7594_v42 = vld [vmem:[%s9480_s1 + $0x9f8] sm:$0xff] }
 0x100   :  { %4767 = vmatpush.bf16.msrb.mxu2 %v7515_v45  ;;  %v1138_v33 = vunpack.c.l.b16 %v30_v27  ;;  %v1139_v37 = vunpack.c.h.b16 %v30_v27  ;;  %v7582_v1 = vld [vmem:[%s9480_s1 + $0x998] sm:$0xff] }
 0x101   :  { %4780 = vmatpush.bf16.msrb.mxu3 %v7523_v46  ;;  %4742 = vmatmul.bf16.vlgmr.msrb.gmra.mxu0 %v1198_v53  ;;  %v4549_v8 = vadd.f32 %v4548_v5, %v4536_v2  ;;  %v1205_v46 = vpack.c.b16 %v1141_v38, %v1141_v38  ;;  %v7584_v53 = vld [vmem:[%s9480_s1 + $0x9a8] sm:$0xff]  ;;  %v7590_v2 = vld [vmem:[%s9480_s1 + $0x9d8] sm:$0xff]  ;;  %v7609_v38 = vld [vmem:[%s9480_s1 + $0xa70] sm:$0xff] }
 0x102   :  { %4786 = vmatpush.bf16.msra.mxu0 %v7538_v49  ;;  %4755 = vmatmul.bf16.vlgmr.msrb.gmra.mxu1 %v1199_v55  ;;  %v1202_v43 = vpack.c.b16 %v1138_v33, %v1138_v33  ;;  %v1203_v45 = vpack.c.b16 %v1139_v37, %v1139_v37  ;;  %v7585_v49 = vld [vmem:[%s9480_s1 + $0x9b0] sm:$0xff] }
 0x103   :  { %4799 = vmatpush.bf16.msra.mxu1 %v7546_v50  ;;  %4768 = vmatmul.bf16.vlgmr.msrb.gmra.mxu2 %v1200_v54  ;;  %v7593_v50 = vld [vmem:[%s9480_s1 + $0x9f0] sm:$0xff]  ;;  %v7592_v54 = vld [vmem:[%s9480_s1 + $0x9e8] sm:$0xff] }
 0x104   :  { %4812 = vmatpush.bf16.msra.mxu2 %v7554_v51  ;;  %4781 = vmatmul.bf16.vlgmr.msrb.gmra.mxu3 %v1201_v56  ;;  %v7568_v51 = vld [vmem:[%s9480_s1 + $0x928] sm:$0xff]  ;;  %v7601_v37 = vld [vmem:[%s9480_s1 + $0xa30] sm:$0xff] }
 0x105   :  { %4825 = vmatpush.bf16.msra.mxu3 %v7562_v52  ;;  %v7576_v52 = vld [vmem:[%s9480_s1 + $0x968] sm:$0xff] }
 0x106   :  { %4787 = vmatpush.bf16.msra.mxu0 %v7537_v57  ;;  %v4561_v13 = vpop.f32.mrf.mxu2  ;;  %v4537_v16 = vpop.f32.mrf.mxu0  ;;  %v7567_v57 = vld [vmem:[%s9480_s1 + $0x920] sm:$0xff] }
 0x107   :  { %4800 = vmatpush.bf16.msra.mxu1 %v7545_v58  ;;  %v4562_v14 = vadd.f32 %v4561_v13, %v4549_v8  ;;  %v4574_v15 = vpop.f32.mrf.mxu3  ;;  %v4550_v20 = vpop.f32.mrf.mxu1  ;;  %v7575_v58 = vld [vmem:[%s9480_s1 + $0x960] sm:$0xff]  ;;  %v7565_v8 = vld [vmem:[%s9480_s1 + $0x910] sm:$0xff]  ;;  %v7564_v13 = vld [vmem:[%s9480_s1 + $0x908] sm:$0xff] }
 0x108   :  { %4813 = vmatpush.bf16.msra.mxu2 %v7553_v59  ;;  %v7588_v16 = vld [vmem:[%s9480_s1 + $0x9c8] sm:$0xff] }
 0x109   :  { %4826 = vmatpush.bf16.msra.mxu3 %v7561_v60  ;;  %v8700_v17 = vadd.f32 %v4574_v15, %v4562_v14  ;;  %v7583_v60 = vld [vmem:[%s9480_s1 + $0x9a0] sm:$0xff]  ;;  %v7572_v14 = vld [vmem:[%s9480_s1 + $0x948] sm:$0xff] }
 0x10a   :  { %4788 = vmatpush.bf16.msra.mxu0 %v7536_v61  ;;  %v7591_v61 = vld [vmem:[%s9480_s1 + $0x9e0] sm:$0xff]  ;;  %v7580_v15 = vld [vmem:[%s9480_s1 + $0x988] sm:$0xff] }
 0x10b   :  { %4801 = vmatpush.bf16.msra.mxu1 %v7544_v62 }
 0x10c   :  { %4814 = vmatpush.bf16.msra.mxu2 %v7552_v63  ;;  %v7566_v63 = vld [vmem:[%s9480_s1 + $0x918] sm:$0xff] }
 0x10d   :  { %4827 = vmatpush.bf16.msra.mxu3 %v7560_v0  ;;  %v7574_v0 = vld [vmem:[%s9480_s1 + $0x958] sm:$0xff] }
 0x10e   :  { %4789 = vmatpush.bf16.msra.mxu0 %v7535_v3  ;;  %v4563_v29 = vpop.f32.mrf.mxu2 }
 0x10f   :  { %4802 = vmatpush.bf16.msra.mxu1 %v7543_v4  ;;  %v4576_v30 = vpop.f32.mrf.mxu3  ;;  %v7602_v29 = vld [vmem:[%s9480_s1 + $0xa38] sm:$0xff] }
 0x110   :  { %4815 = vmatpush.bf16.msra.mxu2 %v7551_v6  ;;  %v7610_v30 = vld [vmem:[%s9480_s1 + $0xa78] sm:$0xff] }
 0x111   :  { %4828 = vmatpush.bf16.msra.mxu3 %v7559_v7 }
 0x112   :  { %4790 = vmatpush.bf16.msra.mxu0 %v7534_v9  ;;  %v7573_v9 = vld [vmem:[%s9480_s1 + $0x950] sm:$0xff] }
 0x113   :  { %4803 = vmatpush.bf16.msra.mxu1 %v7542_v10 }
 0x114   :  { %4816 = vmatpush.bf16.msra.mxu2 %v7550_v11  ;;  %v7581_v11 = vld [vmem:[%s9480_s1 + $0x990] sm:$0xff] }
 0x115   :  { %4829 = vmatpush.bf16.msra.mxu3 %v7558_v12  ;;  %v7589_v12 = vld [vmem:[%s9480_s1 + $0x9d0] sm:$0xff] }
 0x116   :  { %4791 = vmatpush.bf16.msra.mxu0 %v7533_v18  ;;  %v33_v18 = vld [vmem:[%s9481_s0 + $0x98] sm:$0xff] }
 0x117   :  { %4804 = vmatpush.bf16.msra.mxu1 %v7541_v19  ;;  %v1145_v28 = vunpack.c.h.b16 %v33_v18 }
 0x118   :  { %4817 = vmatpush.bf16.msra.mxu2 %v7549_v21  ;;  %v7563_v21 = vld [vmem:[%s9480_s1 + $0x900] sm:$0xff] }
 0x119   :  { %4830 = vmatpush.bf16.msra.mxu3 %v7557_v22  ;;  %v7571_v22 = vld [vmem:[%s9480_s1 + $0x940] sm:$0xff] }
 0x11a   :  { %4792 = vmatpush.bf16.msra.mxu0 %v7532_v23 }
 0x11b   :  { %4805 = vmatpush.bf16.msra.mxu1 %v7540_v24  ;;  %v1144_v24 = vunpack.c.l.b16 %v33_v18 }
 0x11c   :  { %4818 = vmatpush.bf16.msra.mxu2 %v7548_v25  ;;  %v7579_v25 = vld [vmem:[%s9480_s1 + $0x980] sm:$0xff] }
 0x11d   :  { %4831 = vmatpush.bf16.msra.mxu3 %v7556_v26  ;;  %v7587_v26 = vld [vmem:[%s9480_s1 + $0x9c0] sm:$0xff]  ;;  %v1208_v34 = vpack.c.b16 %v1144_v24, %v1144_v24 }
 0x11e   :  { %4793 = vmatpush.bf16.msra.mxu0 %v7531_v31  ;;  %v4587_v55 = vpop.f32.mrf.mxu0  ;;  %v7618_v31 = vld [vmem:[%s9480_s1 + $0xab8] sm:$0xff] }
 0x11f   :  { %4806 = vmatpush.bf16.msra.mxu1 %v7539_v32  ;;  %v4588_v56 = vadd.f32 %v4587_v55, %v8700_v17  ;;  %v4600_v59 = vpop.f32.mrf.mxu1  ;;  %v32_v17 = vld [vmem:[%s9481_s0 + $0x90] sm:$0xff]  ;;  %v7626_v32 = vld [vmem:[%s9480_s1 + $0xaf8] sm:$0xff] }
 0x120   :  { %4819 = vmatpush.bf16.msra.mxu2 %v7547_v35  ;;  %v1142_v23 = vunpack.c.l.b16 %v32_v17  ;;  %v1143_v27 = vunpack.c.h.b16 %v32_v17  ;;  %v7614_v55 = vld [vmem:[%s9480_s1 + $0xa98] sm:$0xff] }
 0x121   :  { %4832 = vmatpush.bf16.msra.mxu3 %v7555_v36  ;;  %4794 = vmatmul.bf16.vlgmr.msra.gmra.mxu0 %v1202_v43  ;;  %v4601_v62 = vadd.f32 %v4600_v59, %v4588_v56  ;;  %v1209_v36 = vpack.c.b16 %v1145_v28, %v1145_v28  ;;  %v7616_v43 = vld [vmem:[%s9480_s1 + $0xaa8] sm:$0xff]  ;;  %v7622_v56 = vld [vmem:[%s9480_s1 + $0xad8] sm:$0xff]  ;;  %v7641_v28 = vld [vmem:[%s9480_s1 + $0xb70] sm:$0xff] }
 0x122   :  { %4838 = vmatpush.bf16.msrb.mxu0 %v7570_v39  ;;  %4807 = vmatmul.bf16.vlgmr.msra.gmra.mxu1 %v1203_v45  ;;  %v1206_v33 = vpack.c.b16 %v1142_v23, %v1142_v23  ;;  %v1207_v35 = vpack.c.b16 %v1143_v27, %v1143_v27  ;;  %v7617_v39 = vld [vmem:[%s9480_s1 + $0xab0] sm:$0xff] }
 0x123   :  { %4851 = vmatpush.bf16.msrb.mxu1 %v7578_v40  ;;  %4820 = vmatmul.bf16.vlgmr.msra.gmra.mxu2 %v1204_v44  ;;  %v7625_v40 = vld [vmem:[%s9480_s1 + $0xaf0] sm:$0xff]  ;;  %v7624_v44 = vld [vmem:[%s9480_s1 + $0xae8] sm:$0xff] }
 0x124   :  { %4864 = vmatpush.bf16.msrb.mxu2 %v7586_v41  ;;  %4833 = vmatmul.bf16.vlgmr.msra.gmra.mxu3 %v1205_v46  ;;  %v7600_v41 = vld [vmem:[%s9480_s1 + $0xa28] sm:$0xff]  ;;  %v7633_v27 = vld [vmem:[%s9480_s1 + $0xb30] sm:$0xff] }
 0x125   :  { %4877 = vmatpush.bf16.msrb.mxu3 %v7594_v42  ;;  %v7608_v42 = vld [vmem:[%s9480_s1 + $0xa68] sm:$0xff] }
 0x126   :  { %4839 = vmatpush.bf16.msrb.mxu0 %v7569_v47  ;;  %v4613_v3 = vpop.f32.mrf.mxu2  ;;  %v4589_v6 = vpop.f32.mrf.mxu0  ;;  %v7599_v47 = vld [vmem:[%s9480_s1 + $0xa20] sm:$0xff] }
 0x127   :  { %4852 = vmatpush.bf16.msrb.mxu1 %v7577_v48  ;;  %v4614_v4 = vadd.f32 %v4613_v3, %v4601_v62  ;;  %v4626_v5 = vpop.f32.mrf.mxu3  ;;  %v4602_v10 = vpop.f32.mrf.mxu1  ;;  %v7607_v48 = vld [vmem:[%s9480_s1 + $0xa60] sm:$0xff]  ;;  %v7597_v62 = vld [vmem:[%s9480_s1 + $0xa10] sm:$0xff]  ;;  %v7596_v3 = vld [vmem:[%s9480_s1 + $0xa08] sm:$0xff] }
 0x128   :  { %4865 = vmatpush.bf16.msrb.mxu2 %v7585_v49  ;;  %v7620_v6 = vld [vmem:[%s9480_s1 + $0xac8] sm:$0xff] }
 0x129   :  { %4878 = vmatpush.bf16.msrb.mxu3 %v7593_v50  ;;  %v8805_v7 = vadd.f32 %v4626_v5, %v4614_v4  ;;  %v7615_v50 = vld [vmem:[%s9480_s1 + $0xaa0] sm:$0xff]  ;;  %v7604_v4 = vld [vmem:[%s9480_s1 + $0xa48] sm:$0xff] }
 0x12a   :  { %4840 = vmatpush.bf16.msrb.mxu0 %v7568_v51  ;;  %v7623_v51 = vld [vmem:[%s9480_s1 + $0xae0] sm:$0xff]  ;;  %v7612_v5 = vld [vmem:[%s9480_s1 + $0xa88] sm:$0xff] }
 0x12b   :  { %4853 = vmatpush.bf16.msrb.mxu1 %v7576_v52 }
 0x12c   :  { %4866 = vmatpush.bf16.msrb.mxu2 %v7584_v53  ;;  %v7598_v53 = vld [vmem:[%s9480_s1 + $0xa18] sm:$0xff] }
 0x12d   :  { %4879 = vmatpush.bf16.msrb.mxu3 %v7592_v54  ;;  %v7606_v54 = vld [vmem:[%s9480_s1 + $0xa58] sm:$0xff] }
 0x12e   :  { %4841 = vmatpush.bf16.msrb.mxu0 %v7567_v57  ;;  %v4615_v19 = vpop.f32.mrf.mxu2 }
 0x12f   :  { %4854 = vmatpush.bf16.msrb.mxu1 %v7575_v58  ;;  %v4628_v20 = vpop.f32.mrf.mxu3  ;;  %v7634_v19 = vld [vmem:[%s9480_s1 + $0xb38] sm:$0xff] }
 0x130   :  { %4867 = vmatpush.bf16.msrb.mxu2 %v7583_v60  ;;  %v7642_v20 = vld [vmem:[%s9480_s1 + $0xb78] sm:$0xff] }
 0x131   :  { %4880 = vmatpush.bf16.msrb.mxu3 %v7591_v61 }
 0x132   :  { %4842 = vmatpush.bf16.msrb.mxu0 %v7566_v63  ;;  %v7605_v63 = vld [vmem:[%s9480_s1 + $0xa50] sm:$0xff] }
 0x133   :  { %4855 = vmatpush.bf16.msrb.mxu1 %v7574_v0 }
 0x134   :  { %4868 = vmatpush.bf16.msrb.mxu2 %v7582_v1  ;;  %v7613_v1 = vld [vmem:[%s9480_s1 + $0xa90] sm:$0xff] }
 0x135   :  { %4881 = vmatpush.bf16.msrb.mxu3 %v7590_v2  ;;  %v7621_v2 = vld [vmem:[%s9480_s1 + $0xad0] sm:$0xff] }
 0x136   :  { %4843 = vmatpush.bf16.msrb.mxu0 %v7565_v8  ;;  %v35_v8 = vld [vmem:[%s9481_s0 + $0xa8] sm:$0xff] }
 0x137   :  { %4856 = vmatpush.bf16.msrb.mxu1 %v7573_v9  ;;  %v1149_v18 = vunpack.c.h.b16 %v35_v8 }
 0x138   :  { %4869 = vmatpush.bf16.msrb.mxu2 %v7581_v11  ;;  %v7595_v11 = vld [vmem:[%s9480_s1 + $0xa00] sm:$0xff] }
 0x139   :  { %4882 = vmatpush.bf16.msrb.mxu3 %v7589_v12  ;;  %v7603_v12 = vld [vmem:[%s9480_s1 + $0xa40] sm:$0xff] }
 0x13a   :  { %4844 = vmatpush.bf16.msrb.mxu0 %v7564_v13 }
 0x13b   :  { %4857 = vmatpush.bf16.msrb.mxu1 %v7572_v14  ;;  %v1148_v14 = vunpack.c.l.b16 %v35_v8 }
 0x13c   :  { %4870 = vmatpush.bf16.msrb.mxu2 %v7580_v15  ;;  %v7611_v15 = vld [vmem:[%s9480_s1 + $0xa80] sm:$0xff] }
 0x13d   :  { %4883 = vmatpush.bf16.msrb.mxu3 %v7588_v16  ;;  %v7619_v16 = vld [vmem:[%s9480_s1 + $0xac0] sm:$0xff]  ;;  %v1212_v24 = vpack.c.b16 %v1148_v14, %v1148_v14 }
 0x13e   :  { %4845 = vmatpush.bf16.msrb.mxu0 %v7563_v21  ;;  %v4639_v45 = vpop.f32.mrf.mxu0  ;;  %v7650_v21 = vld [vmem:[%s9480_s1 + $0xbb8] sm:$0xff] }
 0x13f   :  { %4858 = vmatpush.bf16.msrb.mxu1 %v7571_v22  ;;  %v4640_v46 = vadd.f32 %v4639_v45, %v8805_v7  ;;  %v4652_v49 = vpop.f32.mrf.mxu1  ;;  %v34_v7 = vld [vmem:[%s9481_s0 + $0xa0] sm:$0xff]  ;;  %v7658_v22 = vld [vmem:[%s9480_s1 + $0xbf8] sm:$0xff] }
 0x140   :  { %4871 = vmatpush.bf16.msrb.mxu2 %v7579_v25  ;;  %v1146_v13 = vunpack.c.l.b16 %v34_v7  ;;  %v1147_v17 = vunpack.c.h.b16 %v34_v7  ;;  %v7646_v45 = vld [vmem:[%s9480_s1 + $0xb98] sm:$0xff] }
 0x141   :  { %4884 = vmatpush.bf16.msrb.mxu3 %v7587_v26  ;;  %4846 = vmatmul.bf16.vlgmr.msrb.gmra.mxu0 %v1206_v33  ;;  %v4653_v52 = vadd.f32 %v4652_v49, %v4640_v46  ;;  %v1213_v26 = vpack.c.b16 %v1149_v18, %v1149_v18  ;;  %v7648_v33 = vld [vmem:[%s9480_s1 + $0xba8] sm:$0xff]  ;;  %v7654_v46 = vld [vmem:[%s9480_s1 + $0xbd8] sm:$0xff]  ;;  %v7673_v18 = vld [vmem:[%s9480_s1 + $0xc70] sm:$0xff] }
 0x142   :  { %4890 = vmatpush.bf16.msra.mxu0 %v7602_v29  ;;  %4859 = vmatmul.bf16.vlgmr.msrb.gmra.mxu1 %v1207_v35  ;;  %v1210_v23 = vpack.c.b16 %v1146_v13, %v1146_v13  ;;  %v1211_v25 = vpack.c.b16 %v1147_v17, %v1147_v17  ;;  %v7649_v29 = vld [vmem:[%s9480_s1 + $0xbb0] sm:$0xff] }
 0x143   :  { %4903 = vmatpush.bf16.msra.mxu1 %v7610_v30  ;;  %4872 = vmatmul.bf16.vlgmr.msrb.gmra.mxu2 %v1208_v34  ;;  %v7657_v30 = vld [vmem:[%s9480_s1 + $0xbf0] sm:$0xff]  ;;  %v7656_v34 = vld [vmem:[%s9480_s1 + $0xbe8] sm:$0xff] }
 0x144   :  { %4916 = vmatpush.bf16.msra.mxu2 %v7618_v31  ;;  %4885 = vmatmul.bf16.vlgmr.msrb.gmra.mxu3 %v1209_v36  ;;  %v7632_v31 = vld [vmem:[%s9480_s1 + $0xb28] sm:$0xff]  ;;  %v7665_v17 = vld [vmem:[%s9480_s1 + $0xc30] sm:$0xff] }
 0x145   :  { %4929 = vmatpush.bf16.msra.mxu3 %v7626_v32  ;;  %v7640_v32 = vld [vmem:[%s9480_s1 + $0xb68] sm:$0xff] }
 0x146   :  { %4891 = vmatpush.bf16.msra.mxu0 %v7601_v37  ;;  %v4665_v57 = vpop.f32.mrf.mxu2  ;;  %v4641_v60 = vpop.f32.mrf.mxu0  ;;  %v7631_v37 = vld [vmem:[%s9480_s1 + $0xb20] sm:$0xff] }
 0x147   :  { %4904 = vmatpush.bf16.msra.mxu1 %v7609_v38  ;;  %v4666_v58 = vadd.f32 %v4665_v57, %v4653_v52  ;;  %v4678_v59 = vpop.f32.mrf.mxu3  ;;  %v4654_v0 = vpop.f32.mrf.mxu1  ;;  %v7639_v38 = vld [vmem:[%s9480_s1 + $0xb60] sm:$0xff]  ;;  %v7629_v52 = vld [vmem:[%s9480_s1 + $0xb10] sm:$0xff]  ;;  %v7628_v57 = vld [vmem:[%s9480_s1 + $0xb08] sm:$0xff] }
 0x148   :  { %4917 = vmatpush.bf16.msra.mxu2 %v7617_v39  ;;  %v7652_v60 = vld [vmem:[%s9480_s1 + $0xbc8] sm:$0xff] }
 0x149   :  { %4930 = vmatpush.bf16.msra.mxu3 %v7625_v40  ;;  %v8910_v61 = vadd.f32 %v4678_v59, %v4666_v58  ;;  %v7647_v40 = vld [vmem:[%s9480_s1 + $0xba0] sm:$0xff]  ;;  %v7636_v58 = vld [vmem:[%s9480_s1 + $0xb48] sm:$0xff] }
 0x14a   :  { %4892 = vmatpush.bf16.msra.mxu0 %v7600_v41  ;;  %v7655_v41 = vld [vmem:[%s9480_s1 + $0xbe0] sm:$0xff]  ;;  %v7644_v59 = vld [vmem:[%s9480_s1 + $0xb88] sm:$0xff] }
 0x14b   :  { %4905 = vmatpush.bf16.msra.mxu1 %v7608_v42 }
 0x14c   :  { %4918 = vmatpush.bf16.msra.mxu2 %v7616_v43  ;;  %v7630_v43 = vld [vmem:[%s9480_s1 + $0xb18] sm:$0xff] }
 0x14d   :  { %4931 = vmatpush.bf16.msra.mxu3 %v7624_v44  ;;  %v7638_v44 = vld [vmem:[%s9480_s1 + $0xb58] sm:$0xff] }
 0x14e   :  { %4893 = vmatpush.bf16.msra.mxu0 %v7599_v47  ;;  %v4667_v9 = vpop.f32.mrf.mxu2 }
 0x14f   :  { %4906 = vmatpush.bf16.msra.mxu1 %v7607_v48  ;;  %v4680_v10 = vpop.f32.mrf.mxu3  ;;  %v7666_v9 = vld [vmem:[%s9480_s1 + $0xc38] sm:$0xff] }
 0x150   :  { %4919 = vmatpush.bf16.msra.mxu2 %v7615_v50  ;;  %v7674_v10 = vld [vmem:[%s9480_s1 + $0xc78] sm:$0xff] }
 0x151   :  { %4932 = vmatpush.bf16.msra.mxu3 %v7623_v51 }
 0x152   :  { %4894 = vmatpush.bf16.msra.mxu0 %v7598_v53  ;;  %v7637_v53 = vld [vmem:[%s9480_s1 + $0xb50] sm:$0xff] }
 0x153   :  { %4907 = vmatpush.bf16.msra.mxu1 %v7606_v54 }
 0x154   :  { %4920 = vmatpush.bf16.msra.mxu2 %v7614_v55  ;;  %v7645_v55 = vld [vmem:[%s9480_s1 + $0xb90] sm:$0xff] }
 0x155   :  { %4933 = vmatpush.bf16.msra.mxu3 %v7622_v56  ;;  %v7653_v56 = vld [vmem:[%s9480_s1 + $0xbd0] sm:$0xff] }
 0x156   :  { %4895 = vmatpush.bf16.msra.mxu0 %v7597_v62  ;;  %v37_v62 = vld [vmem:[%s9481_s0 + $0xb8] sm:$0xff] }
 0x157   :  { %4908 = vmatpush.bf16.msra.mxu1 %v7605_v63  ;;  %v1153_v8 = vunpack.c.h.b16 %v37_v62 }
 0x158   :  { %4921 = vmatpush.bf16.msra.mxu2 %v7613_v1  ;;  %v7627_v1 = vld [vmem:[%s9480_s1 + $0xb00] sm:$0xff] }
 0x159   :  { %4934 = vmatpush.bf16.msra.mxu3 %v7621_v2  ;;  %v7635_v2 = vld [vmem:[%s9480_s1 + $0xb40] sm:$0xff] }
 0x15a   :  { %4896 = vmatpush.bf16.msra.mxu0 %v7596_v3 }
 0x15b   :  { %4909 = vmatpush.bf16.msra.mxu1 %v7604_v4  ;;  %v1152_v4 = vunpack.c.l.b16 %v37_v62 }
 0x15c   :  { %4922 = vmatpush.bf16.msra.mxu2 %v7612_v5  ;;  %v7643_v5 = vld [vmem:[%s9480_s1 + $0xb80] sm:$0xff] }
 0x15d   :  { %4935 = vmatpush.bf16.msra.mxu3 %v7620_v6  ;;  %v7651_v6 = vld [vmem:[%s9480_s1 + $0xbc0] sm:$0xff]  ;;  %v1216_v14 = vpack.c.b16 %v1152_v4, %v1152_v4 }
 0x15e   :  { %4897 = vmatpush.bf16.msra.mxu0 %v7595_v11  ;;  %v4691_v35 = vpop.f32.mrf.mxu0  ;;  %v7682_v11 = vld [vmem:[%s9480_s1 + $0xcb8] sm:$0xff] }
 0x15f   :  { %4910 = vmatpush.bf16.msra.mxu1 %v7603_v12  ;;  %v4692_v36 = vadd.f32 %v4691_v35, %v8910_v61  ;;  %v4704_v39 = vpop.f32.mrf.mxu1  ;;  %v36_v61 = vld [vmem:[%s9481_s0 + $0xb0] sm:$0xff]  ;;  %v7690_v12 = vld [vmem:[%s9480_s1 + $0xcf8] sm:$0xff] }
 0x160   :  { %4923 = vmatpush.bf16.msra.mxu2 %v7611_v15  ;;  %v1150_v3 = vunpack.c.l.b16 %v36_v61  ;;  %v1151_v7 = vunpack.c.h.b16 %v36_v61  ;;  %v7678_v35 = vld [vmem:[%s9480_s1 + $0xc98] sm:$0xff] }
 0x161   :  { %4936 = vmatpush.bf16.msra.mxu3 %v7619_v16  ;;  %4898 = vmatmul.bf16.vlgmr.msra.gmra.mxu0 %v1210_v23  ;;  %v4705_v42 = vadd.f32 %v4704_v39, %v4692_v36  ;;  %v1217_v16 = vpack.c.b16 %v1153_v8, %v1153_v8  ;;  %v7680_v23 = vld [vmem:[%s9480_s1 + $0xca8] sm:$0xff]  ;;  %v7686_v36 = vld [vmem:[%s9480_s1 + $0xcd8] sm:$0xff]  ;;  %v7705_v8 = vld [vmem:[%s9480_s1 + $0xd70] sm:$0xff] }
 0x162   :  { %4942 = vmatpush.bf16.msrb.mxu0 %v7634_v19  ;;  %4911 = vmatmul.bf16.vlgmr.msra.gmra.mxu1 %v1211_v25  ;;  %v1214_v13 = vpack.c.b16 %v1150_v3, %v1150_v3  ;;  %v1215_v15 = vpack.c.b16 %v1151_v7, %v1151_v7  ;;  %v7681_v19 = vld [vmem:[%s9480_s1 + $0xcb0] sm:$0xff] }
 0x163   :  { %4955 = vmatpush.bf16.msrb.mxu1 %v7642_v20  ;;  %4924 = vmatmul.bf16.vlgmr.msra.gmra.mxu2 %v1212_v24  ;;  %v7689_v20 = vld [vmem:[%s9480_s1 + $0xcf0] sm:$0xff]  ;;  %v7688_v24 = vld [vmem:[%s9480_s1 + $0xce8] sm:$0xff] }
 0x164   :  { %4968 = vmatpush.bf16.msrb.mxu2 %v7650_v21  ;;  %4937 = vmatmul.bf16.vlgmr.msra.gmra.mxu3 %v1213_v26  ;;  %v7664_v21 = vld [vmem:[%s9480_s1 + $0xc28] sm:$0xff]  ;;  %v7697_v7 = vld [vmem:[%s9480_s1 + $0xd30] sm:$0xff] }
 0x165   :  { %4981 = vmatpush.bf16.msrb.mxu3 %v7658_v22  ;;  %v7672_v22 = vld [vmem:[%s9480_s1 + $0xc68] sm:$0xff] }
 0x166   :  { %4943 = vmatpush.bf16.msrb.mxu0 %v7633_v27  ;;  %v4717_v47 = vpop.f32.mrf.mxu2  ;;  %v4693_v50 = vpop.f32.mrf.mxu0  ;;  %v7663_v27 = vld [vmem:[%s9480_s1 + $0xc20] sm:$0xff] }
 0x167   :  { %4956 = vmatpush.bf16.msrb.mxu1 %v7641_v28  ;;  %v4718_v48 = vadd.f32 %v4717_v47, %v4705_v42  ;;  %v4730_v49 = vpop.f32.mrf.mxu3  ;;  %v4706_v54 = vpop.f32.mrf.mxu1  ;;  %v7671_v28 = vld [vmem:[%s9480_s1 + $0xc60] sm:$0xff]  ;;  %v7661_v42 = vld [vmem:[%s9480_s1 + $0xc10] sm:$0xff]  ;;  %v7660_v47 = vld [vmem:[%s9480_s1 + $0xc08] sm:$0xff] }
 0x168   :  { %4969 = vmatpush.bf16.msrb.mxu2 %v7649_v29  ;;  %v7684_v50 = vld [vmem:[%s9480_s1 + $0xcc8] sm:$0xff] }
 0x169   :  { %4982 = vmatpush.bf16.msrb.mxu3 %v7657_v30  ;;  %v9015_v51 = vadd.f32 %v4730_v49, %v4718_v48  ;;  %v7679_v30 = vld [vmem:[%s9480_s1 + $0xca0] sm:$0xff]  ;;  %v7668_v48 = vld [vmem:[%s9480_s1 + $0xc48] sm:$0xff] }
 0x16a   :  { %4944 = vmatpush.bf16.msrb.mxu0 %v7632_v31  ;;  %v7687_v31 = vld [vmem:[%s9480_s1 + $0xce0] sm:$0xff]  ;;  %v7676_v49 = vld [vmem:[%s9480_s1 + $0xc88] sm:$0xff] }
 0x16b   :  { %4957 = vmatpush.bf16.msrb.mxu1 %v7640_v32 }
 0x16c   :  { %4970 = vmatpush.bf16.msrb.mxu2 %v7648_v33  ;;  %v7662_v33 = vld [vmem:[%s9480_s1 + $0xc18] sm:$0xff] }
 0x16d   :  { %4983 = vmatpush.bf16.msrb.mxu3 %v7656_v34  ;;  %v7670_v34 = vld [vmem:[%s9480_s1 + $0xc58] sm:$0xff] }
 0x16e   :  { %4945 = vmatpush.bf16.msrb.mxu0 %v7631_v37  ;;  %v4719_v63 = vpop.f32.mrf.mxu2 }
 0x16f   :  { %4958 = vmatpush.bf16.msrb.mxu1 %v7639_v38  ;;  %v4732_v0 = vpop.f32.mrf.mxu3  ;;  %v7698_v63 = vld [vmem:[%s9480_s1 + $0xd38] sm:$0xff] }
 0x170   :  { %4971 = vmatpush.bf16.msrb.mxu2 %v7647_v40  ;;  %v7706_v0 = vld [vmem:[%s9480_s1 + $0xd78] sm:$0xff] }
 0x171   :  { %4984 = vmatpush.bf16.msrb.mxu3 %v7655_v41 }
 0x172   :  { %4946 = vmatpush.bf16.msrb.mxu0 %v7630_v43  ;;  %v7669_v43 = vld [vmem:[%s9480_s1 + $0xc50] sm:$0xff] }
 0x173   :  { %4959 = vmatpush.bf16.msrb.mxu1 %v7638_v44 }
 0x174   :  { %4972 = vmatpush.bf16.msrb.mxu2 %v7646_v45  ;;  %v7677_v45 = vld [vmem:[%s9480_s1 + $0xc90] sm:$0xff] }
 0x175   :  { %4985 = vmatpush.bf16.msrb.mxu3 %v7654_v46  ;;  %v7685_v46 = vld [vmem:[%s9480_s1 + $0xcd0] sm:$0xff] }
 0x176   :  { %4947 = vmatpush.bf16.msrb.mxu0 %v7629_v52  ;;  %v39_v52 = vld [vmem:[%s9481_s0 + $0xc8] sm:$0xff] }
 0x177   :  { %4960 = vmatpush.bf16.msrb.mxu1 %v7637_v53  ;;  %v1157_v62 = vunpack.c.h.b16 %v39_v52 }
 0x178   :  { %4973 = vmatpush.bf16.msrb.mxu2 %v7645_v55  ;;  %v7659_v55 = vld [vmem:[%s9480_s1 + $0xc00] sm:$0xff] }
 0x179   :  { %4986 = vmatpush.bf16.msrb.mxu3 %v7653_v56  ;;  %v7667_v56 = vld [vmem:[%s9480_s1 + $0xc40] sm:$0xff] }
 0x17a   :  { %4948 = vmatpush.bf16.msrb.mxu0 %v7628_v57 }
 0x17b   :  { %4961 = vmatpush.bf16.msrb.mxu1 %v7636_v58  ;;  %v1156_v58 = vunpack.c.l.b16 %v39_v52 }
 0x17c   :  { %4974 = vmatpush.bf16.msrb.mxu2 %v7644_v59  ;;  %v7675_v59 = vld [vmem:[%s9480_s1 + $0xc80] sm:$0xff] }
 0x17d   :  { %4987 = vmatpush.bf16.msrb.mxu3 %v7652_v60  ;;  %v7683_v60 = vld [vmem:[%s9480_s1 + $0xcc0] sm:$0xff]  ;;  %v1220_v4 = vpack.c.b16 %v1156_v58, %v1156_v58 }
 0x17e   :  { %4949 = vmatpush.bf16.msrb.mxu0 %v7627_v1  ;;  %v4743_v25 = vpop.f32.mrf.mxu0  ;;  %v7714_v1 = vld [vmem:[%s9480_s1 + $0xdb8] sm:$0xff] }
 0x17f   :  { %4962 = vmatpush.bf16.msrb.mxu1 %v7635_v2  ;;  %v4744_v26 = vadd.f32 %v4743_v25, %v9015_v51  ;;  %v4756_v29 = vpop.f32.mrf.mxu1  ;;  %v38_v51 = vld [vmem:[%s9481_s0 + $0xc0] sm:$0xff]  ;;  %v7722_v2 = vld [vmem:[%s9480_s1 + $0xdf8] sm:$0xff] }
 0x180   :  { %4975 = vmatpush.bf16.msrb.mxu2 %v7643_v5  ;;  %v1154_v57 = vunpack.c.l.b16 %v38_v51  ;;  %v1155_v61 = vunpack.c.h.b16 %v38_v51  ;;  %v7710_v25 = vld [vmem:[%s9480_s1 + $0xd98] sm:$0xff] }
 0x181   :  { %4988 = vmatpush.bf16.msrb.mxu3 %v7651_v6  ;;  %4950 = vmatmul.bf16.vlgmr.msrb.gmra.mxu0 %v1214_v13  ;;  %v4757_v32 = vadd.f32 %v4756_v29, %v4744_v26  ;;  %v1221_v6 = vpack.c.b16 %v1157_v62, %v1157_v62  ;;  %v7712_v13 = vld [vmem:[%s9480_s1 + $0xda8] sm:$0xff]  ;;  %v7718_v26 = vld [vmem:[%s9480_s1 + $0xdd8] sm:$0xff]  ;;  %v7737_v62 = vld [vmem:[%s9480_s1 + $0xe70] sm:$0xff] }
 0x182   :  { %4994 = vmatpush.bf16.msra.mxu0 %v7666_v9  ;;  %4963 = vmatmul.bf16.vlgmr.msrb.gmra.mxu1 %v1215_v15  ;;  %v1218_v3 = vpack.c.b16 %v1154_v57, %v1154_v57  ;;  %v1219_v5 = vpack.c.b16 %v1155_v61, %v1155_v61  ;;  %v7713_v9 = vld [vmem:[%s9480_s1 + $0xdb0] sm:$0xff] }
 0x183   :  { %5007 = vmatpush.bf16.msra.mxu1 %v7674_v10  ;;  %4976 = vmatmul.bf16.vlgmr.msrb.gmra.mxu2 %v1216_v14  ;;  %v7721_v10 = vld [vmem:[%s9480_s1 + $0xdf0] sm:$0xff]  ;;  %v7720_v14 = vld [vmem:[%s9480_s1 + $0xde8] sm:$0xff] }
 0x184   :  { %5020 = vmatpush.bf16.msra.mxu2 %v7682_v11  ;;  %4989 = vmatmul.bf16.vlgmr.msrb.gmra.mxu3 %v1217_v16  ;;  %v7696_v11 = vld [vmem:[%s9480_s1 + $0xd28] sm:$0xff]  ;;  %v7729_v61 = vld [vmem:[%s9480_s1 + $0xe30] sm:$0xff] }
 0x185   :  { %5033 = vmatpush.bf16.msra.mxu3 %v7690_v12  ;;  %v7704_v12 = vld [vmem:[%s9480_s1 + $0xd68] sm:$0xff] }
 0x186   :  { %4995 = vmatpush.bf16.msra.mxu0 %v7665_v17  ;;  %v4769_v37 = vpop.f32.mrf.mxu2  ;;  %v4745_v40 = vpop.f32.mrf.mxu0  ;;  %v7695_v17 = vld [vmem:[%s9480_s1 + $0xd20] sm:$0xff] }
 0x187   :  { %5008 = vmatpush.bf16.msra.mxu1 %v7673_v18  ;;  %v4770_v38 = vadd.f32 %v4769_v37, %v4757_v32  ;;  %v4782_v39 = vpop.f32.mrf.mxu3  ;;  %v4758_v44 = vpop.f32.mrf.mxu1  ;;  %v7703_v18 = vld [vmem:[%s9480_s1 + $0xd60] sm:$0xff]  ;;  %v7693_v32 = vld [vmem:[%s9480_s1 + $0xd10] sm:$0xff]  ;;  %v7692_v37 = vld [vmem:[%s9480_s1 + $0xd08] sm:$0xff] }
 0x188   :  { %5021 = vmatpush.bf16.msra.mxu2 %v7681_v19  ;;  %v7716_v40 = vld [vmem:[%s9480_s1 + $0xdc8] sm:$0xff] }
 0x189   :  { %5034 = vmatpush.bf16.msra.mxu3 %v7689_v20  ;;  %v9120_v41 = vadd.f32 %v4782_v39, %v4770_v38  ;;  %v7711_v20 = vld [vmem:[%s9480_s1 + $0xda0] sm:$0xff]  ;;  %v7700_v38 = vld [vmem:[%s9480_s1 + $0xd48] sm:$0xff] }
 0x18a   :  { %4996 = vmatpush.bf16.msra.mxu0 %v7664_v21  ;;  %v7719_v21 = vld [vmem:[%s9480_s1 + $0xde0] sm:$0xff]  ;;  %v7708_v39 = vld [vmem:[%s9480_s1 + $0xd88] sm:$0xff] }
 0x18b   :  { %5009 = vmatpush.bf16.msra.mxu1 %v7672_v22 }
 0x18c   :  { %5022 = vmatpush.bf16.msra.mxu2 %v7680_v23  ;;  %v7694_v23 = vld [vmem:[%s9480_s1 + $0xd18] sm:$0xff] }
 0x18d   :  { %5035 = vmatpush.bf16.msra.mxu3 %v7688_v24  ;;  %v7702_v24 = vld [vmem:[%s9480_s1 + $0xd58] sm:$0xff] }
 0x18e   :  { %4997 = vmatpush.bf16.msra.mxu0 %v7663_v27  ;;  %v4771_v53 = vpop.f32.mrf.mxu2 }
 0x18f   :  { %5010 = vmatpush.bf16.msra.mxu1 %v7671_v28  ;;  %v4784_v54 = vpop.f32.mrf.mxu3  ;;  %v7730_v53 = vld [vmem:[%s9480_s1 + $0xe38] sm:$0xff] }
 0x190   :  { %5023 = vmatpush.bf16.msra.mxu2 %v7679_v30  ;;  %v7738_v54 = vld [vmem:[%s9480_s1 + $0xe78] sm:$0xff] }
 0x191   :  { %5036 = vmatpush.bf16.msra.mxu3 %v7687_v31 }
 0x192   :  { %4998 = vmatpush.bf16.msra.mxu0 %v7662_v33  ;;  %v7701_v33 = vld [vmem:[%s9480_s1 + $0xd50] sm:$0xff] }
 0x193   :  { %5011 = vmatpush.bf16.msra.mxu1 %v7670_v34 }
 0x194   :  { %5024 = vmatpush.bf16.msra.mxu2 %v7678_v35  ;;  %v7709_v35 = vld [vmem:[%s9480_s1 + $0xd90] sm:$0xff] }
 0x195   :  { %5037 = vmatpush.bf16.msra.mxu3 %v7686_v36  ;;  %v7717_v36 = vld [vmem:[%s9480_s1 + $0xdd0] sm:$0xff] }
 0x196   :  { %4999 = vmatpush.bf16.msra.mxu0 %v7661_v42  ;;  %v41_v42 = vld [vmem:[%s9481_s0 + $0xd8] sm:$0xff] }
 0x197   :  { %5012 = vmatpush.bf16.msra.mxu1 %v7669_v43  ;;  %v1161_v52 = vunpack.c.h.b16 %v41_v42 }
 0x198   :  { %5025 = vmatpush.bf16.msra.mxu2 %v7677_v45  ;;  %v7691_v45 = vld [vmem:[%s9480_s1 + $0xd00] sm:$0xff] }
 0x199   :  { %5038 = vmatpush.bf16.msra.mxu3 %v7685_v46  ;;  %v7699_v46 = vld [vmem:[%s9480_s1 + $0xd40] sm:$0xff] }
 0x19a   :  { %5000 = vmatpush.bf16.msra.mxu0 %v7660_v47 }
 0x19b   :  { %5013 = vmatpush.bf16.msra.mxu1 %v7668_v48  ;;  %v1160_v48 = vunpack.c.l.b16 %v41_v42 }
 0x19c   :  { %5026 = vmatpush.bf16.msra.mxu2 %v7676_v49  ;;  %v7707_v49 = vld [vmem:[%s9480_s1 + $0xd80] sm:$0xff] }
 0x19d   :  { %5039 = vmatpush.bf16.msra.mxu3 %v7684_v50  ;;  %v7715_v50 = vld [vmem:[%s9480_s1 + $0xdc0] sm:$0xff]  ;;  %v1224_v58 = vpack.c.b16 %v1160_v48, %v1160_v48 }
 0x19e   :  { %5001 = vmatpush.bf16.msra.mxu0 %v7659_v55  ;;  %v4795_v15 = vpop.f32.mrf.mxu0  ;;  %v7746_v55 = vld [vmem:[%s9480_s1 + $0xeb8] sm:$0xff] }
 0x19f   :  { %5014 = vmatpush.bf16.msra.mxu1 %v7667_v56  ;;  %v4796_v16 = vadd.f32 %v4795_v15, %v9120_v41  ;;  %v4808_v19 = vpop.f32.mrf.mxu1  ;;  %v40_v41 = vld [vmem:[%s9481_s0 + $0xd0] sm:$0xff]  ;;  %v7754_v56 = vld [vmem:[%s9480_s1 + $0xef8] sm:$0xff] }
 0x1a0   :  { %5027 = vmatpush.bf16.msra.mxu2 %v7675_v59  ;;  %v1158_v47 = vunpack.c.l.b16 %v40_v41  ;;  %v1159_v51 = vunpack.c.h.b16 %v40_v41  ;;  %v7742_v15 = vld [vmem:[%s9480_s1 + $0xe98] sm:$0xff] }
 0x1a1   :  { %5040 = vmatpush.bf16.msra.mxu3 %v7683_v60  ;;  %5002 = vmatmul.bf16.vlgmr.msra.gmra.mxu0 %v1218_v3  ;;  %v4809_v22 = vadd.f32 %v4808_v19, %v4796_v16  ;;  %v1225_v60 = vpack.c.b16 %v1161_v52, %v1161_v52  ;;  %v7744_v3 = vld [vmem:[%s9480_s1 + $0xea8] sm:$0xff]  ;;  %v7750_v16 = vld [vmem:[%s9480_s1 + $0xed8] sm:$0xff]  ;;  %v7769_v52 = vld [vmem:[%s9480_s1 + $0xf70] sm:$0xff] }
 0x1a2   :  { %5046 = vmatpush.bf16.msrb.mxu0 %v7698_v63  ;;  %5015 = vmatmul.bf16.vlgmr.msra.gmra.mxu1 %v1219_v5  ;;  %v1222_v57 = vpack.c.b16 %v1158_v47, %v1158_v47  ;;  %v1223_v59 = vpack.c.b16 %v1159_v51, %v1159_v51  ;;  %v7745_v63 = vld [vmem:[%s9480_s1 + $0xeb0] sm:$0xff] }
 0x1a3   :  { %5059 = vmatpush.bf16.msrb.mxu1 %v7706_v0  ;;  %5028 = vmatmul.bf16.vlgmr.msra.gmra.mxu2 %v1220_v4  ;;  %v7753_v0 = vld [vmem:[%s9480_s1 + $0xef0] sm:$0xff]  ;;  %v7752_v4 = vld [vmem:[%s9480_s1 + $0xee8] sm:$0xff] }
 0x1a4   :  { %5072 = vmatpush.bf16.msrb.mxu2 %v7714_v1  ;;  %5041 = vmatmul.bf16.vlgmr.msra.gmra.mxu3 %v1221_v6  ;;  %v7728_v1 = vld [vmem:[%s9480_s1 + $0xe28] sm:$0xff]  ;;  %v7761_v51 = vld [vmem:[%s9480_s1 + $0xf30] sm:$0xff] }
 0x1a5   :  { %5085 = vmatpush.bf16.msrb.mxu3 %v7722_v2  ;;  %v7736_v2 = vld [vmem:[%s9480_s1 + $0xe68] sm:$0xff] }
 0x1a6   :  { %5047 = vmatpush.bf16.msrb.mxu0 %v7697_v7  ;;  %v4821_v27 = vpop.f32.mrf.mxu2  ;;  %v4797_v30 = vpop.f32.mrf.mxu0  ;;  %v7727_v7 = vld [vmem:[%s9480_s1 + $0xe20] sm:$0xff] }
 0x1a7   :  { %5060 = vmatpush.bf16.msrb.mxu1 %v7705_v8  ;;  %v4822_v28 = vadd.f32 %v4821_v27, %v4809_v22  ;;  %v4834_v29 = vpop.f32.mrf.mxu3  ;;  %v4810_v34 = vpop.f32.mrf.mxu1  ;;  %v7735_v8 = vld [vmem:[%s9480_s1 + $0xe60] sm:$0xff]  ;;  %v7725_v22 = vld [vmem:[%s9480_s1 + $0xe10] sm:$0xff]  ;;  %v7724_v27 = vld [vmem:[%s9480_s1 + $0xe08] sm:$0xff] }
 0x1a8   :  { %5073 = vmatpush.bf16.msrb.mxu2 %v7713_v9  ;;  %v7748_v30 = vld [vmem:[%s9480_s1 + $0xec8] sm:$0xff] }
 0x1a9   :  { %5086 = vmatpush.bf16.msrb.mxu3 %v7721_v10  ;;  %v9225_v31 = vadd.f32 %v4834_v29, %v4822_v28  ;;  %v7743_v10 = vld [vmem:[%s9480_s1 + $0xea0] sm:$0xff]  ;;  %v7732_v28 = vld [vmem:[%s9480_s1 + $0xe48] sm:$0xff] }
 0x1aa   :  { %5048 = vmatpush.bf16.msrb.mxu0 %v7696_v11  ;;  %v7751_v11 = vld [vmem:[%s9480_s1 + $0xee0] sm:$0xff]  ;;  %v7740_v29 = vld [vmem:[%s9480_s1 + $0xe88] sm:$0xff] }
 0x1ab   :  { %5061 = vmatpush.bf16.msrb.mxu1 %v7704_v12 }
 0x1ac   :  { %5074 = vmatpush.bf16.msrb.mxu2 %v7712_v13  ;;  %v7726_v13 = vld [vmem:[%s9480_s1 + $0xe18] sm:$0xff] }
 0x1ad   :  { %5087 = vmatpush.bf16.msrb.mxu3 %v7720_v14  ;;  %v7734_v14 = vld [vmem:[%s9480_s1 + $0xe58] sm:$0xff] }
 0x1ae   :  { %5049 = vmatpush.bf16.msrb.mxu0 %v7695_v17  ;;  %v4823_v43 = vpop.f32.mrf.mxu2 }
 0x1af   :  { %5062 = vmatpush.bf16.msrb.mxu1 %v7703_v18  ;;  %v4836_v44 = vpop.f32.mrf.mxu3  ;;  %v7762_v43 = vld [vmem:[%s9480_s1 + $0xf38] sm:$0xff] }
 0x1b0   :  { %5075 = vmatpush.bf16.msrb.mxu2 %v7711_v20  ;;  %v7770_v44 = vld [vmem:[%s9480_s1 + $0xf78] sm:$0xff] }
 0x1b1   :  { %5088 = vmatpush.bf16.msrb.mxu3 %v7719_v21 }
 0x1b2   :  { %5050 = vmatpush.bf16.msrb.mxu0 %v7694_v23  ;;  %v7733_v23 = vld [vmem:[%s9480_s1 + $0xe50] sm:$0xff] }
 0x1b3   :  { %5063 = vmatpush.bf16.msrb.mxu1 %v7702_v24 }
 0x1b4   :  { %5076 = vmatpush.bf16.msrb.mxu2 %v7710_v25  ;;  %v7741_v25 = vld [vmem:[%s9480_s1 + $0xe90] sm:$0xff] }
 0x1b5   :  { %5089 = vmatpush.bf16.msrb.mxu3 %v7718_v26  ;;  %v7749_v26 = vld [vmem:[%s9480_s1 + $0xed0] sm:$0xff] }
 0x1b6   :  { %5051 = vmatpush.bf16.msrb.mxu0 %v7693_v32  ;;  %v43_v32 = vld [vmem:[%s9481_s0 + $0xe8] sm:$0xff] }
 0x1b7   :  { %5064 = vmatpush.bf16.msrb.mxu1 %v7701_v33  ;;  %v1165_v42 = vunpack.c.h.b16 %v43_v32 }
 0x1b8   :  { %5077 = vmatpush.bf16.msrb.mxu2 %v7709_v35  ;;  %v7723_v35 = vld [vmem:[%s9480_s1 + $0xe00] sm:$0xff] }
 0x1b9   :  { %5090 = vmatpush.bf16.msrb.mxu3 %v7717_v36  ;;  %v7731_v36 = vld [vmem:[%s9480_s1 + $0xe40] sm:$0xff] }
 0x1ba   :  { %5052 = vmatpush.bf16.msrb.mxu0 %v7692_v37 }
 0x1bb   :  { %5065 = vmatpush.bf16.msrb.mxu1 %v7700_v38  ;;  %v1164_v38 = vunpack.c.l.b16 %v43_v32  ;;  %v7779_v32 = vld [vmem:[%s9480_s1 + $0xfc0] sm:$0xff] }
 0x1bc   :  { %5078 = vmatpush.bf16.msrb.mxu2 %v7708_v39  ;;  %v7739_v39 = vld [vmem:[%s9480_s1 + $0xe80] sm:$0xff] }
 0x1bd   :  { %5091 = vmatpush.bf16.msrb.mxu3 %v7716_v40  ;;  %v7747_v40 = vld [vmem:[%s9480_s1 + $0xec0] sm:$0xff]  ;;  %v1228_v48 = vpack.c.b16 %v1164_v38, %v1164_v38 }
 0x1be   :  { %5053 = vmatpush.bf16.msrb.mxu0 %v7691_v45  ;;  %v4847_v5 = vpop.f32.mrf.mxu0  ;;  %v7778_v45 = vld [vmem:[%s9480_s1 + $0xfb8] sm:$0xff] }
 0x1bf   :  { %5066 = vmatpush.bf16.msrb.mxu1 %v7699_v46  ;;  %v4848_v6 = vadd.f32 %v4847_v5, %v9225_v31  ;;  %v4860_v9 = vpop.f32.mrf.mxu1  ;;  %v42_v31 = vld [vmem:[%s9481_s0 + $0xe0] sm:$0xff]  ;;  %v7786_v46 = vld [vmem:[%s9480_s1 + $0xff8] sm:$0xff] }
 0x1c0   :  { %5079 = vmatpush.bf16.msrb.mxu2 %v7707_v49  ;;  %v1162_v37 = vunpack.c.l.b16 %v42_v31  ;;  %v1163_v41 = vunpack.c.h.b16 %v42_v31  ;;  %v7774_v5 = vld [vmem:[%s9480_s1 + $0xf98] sm:$0xff]  ;;  %v7771_v31 = vld [vmem:[%s9480_s1 + $0xf80] sm:$0xff] }
 0x1c1   :  { %5092 = vmatpush.bf16.msrb.mxu3 %v7715_v50  ;;  %5054 = vmatmul.bf16.vlgmr.msrb.gmra.mxu0 %v1222_v57  ;;  %v4861_v12 = vadd.f32 %v4860_v9, %v4848_v6  ;;  %v1229_v50 = vpack.c.b16 %v1165_v42, %v1165_v42  ;;  %v7776_v57 = vld [vmem:[%s9480_s1 + $0xfa8] sm:$0xff]  ;;  %v7782_v6 = vld [vmem:[%s9480_s1 + $0xfd8] sm:$0xff] }
 0x1c2   :  { %5098 = vmatpush.bf16.msra.mxu0 %v7730_v53  ;;  %5067 = vmatmul.bf16.vlgmr.msrb.gmra.mxu1 %v1223_v59  ;;  %v1226_v47 = vpack.c.b16 %v1162_v37, %v1162_v37  ;;  %v1227_v49 = vpack.c.b16 %v1163_v41, %v1163_v41  ;;  %v7777_v53 = vld [vmem:[%s9480_s1 + $0xfb0] sm:$0xff] }
 0x1c3   :  { %5111 = vmatpush.bf16.msra.mxu1 %v7738_v54  ;;  %5080 = vmatmul.bf16.vlgmr.msrb.gmra.mxu2 %v1224_v58  ;;  %v7785_v54 = vld [vmem:[%s9480_s1 + $0xff0] sm:$0xff]  ;;  %v7784_v58 = vld [vmem:[%s9480_s1 + $0xfe8] sm:$0xff] }
 0x1c4   :  { %5124 = vmatpush.bf16.msra.mxu2 %v7746_v55  ;;  %5093 = vmatmul.bf16.vlgmr.msrb.gmra.mxu3 %v1225_v60  ;;  %v7760_v55 = vld [vmem:[%s9480_s1 + $0xf28] sm:$0xff] }
 0x1c5   :  { %5137 = vmatpush.bf16.msra.mxu3 %v7754_v56  ;;  %v7768_v56 = vld [vmem:[%s9480_s1 + $0xf68] sm:$0xff] }
 0x1c6   :  { %5099 = vmatpush.bf16.msra.mxu0 %v7729_v61  ;;  %v4873_v17 = vpop.f32.mrf.mxu2  ;;  %v4849_v20 = vpop.f32.mrf.mxu0  ;;  %v7759_v61 = vld [vmem:[%s9480_s1 + $0xf20] sm:$0xff] }
 0x1c7   :  { %5112 = vmatpush.bf16.msra.mxu1 %v7737_v62  ;;  %v4874_v18 = vadd.f32 %v4873_v17, %v4861_v12  ;;  %v4886_v19 = vpop.f32.mrf.mxu3  ;;  %v4862_v24 = vpop.f32.mrf.mxu1  ;;  %v7767_v62 = vld [vmem:[%s9480_s1 + $0xf60] sm:$0xff]  ;;  %v7757_v12 = vld [vmem:[%s9480_s1 + $0xf10] sm:$0xff]  ;;  %v7756_v17 = vld [vmem:[%s9480_s1 + $0xf08] sm:$0xff] }
 0x1c8   :  { %5125 = vmatpush.bf16.msra.mxu2 %v7745_v63  ;;  %v7772_v20 = vld [vmem:[%s9480_s1 + $0xf88] sm:$0xff] }
 0x1c9   :  { %5138 = vmatpush.bf16.msra.mxu3 %v7753_v0  ;;  %v9330_v21 = vadd.f32 %v4886_v19, %v4874_v18  ;;  %v7775_v0 = vld [vmem:[%s9480_s1 + $0xfa0] sm:$0xff]  ;;  %v7764_v18 = vld [vmem:[%s9480_s1 + $0xf48] sm:$0xff]  ;;  %v44_v19 = vld [vmem:[%s9481_s0 + $0xf0] sm:$0xff] }
 0x1ca   :  { %5100 = vmatpush.bf16.msra.mxu0 %v7728_v1  ;;  %v7783_v1 = vld [vmem:[%s9480_s1 + $0xfe0] sm:$0xff] }
 0x1cb   :  { %5113 = vmatpush.bf16.msra.mxu1 %v7736_v2 }
 0x1cc   :  { %5126 = vmatpush.bf16.msra.mxu2 %v7744_v3  ;;  %v7758_v3 = vld [vmem:[%s9480_s1 + $0xf18] sm:$0xff] }
 0x1cd   :  { %5139 = vmatpush.bf16.msra.mxu3 %v7752_v4  ;;  %v7766_v4 = vld [vmem:[%s9480_s1 + $0xf58] sm:$0xff] }
 0x1ce   :  { %5101 = vmatpush.bf16.msra.mxu0 %v7727_v7  ;;  %v4875_v33 = vpop.f32.mrf.mxu2 }
 0x1cf   :  { %5114 = vmatpush.bf16.msra.mxu1 %v7735_v8  ;;  %v4888_v34 = vpop.f32.mrf.mxu3 }
 0x1d0   :  { %5127 = vmatpush.bf16.msra.mxu2 %v7743_v10 }
 0x1d1   :  { %5140 = vmatpush.bf16.msra.mxu3 %v7751_v11 }
 0x1d2   :  { %5102 = vmatpush.bf16.msra.mxu0 %v7726_v13  ;;  %v7765_v13 = vld [vmem:[%s9480_s1 + $0xf50] sm:$0xff] }
 0x1d3   :  { %5115 = vmatpush.bf16.msra.mxu1 %v7734_v14 }
 0x1d4   :  { %5128 = vmatpush.bf16.msra.mxu2 %v7742_v15  ;;  %v7773_v15 = vld [vmem:[%s9480_s1 + $0xf90] sm:$0xff] }
 0x1d5   :  { %5141 = vmatpush.bf16.msra.mxu3 %v7750_v16  ;;  %v7781_v16 = vld [vmem:[%s9480_s1 + $0xfd0] sm:$0xff] }
 0x1d6   :  { %5103 = vmatpush.bf16.msra.mxu0 %v7725_v22  ;;  %v45_v22 = vld [vmem:[%s9481_s0 + $0xf8] sm:$0xff] }
 0x1d7   :  { %5116 = vmatpush.bf16.msra.mxu1 %v7733_v23 }
 0x1d8   :  { %5129 = vmatpush.bf16.msra.mxu2 %v7741_v25  ;;  %v1166_v25 = vunpack.c.l.b16 %v44_v19 }
 0x1d9   :  { %5142 = vmatpush.bf16.msra.mxu3 %v7749_v26  ;;  %v1167_v26 = vunpack.c.h.b16 %v44_v19 }
 0x1da   :  { %5104 = vmatpush.bf16.msra.mxu0 %v7724_v27  ;;  %v7755_v27 = vld [vmem:[%s9480_s1 + $0xf00] sm:$0xff]  ;;  %v1230_v33 = vpack.c.b16 %v1166_v25, %v1166_v25 }
 0x1db   :  { %5117 = vmatpush.bf16.msra.mxu1 %v7732_v28  ;;  %v7763_v28 = vld [vmem:[%s9480_s1 + $0xf40] sm:$0xff]  ;;  %v1231_v34 = vpack.c.b16 %v1167_v26, %v1167_v26 }
 0x1dc   :  { %5130 = vmatpush.bf16.msra.mxu2 %v7740_v29  ;;  %v1168_v29 = vunpack.c.l.b16 %v45_v22 }
 0x1dd   :  { %5143 = vmatpush.bf16.msra.mxu3 %v7748_v30  ;;  %v1169_v30 = vunpack.c.h.b16 %v45_v22 }
 0x1de   :  { %5105 = vmatpush.bf16.msra.mxu0 %v7723_v35  ;;  %v4899_v59 = vpop.f32.mrf.mxu0  ;;  %v1232_v35 = vpack.c.b16 %v1168_v29, %v1168_v29 }
 0x1df   :  { %5118 = vmatpush.bf16.msra.mxu1 %v7731_v36  ;;  %v4900_v60 = vadd.f32 %v4899_v59, %v9330_v21  ;;  %v4912_v63 = vpop.f32.mrf.mxu1  ;;  %v7780_v21 = vld [vmem:[%s9480_s1 + $0xfc8] sm:$0xff]  ;;  %v1233_v36 = vpack.c.b16 %v1169_v30, %v1169_v30 }
 0x1e0   :  { %5131 = vmatpush.bf16.msra.mxu2 %v7739_v39 }
 0x1e1   :  { %5144 = vmatpush.bf16.msra.mxu3 %v7747_v40  ;;  %5106 = vmatmul.bf16.vlgmr.msra.gmra.mxu0 %v1226_v47  ;;  %v4913_v2 = vadd.f32 %v4912_v63, %v4900_v60 }
 0x1e2   :  { %5150 = vmatpush.bf16.msrb.mxu0 %v7762_v43  ;;  %5119 = vmatmul.bf16.vlgmr.msra.gmra.mxu1 %v1227_v49 }
 0x1e3   :  { %5163 = vmatpush.bf16.msrb.mxu1 %v7770_v44  ;;  %5132 = vmatmul.bf16.vlgmr.msra.gmra.mxu2 %v1228_v48 }
 0x1e4   :  { %5176 = vmatpush.bf16.msrb.mxu2 %v7778_v45  ;;  %5145 = vmatmul.bf16.vlgmr.msra.gmra.mxu3 %v1229_v50 }
 0x1e5   :  { %5189 = vmatpush.bf16.msrb.mxu3 %v7786_v46 }
 0x1e6   :  { %5151 = vmatpush.bf16.msrb.mxu0 %v7761_v51  ;;  %v4925_v7 = vpop.f32.mrf.mxu2  ;;  %v4901_v10 = vpop.f32.mrf.mxu0 }
 0x1e7   :  { %5164 = vmatpush.bf16.msrb.mxu1 %v7769_v52  ;;  %v4926_v8 = vadd.f32 %v4925_v7, %v4913_v2  ;;  %v4938_v9 = vpop.f32.mrf.mxu3  ;;  %v4914_v14 = vpop.f32.mrf.mxu1 }
 0x1e8   :  { %5177 = vmatpush.bf16.msrb.mxu2 %v7777_v53 }
 0x1e9   :  { %5190 = vmatpush.bf16.msrb.mxu3 %v7785_v54  ;;  %v4939_v11 = vadd.f32 %v4938_v9, %v4926_v8 }
 0x1ea   :  { %5152 = vmatpush.bf16.msrb.mxu0 %v7760_v55 }
 0x1eb   :  { %5165 = vmatpush.bf16.msrb.mxu1 %v7768_v56 }
 0x1ec   :  { %5178 = vmatpush.bf16.msrb.mxu2 %v7776_v57 }
 0x1ed   :  { %5191 = vmatpush.bf16.msrb.mxu3 %v7784_v58 }
 0x1ee   :  { %5153 = vmatpush.bf16.msrb.mxu0 %v7759_v61  ;;  %v4927_v23 = vpop.f32.mrf.mxu2 }
 0x1ef   :  { %5166 = vmatpush.bf16.msrb.mxu1 %v7767_v62  ;;  %v4940_v24 = vpop.f32.mrf.mxu3 }
 0x1f0   :  { %5179 = vmatpush.bf16.msrb.mxu2 %v7775_v0 }
 0x1f1   :  { %5192 = vmatpush.bf16.msrb.mxu3 %v7783_v1 }
 0x1f2   :  { %5154 = vmatpush.bf16.msrb.mxu0 %v7758_v3 }
 0x1f3   :  { %5167 = vmatpush.bf16.msrb.mxu1 %v7766_v4 }
 0x1f4   :  { %5180 = vmatpush.bf16.msrb.mxu2 %v7774_v5 }
 0x1f5   :  { %5193 = vmatpush.bf16.msrb.mxu3 %v7782_v6 }
 0x1f6   :  { %5155 = vmatpush.bf16.msrb.mxu0 %v7757_v12 }
 0x1f7   :  { %5168 = vmatpush.bf16.msrb.mxu1 %v7765_v13 }
 0x1f8   :  { %5181 = vmatpush.bf16.msrb.mxu2 %v7773_v15 }
 0x1f9   :  { %5194 = vmatpush.bf16.msrb.mxu3 %v7781_v16 }
 0x1fa   :  { %5156 = vmatpush.bf16.msrb.mxu0 %v7756_v17 }
 0x1fb   :  { %5169 = vmatpush.bf16.msrb.mxu1 %v7764_v18 }
 0x1fc   :  { %5182 = vmatpush.bf16.msrb.mxu2 %v7772_v20 }
 0x1fd   :  { %5195 = vmatpush.bf16.msrb.mxu3 %v7780_v21 }
 0x1fe   :  { %5157 = vmatpush.bf16.msrb.mxu0 %v7755_v27  ;;  %v4951_v37 = vpop.f32.mrf.mxu0 }
 0x1ff   :  { %5170 = vmatpush.bf16.msrb.mxu1 %v7763_v28  ;;  %v4952_v38 = vadd.f32 %v4951_v37, %v4939_v11  ;;  %v4964_v39 = vpop.f32.mrf.mxu1 }
 0x200   :  { %5183 = vmatpush.bf16.msrb.mxu2 %v7771_v31 }
 0x201   :  { %5196 = vmatpush.bf16.msrb.mxu3 %v7779_v32  ;;  %5158 = vmatmul.bf16.vlgmr.msrb.gmra.mxu0 %v1230_v33  ;;  %v4965_v40 = vadd.f32 %v4964_v39, %v4952_v38 }
 0x202   :  { %5171 = vmatmul.bf16.vlgmr.msrb.gmra.mxu1 %v1231_v34 }
 0x203   :  { %5184 = vmatmul.bf16.vlgmr.msrb.gmra.mxu2 %v1232_v35 }
 0x204   :  { %5197 = vmatmul.bf16.vlgmr.msrb.gmra.mxu3 %v1233_v36 }
 0x206   :  { %v4977_v41 = vpop.f32.mrf.mxu2  ;;  %v4953_v44 = vpop.f32.mrf.mxu0 }
 0x207   :  { %v4978_v42 = vadd.f32 %v4977_v41, %v4965_v40  ;;  %v4990_v43 = vpop.f32.mrf.mxu3  ;;  %v4966_v46 = vpop.f32.mrf.mxu1 }
 0x209   :  { %v4991_v45 = vadd.f32 %v4990_v43, %v4978_v42 }
 0x20e   :  { %v4979_v47 = vpop.f32.mrf.mxu2 }
 0x20f   :  { %v4992_v48 = vpop.f32.mrf.mxu3 }
 0x21e   :  { %v5003_v49 = vpop.f32.mrf.mxu0 }
 0x21f   :  { %v5004_v50 = vadd.f32 %v5003_v49, %v4991_v45  ;;  %v5016_v51 = vpop.f32.mrf.mxu1 }
 0x221   :  { %v5017_v52 = vadd.f32 %v5016_v51, %v5004_v50 }
 0x226   :  { %v5029_v53 = vpop.f32.mrf.mxu2  ;;  %v5005_v56 = vpop.f32.mrf.mxu0 }
 0x227   :  { %v5030_v54 = vadd.f32 %v5029_v53, %v5017_v52  ;;  %v5042_v55 = vpop.f32.mrf.mxu3  ;;  %v5018_v58 = vpop.f32.mrf.mxu1 }
 0x229   :  { %v5043_v57 = vadd.f32 %v5042_v55, %v5030_v54 }
 0x22e   :  { %v5031_v59 = vpop.f32.mrf.mxu2 }
 0x22f   :  { %v5044_v60 = vpop.f32.mrf.mxu3 }
 0x23e   :  { %v5055_v61 = vpop.f32.mrf.mxu0 }
 0x23f   :  { %v5068_v62 = vpop.f32.mrf.mxu1  ;;  %v5056_v8 = vadd.f32 %v5055_v61, %v5043_v57 }
 0x241   :  { %v5069_v12 = vadd.f32 %v5068_v62, %v5056_v8 }
 0x246   :  { %v5081_v63 = vpop.f32.mrf.mxu2  ;;  %v5057_v1 = vpop.f32.mrf.mxu0 }
 0x247   :  { %v5094_v0 = vpop.f32.mrf.mxu3  ;;  %v5070_v2 = vpop.f32.mrf.mxu1  ;;  %v5082_v13 = vadd.f32 %v5081_v63, %v5069_v12 }
 0x249   :  { %v5095_v16 = vadd.f32 %v5094_v0, %v5082_v13 }
 0x24e   :  { %v5083_v3 = vpop.f32.mrf.mxu2 }
 0x24f   :  { %v5096_v4 = vpop.f32.mrf.mxu3 }
 0x25e   :  { %v5107_v5 = vpop.f32.mrf.mxu0 }
 0x25f   :  { %v5120_v6 = vpop.f32.mrf.mxu1  ;;  %v5108_v17 = vadd.f32 %v5107_v5, %v5095_v16 }
 0x261   :  { %v5121_v18 = vadd.f32 %v5120_v6, %v5108_v17 }
 0x266   :  { %v5133_v7 = vpop.f32.mrf.mxu2  ;;  %v5109_v10 = vpop.f32.mrf.mxu0 }
 0x267   :  { %v5146_v9 = vpop.f32.mrf.mxu3  ;;  %v5122_v11 = vpop.f32.mrf.mxu1  ;;  %v5134_v19 = vadd.f32 %v5133_v7, %v5121_v18 }
 0x269   :  { %v5147_v20 = vadd.f32 %v5146_v9, %v5134_v19 }
 0x26e   :  { %v5135_v14 = vpop.f32.mrf.mxu2 }
 0x26f   :  { %v5148_v15 = vpop.f32.mrf.mxu3 }
 0x27e   :  { %v5159_v21 = vpop.f32.mrf.mxu0 }
 0x27f   :  { %v5172_v22 = vpop.f32.mrf.mxu1  ;;  %v5160_v23 = vadd.f32 %v5159_v21, %v5147_v20 }
 0x281   :  { %v5173_v24 = vadd.f32 %v5172_v22, %v5160_v23 }
 0x286   :  { %v5185_v25 = vpop.f32.mrf.mxu2  ;;  %v5161_v28 = vpop.f32.mrf.mxu0 }
 0x287   :  { %v5198_v26 = vpop.f32.mrf.mxu3  ;;  %v5186_v27 = vadd.f32 %v5185_v25, %v5173_v24  ;;  %v5174_v29 = vpop.f32.mrf.mxu1 }
 0x289   :  { %v5199_v30 = vadd.f32 %v5198_v26, %v5186_v27 }
 0x28b   :  { %v7274_v31 = vmul.f32 -1.442695, %v5199_v30 }
 0x28d   :  { %7788 = vpow2.f32 %v7274_v31 }
 0x28e   :  { %v5187_v32 = vpop.f32.mrf.mxu2 }
 0x28f   :  { %v5200_v33 = vpop.f32.mrf.mxu3 }
 0x293   :  { %v7789_v34 = vpop.eup %7788 }
 0x294   :  { %v5205_v35 = vadd.f32 1.0, %v7789_v34 }
 0x296   :  { %7790 = vrcp.f32 %v5205_v35  ;;  %v5217_v39 = vand.u32 2147483648, %v5205_v35  ;;  %v5215_v41 = vand.u32 2147483647, %v5205_v35  ;;  %vm5211_vm1 = vweird.f32 %v5205_v35 }
 0x298   :  { %v5218_v43 = vor.u32 1.1754944e-38, %v5217_v39  ;;  %vm5216_vm3 = vcmp.eq.f32.partialorder %v5215_v41, 8.507059e+37 }
 0x29c   :  { %v7791_v36 = vpop.eup %7790 }
 0x29d   :  { %v5207_v37 = vmul.f32 %v7791_v36, %v5205_v35  ;;  %vm5212_vm0 = vweird.f32 %v7791_v36 }
 0x29e   :  { %vm5213_vm2 = vmor %vm5211_vm1, %vm5212_vm0 }
 0x29f   :  { %v5208_v38 = vsub.f32 1.0, %v5207_v37 }
 0x2a1   :  { %v5209_v40 = vmul.f32 %v7791_v36, %v5208_v38 }
 0x2a3   :  { %v5210_v42 = vadd.f32 %v7791_v36, %v5209_v40 }
 0x2a5   :  { %v5214_v44 = vsel %vm5213_vm2, %v7791_v36, %v5210_v42 }
 0x2a6   :  { %v5219_v45 = vsel %vm5216_vm3, %v5218_v43, %v5214_v44 }
 0x2a7   :  { %5221 = vst [vmem:[%s9483_s3] sm:$0xff] %v5219_v45 }

</bundles_post_ra>
